<compile_context>
chip_gen: v7x
topology: tpu7x:2x2x1
jax: 0.10.0
libtpu: 0.0.40
codegen_flags: <defaults>
</compile_context>

<pallas_src>
import functools

import numpy as np
import jax
import jax.numpy as jnp
from jax import lax
from jax.experimental import pallas as pl
from jax.experimental.pallas import tpu as pltpu

BN_EPS = 1e-5

# Synthetic test configuration (small; groups=16 requires channels % 16 == 0).
N_BATCH = 2
IN_CH = 32
OUT_CH = 32
H = W = 16
KERNEL_SIZE = 3
PADDING = 6
DILATION = 6


# --------------------------------------------------------------------------- #
# Weight assembly (host/numpy, done once): fold groups + branches into taps    #
# --------------------------------------------------------------------------- #
def _dense_grouped_weight(w, groups):
    """PyTorch (cout, cin//g, kh, kw) -> dense (kh*kw, cin, cout), zero off-group."""
    w = np.asarray(w, np.float32)
    cout, cing, kh, kw = w.shape
    cin = cing * groups
    ncg = cout // groups
    dense = np.zeros((kh * kw, cin, cout), np.float32)
    wr = w.reshape(groups, ncg, cing, kh, kw)
    for g in range(groups):
        blk = wr[g].transpose(2, 3, 1, 0).reshape(kh * kw, cing, ncg)  # (tap, ci, oi)
        dense[:, g * cing:(g + 1) * cing, g * ncg:(g + 1) * ncg] = blk
    return dense


def _build_taps(branches, cin, cout, pad_max):
    """Union all branch taps into (offsets, centre_tap_idx, W_taps (T*cin, 5*cout))."""
    ncols = 5 * cout
    taps = {}
    for b in branches:
        k, pb, dl = b["k"], b["pad"], b["dil"]
        dense = _dense_grouped_weight(b["w"], b["groups"])
        for i in range(k):
            for j in range(k):
                off = (pad_max - pb + i * dl, pad_max - pb + j * dl)
                cur = taps.setdefault(off, np.zeros((cin, ncols), np.float32))
                cur[:, b["col"]:b["col"] + cout] += dense[i * k + j]
    offsets = tuple(sorted(taps.keys()))
    center = offsets.index((pad_max, pad_max))          # 1x1 branch guarantees presence
    wtaps2d = np.concatenate([taps[o] for o in offsets], axis=0)   # (T*cin, 5*cout)
    return offsets, center, jnp.asarray(wtaps2d)


def make_aspp_params(key, in_channels, out_channels, kernel_size, padding, dilation):
    # TODO(synk): source passes (kernel_size, padding, dilation) positionally into
    # ConvBNReLU's (kernel_size, stride, padding) slots; normalized to "same" padding so
    # every branch keeps the HxW grid (required for the channel concat).
    del padding
    d = max(dilation, 1)
    keys = iter(jax.random.split(key, 16))

    def conv_w(cout, cing, k):
        return 0.1 * jax.random.normal(next(keys), (cout, cing, k, k), jnp.float32)

    cout, cin = out_channels, in_channels
    branches = [
        dict(w=conv_w(cout, cin, kernel_size), k=kernel_size,
             pad=d * (kernel_size - 1) // 2, dil=d, groups=1, col=0 * cout),
        dict(w=conv_w(cout, cin, 1), k=1, pad=0, dil=1, groups=1, col=1 * cout),
        dict(w=conv_w(cout, cin // 4, 3), k=3, pad=d, dil=d, groups=4, col=2 * cout),
        dict(w=conv_w(cout, cin // 8, 3), k=3, pad=d, dil=d, groups=8, col=3 * cout),
        dict(w=conv_w(cout, cin // 16, 3), k=3, pad=d, dil=d, groups=16, col=4 * cout),
    ]
    pad_max = max(b["pad"] for b in branches)
    offsets, center, wtaps2d = _build_taps(branches, cin, cout, pad_max)
    wpool = np.asarray(conv_w(cout, cin, 1)).reshape(cout, cin).T        # (cin, cout)
    # BatchNorm affine params for all 6 branches, channel-concatenated.  Conv biases
    # (bias=True in the source) cancel exactly under train-mode BatchNorm -> omitted.
    gamma = 1.0 + 0.1 * jax.random.normal(next(keys), (1, 6 * cout), jnp.float32)
    beta = 0.1 * jax.random.normal(next(keys), (1, 6 * cout), jnp.float32)
    return dict(tap_offsets=offsets, center_tap=center,
                wtaps=wtaps2d.astype(jnp.bfloat16),
                wpool=jnp.asarray(wpool).astype(jnp.bfloat16),
                gamma=gamma, beta=beta,
                cout=cout, pad_max=pad_max)


# --------------------------------------------------------------------------- #
# Fused Pallas kernel: 5 conv branches + pool branch + BN(batch stats) + ReLU  #
# --------------------------------------------------------------------------- #
def _aspp_kernel(xpad_ref, wtaps_ref, wpool_ref, gamma_ref, beta_ref, o_ref,
                 *, tap_offsets, center_tap, n, h, w, c_conv, c_pool):
    m = n * h * w
    c = xpad_ref.shape[3]

    # ---- conv1..conv5: stack the 9 shifted views along the contraction dim and do a
    # single bf16 MXU matmul (K = T*C) with a write-once f32 result (no scratch RMW). ----
    xt_slices = [xpad_ref[:, dy:dy + h, dx:dx + w, :].reshape(m, c)
                 for (dy, dx) in tap_offsets]
    xt_all = jnp.concatenate(xt_slices, axis=-1)                          # (M, T*C) bf16
    acc = jnp.dot(xt_all, wtaps_ref[...],
                  preferred_element_type=jnp.float32)                     # (M, 5*cout) f32

    # One-pass train-mode BatchNorm stats over the N*H*W rows (branch channels are
    # disjoint columns, so one fused reduction is exact), then affine + ReLU.
    inv_m = 1.0 / float(m)
    mu = jnp.sum(acc, axis=0, keepdims=True) * inv_m
    ex2 = jnp.sum(acc * acc, axis=0, keepdims=True) * inv_m
    var = jnp.maximum(ex2 - mu * mu, 0.0)
    conv_out = (acc - mu) * lax.rsqrt(var + BN_EPS)
    conv_out = conv_out * gamma_ref[0, :c_conv] + beta_ref[0, :c_conv]
    conv_out = jnp.maximum(conv_out, 0.0)
    o_ref[:, :c_conv] = conv_out.astype(o_ref.dtype)                      # sliced store

    # ---- pool branch: GAP (reuse the centre tap) -> 1x1 conv -> BN -> ReLU ----
    xc = xt_slices[center_tap].reshape(n, h * w, c)                       # centre view
    gap = jnp.mean(xc.astype(jnp.float32), axis=1)                        # (N, C) f32
    pool = jnp.dot(gap.astype(jnp.bfloat16), wpool_ref[...],
                   preferred_element_type=jnp.float32)                    # (N, cout)
    pmu = jnp.mean(pool, axis=0, keepdims=True)
    pex2 = jnp.mean(pool * pool, axis=0, keepdims=True)
    pvar = jnp.maximum(pex2 - pmu * pmu, 0.0)
    pool = (pool - pmu) * lax.rsqrt(pvar + BN_EPS)
    pool = pool * gamma_ref[0, c_conv:] + beta_ref[0, c_conv:]
    pool = jnp.maximum(pool, 0.0).astype(o_ref.dtype)
    # bilinear(align_corners=True) of a 1x1 map to HxW is a pure broadcast.
    pool_bc = jnp.broadcast_to(pool[:, None, :], (n, h * w, c_pool)).reshape(m, c_pool)
    o_ref[:, c_conv:] = pool_bc                                           # sliced store


_params = make_aspp_params(jax.random.PRNGKey(1), IN_CH, OUT_CH,
                           KERNEL_SIZE, PADDING, DILATION)


@jax.jit
def aspp_forward(x_nchw):
    n, _, h, w = x_nchw.shape
    cout = _params["cout"]
    p = _params["pad_max"]
    c_conv, c_tot = 5 * cout, 6 * cout
    m = n * h * w

    x = jnp.transpose(x_nchw, (0, 2, 3, 1)).astype(jnp.bfloat16)          # NCHW -> NHWC
    xpad = jnp.pad(x, ((0, 0), (p, p), (p, p), (0, 0)))

    kernel = functools.partial(_aspp_kernel,
                               tap_offsets=_params["tap_offsets"],
                               center_tap=_params["center_tap"],
                               n=n, h=h, w=w, c_conv=c_conv, c_pool=cout)
    out = pl.pallas_call(
        kernel,
        out_shape=jax.ShapeDtypeStruct((m, c_tot), jnp.bfloat16),
        grid=(1,),
        in_specs=[
            pl.BlockSpec(xpad.shape, lambda i: (0, 0, 0, 0)),
            pl.BlockSpec(_params["wtaps"].shape, lambda i: (0, 0)),
            pl.BlockSpec(_params["wpool"].shape, lambda i: (0, 0)),
            pl.BlockSpec((1, c_tot), lambda i: (0, 0)),
            pl.BlockSpec((1, c_tot), lambda i: (0, 0)),
        ],
        out_specs=pl.BlockSpec((m, c_tot), lambda i: (0, 0)),
        compiler_params=pltpu.CompilerParams(dimension_semantics=("arbitrary",)),
    )(xpad, _params["wtaps"], _params["wpool"], _params["gamma"], _params["beta"])

    out = out.reshape(n, h, w, c_tot)
    return jnp.transpose(out, (0, 3, 1, 2)).astype(jnp.float32)           # NHWC -> NCHW


if __name__ == "__main__":
    x = jax.random.normal(jax.random.PRNGKey(0), (N_BATCH, IN_CH, H, W), jnp.float32)
    out = aspp_forward(x)
    out = jax.block_until_ready(out)
    assert out.shape == (N_BATCH, 6 * OUT_CH, H, W), out.shape
    assert bool(jnp.all(jnp.isfinite(out)))
    print("KERNEL_OK")
</pallas_src>

<mosaic_0001>
module attributes {stable_mosaic.version = 11 : i64} {
  func.func @_aspp_kernel(%arg0: i32, %arg1: memref<2x28x28x32xbf16, #tpu.memory_space<vmem>>, %arg2: memref<288x160xbf16, #tpu.memory_space<vmem>>, %arg3: memref<32x32xbf16, #tpu.memory_space<vmem>>, %arg4: memref<1x192xf32, #tpu.memory_space<vmem>>, %arg5: memref<1x192xf32, #tpu.memory_space<vmem>>, %arg6: memref<512x192xbf16, #tpu.memory_space<vmem>>) attributes {dimension_semantics = [#tpu.dimension_semantics<arbitrary>], iteration_bounds = array<i64: 1>, scalar_prefetch = 0 : i64, scratch_operands = 0 : i64, tpu.core_type = #tpu.core_type<tc>, window_params = [{pipeline_mode = #tpu.pipeline_mode<synchronous>, transform_indices = @transform_0, window_bounds = array<i64: 2, 28, 28, 32>}, {pipeline_mode = #tpu.pipeline_mode<synchronous>, transform_indices = @transform_1, window_bounds = array<i64: 288, 160>}, {pipeline_mode = #tpu.pipeline_mode<synchronous>, transform_indices = @transform_2, window_bounds = array<i64: 32, 32>}, {pipeline_mode = #tpu.pipeline_mode<synchronous>, transform_indices = @transform_3, window_bounds = array<i64: 1, 192>}, {pipeline_mode = #tpu.pipeline_mode<synchronous>, transform_indices = @transform_4, window_bounds = array<i64: 1, 192>}, {pipeline_mode = #tpu.pipeline_mode<synchronous>, transform_indices = @transform_5, window_bounds = array<i64: 512, 192>}]} {
    %c0 = arith.constant 0 : index
    %c0_0 = arith.constant 0 : index
    %c0_1 = arith.constant 0 : index
    %c0_2 = arith.constant 0 : index
    %0 = vector.load %arg1[%c0, %c0_0, %c0_1, %c0_2] : memref<2x28x28x32xbf16, #tpu.memory_space<vmem>>, vector<2x16x16x32xbf16>
    %1 = vector.shape_cast %0 : vector<2x16x16x32xbf16> to vector<512x32xbf16>
    %c0_3 = arith.constant 0 : index
    %c0_4 = arith.constant 0 : index
    %c6 = arith.constant 6 : index
    %c0_5 = arith.constant 0 : index
    %2 = vector.load %arg1[%c0_3, %c0_4, %c6, %c0_5] : memref<2x28x28x32xbf16, #tpu.memory_space<vmem>>, vector<2x16x16x32xbf16>
    %3 = vector.shape_cast %2 : vector<2x16x16x32xbf16> to vector<512x32xbf16>
    %c0_6 = arith.constant 0 : index
    %c0_7 = arith.constant 0 : index
    %c12 = arith.constant 12 : index
    %c0_8 = arith.constant 0 : index
    %4 = vector.load %arg1[%c0_6, %c0_7, %c12, %c0_8] : memref<2x28x28x32xbf16, #tpu.memory_space<vmem>>, vector<2x16x16x32xbf16>
    %5 = vector.shape_cast %4 : vector<2x16x16x32xbf16> to vector<512x32xbf16>
    %c0_9 = arith.constant 0 : index
    %c6_10 = arith.constant 6 : index
    %c0_11 = arith.constant 0 : index
    %c0_12 = arith.constant 0 : index
    %6 = vector.load %arg1[%c0_9, %c6_10, %c0_11, %c0_12] : memref<2x28x28x32xbf16, #tpu.memory_space<vmem>>, vector<2x16x16x32xbf16>
    %7 = vector.shape_cast %6 : vector<2x16x16x32xbf16> to vector<512x32xbf16>
    %c0_13 = arith.constant 0 : index
    %c6_14 = arith.constant 6 : index
    %c6_15 = arith.constant 6 : index
    %c0_16 = arith.constant 0 : index
    %8 = vector.load %arg1[%c0_13, %c6_14, %c6_15, %c0_16] : memref<2x28x28x32xbf16, #tpu.memory_space<vmem>>, vector<2x16x16x32xbf16>
    %9 = vector.shape_cast %8 : vector<2x16x16x32xbf16> to vector<512x32xbf16>
    %c0_17 = arith.constant 0 : index
    %c6_18 = arith.constant 6 : index
    %c12_19 = arith.constant 12 : index
    %c0_20 = arith.constant 0 : index
    %10 = vector.load %arg1[%c0_17, %c6_18, %c12_19, %c0_20] : memref<2x28x28x32xbf16, #tpu.memory_space<vmem>>, vector<2x16x16x32xbf16>
    %11 = vector.shape_cast %10 : vector<2x16x16x32xbf16> to vector<512x32xbf16>
    %c0_21 = arith.constant 0 : index
    %c12_22 = arith.constant 12 : index
    %c0_23 = arith.constant 0 : index
    %c0_24 = arith.constant 0 : index
    %12 = vector.load %arg1[%c0_21, %c12_22, %c0_23, %c0_24] : memref<2x28x28x32xbf16, #tpu.memory_space<vmem>>, vector<2x16x16x32xbf16>
    %13 = vector.shape_cast %12 : vector<2x16x16x32xbf16> to vector<512x32xbf16>
    %c0_25 = arith.constant 0 : index
    %c12_26 = arith.constant 12 : index
    %c6_27 = arith.constant 6 : index
    %c0_28 = arith.constant 0 : index
    %14 = vector.load %arg1[%c0_25, %c12_26, %c6_27, %c0_28] : memref<2x28x28x32xbf16, #tpu.memory_space<vmem>>, vector<2x16x16x32xbf16>
    %15 = vector.shape_cast %14 : vector<2x16x16x32xbf16> to vector<512x32xbf16>
    %c0_29 = arith.constant 0 : index
    %c12_30 = arith.constant 12 : index
    %c12_31 = arith.constant 12 : index
    %c0_32 = arith.constant 0 : index
    %16 = vector.load %arg1[%c0_29, %c12_30, %c12_31, %c0_32] : memref<2x28x28x32xbf16, #tpu.memory_space<vmem>>, vector<2x16x16x32xbf16>
    %17 = vector.shape_cast %16 : vector<2x16x16x32xbf16> to vector<512x32xbf16>
    %18 = tpu.concatenate %1, %3, %5, %7, %9, %11, %13, %15, %17 in 1 : vector<512x32xbf16>, vector<512x32xbf16>, vector<512x32xbf16>, vector<512x32xbf16>, vector<512x32xbf16>, vector<512x32xbf16>, vector<512x32xbf16>, vector<512x32xbf16>, vector<512x32xbf16> -> vector<512x288xbf16>
    %c0_33 = arith.constant 0 : index
    %c0_34 = arith.constant 0 : index
    %19 = vector.load %arg2[%c0_33, %c0_34] : memref<288x160xbf16, #tpu.memory_space<vmem>>, vector<288x160xbf16>
    %cst = arith.constant dense<0.000000e+00> : vector<512x160xf32>
    %20 = tpu.matmul %18, %19, %cst {dimension_numbers = #tpu.dot_dimension_numbers<[1], [0], [0], [1], [0, 0, 1, 1], [], []>} : vector<512x288xbf16>, vector<288x160xbf16>, vector<512x160xf32> -> vector<512x160xf32>
    %cst_35 = arith.constant dense<0.000000e+00> : vector<160xf32>
    %21 = vector.multi_reduction <add>, %20, %cst_35 [0] : vector<512x160xf32> to vector<160xf32>
    %22 = vector.shape_cast %21 : vector<160xf32> to vector<1x160xf32>
    %cst_36 = arith.constant 0.001953125 : f32
    %23 = vector.broadcast %cst_36 : f32 to vector<1x160xf32>
    %24 = arith.mulf %22, %23 : vector<1x160xf32>
    %25 = arith.mulf %20, %20 : vector<512x160xf32>
    %cst_37 = arith.constant dense<0.000000e+00> : vector<160xf32>
    %26 = vector.multi_reduction <add>, %25, %cst_37 [0] : vector<512x160xf32> to vector<160xf32>
    %27 = vector.shape_cast %26 : vector<160xf32> to vector<1x160xf32>
    %cst_38 = arith.constant 0.001953125 : f32
    %28 = vector.broadcast %cst_38 : f32 to vector<1x160xf32>
    %29 = arith.mulf %27, %28 : vector<1x160xf32>
    %30 = arith.mulf %24, %24 : vector<1x160xf32>
    %31 = arith.subf %29, %30 : vector<1x160xf32>
    %cst_39 = arith.constant 0.000000e+00 : f32
    %32 = vector.broadcast %cst_39 : f32 to vector<1x160xf32>
    %33 = arith.maximumf %31, %32 : vector<1x160xf32>
    %34 = vector.broadcast %24 : vector<1x160xf32> to vector<512x160xf32>
    %35 = arith.subf %20, %34 : vector<512x160xf32>
    %cst_40 = arith.constant 9.99999974E-6 : f32
    %36 = vector.broadcast %cst_40 : f32 to vector<1x160xf32>
    %37 = arith.addf %33, %36 : vector<1x160xf32>
    %38 = math.rsqrt %37 : vector<1x160xf32>
    %39 = vector.broadcast %38 : vector<1x160xf32> to vector<512x160xf32>
    %40 = arith.mulf %35, %39 : vector<512x160xf32>
    %c0_41 = arith.constant 0 : index
    %c0_42 = arith.constant 0 : index
    %41 = vector.load %arg4[%c0_41, %c0_42] : memref<1x192xf32, #tpu.memory_space<vmem>>, vector<1x160xf32>
    %42 = vector.shape_cast %41 : vector<1x160xf32> to vector<160xf32>
    %43 = vector.shape_cast %42 : vector<160xf32> to vector<1x160xf32>
    %44 = vector.broadcast %43 : vector<1x160xf32> to vector<512x160xf32>
    %45 = arith.mulf %40, %44 : vector<512x160xf32>
    %c0_43 = arith.constant 0 : index
    %c0_44 = arith.constant 0 : index
    %46 = vector.load %arg5[%c0_43, %c0_44] : memref<1x192xf32, #tpu.memory_space<vmem>>, vector<1x160xf32>
    %47 = vector.shape_cast %46 : vector<1x160xf32> to vector<160xf32>
    %48 = vector.shape_cast %47 : vector<160xf32> to vector<1x160xf32>
    %49 = vector.broadcast %48 : vector<1x160xf32> to vector<512x160xf32>
    %50 = arith.addf %45, %49 : vector<512x160xf32>
    %cst_45 = arith.constant 0.000000e+00 : f32
    %51 = vector.broadcast %cst_45 : f32 to vector<512x160xf32>
    %52 = arith.maximumf %50, %51 : vector<512x160xf32>
    %53 = arith.truncf %52 : vector<512x160xf32> to vector<512x160xbf16>
    %c0_46 = arith.constant 0 : index
    %c0_47 = arith.constant 0 : index
    %54 = vector.load %arg6[%c0_46, %c0_47] : memref<512x192xbf16, #tpu.memory_space<vmem>>, vector<512x160xbf16>
    tpu.vector_store %arg6[%c0_46, %c0_47], %53 {strides = array<i32>} : memref<512x192xbf16, #tpu.memory_space<vmem>>, vector<512x160xbf16>,
    %55 = vector.shape_cast %9 : vector<512x32xbf16> to vector<2x256x32xbf16>
    %56 = arith.extf %55 : vector<2x256x32xbf16> to vector<2x256x32xf32>
    %cst_48 = arith.constant dense<0.000000e+00> : vector<2x32xf32>
    %57 = vector.multi_reduction <add>, %56, %cst_48 [1] : vector<2x256x32xf32> to vector<2x32xf32>
    %cst_49 = arith.constant 2.560000e+02 : f32
    %58 = vector.broadcast %cst_49 : f32 to vector<2x32xf32>
    %59 = arith.divf %57, %58 : vector<2x32xf32>
    %60 = arith.truncf %59 : vector<2x32xf32> to vector<2x32xbf16>
    %c0_50 = arith.constant 0 : index
    %c0_51 = arith.constant 0 : index
    %61 = vector.load %arg3[%c0_50, %c0_51] : memref<32x32xbf16, #tpu.memory_space<vmem>>, vector<32x32xbf16>
    %cst_52 = arith.constant dense<0.000000e+00> : vector<2x32xf32>
    %62 = tpu.matmul %60, %61, %cst_52 {dimension_numbers = #tpu.dot_dimension_numbers<[1], [0], [0], [1], [0, 0, 1, 1], [], []>} : vector<2x32xbf16>, vector<32x32xbf16>, vector<2x32xf32> -> vector<2x32xf32>
    %cst_53 = arith.constant dense<0.000000e+00> : vector<32xf32>
    %63 = vector.multi_reduction <add>, %62, %cst_53 [0] : vector<2x32xf32> to vector<32xf32>
    %64 = vector.shape_cast %63 : vector<32xf32> to vector<1x32xf32>
    %cst_54 = arith.constant 2.000000e+00 : f32
    %65 = vector.broadcast %cst_54 : f32 to vector<1x32xf32>
    %66 = arith.divf %64, %65 : vector<1x32xf32>
    %67 = arith.mulf %62, %62 : vector<2x32xf32>
    %cst_55 = arith.constant dense<0.000000e+00> : vector<32xf32>
    %68 = vector.multi_reduction <add>, %67, %cst_55 [0] : vector<2x32xf32> to vector<32xf32>
    %69 = vector.shape_cast %68 : vector<32xf32> to vector<1x32xf32>
    %cst_56 = arith.constant 2.000000e+00 : f32
    %70 = vector.broadcast %cst_56 : f32 to vector<1x32xf32>
    %71 = arith.divf %69, %70 : vector<1x32xf32>
    %72 = arith.mulf %66, %66 : vector<1x32xf32>
    %73 = arith.subf %71, %72 : vector<1x32xf32>
    %cst_57 = arith.constant 0.000000e+00 : f32
    %74 = vector.broadcast %cst_57 : f32 to vector<1x32xf32>
    %75 = arith.maximumf %73, %74 : vector<1x32xf32>
    %76 = vector.broadcast %66 : vector<1x32xf32> to vector<2x32xf32>
    %77 = arith.subf %62, %76 : vector<2x32xf32>
    %cst_58 = arith.constant 9.99999974E-6 : f32
    %78 = vector.broadcast %cst_58 : f32 to vector<1x32xf32>
    %79 = arith.addf %75, %78 : vector<1x32xf32>
    %80 = math.rsqrt %79 : vector<1x32xf32>
    %81 = vector.broadcast %80 : vector<1x32xf32> to vector<2x32xf32>
    %82 = arith.mulf %77, %81 : vector<2x32xf32>
    %c0_59 = arith.constant 0 : index
    %c160 = arith.constant 160 : index
    %83 = vector.load %arg4[%c0_59, %c160] : memref<1x192xf32, #tpu.memory_space<vmem>>, vector<1x32xf32>
    %84 = vector.shape_cast %83 : vector<1x32xf32> to vector<32xf32>
    %85 = vector.shape_cast %84 : vector<32xf32> to vector<1x32xf32>
    %86 = vector.broadcast %85 : vector<1x32xf32> to vector<2x32xf32>
    %87 = arith.mulf %82, %86 : vector<2x32xf32>
    %c0_60 = arith.constant 0 : index
    %c160_61 = arith.constant 160 : index
    %88 = vector.load %arg5[%c0_60, %c160_61] : memref<1x192xf32, #tpu.memory_space<vmem>>, vector<1x32xf32>
    %89 = vector.shape_cast %88 : vector<1x32xf32> to vector<32xf32>
    %90 = vector.shape_cast %89 : vector<32xf32> to vector<1x32xf32>
    %91 = vector.broadcast %90 : vector<1x32xf32> to vector<2x32xf32>
    %92 = arith.addf %87, %91 : vector<2x32xf32>
    %cst_62 = arith.constant 0.000000e+00 : f32
    %93 = vector.broadcast %cst_62 : f32 to vector<2x32xf32>
    %94 = arith.maximumf %92, %93 : vector<2x32xf32>
    %95 = arith.truncf %94 : vector<2x32xf32> to vector<2x32xbf16>
    %96 = vector.shape_cast %95 : vector<2x32xbf16> to vector<2x1x32xbf16>
    %97 = vector.shape_cast %96 : vector<2x1x32xbf16> to vector<2x1x32xbf16>
    %98 = vector.broadcast %97 : vector<2x1x32xbf16> to vector<2x256x32xbf16>
    %99 = vector.shape_cast %98 : vector<2x256x32xbf16> to vector<512x32xbf16>
    %c0_63 = arith.constant 0 : index
    %c160_64 = arith.constant 160 : index
    %100 = vector.load %arg6[%c0_63, %c160_64] : memref<512x192xbf16, #tpu.memory_space<vmem>>, vector<512x32xbf16>
    tpu.vector_store %arg6[%c0_63, %c160_64], %99 {strides = array<i32>} : memref<512x192xbf16, #tpu.memory_space<vmem>>, vector<512x32xbf16>,
    return
  }
  func.func @transform_0(%arg0: i32) -> (i32, i32, i32, i32) {
    %c0_i32 = arith.constant 0 : i32
    %c0_i32_0 = arith.constant 0 : i32
    %c0_i32_1 = arith.constant 0 : i32
    %c0_i32_2 = arith.constant 0 : i32
    %c0_i32_3 = arith.constant 0 : i32
    return %c0_i32, %c0_i32_0, %c0_i32_1, %c0_i32_2 : i32, i32, i32, i32
  }
  func.func @transform_1(%arg0: i32) -> (i32, i32) {
    %c0_i32 = arith.constant 0 : i32
    %c0_i32_0 = arith.constant 0 : i32
    %c0_i32_1 = arith.constant 0 : i32
    return %c0_i32, %c0_i32_0 : i32, i32
  }
  func.func @transform_2(%arg0: i32) -> (i32, i32) {
    %c0_i32 = arith.constant 0 : i32
    %c0_i32_0 = arith.constant 0 : i32
    %c0_i32_1 = arith.constant 0 : i32
    return %c0_i32, %c0_i32_0 : i32, i32
  }
  func.func @transform_3(%arg0: i32) -> (i32, i32) {
    %c0_i32 = arith.constant 0 : i32
    %c0_i32_0 = arith.constant 0 : i32
    %c0_i32_1 = arith.constant 0 : i32
    return %c0_i32, %c0_i32_0 : i32, i32
  }
  func.func @transform_4(%arg0: i32) -> (i32, i32) {
    %c0_i32 = arith.constant 0 : i32
    %c0_i32_0 = arith.constant 0 : i32
    %c0_i32_1 = arith.constant 0 : i32
    return %c0_i32, %c0_i32_0 : i32, i32
  }
  func.func @transform_5(%arg0: i32) -> (i32, i32) {
    %c0_i32 = arith.constant 0 : i32
    %c0_i32_0 = arith.constant 0 : i32
    %c0_i32_1 = arith.constant 0 : i32
    return %c0_i32, %c0_i32_0 : i32, i32
  }
}

</mosaic_0001>

<bundles_post_ra>
// kernel: aspp_forward.1
= control target key start
LH: loop header
LB: loop body
LE: loop exit
PB: predicated region body
PF: predicated region fallthrough
CT: control target
= control target key end

     0   :  { %vm664_vm0 = vcmask 1041408   ;;  %vm665_vm1 = vcmask 1045508   ;;  %vm245_vm2 = vcmask 1040384   ;;  %vm246_vm4 = vcmask 1044484   ;;  %s9152_s7 = smov 64   ;;  %s9153_s20 = smov 96   ;;  %s16999_s0 = inlined_call_operand.vmem [shape: bf16[2,28,28,32], index: 0, kind: input, shape index: {}]   ;;  %s17000_s1 = inlined_call_operand.vmem [shape: bf16[288,160], index: 1, kind: input, shape index: {}]   ;;  %s17001_s2 = inlined_call_operand.vmem [shape: bf16[32,32], index: 2, kind: input, shape index: {}]   ;;  %s17002_s4 = inlined_call_operand.vmem [shape: f32[1,192], index: 4, kind: input, shape index: {}]   ;;  %s17003_s3 = inlined_call_operand.vmem [shape: f32[1,192], index: 3, kind: input, shape index: {}]   ;;  %s17004_s5 = inlined_call_operand.vmem [shape: bf16[512,192], index: 5, kind: output, shape index: {}]  }
   0x1   :  { %v8028_v0 = vld [vmem:[%s16999_s0 + $0xc0] sm:$0xf]  ;;  %v9195_v1 = vld [vmem:[%s16999_s0 + $0xc4] sm:$0xf]  ;;  %vm9210_vm3 = vmor %vm664_vm0, %vm665_vm1  ;;  %s9154_s6 = smov 32   ;;  %vm3965_vm6 = vcmask 261120  }
   0x2   :  { %v7740_v2 = vld [vmem:[%s16999_s0 + $0x60] sm:$0xf]  ;;  %v1983_v3 = vrot.slane %v9195_v1, 7  ;;  %v8508_v4 = vcombine.low %v8028_v0, %v9195_v1  ;;  %v9205_v5 = vld [vmem:[%s16999_s0 + $0x64] sm:$0xf]  ;;  %vm9240_vm5 = vmor %vm245_vm2, %vm246_vm4  ;;  %vm4062_vm7 = vcmask 523264  }
   0x3   :  { %v7900_v6 = vld [vmem:[%s16999_s0 + $0x64] sm:$0xc]  ;;  %v7901_v8 = vld [vmem:[%s16999_s0 + $0x68] sm:$0xf]  ;;  %v7902_v9 = vld [vmem:[%s16999_s0 + $0x6c] sm:$0x3]  ;;  %v8412_v11 = vcombine.low %v7740_v2, %v9205_v5 }
   0x4   :  { %v7996_v10 = vrot.slane %v7900_v6, 10  ;;  %3645 = vrot.lane.b32.xlu1 %v8508_v4, %s9152_s7  ;;  %v1534_v12 = vrot.slane %v7901_v8, 6  ;;  %v1537_v13 = vrot.slane %v7902_v9, 6  ;;  %v472_v14 = vld [vmem:[%s16999_s0 + $0x4] sm:$0xc]  ;;  %v1985_v15 = vrot.slane %v1983_v3, 4 }
   0x5   :  { %v473_v16 = vld [vmem:[%s16999_s0 + $0x8] sm:$0xf]  ;;  %v474_v17 = vld [vmem:[%s16999_s0 + $0xc] sm:$0x3]  ;;  %v7708_v18 = vrot.slane %v472_v14, 10  ;;  %vm4127_vm8 = vcmask 785408  }
   0x6   :  { %v1535_v19 = vsel %vm9210_vm3, %v7996_v10, %v1534_v12  ;;  %v1536_v20 = vrot.slane %v1534_v12, 4  ;;  %v669_v21 = vrot.slane %v473_v16, 6  ;;  %v672_v22 = vrot.slane %v474_v17, 6  ;;  %v22_v23 = vld [vmem:[%s16999_s0 + $0x4] sm:$0xf] }
   0x7   :  { %v85_v25 = vld [vmem:[%s16999_s0] sm:$0x8]  ;;  %v86_v26 = vld [vmem:[%s16999_s0 + $0x8] sm:$0x7]  ;;  %v250_v27 = vrot.slane %v22_v23, 7  ;;  %vm9157_vm9 = vmmov 0  }
   0x8   :  { %3197 = vrot.lane.b32.xlu1 %v8412_v11, %s9153_s20  ;;  %v1538_v28 = vsel %vm9210_vm3, %v1536_v20, %v1537_v13  ;;  %v670_v29 = vsel %vm9210_vm3, %v7708_v18, %v669_v21  ;;  %v671_v30 = vrot.slane %v669_v21, 4  ;;  %v7676_v31 = vrot.slane %v85_v25, 11  ;;  %v24_v32 = vld [vmem:[%s16999_s0 + $0x14] sm:$0xf]  ;;  %v87_v33 = vld [vmem:[%s16999_s0 + $0x10] sm:$0x8] }
   0x9   :  { %v8476_v34 = vcombine.low %v1535_v19, %v1538_v28  ;;  %v252_v35 = vrot.slane %v250_v27, 4  ;;  %v253_v36 = vrot.slane %v86_v26, 7  ;;  %v88_v37 = vld [vmem:[%s16999_s0 + $0x18] sm:$0x7]  ;;  %v7677_v38 = vrot.slane %v87_v33, 11 }
   0xa   :  { %v673_v39 = vsel %vm9210_vm3, %v671_v30, %v672_v22  ;;  %v251_v40 = vsel %vm9240_vm5, %v7676_v31, %v250_v27  ;;  %v257_v41 = vrot.slane %v24_v32, 7  ;;  %v260_v42 = vrot.slane %v88_v37, 7  ;;  %v8092_v43 = vld [vmem:[%s16999_s0 + $0xc0] sm:$0x8]  ;;  %v8093_v44 = vld [vmem:[%s16999_s0 + $0xc8] sm:$0x7] }
   0xb   :  { %3453 = vrot.lane.b32.xlu0 %v8476_v34, %s9154_s6  ;;  %v8380_v45 = vcombine.low %v670_v29, %v673_v39  ;;  %v254_v46 = vsel %vm9240_vm5, %v252_v35, %v253_v36  ;;  %v8156_v47 = vrot.slane %v8092_v43, 11  ;;  %v1986_v48 = vrot.slane %v8093_v44, 7  ;;  %v475_v49 = vld [vmem:[%s16999_s0 + $0x14] sm:$0xc]  ;;  %v476_v50 = vld [vmem:[%s16999_s0 + $0x18] sm:$0xf] }
   0xc   :  { %v8348_v51 = vcombine.low %v251_v40, %v254_v46  ;;  %v258_v52 = vsel %vm9240_vm5, %v7677_v38, %v257_v41  ;;  %v259_v53 = vrot.slane %v257_v41, 4  ;;  %v477_v54 = vld [vmem:[%s16999_s0 + $0x1c] sm:$0x3]  ;;  %v7709_v55 = vrot.slane %v475_v49, 10  ;;  %v7903_v56 = vld [vmem:[%s16999_s0 + $0x74] sm:$0xc] }
   0xd   :  { %3005 = vrot.lane.b32.xlu1 %v8380_v45, %s9152_s7  ;;  %v1984_v57 = vsel %vm9240_vm5, %v8156_v47, %v1983_v3  ;;  %v1987_v58 = vsel %vm9240_vm5, %v1985_v15, %v1986_v48  ;;  %v676_v59 = vrot.slane %v476_v50, 6  ;;  %v679_v60 = vrot.slane %v477_v54, 6  ;;  %v7904_v61 = vld [vmem:[%s16999_s0 + $0x78] sm:$0xf]  ;;  %v7905_v62 = vld [vmem:[%s16999_s0 + $0x7c] sm:$0x3] }
   0xe   :  { %v261_v63 = vsel %vm9240_vm5, %v259_v53, %v260_v42  ;;  %v8540_v0 = vcombine.low %v1984_v57, %v1987_v58  ;;  %v7997_v1 = vrot.slane %v7903_v56, 10  ;;  %v1541_v2 = vrot.slane %v7904_v61, 6  ;;  %v8031_v9 = vld [vmem:[%s16999_s0 + $0xd4] sm:$0xf]  ;;  %v7742_v12 = vld [vmem:[%s16999_s0 + $0x70] sm:$0xf] }
   0xf   :  { %2845 = vrot.lane.b32.xlu0 %v8348_v51, %s9154_s6  ;;  %v8349_v3 = vcombine.low %v258_v52, %v261_v63  ;;  %v677_v4 = vsel %vm9210_vm3, %v7709_v55, %v676_v59  ;;  %v678_v6 = vrot.slane %v676_v59, 4  ;;  %v1544_v8 = vrot.slane %v7905_v62, 6  ;;  %v9320_v13 = vld [vmem:[%s16999_s0 + $0x74] sm:$0xf]  ;;  %v26_v14 = vld [vmem:[%s16999_s0 + $0x24] sm:$0xf] }
  0x10   :  { %v1542_v10 = vsel %vm9210_vm3, %v7997_v1, %v1541_v2  ;;  %v1543_v11 = vrot.slane %v1541_v2, 4  ;;  %v89_v15 = vld [vmem:[%s16999_s0 + $0x20] sm:$0x8]  ;;  %v1990_v17 = vrot.slane %v8031_v9, 7  ;;  %v90_v18 = vld [vmem:[%s16999_s0 + $0x28] sm:$0x7]  ;;  %v8413_v36 = vcombine.low %v7742_v12, %v9320_v13 }
  0x11   :  { %2847 = vrot.lane.b32.xlu1 %v8349_v3, %s9154_s6  ;;  %v680_v16 = vsel %vm9210_vm3, %v678_v6, %v679_v60  ;;  %v7678_v19 = vrot.slane %v89_v15, 11  ;;  %v8094_v20 = vld [vmem:[%s16999_s0 + $0xd0] sm:$0x8]  ;;  %v264_v25 = vrot.slane %v26_v14, 7  ;;  %v8095_v26 = vld [vmem:[%s16999_s0 + $0xd8] sm:$0x7] }
  0x12   :  { %v8381_v21 = vcombine.low %v677_v4, %v680_v16  ;;  %v1545_v22 = vsel %vm9210_vm3, %v1543_v11, %v1544_v8  ;;  %v8030_v23 = vld [vmem:[%s16999_s0 + $0xd0] sm:$0xf]  ;;  %v478_v27 = vld [vmem:[%s16999_s0 + $0x24] sm:$0xc]  ;;  %v267_v29 = vrot.slane %v90_v18, 7  ;;  %v8157_v30 = vrot.slane %v8094_v20, 11 }
  0x13   :  { %3805 = vrot.lane.b32.xlu0 %v8540_v0, %s9153_s20  ;;  %v8477_v28 = vcombine.low %v1542_v10, %v1545_v22  ;;  %v479_v31 = vld [vmem:[%s16999_s0 + $0x28] sm:$0xf]  ;;  %v1992_v32 = vrot.slane %v1990_v17, 4  ;;  %v266_v33 = vrot.slane %v264_v25, 4  ;;  %v1993_v34 = vrot.slane %v8095_v26, 7 }
  0x14   :  { %v480_v35 = vld [vmem:[%s16999_s0 + $0x2c] sm:$0x3]  ;;  %v265_v37 = vsel %vm9240_vm5, %v7678_v19, %v264_v25  ;;  %v683_v38 = vrot.slane %v479_v31, 6  ;;  %v7906_v39 = vld [vmem:[%s16999_s0 + $0x84] sm:$0xc]  ;;  %v7710_v42 = vrot.slane %v478_v27, 10  ;;  %v8509_v46 = vcombine.low %v8030_v23, %v8031_v9 }
  0x15   :  { %3007 = vrot.lane.b32.xlu1 %v8381_v21, %s9152_s7  ;;  %v7907_v40 = vld [vmem:[%s16999_s0 + $0x88] sm:$0xf]  ;;  %v268_v41 = vsel %vm9240_vm5, %v266_v33, %v267_v29  ;;  %v686_v43 = vrot.slane %v480_v35, 6  ;;  %v7908_v44 = vld [vmem:[%s16999_s0 + $0x8c] sm:$0x3]  ;;  %v1991_v47 = vsel %vm9240_vm5, %v8157_v30, %v1990_v17  ;;  %v1994_v49 = vsel %vm9240_vm5, %v1992_v32, %v1993_v34 }
  0x16   :  { %v1548_v45 = vrot.slane %v7907_v40, 6  ;;  %v685_v48 = vrot.slane %v683_v38, 4  ;;  %v7998_v50 = vrot.slane %v7906_v39, 10  ;;  %v1551_v52 = vrot.slane %v7908_v44, 6  ;;  %v8033_v54 = vld [vmem:[%s16999_s0 + $0xe4] sm:$0xf] }
  0x17   :  { %3455 = vrot.lane.b32.xlu0 %v8477_v28, %s9154_s6  ;;  %v8350_v53 = vcombine.low %v265_v37, %v268_v41  ;;  %v28_v55 = vld [vmem:[%s16999_s0 + $0x34] sm:$0xf]  ;;  %v684_v56 = vsel %vm9210_vm3, %v7710_v42, %v683_v38  ;;  %v91_v58 = vld [vmem:[%s16999_s0 + $0x30] sm:$0x8]  ;;  %v8541_v59 = vcombine.low %v1991_v47, %v1994_v49  ;;  %v92_v60 = vld [vmem:[%s16999_s0 + $0x38] sm:$0x7] }
  0x18   :  { %v1550_v51 = vrot.slane %v1548_v45, 4  ;;  %v687_v57 = vsel %vm9210_vm3, %v685_v48, %v686_v43  ;;  %v271_v61 = vrot.slane %v28_v55, 7  ;;  %v1549_v62 = vsel %vm9210_vm3, %v7998_v50, %v1548_v45  ;;  %v7744_v0 = vld [vmem:[%s16999_s0 + $0x80] sm:$0xf]  ;;  %v482_v3 = vld [vmem:[%s16999_s0 + $0x38] sm:$0xf] }
  0x19   :  { %3199 = vrot.lane.b32.xlu1 %v8413_v36, %s9153_s20  ;;  %v1997_v1 = vrot.slane %v8033_v54, 7  ;;  %v8096_v2 = vld [vmem:[%s16999_s0 + $0xe0] sm:$0x8]  ;;  %v8382_v4 = vcombine.low %v684_v56, %v687_v57  ;;  %v9410_v6 = vld [vmem:[%s16999_s0 + $0x84] sm:$0xf]  ;;  %v7679_v8 = vrot.slane %v91_v58, 11 }
  0x1a   :  { %v1552_v63 = vsel %vm9210_vm3, %v1550_v51, %v1551_v52  ;;  %v8097_v9 = vld [vmem:[%s16999_s0 + $0xe8] sm:$0x7]  ;;  %v273_v10 = vrot.slane %v271_v61, 4  ;;  %v274_v11 = vrot.slane %v92_v60, 7  ;;  %v690_v12 = vrot.slane %v482_v3, 6 }
  0x1b   :  { %3647 = vrot.lane.b32.xlu0 %v8509_v46, %s9152_s7  ;;  %v7910_v14 = vld [vmem:[%s16999_s0 + $0x98] sm:$0xf]  ;;  %v8478_v15 = vcombine.low %v1549_v62, %v1552_v63  ;;  %v8158_v16 = vrot.slane %v8096_v2, 11  ;;  %v481_v17 = vld [vmem:[%s16999_s0 + $0x34] sm:$0xc]  ;;  %v1999_v20 = vrot.slane %v1997_v1, 4  ;;  %v8414_v23 = vcombine.low %v7744_v0, %v9410_v6 }
  0x1c   :  { %v483_v18 = vld [vmem:[%s16999_s0 + $0x3c] sm:$0x3]  ;;  %v8032_v19 = vld [vmem:[%s16999_s0 + $0xe0] sm:$0xf]  ;;  %v2000_v21 = vrot.slane %v8097_v9, 7  ;;  %v1555_v22 = vrot.slane %v7910_v14, 6  ;;  %v272_v25 = vsel %vm9240_vm5, %v7679_v8, %v271_v61  ;;  %v275_v28 = vsel %vm9240_vm5, %v273_v10, %v274_v11 }
  0x1d   :  { %2849 = vrot.lane.b32.xlu1 %v8350_v53, %s9154_s6  ;;  %v7909_v26 = vld [vmem:[%s16999_s0 + $0x94] sm:$0xc]  ;;  %v7911_v27 = vld [vmem:[%s16999_s0 + $0x9c] sm:$0x3]  ;;  %v7711_v29 = vrot.slane %v481_v17, 10  ;;  %v692_v30 = vrot.slane %v690_v12, 4  ;;  %v8510_v32 = vcombine.low %v8032_v19, %v8033_v54  ;;  %v1998_v33 = vsel %vm9240_vm5, %v8158_v16, %v1997_v1 }
  0x1e   :  { %v693_v31 = vrot.slane %v483_v18, 6  ;;  %v30_v34 = vld [vmem:[%s16999_s0 + $0x44] sm:$0xf]  ;;  %v2001_v35 = vsel %vm9240_vm5, %v1999_v20, %v2000_v21  ;;  %v7999_v36 = vrot.slane %v7909_v26, 10  ;;  %v1557_v37 = vrot.slane %v1555_v22, 4 }
  0x1f   :  { %3807 = vrot.lane.b32.xlu0 %v8541_v59, %s9153_s20  ;;  %v1558_v38 = vrot.slane %v7911_v27, 6  ;;  %v1118_v39 = vrot.slane %v9205_v5, 7  ;;  %v8351_v40 = vcombine.low %v272_v25, %v275_v28  ;;  %v9453_v41 = vld [vmem:[%s16999_s0 + $0xf4] sm:$0xf]  ;;  %v691_v42 = vsel %vm9210_vm3, %v7711_v29, %v690_v12  ;;  %v93_v44 = vld [vmem:[%s16999_s0 + $0x40] sm:$0x8] }
  0x20   :  { %v694_v43 = vsel %vm9210_vm3, %v692_v30, %v693_v31  ;;  %v278_v45 = vrot.slane %v30_v34, 7  ;;  %v1125_v46 = vrot.slane %v9320_v13, 7  ;;  %v1132_v47 = vrot.slane %v9410_v6, 7  ;;  %v94_v49 = vld [vmem:[%s16999_s0 + $0x48] sm:$0x7] }
  0x21   :  { %3009 = vrot.lane.b32.xlu1 %v8382_v4, %s9152_s7  ;;  %v8542_v48 = vcombine.low %v1998_v33, %v2001_v35  ;;  %v485_v50 = vld [vmem:[%s16999_s0 + $0x48] sm:$0xf]  ;;  %v17012_v51 = vmov 0   ;;  %v1556_v52 = vsel %vm9210_vm3, %v7999_v36, %v1555_v22  ;;  %v1559_v53 = vsel %vm9210_vm3, %v1557_v37, %v1558_v38  ;;  %v7746_v54 = vld [vmem:[%s16999_s0 + $0x90] sm:$0xf] }
  0x22   :  { %5177 = vmatprep.mubr.bf16.mxu1 %v17012_v51  ;;  %v2004_v55 = vrot.slane %v9453_v41, 7  ;;  %v8098_v56 = vld [vmem:[%s16999_s0 + $0xf0] sm:$0x8]  ;;  %v8383_v57 = vcombine.low %v691_v42, %v694_v43  ;;  %v7680_v58 = vrot.slane %v93_v44, 11  ;;  %v8099_v59 = vld [vmem:[%s16999_s0 + $0xf8] sm:$0x7]  ;;  %v8479_v1 = vcombine.low %v1556_v52, %v1559_v53 }
  0x23   :  { %3457 = vrot.lane.b32.xlu0 %v8478_v15, %s9154_s6  ;;  %v7913_v60 = vld [vmem:[%s16999_s0 + $0xa8] sm:$0xf]  ;;  %v9493_v61 = vld [vmem:[%s16999_s0 + $0x94] sm:$0xf]  ;;  %v280_v62 = vrot.slane %v278_v45, 4  ;;  %v281_v63 = vrot.slane %v94_v49, 7 }
  0x24   :  { %v697_v0 = vrot.slane %v485_v50, 6  ;;  %v1139_v2 = vrot.slane %v9493_v61, 7  ;;  %v8159_v3 = vrot.slane %v8098_v56, 11  ;;  %v484_v4 = vld [vmem:[%s16999_s0 + $0x44] sm:$0xc]  ;;  %v2006_v10 = vrot.slane %v2004_v55, 4 }
  0x25   :  { %3201 = vrot.lane.b32.xlu1 %v8414_v23, %s9153_s20  ;;  %v486_v8 = vld [vmem:[%s16999_s0 + $0x4c] sm:$0x3]  ;;  %v8034_v9 = vld [vmem:[%s16999_s0 + $0xf0] sm:$0xf]  ;;  %v2007_v11 = vrot.slane %v8099_v59, 7  ;;  %v1562_v12 = vrot.slane %v7913_v60, 6  ;;  %v8415_v16 = vcombine.low %v7746_v54, %v9493_v61  ;;  %v279_v17 = vsel %vm9240_vm5, %v7680_v58, %v278_v45 }
  0x26   :  { %v9508_v14 = vrot.slane %v1118_v39, 4  ;;  %v9512_v15 = vrot.slane %v1125_v46, 4  ;;  %v7912_v18 = vld [vmem:[%s16999_s0 + $0xa4] sm:$0xc]  ;;  %v7914_v19 = vld [vmem:[%s16999_s0 + $0xac] sm:$0x3]  ;;  %v282_v20 = vsel %vm9240_vm5, %v280_v62, %v281_v63  ;;  %v8511_v28 = vcombine.low %v8034_v9, %v9453_v41 }
  0x27   :  { %3649 = vrot.lane.b32.xlu0 %v8510_v32, %s9152_s7  ;;  %v7712_v21 = vrot.slane %v484_v4, 10  ;;  %v699_v22 = vrot.slane %v697_v0, 4  ;;  %v700_v23 = vrot.slane %v486_v8, 6  ;;  %v9529_v25 = vld [vmem:[%s16999_s0 + $0x104] sm:$0xf]  ;;  %v9533_v26 = vrot.slane %v1132_v47, 4 }
  0x28   :  { %v9538_v27 = vrot.slane %v1139_v2, 4  ;;  %v2005_v29 = vsel %vm9240_vm5, %v8159_v3, %v2004_v55  ;;  %v32_v30 = vld [vmem:[%s16999_s0 + $0x54] sm:$0xf]  ;;  %v2008_v31 = vsel %vm9240_vm5, %v2006_v10, %v2007_v11  ;;  %v8000_v32 = vrot.slane %v7912_v18, 10  ;;  %v95_v37 = vld [vmem:[%s16999_s0 + $0x50] sm:$0x8] }
  0x29   :  { %2851 = vrot.lane.b32.xlu1 %v8351_v40, %s9154_s6  ;;  %v1564_v33 = vrot.slane %v1562_v12, 4  ;;  %v1565_v34 = vrot.slane %v7914_v19, 6  ;;  %v8352_v35 = vcombine.low %v279_v17, %v282_v20  ;;  %v2011_v36 = vrot.slane %v9529_v25, 7  ;;  %v8966_v38 = vld [vmem:[%s17000_s1 + $0x4] ss:$8 sps:$4 sm:$0xff]  }
  0x2a   :  { %v698_v40 = vsel %vm9210_vm3, %v7712_v21, %v697_v0  ;;  %v701_v41 = vsel %vm9210_vm3, %v699_v22, %v700_v23  ;;  %v96_v42 = vld [vmem:[%s16999_s0 + $0x58] sm:$0x7]  ;;  %v285_v43 = vrot.slane %v32_v30, 7  ;;  %v8968_v44 = vld [vmem:[%s17000_s1] ss:$8 sps:$4 sm:$0xff]   ;;  %v8543_v45 = vcombine.low %v2005_v29, %v2008_v31  ;;  %4792 = vmatprep.subr.bf16.mxu0 %v8966_v38 }
  0x2b   :  { %3809 = vrot.lane.b32.xlu0 %v8542_v48, %s9153_s20  ;;  %v8100_v48 = vld [vmem:[%s16999_s0 + $0x100] sm:$0x8]  ;;  %v8101_v49 = vld [vmem:[%s16999_s0 + $0x108] sm:$0x7]  ;;  %v9576_v50 = vld [vmem:[%s16999_s0 + $0x58] sm:$0xf]  ;;  %v1563_v52 = vsel %vm9210_vm3, %v8000_v32, %v1562_v12  ;;  %v1566_v53 = vsel %vm9210_vm3, %v1564_v33, %v1565_v34  ;;  %4793 = vmatpush1.bf16.msra.mxu0 %v8968_v44  ;;  %v8384_v58 = vcombine.low %v698_v40, %v701_v41 }
  0x2c   :  { %v7748_v54 = vld [vmem:[%s16999_s0 + $0xa0] sm:$0xf]  ;;  %v9588_v55 = vld [vmem:[%s16999_s0 + $0xa4] sm:$0xf]  ;;  %v9593_v56 = vld [vmem:[%s16999_s0 + $0xb8] sm:$0xf]  ;;  %v8480_v10 = vcombine.low %v1563_v52, %v1566_v53 }
  0x2d   :  { %3011 = vrot.lane.b32.xlu1 %v8383_v57, %s9152_s7  ;;  %v8971_v57 = vld [vmem:[%s17000_s1 + $0x14] ss:$8 sps:$4 sm:$0xff]   ;;  %v2013_v59 = vrot.slane %v2011_v36, 4  ;;  %v7681_v60 = vrot.slane %v95_v37, 11  ;;  %v288_v62 = vrot.slane %v96_v42, 7  ;;  %v8160_v3 = vrot.slane %v8100_v48, 11 }
  0x2e   :  { %v8973_v63 = vld [vmem:[%s17000_s1 + $0x10] ss:$8 sps:$4 sm:$0xff]   ;;  %v8036_v0 = vld [vmem:[%s16999_s0 + $0x100] sm:$0xf]  ;;  %v2014_v4 = vrot.slane %v8101_v49, 7  ;;  %v704_v9 = vrot.slane %v9576_v50, 6  ;;  %4794 = vmatprep.subr.bf16.mxu0 %v8971_v57  ;;  %v8416_v20 = vcombine.low %v7748_v54, %v9588_v55 }
  0x2f   :  { %3459 = vrot.lane.b32.xlu0 %v8479_v1, %s9154_s6  ;;  %v287_v1 = vrot.slane %v285_v43, 4  ;;  %v487_v8 = vld [vmem:[%s16999_s0 + $0x54] sm:$0xc]  ;;  %v489_v11 = vld [vmem:[%s16999_s0 + $0x5c] sm:$0x3]  ;;  %v1569_v12 = vrot.slane %v9593_v56, 6  ;;  %4795 = vmatpush1.bf16.msra.mxu0 %v8973_v63  ;;  %v286_v21 = vsel %vm9240_vm5, %v7681_v60, %v285_v43  ;;  %v8512_v33 = vcombine.low %v8036_v0, %v9529_v25 }
  0x30   :  { %v7915_v17 = vld [vmem:[%s16999_s0 + $0xb4] sm:$0xc]  ;;  %v7917_v18 = vld [vmem:[%s16999_s0 + $0xbc] sm:$0x3]  ;;  %v8974_v19 = vld [vmem:[%s17000_s1 + $0x24] ss:$8 sps:$4 sm:$0xff]   ;;  %v2012_v40 = vsel %vm9240_vm5, %v8160_v3, %v2011_v36  ;;  %v2015_v41 = vsel %vm9240_vm5, %v2013_v59, %v2014_v4 }
  0x31   :  { %3203 = vrot.lane.b32.xlu1 %v8415_v16, %s9153_s20  ;;  %v9617_v16 = vld [vmem:[%s16999_s0 + $0x114] sm:$0xf]  ;;  %v7713_v22 = vrot.slane %v487_v8, 10  ;;  %v9635_v23 = vld [vmem:[%s16999_s0 + $0x64] sm:$0xf]  ;;  %v289_v29 = vsel %vm9240_vm5, %v287_v1, %v288_v62  ;;  %v706_v30 = vrot.slane %v704_v9, 4  ;;  %4796 = vmatprep.subr.bf16.mxu0 %v8974_v19 }
  0x32   :  { %v707_v31 = vrot.slane %v489_v11, 6  ;;  %v2018_v32 = vrot.slane %v9617_v16, 7  ;;  %v8001_v34 = vrot.slane %v7915_v17, 10  ;;  %v1572_v37 = vrot.slane %v7917_v18, 6  ;;  %v9653_v42 = vld [vmem:[%s16999_s0 + $0x60] sm:$0x8] }
  0x33   :  { %3651 = vrot.lane.b32.xlu0 %v8511_v28, %s9152_s7  ;;  %v8976_v28 = vld [vmem:[%s17000_s1 + $0x20] ss:$8 sps:$4 sm:$0xff]   ;;  %v1146_v38 = vrot.slane %v9588_v55, 7  ;;  %v292_v43 = vrot.slane %v9635_v23, 7  ;;  %v8977_v25 = vld [vmem:[%s17000_s1 + $0x34] ss:$8 sps:$4 sm:$0xff]   ;;  %v8353_v44 = vcombine.low %v286_v21, %v289_v29  ;;  %v705_v52 = vsel %vm9210_vm3, %v7713_v22, %v704_v9 }
  0x34   :  { %4797 = vmatpush1.bf16.msra.mxu0 %v8976_v28  ;;  %v98_v36 = vld [vmem:[%s16999_s0 + $0x68] sm:$0x7]  ;;  %v8979_v49 = vld [vmem:[%s17000_s1 + $0x30] ss:$8 sps:$4 sm:$0xff]   ;;  %v8980_v50 = vld [vmem:[%s17000_s1 + $0x104] ss:$8 sps:$4 sm:$0xff]   ;;  %v708_v53 = vsel %vm9210_vm3, %v706_v30, %v707_v31  ;;  %v1570_v59 = vsel %vm9210_vm3, %v8001_v34, %v1569_v12 }
  0x35   :  { %2853 = vrot.lane.b32.xlu1 %v8352_v35, %s9154_s6  ;;  %v1571_v35 = vrot.slane %v1569_v12, 4  ;;  %v9671_v48 = vld [vmem:[%s16999_s0 + $0x68] sm:$0xf]  ;;  %v2020_v54 = vrot.slane %v2018_v32, 4  ;;  %v8103_v56 = vld [vmem:[%s16999_s0 + $0x118] sm:$0x7]  ;;  %4798 = vmatprep.subr.bf16.mxu0 %v8977_v25 }
  0x36   :  { %v8982_v57 = vld [vmem:[%s17000_s1 + $0x100] ss:$8 sps:$4 sm:$0xff]   ;;  %v9699_v62 = vld [vmem:[%s16999_s0 + $0x64] sm:$0xc]  ;;  %v9704_v63 = vld [vmem:[%s16999_s0 + $0x6c] sm:$0x3]  ;;  %5145 = vmatprep.subr.bf16.mxu1 %v8980_v50 }
  0x37   :  { %3811 = vrot.lane.b32.xlu0 %v8543_v45, %s9153_s20  ;;  %v9666_v45 = vld [vmem:[%s16999_s0 + $0x110] sm:$0x8]  ;;  %v1573_v60 = vsel %vm9210_vm3, %v1571_v35, %v1572_v37  ;;  %v9709_v0 = vld [vmem:[%s16999_s0 + $0xc8] sm:$0xf]  ;;  %v9717_v3 = vld [vmem:[%s16999_s0 + $0xb4] sm:$0xf]  ;;  %5146 = vmatpush1.bf16.msra.mxu1 %v8982_v57 }
  0x38   :  { %v7750_v1 = vld [vmem:[%s16999_s0 + $0xb0] sm:$0xf]  ;;  %v711_v4 = vrot.slane %v9671_v48, 6  ;;  %4799 = vmatpush1.bf16.msra.mxu0 %v8979_v49  ;;  %v8985_v8 = vld [vmem:[%s17000_s1 + $0x44] ss:$8 sps:$4 sm:$0xff]   ;;  %v7682_v11 = vrot.slane %v9653_v42, 11  ;;  %v8481_v18 = vcombine.low %v1570_v59, %v1573_v60 }
  0x39   :  { %3013 = vrot.lane.b32.xlu1 %v8384_v58, %s9152_s7  ;;  %v8544_v58 = vcombine.low %v2012_v40, %v2015_v41  ;;  %v8987_v9 = vld [vmem:[%s17000_s1 + $0x40] ss:$8 sps:$4 sm:$0xff]   ;;  %v8988_v12 = vld [vmem:[%s17000_s1 + $0x114] ss:$8 sps:$4 sm:$0xff]   ;;  %v8990_v17 = vld [vmem:[%s17000_s1 + $0x110] ss:$8 sps:$4 sm:$0xff]   ;;  %4800 = vmatprep.subr.bf16.mxu0 %v8985_v8  ;;  %v8417_v40 = vcombine.low %v7750_v1, %v9717_v3 }
  0x3a   :  { %v294_v19 = vrot.slane %v292_v43, 4  ;;  %v8161_v21 = vrot.slane %v9666_v45, 11  ;;  %v9740_v22 = vld [vmem:[%s16999_s0 + $0x124] sm:$0xf]  ;;  %v8038_v28 = vld [vmem:[%s16999_s0 + $0x110] sm:$0xf]  ;;  %5147 = vmatprep.subr.bf16.mxu1 %v8988_v12  ;;  %v293_v45 = vsel %vm9240_vm5, %v7682_v11, %v292_v43 }
  0x3b   :  { %3461 = vrot.lane.b32.xlu0 %v8480_v10, %s9154_s6  ;;  %v8385_v10 = vcombine.low %v705_v52, %v708_v53  ;;  %v2021_v29 = vrot.slane %v8103_v56, 7  ;;  %v7714_v30 = vrot.slane %v9699_v62, 10  ;;  %v714_v31 = vrot.slane %v9704_v63, 6  ;;  %v7918_v34 = vld [vmem:[%s16999_s0 + $0xc4] sm:$0xc]  ;;  %5148 = vmatpush1.bf16.msra.mxu1 %v8990_v17 }
  0x3c   :  { %v7920_v35 = vld [vmem:[%s16999_s0 + $0xcc] sm:$0x3]  ;;  %v1576_v37 = vrot.slane %v9709_v0, 6  ;;  %4801 = vmatpush1.bf16.msra.mxu0 %v8987_v9  ;;  %v2025_v41 = vrot.slane %v9740_v22, 7  ;;  %v9761_v42 = vld [vmem:[%s16999_s0 + $0x74] sm:$0xf]  ;;  %v2019_v23 = vsel %vm9240_vm5, %v8161_v21, %v2018_v32 }
  0x3d   :  { %3205 = vrot.lane.b32.xlu1 %v8416_v20, %s9153_s20  ;;  %v295_v20 = vrot.slane %v98_v36, 7  ;;  %v8991_v25 = vld [vmem:[%s17000_s1 + $0x54] ss:$8 sps:$4 sm:$0xff]   ;;  %v8513_v36 = vcombine.low %v8038_v28, %v9617_v16  ;;  %v8993_v49 = vld [vmem:[%s17000_s1 + $0x50] ss:$8 sps:$4 sm:$0xff]   ;;  %v2022_v43 = vsel %vm9240_vm5, %v2020_v54, %v2021_v29  ;;  %v8002_v53 = vrot.slane %v7918_v34, 10 }
  0x3e   :  { %v8188_v50 = vld [vmem:[%s16999_s0 + $0xc4] sm:$0xc]  ;;  %v8189_v52 = vld [vmem:[%s16999_s0 + $0xc8] sm:$0xf]  ;;  %4802 = vmatprep.subr.bf16.mxu0 %v8991_v25  ;;  %v8190_v56 = vld [vmem:[%s16999_s0 + $0xcc] sm:$0x3]  ;;  %v712_v63 = vsel %vm9210_vm3, %v7714_v30, %v711_v4 }
  0x3f   :  { %3653 = vrot.lane.b32.xlu0 %v8512_v33, %s9152_s7  ;;  %v713_v33 = vrot.slane %v711_v4, 4  ;;  %v296_v48 = vsel %vm9240_vm5, %v294_v19, %v295_v20  ;;  %v8284_v57 = vrot.slane %v8188_v50, 10  ;;  %v1579_v59 = vrot.slane %v7920_v35, 6  ;;  %v99_v60 = vld [vmem:[%s16999_s0 + $0x70] sm:$0x8] }
  0x40   :  { %4803 = vmatpush1.bf16.msra.mxu0 %v8993_v49  ;;  %v2399_v16 = vrot.slane %v8189_v52, 6  ;;  %v2402_v62 = vrot.slane %v8190_v56, 6  ;;  %v9798_v32 = vrot.slane %v1146_v38, 4  ;;  %v8354_v54 = vcombine.low %v293_v45, %v296_v48  ;;  %v100_v0 = vld [vmem:[%s16999_s0 + $0x78] sm:$0x7] }
  0x41   :  { %2855 = vrot.lane.b32.xlu1 %v8353_v44, %s9154_s6  ;;  %v17005_v44 = vmov 0.0   ;;  %v299_v1 = vrot.slane %v9761_v42, 7  ;;  %v715_v8 = vsel %vm9210_vm3, %v713_v33, %v714_v31  ;;  %v9812_v9 = vld [vmem:[%s16999_s0 + $0xc0] sm:$0xf]  ;;  %v9821_v4 = vrot.slane %v2025_v41, 4 }
  0x42   :  { %8813 = vmatprep.subr.bf16.mxu1 %v17005_v44  ;;  %v2400_v11 = vsel %vm9210_vm3, %v8284_v57, %v2399_v16  ;;  %v2401_v12 = vrot.slane %v2399_v16, 4  ;;  %v9828_v17 = vld [vmem:[%s16999_s0 + $0x78] sm:$0xf]  ;;  %v7683_v19 = vrot.slane %v99_v60, 11  ;;  %v8104_v20 = vld [vmem:[%s16999_s0 + $0x120] sm:$0x8]  ;;  %v1577_v29 = vsel %vm9210_vm3, %v8002_v53, %v1576_v37 }
  0x43   :  { %3813 = vrot.lane.b32.xlu0 %v8544_v58, %s9153_s20  ;;  %v1578_v58 = vrot.slane %v1576_v37, 4  ;;  %v8105_v21 = vld [vmem:[%s16999_s0 + $0x128] sm:$0x7]  ;;  %v8994_v28 = vld [vmem:[%s17000_s1 + $0x64] ss:$8 sps:$4 sm:$0xff]   ;;  %v302_v31 = vrot.slane %v100_v0, 7 }
  0x44   :  { %v2403_v33 = vsel %vm9210_vm3, %v2401_v12, %v2402_v62  ;;  %v9849_v34 = vld [vmem:[%s16999_s0 + $0x74] sm:$0xc]  ;;  %v8996_v35 = vld [vmem:[%s17000_s1 + $0x60] ss:$8 sps:$4 sm:$0xff]   ;;  %v301_v42 = vrot.slane %v299_v1, 4  ;;  %v718_v45 = vrot.slane %v9828_v17, 6  ;;  %4804 = vmatprep.subr.bf16.mxu0 %v8994_v28  ;;  %v9891_v57 = vsel %vm9240_vm5, %v7683_v19, %v299_v1 }
  0x45   :  { %3015 = vrot.lane.b32.xlu1 %v8385_v10, %s9152_s7  ;;  %v9817_v10 = vld [vmem:[%s16999_s0 + $0xc4] sm:$0xf]  ;;  %v1580_v30 = vsel %vm9210_vm3, %v1578_v58, %v1579_v59  ;;  %v8572_v25 = vcombine.low %v2400_v11, %v2403_v33  ;;  %v9865_v48 = vld [vmem:[%s16999_s0 + $0xd4] sm:$0xc]  ;;  %v9870_v49 = vld [vmem:[%s16999_s0 + $0xd8] sm:$0xf]  ;;  %4805 = vmatpush1.bf16.msra.mxu0 %v8996_v35 }
  0x46   :  { %v9024_v37 = vld [vmem:[%s17001_s2] sm:$0xff]   ;;  %v9878_v52 = vld [vmem:[%s16999_s0 + $0x134] sm:$0xf]  ;;  %v8482_v53 = vcombine.low %v1577_v29, %v1580_v30  ;;  %v8418_v56 = vcombine.low %v9812_v9, %v9817_v10  ;;  %v8192_v59 = vld [vmem:[%s16999_s0 + $0xd8] sm:$0xf]  ;;  %v8162_v16 = vrot.slane %v8104_v20, 11  ;;  %v303_v1 = vsel %vm9240_vm5, %v301_v42, %v302_v31 }
  0x47   :  { %3463 = vrot.lane.b32.xlu0 %v8481_v18, %s9154_s6  ;;  %v8545_v18 = vcombine.low %v2019_v23, %v2022_v43  ;;  %v8040_v50 = vld [vmem:[%s16999_s0 + $0x120] sm:$0xf]  ;;  %v8999_v23 = vld [vmem:[%s17000_s1 + $0x74] ss:$8 sps:$4 sm:$0xff]   ;;  %v9001_v43 = vld [vmem:[%s17000_s1 + $0x70] ss:$8 sps:$4 sm:$0xff]   ;;  %8640 = vmatmul.mubr.msk.bf16.vlgmr.msra.gmra.mrb[0].mxu1 %vm3965_vm6, %v8572_v25 }
  0x48   :  { %v8191_v58 = vld [vmem:[%s16999_s0 + $0xd4] sm:$0xc]  ;;  %v8193_v60 = vld [vmem:[%s16999_s0 + $0xdc] sm:$0x3]  ;;  %v2028_v62 = vrot.slane %v8105_v21, 7  ;;  %4806 = vmatprep.subr.bf16.mxu0 %v8999_v23  ;;  %5187 = vmatprep.mubr.bf16.mxu1 %v17012_v51  ;;  %v2406_v9 = vrot.slane %v8192_v59, 6  ;;  %v8514_v28 = vcombine.low %v8040_v50, %v9740_v22  ;;  %v2026_v35 = vsel %vm9240_vm5, %v8162_v16, %v2025_v41 }
  0x49   :  { %3207 = vrot.lane.b32.xlu1 %v8417_v40, %s9153_s20  ;;  %v8386_v40 = vcombine.low %v712_v63, %v715_v8  ;;  %v1583_v63 = vrot.slane %v9870_v49, 6  ;;  %v8285_v0 = vrot.slane %v8191_v58, 10  ;;  %v7715_v8 = vrot.slane %v9849_v34, 10  ;;  %v9915_v12 = vld [vmem:[%s16999_s0 + $0x84] sm:$0xf]  ;;  %8814 = vmatpush3.bf16.msra.mxu1 %v9024_v37 }
  0x4a   :  { %v2409_v11 = vrot.slane %v8193_v60, 6  ;;  %v720_v17 = vrot.slane %v718_v45, 4  ;;  %v8003_v19 = vrot.slane %v9865_v48, 10  ;;  %v2032_v20 = vrot.slane %v9878_v52, 7  ;;  %4807 = vmatpush1.bf16.msra.mxu0 %v9001_v43  ;;  %v9922_v21 = vld [vmem:[%s16999_s0 + $0x80] sm:$0x8]  ;;  %8815 = vmatprep.subr.bf16.mxu1 %v17005_v44 }
  0x4b   :  { %3655 = vrot.lane.b32.xlu0 %v8513_v36, %s9152_s7  ;;  %v495_v36 = vld [vmem:[%s16999_s0 + $0x7c] sm:$0x3]  ;;  %v2407_v30 = vsel %vm9210_vm3, %v8285_v0, %v2406_v9  ;;  %v2408_v31 = vrot.slane %v2406_v9, 4  ;;  %v9932_v33 = vld [vmem:[%s16999_s0 + $0x88] sm:$0x7]  ;;  %v2029_v37 = vsel %vm9240_vm5, %v9821_v4, %v2028_v62  ;;  %v306_v42 = vrot.slane %v9915_v12, 7 }
  0x4c   :  { %v9002_v34 = vld [vmem:[%s17000_s1 + $0x84] ss:$8 sps:$4 sm:$0xff]   ;;  %v8106_v25 = vld [vmem:[%s16999_s0 + $0x130] sm:$0x8]  ;;  %v1153_v22 = vrot.slane %v9717_v3, 7  ;;  %v8355_v41 = vcombine.low %v9891_v57, %v303_v1  ;;  %v719_v4 = vsel %vm9210_vm3, %v7715_v8, %v718_v45  ;;  %v2034_v23 = vrot.slane %v2032_v20, 4 }
  0x4d   :  { %2857 = vrot.lane.b32.xlu1 %v8354_v54, %s9154_s6  ;;  %v7923_v54 = vld [vmem:[%s16999_s0 + $0xdc] sm:$0x3]  ;;  %v2410_v48 = vsel %vm9210_vm3, %v2408_v31, %v2409_v11  ;;  %v8107_v49 = vld [vmem:[%s16999_s0 + $0x138] sm:$0x7]  ;;  %4808 = vmatprep.subr.bf16.mxu0 %v9002_v34  ;;  %v8546_v45 = vcombine.low %v2026_v35, %v2029_v37  ;;  %v9975_v57 = vld [vmem:[%s16999_s0 + $0xd4] sm:$0xf]  ;;  %v1584_v62 = vsel %vm9210_vm3, %v8003_v19, %v1583_v63 }
  0x4e   :  { %v1586_v29 = vrot.slane %v7923_v54, 6  ;;  %v8573_v43 = vcombine.low %v2407_v30, %v2410_v48  ;;  %v309_v58 = vrot.slane %v9932_v33, 7  ;;  %v8163_v59 = vrot.slane %v8106_v25, 11  ;;  %v9981_v60 = vld [vmem:[%s16999_s0 + $0x88] sm:$0xf] }
  0x4f   :  { %3815 = vrot.lane.b32.xlu0 %v8545_v18, %s9153_s20  ;;  %v721_v18 = vrot.slane %v495_v36, 6  ;;  %v9004_v36 = vld [vmem:[%s17000_s1 + $0x80] ss:$8 sps:$4 sm:$0xff]   ;;  %v9005_v16 = vld [vmem:[%s17000_s1 + $0x94] ss:$8 sps:$4 sm:$0xff]   ;;  %v308_v0 = vrot.slane %v306_v42, 4 }
  0x50   :  { %4809 = vmatpush1.bf16.msra.mxu0 %v9004_v36  ;;  %8641 = vmatmul.mubr.msk.bf16.gmra.mrb[4].mxu1 %vm3965_vm6, %v8573_v43  ;;  %v2035_v1 = vrot.slane %v8107_v49, 7  ;;  %v7925_v8 = vld [vmem:[%s16999_s0 + $0xe8] sm:$0xf]  ;;  %v9007_v9 = vld [vmem:[%s17000_s1 + $0x90] ss:$8 sps:$4 sm:$0xff]   ;;  %v10030_v25 = vsel %vm9240_vm5, %v8163_v59, %v2032_v20  ;;  %vm7438_vm10 = vcmask 1041409  }
  0x51   :  { %3017 = vrot.lane.b32.xlu1 %v8386_v40, %s9152_s7  ;;  %v1585_v40 = vrot.slane %v1583_v63, 4  ;;  %v722_v50 = vsel %vm9210_vm3, %v720_v17, %v721_v18  ;;  %4810 = vmatprep.subr.bf16.mxu0 %v9005_v16  ;;  %v8194_v63 = vld [vmem:[%s16999_s0 + $0xe4] sm:$0xc]  ;;  %v8195_v12 = vld [vmem:[%s16999_s0 + $0xe8] sm:$0xf]  ;;  %v1590_v33 = vrot.slane %v7925_v8, 6 }
  0x52   :  { %v8387_v11 = vcombine.low %v719_v4, %v722_v50  ;;  %v8196_v17 = vld [vmem:[%s16999_s0 + $0xec] sm:$0x3]  ;;  %v8042_v18 = vld [vmem:[%s16999_s0 + $0x130] sm:$0xf]  ;;  %v496_v19 = vld [vmem:[%s16999_s0 + $0x84] sm:$0xc]  ;;  %5197 = vmatprep.mubr.bf16.mxu1 %v17012_v51 }
  0x53   :  { %3465 = vrot.lane.b32.xlu0 %v8482_v53, %s9154_s6  ;;  %v7684_v53 = vrot.slane %v9922_v21, 11  ;;  %v1587_v54 = vsel %vm9210_vm3, %v1585_v40, %v1586_v29  ;;  %v498_v21 = vld [vmem:[%s16999_s0 + $0x8c] sm:$0x3]  ;;  %v8286_v29 = vrot.slane %v8194_v63, 10  ;;  %v7924_v31 = vld [vmem:[%s16999_s0 + $0xe4] sm:$0xc]  ;;  %v8515_v59 = vcombine.low %v8042_v18, %v9878_v52 }
  0x54   :  { %4811 = vmatpush1.bf16.msra.mxu0 %v9007_v9  ;;  %v8483_v30 = vcombine.low %v1584_v62, %v1587_v54  ;;  %v2413_v34 = vrot.slane %v8195_v12, 6  ;;  %v2416_v35 = vrot.slane %v8196_v17, 6  ;;  %v7926_v36 = vld [vmem:[%s16999_s0 + $0xec] sm:$0x3]  ;;  %v9012_v4 = vld [vmem:[%s17000_s1 + $0xa0] ss:$8 sps:$4 sm:$0xff]  }
  0x55   :  { %3209 = vrot.lane.b32.xlu1 %v8418_v56, %s9153_s20  ;;  %v9970_v56 = vld [vmem:[%s16999_s0 + $0xd0] sm:$0xf]  ;;  %v307_v40 = vsel %vm9240_vm5, %v7684_v53, %v306_v42  ;;  %v310_v42 = vsel %vm9240_vm5, %v308_v0, %v309_v58  ;;  %v7716_v48 = vrot.slane %v496_v19, 10  ;;  %v10049_v50 = vld [vmem:[%s16999_s0 + $0x144] sm:$0xf]  ;;  %v2036_v53 = vsel %vm9240_vm5, %v2034_v23, %v2035_v1 }
  0x56   :  { %v8419_v37 = vcombine.low %v9970_v56, %v9975_v57  ;;  %v2414_v20 = vsel %vm9210_vm3, %v8286_v29, %v2413_v34  ;;  %v2415_v49 = vrot.slane %v2413_v34, 4  ;;  %v10054_v43 = vld [vmem:[%s16999_s0 + $0x94] sm:$0xf]  ;;  %v728_v56 = vrot.slane %v498_v21, 6  ;;  %v103_v54 = vld [vmem:[%s16999_s0 + $0x90] sm:$0x8] }
  0x57   :  { %3657 = vrot.lane.b32.xlu0 %v8514_v28, %s9152_s7  ;;  %v725_v28 = vrot.slane %v9981_v60, 6  ;;  %v8004_v58 = vrot.slane %v7924_v31, 10  ;;  %v1592_v60 = vrot.slane %v1590_v33, 4  ;;  %v1593_v16 = vrot.slane %v7926_v36, 6  ;;  %v10068_v23 = vld [vmem:[%s16999_s0 + $0x98] sm:$0x7] }
  0x58   :  { %v2417_v62 = vsel %vm9210_vm3, %v2415_v49, %v2416_v35  ;;  %v2039_v1 = vrot.slane %v10049_v50, 7  ;;  %v313_v52 = vrot.slane %v10054_v43, 7  ;;  %v9013_v8 = vld [vmem:[%s17000_s1 + $0xb4] ss:$8 sps:$4 sm:$0xff]   ;;  %v9015_v9 = vld [vmem:[%s17000_s1 + $0xb0] ss:$8 sps:$4 sm:$0xff]   ;;  %v8547_v63 = vcombine.low %v10030_v25, %v2036_v53 }
  0x59   :  { %2859 = vrot.lane.b32.xlu1 %v8355_v41, %s9154_s6  ;;  %v9010_v41 = vld [vmem:[%s17000_s1 + $0xa4] ss:$8 sps:$4 sm:$0xff]   ;;  %v8574_v0 = vcombine.low %v2414_v20, %v2417_v62  ;;  %v726_v12 = vsel %vm9210_vm3, %v7716_v48, %v725_v28  ;;  %v8108_v17 = vld [vmem:[%s16999_s0 + $0x140] sm:$0x8]  ;;  %v8197_v18 = vld [vmem:[%s16999_s0 + $0xf4] sm:$0xc]  ;;  %v1591_v29 = vsel %vm9210_vm3, %v8004_v58, %v1590_v33  ;;  %v1594_v35 = vsel %vm9210_vm3, %v1592_v60, %v1593_v16 }
  0x5a   :  { %4812 = vmatprep.subr.bf16.mxu0 %v9010_v41  ;;  %v8198_v19 = vld [vmem:[%s16999_s0 + $0xf8] sm:$0xf]  ;;  %v8287_v31 = vrot.slane %v8197_v18, 10  ;;  %v10108_v33 = vld [vmem:[%s16999_s0 + $0xe0] sm:$0xf]  ;;  %v316_v25 = vrot.slane %v10068_v23, 7 }
  0x5b   :  { %3817 = vrot.lane.b32.xlu0 %v8546_v45, %s9153_s20  ;;  %v727_v45 = vrot.slane %v725_v28, 4  ;;  %4813 = vmatpush1.bf16.msra.mxu0 %v9012_v4  ;;  %v8109_v28 = vld [vmem:[%s16999_s0 + $0x148] sm:$0x7]  ;;  %v2420_v34 = vrot.slane %v8198_v19, 6  ;;  %v10120_v41 = vld [vmem:[%s16999_s0 + $0x98] sm:$0xf] }
  0x5c   :  { %8642 = vmatmul.mubr.msk.bf16.gmra.mrb[8].mxu1 %vm3965_vm6, %v8574_v0  ;;  %4814 = vmatprep.subr.bf16.mxu0 %v9013_v8  ;;  %v2041_v4 = vrot.slane %v2039_v1, 4  ;;  %v10127_v49 = vld [vmem:[%s16999_s0 + $0xf8] sm:$0xf]  ;;  %v8164_v53 = vrot.slane %v8108_v17, 11  ;;  %v501_v58 = vld [vmem:[%s16999_s0 + $0x9c] sm:$0x3]  ;;  %v8484_v0 = vcombine.low %v1591_v29, %v1594_v35 }
  0x5d   :  { %3019 = vrot.lane.b32.xlu1 %v8387_v11, %s9152_s7  ;;  %v8356_v11 = vcombine.low %v307_v40, %v310_v42  ;;  %v729_v21 = vsel %vm9210_vm3, %v727_v45, %v728_v56  ;;  %v7685_v40 = vrot.slane %v103_v54, 11  ;;  %5207 = vmatprep.mubr.bf16.mxu1 %v17012_v51  ;;  %v315_v42 = vrot.slane %v313_v52, 4  ;;  %v499_v56 = vld [vmem:[%s16999_s0 + $0x94] sm:$0xc]  ;;  %v9016_v62 = vld [vmem:[%s17000_s1 + $0xc4] ss:$8 sps:$4 sm:$0xff]  }
  0x5e   :  { %v2421_v48 = vsel %vm9210_vm3, %v8287_v31, %v2420_v34  ;;  %v2422_v20 = vrot.slane %v2420_v34, 4  ;;  %v8388_v43 = vcombine.low %v726_v12, %v729_v21  ;;  %v2042_v45 = vrot.slane %v8109_v28, 7  ;;  %v9018_v54 = vld [vmem:[%s17000_s1 + $0xc0] ss:$8 sps:$4 sm:$0xff]   ;;  %v7929_v21 = vld [vmem:[%s16999_s0 + $0xfc] sm:$0x3] }
  0x5f   :  { %3467 = vrot.lane.b32.xlu0 %v8483_v30, %s9154_s6  ;;  %v8199_v30 = vld [vmem:[%s16999_s0 + $0xfc] sm:$0x3]  ;;  %4815 = vmatpush1.bf16.msra.mxu0 %v9015_v9  ;;  %v732_v16 = vrot.slane %v10120_v41, 6  ;;  %v1160_v23 = vrot.slane %v9817_v10, 7  ;;  %v8044_v8 = vld [vmem:[%s16999_s0 + $0x140] sm:$0xf]  ;;  %v314_v18 = vsel %vm9240_vm5, %v7685_v40, %v313_v52  ;;  %v317_v29 = vsel %vm9240_vm5, %v315_v42, %v316_v25 }
  0x60   :  { %v2423_v36 = vrot.slane %v8199_v30, 6  ;;  %v1597_v12 = vrot.slane %v10127_v49, 6  ;;  %v7717_v19 = vrot.slane %v499_v56, 10  ;;  %4816 = vmatprep.subr.bf16.mxu0 %v9016_v62  ;;  %v10170_v28 = vsel %vm9240_vm5, %v8164_v53, %v2039_v1  ;;  %v10179_v52 = vld [vmem:[%s16999_s0 + $0x154] sm:$0xf] }
  0x61   :  { %3211 = vrot.lane.b32.xlu1 %v8419_v37, %s9153_s20  ;;  %v10113_v37 = vld [vmem:[%s16999_s0 + $0xe4] sm:$0xf]  ;;  %v10174_v30 = vsel %vm9240_vm5, %v2041_v4, %v2042_v45  ;;  %v9021_v31 = vld [vmem:[%s17000_s1 + $0xd4] ss:$8 sps:$4 sm:$0xff]   ;;  %v9023_v34 = vld [vmem:[%s17000_s1 + $0xd0] ss:$8 sps:$4 sm:$0xff]   ;;  %v8516_v1 = vcombine.low %v8044_v8, %v10049_v50  ;;  %v8357_v42 = vcombine.low %v314_v18, %v317_v29 }
  0x62   :  { %v2424_v60 = vsel %vm9210_vm3, %v2422_v20, %v2423_v36  ;;  %v8420_v17 = vcombine.low %v10108_v33, %v10113_v37  ;;  %v734_v35 = vrot.slane %v732_v16, 4  ;;  %v8200_v37 = vld [vmem:[%s16999_s0 + $0x104] sm:$0xc]  ;;  %v8201_v40 = vld [vmem:[%s16999_s0 + $0x108] sm:$0xf]  ;;  %v1599_v25 = vrot.slane %v1597_v12, 4 }
  0x63   :  { %3659 = vrot.lane.b32.xlu0 %v8515_v59, %s9152_s7  ;;  %v10138_v59 = vrot.slane %v1153_v22, 4  ;;  %v8575_v9 = vcombine.low %v2421_v48, %v2424_v60  ;;  %4817 = vmatpush1.bf16.msra.mxu0 %v9018_v54  ;;  %v1600_v36 = vrot.slane %v7929_v21, 6  ;;  %v8202_v50 = vld [vmem:[%s16999_s0 + $0x10c] sm:$0x3]  ;;  %v8288_v41 = vrot.slane %v8200_v37, 10 }
  0x64   :  { %4818 = vmatprep.subr.bf16.mxu0 %v9021_v31  ;;  %v2427_v4 = vrot.slane %v8201_v40, 6  ;;  %v8548_v48 = vcombine.low %v10170_v28, %v10174_v30  ;;  %v2046_v20 = vrot.slane %v10179_v52, 7  ;;  %v2430_v49 = vrot.slane %v8202_v50, 6  ;;  %v7805_v53 = vld [vmem:[%s16999_s0 + $0x68] sm:$0x7] }
  0x65   :  { %2861 = vrot.lane.b32.xlu1 %v8356_v11, %s9154_s6  ;;  %v7927_v11 = vld [vmem:[%s16999_s0 + $0xf4] sm:$0xc]  ;;  %8643 = vmatmul.mubr.msk.bf16.gmra.mrb[12].mxu1 %vm3965_vm6, %v8575_v9  ;;  %v1121_v60 = vrot.slane %v7805_v53, 7  ;;  %v42_v62 = vld [vmem:[%s16999_s0 + $0xa4] sm:$0xf]  ;;  %v733_v54 = vsel %vm9210_vm3, %v7717_v19, %v732_v16  ;;  %v1601_v29 = vsel %vm9210_vm3, %v1599_v25, %v1600_v36  ;;  %vm7496_vm11 = vcmask 254976  }
  0x66   :  { %v8005_v33 = vrot.slane %v7927_v11, 10  ;;  %5217 = vmatprep.mubr.bf16.mxu1 %v17012_v51  ;;  %v2428_v45 = vsel %vm9210_vm3, %v8288_v41, %v2427_v4  ;;  %v2429_v56 = vrot.slane %v2427_v4, 4  ;;  %v105_v9 = vld [vmem:[%s16999_s0 + $0xa0] sm:$0x8]  ;;  %v106_v11 = vld [vmem:[%s16999_s0 + $0xa8] sm:$0x7] }
  0x67   :  { %3819 = vrot.lane.b32.xlu0 %v8547_v63, %s9153_s20  ;;  %v735_v63 = vrot.slane %v501_v58, 6  ;;  %4819 = vmatpush1.bf16.msra.mxu0 %v9023_v34  ;;  %v10231_v16 = vld [vmem:[%s16999_s0 + $0xf0] sm:$0xf]  ;;  %v7686_v21 = vrot.slane %v105_v9, 11  ;;  %v9027_v37 = vld [vmem:[%s17000_s1 + $0xe0] ss:$8 sps:$4 sm:$0xff]  }
  0x68   :  { %v1598_v8 = vsel %vm9210_vm3, %v8005_v33, %v1597_v12  ;;  %v10236_v12 = vld [vmem:[%s16999_s0 + $0xf4] sm:$0xf]  ;;  %v2431_v18 = vsel %vm9210_vm3, %v2429_v56, %v2430_v49  ;;  %v8110_v5 = vld [vmem:[%s16999_s0 + $0x150] sm:$0x8]  ;;  %v323_v33 = vrot.slane %v106_v11, 7  ;;  %vm7092_vm12 = vcmask 1043456  }
  0x69   :  { %3021 = vrot.lane.b32.xlu1 %v8388_v43, %s9152_s7  ;;  %v7804_v43 = vld [vmem:[%s16999_s0 + $0x60] sm:$0x8]  ;;  %v8576_v28 = vcombine.low %v2428_v45, %v2431_v18  ;;  %v8165_v36 = vrot.slane %v8110_v5, 11  ;;  %v8485_v41 = vcombine.low %v1598_v8, %v1601_v29  ;;  %v503_v49 = vld [vmem:[%s16999_s0 + $0xa8] sm:$0xf]  ;;  %v8421_v53 = vcombine.low %v10231_v16, %v10236_v12 }
  0x6a   :  { %v7868_v58 = vrot.slane %v7804_v43, 11  ;;  %v504_v43 = vld [vmem:[%s16999_s0 + $0xac] sm:$0x3]  ;;  %v9029_v18 = vld [vmem:[%s17000_s1 + $0xf4] ss:$8 sps:$4 sm:$0xff]   ;;  %vm7093_vm13 = vcmask 261124  }
  0x6b   :  { %3469 = vrot.lane.b32.xlu0 %v8484_v0, %s9154_s6  ;;  %v736_v0 = vsel %vm9210_vm3, %v734_v35, %v735_v63  ;;  %v10249_v63 = vsel %vm9240_vm5, %v9508_v14, %v1121_v60  ;;  %v9025_v14 = vld [vmem:[%s17000_s1 + $0xe4] ss:$8 sps:$4 sm:$0xff]   ;;  %v7931_v60 = vld [vmem:[%s16999_s0 + $0x108] sm:$0xf]  ;;  %v742_v8 = vrot.slane %v504_v43, 6  ;;  %vm7607_vm14 = vcmask 519424   ;;  %vm15776_vm15 = vmor %vm7093_vm13, %vm7092_vm12 }
  0x6c   :  { %v10244_v19 = vsel %vm9240_vm5, %v7868_v58, %v1118_v39  ;;  %v7224_v31 = vunpack.c.l.bf16 %v10249_v63  ;;  %v8111_v39 = vld [vmem:[%s16999_s0 + $0x158] sm:$0x7]  ;;  %v8389_v34 = vcombine.low %v733_v54, %v736_v0  ;;  %4820 = vmatprep.subr.bf16.mxu0 %v9025_v14  ;;  %v7930_v58 = vld [vmem:[%s16999_s0 + $0x104] sm:$0xc]  ;;  %v739_v0 = vrot.slane %v503_v49, 6 }
  0x6d   :  { %3213 = vrot.lane.b32.xlu1 %v8420_v17, %s9153_s20  ;;  %v320_v17 = vrot.slane %v42_v62, 7  ;;  %v7223_v30 = vunpack.c.l.bf16 %v10244_v19  ;;  %8644 = vmatmul.mubr.msk.bf16.gmra.mrb[16].mxu1 %vm3965_vm6, %v8576_v28  ;;  %v2049_v50 = vrot.slane %v8111_v39, 7  ;;  %v10307_v62 = vld [vmem:[%s16999_s0] sm:$0xf]  ;;  %v7932_v9 = vld [vmem:[%s16999_s0 + $0x10c] sm:$0x3]  ;;  %v2047_v28 = vsel %vm9240_vm5, %v8165_v36, %v2046_v20 }
  0x6e   :  { %v7288_v25 = vsel %vm3965_vm6, %v7224_v31, 0.0  ;;  %4821 = vmatpush1.bf16.msra.mxu0 %v9027_v37  ;;  %5227 = vmatprep.mubr.bf16.mxu1 %v17012_v51  ;;  %v8006_v11 = vrot.slane %v7930_v58, 10  ;;  %v1604_v16 = vrot.slane %v7931_v60, 6  ;;  %v1607_v12 = vrot.slane %v7932_v9, 6  ;;  %v9032_v5 = vld [vmem:[%s17000_s1 + $0xf0] ss:$8 sps:$4 sm:$0xff]  }
  0x6f   :  { %3661 = vrot.lane.b32.xlu0 %v8516_v1, %s9152_s7  ;;  %v2048_v1 = vrot.slane %v2046_v20, 4  ;;  %v322_v35 = vrot.slane %v320_v17, 4  ;;  %v7287_v40 = vsel %vm3965_vm6, %v7223_v30, 0.0  ;;  %v10292_v45 = vsel %vm9240_vm5, %v7686_v21, %v320_v17  ;;  %v10320_v21 = vld [vmem:[%s16999_s0 + $0x10] sm:$0xf]  ;;  %4822 = vmatprep.subr.bf16.mxu0 %v9029_v18 }
  0x70   :  { %v10274_v4 = vadd.f32 %v7288_v25, %v7287_v40  ;;  %v741_v31 = vrot.slane %v739_v0, 4  ;;  %v8203_v39 = vld [vmem:[%s16999_s0 + $0x114] sm:$0xc]  ;;  %v8444_v14 = vcombine.low %v10244_v19, %v10249_v63  ;;  %v8204_v20 = vld [vmem:[%s16999_s0 + $0x118] sm:$0xf]  ;;  %v1605_v49 = vsel %vm9210_vm3, %v8006_v11, %v1604_v16 }
  0x71   :  { %2863 = vrot.lane.b32.xlu1 %v8357_v42, %s9154_s6  ;;  %v502_v42 = vld [vmem:[%s16999_s0 + $0xa4] sm:$0xc]  ;;  %v324_v56 = vsel %vm9240_vm5, %v322_v35, %v323_v33  ;;  %v2050_v30 = vsel %vm9240_vm5, %v2048_v1, %v2049_v50  ;;  %v8205_v1 = vld [vmem:[%s16999_s0 + $0x11c] sm:$0x3]  ;;  %v8289_v35 = vrot.slane %v8203_v39, 10  ;;  %v2434_v63 = vrot.slane %v8204_v20, 6 }
  0x72   :  { %v7718_v54 = vrot.slane %v502_v42, 10  ;;  %v743_v19 = vsel %vm9210_vm3, %v741_v31, %v742_v8  ;;  %4823 = vmatpush1.bf16.msra.mxu0 %v9032_v5  ;;  %v2437_v37 = vrot.slane %v8205_v1, 6  ;;  %v10353_v40 = vld [vmem:[%s16999_s0 + $0x100] sm:$0xf]  ;;  %v10358_v25 = vld [vmem:[%s16999_s0 + $0x104] sm:$0xf]  ;;  %v8549_v50 = vcombine.low %v2047_v28, %v2050_v30 }
  0x73   :  { %3821 = vrot.lane.b32.xlu0 %v8548_v48, %s9153_s20  ;;  %v8046_v48 = vld [vmem:[%s16999_s0 + $0x150] sm:$0xf]  ;;  %v2435_v58 = vsel %vm9210_vm3, %v8289_v35, %v2434_v63  ;;  %v2436_v60 = vrot.slane %v2434_v63, 4  ;;  %v8422_v9 = vcombine.low %v10353_v40, %v10358_v25  ;;  %v108_v5 = vld [vmem:[%s16999_s0 + $0xb8] sm:$0x7] }
  0x74   :  { %v8517_v29 = vcombine.low %v8046_v48, %v10179_v52  ;;  %v8358_v52 = vcombine.low %v10292_v45, %v324_v56  ;;  %v740_v33 = vsel %vm9210_vm3, %v7718_v54, %v739_v0  ;;  %v10378_v48 = vld [vmem:[%s16999_s0 + $0x164] sm:$0xf]  ;;  %v10384_v45 = vld [vmem:[%s16999_s0 + $0x14] sm:$0xf]  ;;  %v7806_v54 = vld [vmem:[%s16999_s0 + $0x70] sm:$0x8] }
  0x75   :  { %3023 = vrot.lane.b32.xlu1 %v8389_v34, %s9152_s7  ;;  %v1606_v34 = vrot.slane %v1604_v16, 4  ;;  %v8317_v56 = vcombine.low %v10320_v21, %v10384_v45  ;;  %v7807_v0 = vld [vmem:[%s16999_s0 + $0x78] sm:$0x7]  ;;  %v8390_v8 = vcombine.low %v740_v33, %v743_v19  ;;  %v7869_v11 = vrot.slane %v7806_v54, 11  ;;  %v107_v31 = vld [vmem:[%s16999_s0 + $0xb0] sm:$0x8] }
  0x76   :  { %v10312_v17 = vpop.permute.xlu1 %3645  ;;  %v1128_v16 = vrot.slane %v7807_v0, 7  ;;  %v2438_v28 = vsel %vm9210_vm3, %v2436_v60, %v2437_v37  ;;  %v8112_v35 = vld [vmem:[%s16999_s0 + $0x160] sm:$0x8]  ;;  %v8206_v13 = vld [vmem:[%s16999_s0 + $0x124] sm:$0xc]  ;;  %v7687_v37 = vrot.slane %v107_v31, 11 }
  0x77   :  { %3471 = vrot.lane.b32.xlu0 %v8485_v41, %s9154_s6  ;;  %v9114_v41 = vld [vmem:[%s16999_s0 + $0x4] sm:$0xf]  ;;  %v1608_v43 = vsel %vm9210_vm3, %v1606_v34, %v1607_v12  ;;  %v44_v12 = vld [vmem:[%s16999_s0 + $0xb4] sm:$0xf]  ;;  %v8577_v20 = vcombine.low %v2435_v58, %v2438_v28  ;;  %v330_v25 = vrot.slane %v108_v5, 7 }
  0x78   :  { %v8316_v42 = vcombine.low %v10307_v62, %v9114_v41  ;;  %v2053_v62 = vrot.slane %v10378_v48, 7  ;;  %v327_v39 = vrot.slane %v44_v12, 7  ;;  %v10423_v1 = vsel %vm9240_vm5, %v9512_v15, %v1128_v16  ;;  %v507_v31 = vld [vmem:[%s16999_s0 + $0xbc] sm:$0x3]  ;;  %v7934_v5 = vld [vmem:[%s16999_s0 + $0x118] sm:$0xf] }
  0x79   :  { %3215 = vrot.lane.b32.xlu1 %v8421_v53, %s9153_s20  ;;  %v10373_v53 = vld [vmem:[%s16999_s0 + $0x160] sm:$0xf]  ;;  %v7226_v63 = vunpack.c.l.bf16 %v10423_v1  ;;  %8645 = vmatmul.mubr.msk.bf16.gmra.mrb[20].mxu1 %vm3965_vm6, %v8577_v20  ;;  %v8166_v41 = vrot.slane %v8112_v35, 11  ;;  %v9145_v24 = vld [vmem:[%s16999_s0 + $0x234] sm:$0xf] }
  0x7a   :  { %v10360_v36 = vpop.permute.xlu1 %3197  ;;  %v8518_v30 = vcombine.low %v10373_v53, %v10378_v48  ;;  %v2055_v33 = vrot.slane %v2053_v62, 4  ;;  %v329_v40 = vrot.slane %v327_v39, 4  ;;  %5237 = vmatprep.mubr.bf16.mxu1 %v17012_v51  ;;  %v8290_v48 = vrot.slane %v8206_v13, 10 }
  0x7b   :  { %3663 = vrot.lane.b32.xlu0 %v8517_v29, %s9152_s7  ;;  %v8486_v29 = vcombine.low %v1605_v49, %v1608_v43  ;;  %v7292_v43 = vsel %vm3965_vm6, %v7226_v63, 0.0  ;;  %v328_v54 = vsel %vm9240_vm5, %v7687_v37, %v327_v39 }
  0x7c   :  { %v331_v0 = vsel %vm9240_vm5, %v329_v40, %v330_v25 }
  0x7d   :  { %v3454_v18 = vpop.permute.xlu0 %3453  ;;  %2865 = vrot.lane.b32.xlu1 %v8358_v52, %s9154_s6  ;;  %v10418_v52 = vsel %vm9240_vm5, %v7869_v11, %v1125_v46  ;;  %v505_v11 = vld [vmem:[%s16999_s0 + $0xb4] sm:$0xc] }
  0x7e   :  { %v4226_v34 = vsel %vm3965_vm6, %v8444_v14, %v3454_v18  ;;  %v8113_v14 = vld [vmem:[%s16999_s0 + $0x168] sm:$0x7]  ;;  %v7225_v19 = vunpack.c.l.bf16 %v10418_v52  ;;  %v8445_v12 = vcombine.low %v10418_v52, %v10423_v1  ;;  %v2054_v18 = vsel %vm9240_vm5, %v8166_v41, %v2053_v62 }
  0x7f   :  { %3823 = vrot.lane.b32.xlu0 %v8549_v50, %s9153_s20  ;;  %v3006_v46 = vpop.permute.xlu1 %3005  ;;  %v4321_v15 = vsel %vm4062_vm7, %v4226_v34, %v10312_v17  ;;  %v2056_v53 = vrot.slane %v8113_v14, 7  ;;  %v8207_v17 = vld [vmem:[%s16999_s0 + $0x128] sm:$0xf]  ;;  %v8359_v62 = vcombine.low %v328_v54, %v331_v0  ;;  %v7719_v14 = vrot.slane %v505_v11, 10  ;;  %v8210_v54 = vld [vmem:[%s16999_s0 + $0x138] sm:$0xf] }
  0x80   :  { %v7290_v50 = vsel %vm3965_vm6, %v7225_v19, 0.0  ;;  %v2441_v1 = vrot.slane %v8207_v17, 6  ;;  %v749_v19 = vrot.slane %v507_v31, 6  ;;  %v7763_v17 = vld [vmem:[%s16999_s0 + $0x114] sm:$0xf] }
  0x81   :  { %v2846_v49 = vpop.permute.xlu0 %2845  ;;  %3025 = vrot.lane.b32.xlu1 %v8390_v8, %s9152_s7  ;;  %v7291_v60 = vadd.f32 %v7290_v50, %v10274_v4  ;;  %v8208_v8 = vld [vmem:[%s16999_s0 + $0x12c] sm:$0x3]  ;;  %v2057_v28 = vsel %vm9240_vm5, %v2055_v33, %v2056_v53 }
  0x82   :  { %v3968_v58 = vsel %vm3965_vm6, %v8316_v42, %v2846_v49  ;;  %v506_v42 = vld [vmem:[%s16999_s0 + $0xb8] sm:$0xf]  ;;  %v8550_v20 = vcombine.low %v2054_v18, %v2057_v28  ;;  %v2444_v35 = vrot.slane %v8208_v8, 6  ;;  %v2443_v40 = vrot.slane %v2441_v1, 4  ;;  %v10496_v49 = vld [vmem:[%s16999_s0 + $0x20] sm:$0xf] }
  0x83   :  { %3473 = vrot.lane.b32.xlu0 %v8486_v29, %s9154_s6  ;;  %v2848_v4 = vpop.permute.xlu1 %2847  ;;  %v4064_v16 = vsel %vm4062_vm7, %v3968_v58, %v3006_v46  ;;  %v7933_v29 = vld [vmem:[%s16999_s0 + $0x114] sm:$0xc]  ;;  %v10481_v34 = vadd.f32 %v7292_v43, %v7291_v60  ;;  %v746_v13 = vrot.slane %v506_v42, 6  ;;  %v7935_v46 = vld [vmem:[%s16999_s0 + $0x11c] sm:$0x3] }
  0x84   :  { %v4129_v39 = vsel %vm4127_vm8, %v4064_v16, %v10360_v36  ;;  %v8007_v63 = vrot.slane %v7933_v29, 10  ;;  %v1611_v36 = vrot.slane %v7934_v5, 6  ;;  %v1614_v53 = vrot.slane %v7935_v46, 6  ;;  %v8209_v60 = vld [vmem:[%s16999_s0 + $0x134] sm:$0xc] }
  0x85   :  { %v3806_v52 = vpop.permute.xlu0 %3805  ;;  %3217 = vrot.lane.b32.xlu1 %v8422_v9, %s9153_s20  ;;  %v2442_v9 = vsel %vm9210_vm3, %v8290_v48, %v2441_v1  ;;  %v747_v25 = vsel %vm9210_vm3, %v7719_v14, %v746_v13  ;;  %v748_v41 = vrot.slane %v746_v13, 4  ;;  %v10513_v48 = vld [vmem:[%s16999_s0 + $0x174] sm:$0xf]  ;;  %v2445_v21 = vsel %vm9210_vm3, %v2443_v40, %v2444_v35  ;;  %v8211_v42 = vld [vmem:[%s16999_s0 + $0x13c] sm:$0x3] }
  0x86   :  { %v4385_v33 = vsel %vm4127_vm8, %v4321_v15, %v3806_v52  ;;  %v7762_v15 = vld [vmem:[%s16999_s0 + $0x110] sm:$0xf]  ;;  %v1612_v50 = vsel %vm9210_vm3, %v8007_v63, %v1611_v36  ;;  %v1613_v43 = vrot.slane %v1611_v36, 4  ;;  %v8578_v0 = vcombine.low %v2442_v9, %v2445_v21  ;;  %v7809_v16 = vld [vmem:[%s16999_s0 + $0x88] sm:$0x7] }
  0x87   :  { %3665 = vrot.lane.b32.xlu0 %v8518_v30, %s9152_s7  ;;  %4824 = vmatprep.mubr.bf16.mxu0 %v4385_v33  ;;  %v3008_v37 = vpop.permute.xlu1 %3007  ;;  %v3971_v30 = vsel %vm3965_vm6, %v8317_v56, %v2848_v4  ;;  %v750_v45 = vsel %vm9210_vm3, %v748_v41, %v749_v19  ;;  %v8050_v56 = vld [vmem:[%s16999_s0 + $0x170] sm:$0xf]  ;;  %v7808_v4 = vld [vmem:[%s16999_s0 + $0x80] sm:$0x8]  ;;  %v9116_v29 = vld [vmem:[%s16999_s0 + $0x24] sm:$0xf]  ;;  %v8423_v1 = vcombine.low %v7762_v15, %v7763_v17 }
  0x88   :  { %4825 = vmatmul.mubr.bf16.vlgmr.msra.gmra.mrb[0].mxu0 %v4129_v39  ;;  %v8391_v8 = vcombine.low %v747_v25, %v750_v45  ;;  %v1615_v11 = vsel %vm9210_vm3, %v1613_v43, %v1614_v53  ;;  %v4066_v18 = vsel %vm4062_vm7, %v3971_v30, %v3008_v37  ;;  %v8318_v5 = vcombine.low %v10496_v49, %v9116_v29  ;;  %v46_v14 = vld [vmem:[%s16999_s0 + $0xc4] sm:$0xf]  ;;  %v110_v13 = vld [vmem:[%s16999_s0 + $0xc8] sm:$0x7]  ;;  %v8114_v25 = vld [vmem:[%s16999_s0 + $0x170] sm:$0x8] }
  0x89   :  { %v3456_v58 = vpop.permute.xlu0 %3455  ;;  %2867 = vrot.lane.b32.xlu1 %v8359_v62, %s9154_s6  ;;  %v8487_v31 = vcombine.low %v1612_v50, %v1615_v11  ;;  %v2060_v39 = vrot.slane %v10513_v48, 7  ;;  %v109_v62 = vld [vmem:[%s16999_s0 + $0xc0] sm:$0x8]  ;;  %8646 = vmatmul.mubr.msk.bf16.gmra.mrb[24].mxu1 %vm3965_vm6, %v8578_v0  ;;  %v2448_v35 = vrot.slane %v8210_v54, 6  ;;  %v8519_v33 = vcombine.low %v8050_v56, %v10513_v48  ;;  %v8115_v43 = vld [vmem:[%s16999_s0 + $0x178] sm:$0x7] }
  0x8a   :  { %v4229_v52 = vsel %vm3965_vm6, %v8445_v12, %v3456_v58  ;;  %5247 = vmatprep.mubr.bf16.mxu1 %v17012_v51  ;;  %v2451_v12 = vrot.slane %v8211_v42, 6  ;;  %v7870_v19 = vrot.slane %v7808_v4, 11  ;;  %v1135_v63 = vrot.slane %v7809_v16, 7  ;;  %v510_v54 = vld [vmem:[%s16999_s0 + $0xcc] sm:$0x3] }
  0x8b   :  { %3825 = vrot.lane.b32.xlu0 %v8550_v20, %s9153_s20  ;;  %v3200_v28 = vpop.permute.xlu1 %3199  ;;  %v8291_v20 = vrot.slane %v8209_v60, 10  ;;  %v2450_v9 = vrot.slane %v2448_v35, 4  ;;  %v7688_v40 = vrot.slane %v109_v62, 11  ;;  %v2062_v49 = vrot.slane %v2060_v39, 4  ;;  %v7936_v4 = vld [vmem:[%s16999_s0 + $0x124] sm:$0xc] }
  0x8c   :  { %v4132_v36 = vsel %vm4127_vm8, %v4066_v18, %v3200_v28  ;;  %v10572_v15 = vsel %vm9240_vm5, %v7870_v19, %v1132_v47  ;;  %v334_v30 = vrot.slane %v46_v14, 7  ;;  %v337_v50 = vrot.slane %v110_v13, 7  ;;  %v508_v47 = vld [vmem:[%s16999_s0 + $0xc4] sm:$0xc]  ;;  %v7937_v62 = vld [vmem:[%s16999_s0 + $0x128] sm:$0xf] }
  0x8d   :  { %v3648_v46 = vpop.permute.xlu0 %3647  ;;  %3027 = vrot.lane.b32.xlu1 %v8391_v8, %s9152_s7  ;;  %v2449_v37 = vsel %vm9210_vm3, %v8291_v20, %v2448_v35  ;;  %v2452_v17 = vsel %vm9210_vm3, %v2450_v9, %v2451_v12  ;;  %v10583_v48 = vsel %vm9240_vm5, %v9533_v26, %v1135_v63  ;;  %v7227_v6 = vunpack.c.l.bf16 %v10572_v15  ;;  %v509_v26 = vld [vmem:[%s16999_s0 + $0xc8] sm:$0xf]  ;;  %v7938_v35 = vld [vmem:[%s16999_s0 + $0x12c] sm:$0x3]  ;;  %v8212_v14 = vld [vmem:[%s16999_s0 + $0x144] sm:$0xc] }
  0x8e   :  { %v4323_v53 = vsel %vm4062_vm7, %v4229_v52, %v3648_v46  ;;  %v8579_v21 = vcombine.low %v2449_v37, %v2452_v17  ;;  %v7228_v45 = vunpack.c.l.bf16 %v10583_v48  ;;  %v335_v56 = vsel %vm9240_vm5, %v7688_v40, %v334_v30  ;;  %v8214_v19 = vld [vmem:[%s16999_s0 + $0x14c] sm:$0x3]  ;;  %v27_v40 = vld [vmem:[%s16999_s0 + $0x30] sm:$0xf] }
  0x8f   :  { %3475 = vrot.lane.b32.xlu0 %v8487_v31, %s9154_s6  ;;  %v2850_v41 = vpop.permute.xlu1 %2849  ;;  %v336_v60 = vrot.slane %v334_v30, 4  ;;  %v7294_v8 = vsel %vm3965_vm6, %v7227_v6, 0.0  ;;  %v8167_v11 = vrot.slane %v8114_v25, 11  ;;  %v2063_v42 = vrot.slane %v8115_v43, 7  ;;  %v10654_v6 = vld [vmem:[%s16999_s0 + $0x184] sm:$0xf] }
  0x90   :  { %v7295_v18 = vadd.f32 %v7294_v8, %v10481_v34  ;;  %v7296_v28 = vsel %vm3965_vm6, %v7228_v45, 0.0  ;;  %v7720_v29 = vrot.slane %v508_v47, 10  ;;  %v3974_v52 = vsel %vm3965_vm6, %v8318_v5, %v2850_v41 }
  0x91   :  { %v3808_v58 = vpop.permute.xlu0 %3807  ;;  %3219 = vrot.lane.b32.xlu1 %v8423_v1, %s9153_s20  ;;  %v338_v31 = vsel %vm9240_vm5, %v336_v60, %v337_v50  ;;  %8647 = vmatmul.mubr.msk.bf16.gmra.mrb[28].mxu1 %vm3965_vm6, %v8579_v21  ;;  %v2061_v20 = vsel %vm9240_vm5, %v8167_v11, %v2060_v39  ;;  %v753_v34 = vrot.slane %v509_v26, 6  ;;  %v2064_v5 = vsel %vm9240_vm5, %v2062_v49, %v2063_v42  ;;  %v8213_v39 = vld [vmem:[%s16999_s0 + $0x148] sm:$0xf]  ;;  %v8052_v60 = vld [vmem:[%s16999_s0 + $0x180] sm:$0xf] }
  0x92   :  { %v4388_v0 = vsel %vm4127_vm8, %v4323_v53, %v3808_v58  ;;  %v8360_v1 = vcombine.low %v335_v56, %v338_v31  ;;  %v10622_v13 = vadd.f32 %v7296_v28, %v7295_v18  ;;  %v8008_v12 = vrot.slane %v7936_v4, 10  ;;  %5257 = vmatprep.mubr.bf16.mxu1 %v17012_v51  ;;  %v7810_v26 = vld [vmem:[%s16999_s0 + $0x90] sm:$0x8]  ;;  %v7811_v4 = vld [vmem:[%s16999_s0 + $0x98] sm:$0x7] }
  0x93   :  { %3667 = vrot.lane.b32.xlu0 %v8519_v33, %s9152_s7  ;;  %4834 = vmatprep.mubr.bf16.mxu0 %v4388_v0  ;;  %v3010_v16 = vpop.permute.xlu1 %3009  ;;  %v756_v33 = vrot.slane %v510_v54, 6  ;;  %v8446_v63 = vcombine.low %v10572_v15, %v10583_v48  ;;  %v754_v37 = vsel %vm9210_vm3, %v7720_v29, %v753_v34  ;;  %v755_v9 = vrot.slane %v753_v34, 4  ;;  %v7764_v15 = vld [vmem:[%s16999_s0 + $0x120] sm:$0xf]  ;;  %v7765_v48 = vld [vmem:[%s16999_s0 + $0x124] sm:$0xf] }
  0x94   :  { %4835 = vmatmul.mubr.bf16.gmra.mrb[4].mxu0 %v4132_v36  ;;  %v8551_v36 = vcombine.low %v2061_v20, %v2064_v5  ;;  %v1167_v25 = vrot.slane %v9975_v57, 7  ;;  %v1618_v49 = vrot.slane %v7937_v62, 6  ;;  %v1621_v30 = vrot.slane %v7938_v35, 6  ;;  %v9117_v0 = vld [vmem:[%s16999_s0 + $0x34] sm:$0xf] }
  0x95   :  { %v3458_v46 = vpop.permute.xlu0 %3457  ;;  %2869 = vrot.lane.b32.xlu1 %v8360_v1, %s9154_s6  ;;  %v8292_v50 = vrot.slane %v8212_v14, 10  ;;  %v757_v43 = vsel %vm9210_vm3, %v755_v9, %v756_v33  ;;  %v2455_v53 = vrot.slane %v8213_v39, 6  ;;  %v2458_v17 = vrot.slane %v8214_v19, 6  ;;  %v112_v1 = vld [vmem:[%s16999_s0 + $0xd8] sm:$0x7]  ;;  %v9064_v33 = vld [vmem:[%s17001_s2 + $0x8] sm:$0xff]  }
  0x96   :  { %v4068_v47 = vsel %vm4062_vm7, %v3974_v52, %v3010_v16  ;;  %v8392_v21 = vcombine.low %v754_v37, %v757_v43  ;;  %v1619_v45 = vsel %vm9210_vm3, %v8008_v12, %v1618_v49  ;;  %v1620_v56 = vrot.slane %v1618_v49, 4  ;;  %v111_v16 = vld [vmem:[%s16999_s0 + $0xd0] sm:$0x8]  ;;  %v48_v52 = vld [vmem:[%s16999_s0 + $0xd4] sm:$0xf]  ;;  %8816 = vmatpush3.bf16.msra.mxu1 %v9064_v33 }
  0x97   :  { %v3202_v41 = vpop.permute.xlu1 %3201  ;;  %3827 = vrot.lane.b32.xlu0 %v8551_v36, %s9153_s20  ;;  %v4232_v54 = vsel %vm3965_vm6, %v8446_v63, %v3458_v46  ;;  %v8319_v8 = vcombine.low %v27_v40, %v9117_v0  ;;  %v2456_v11 = vsel %vm9210_vm3, %v8292_v50, %v2455_v53  ;;  %v2457_v42 = vrot.slane %v2455_v53, 4  ;;  %v8116_v46 = vld [vmem:[%s16999_s0 + $0x180] sm:$0x8]  ;;  %v8117_v5 = vld [vmem:[%s16999_s0 + $0x188] sm:$0x7] }
  0x98   :  { %v1622_v28 = vsel %vm9210_vm3, %v1620_v56, %v1621_v30  ;;  %v8424_v29 = vcombine.low %v7764_v15, %v7765_v48  ;;  %v2067_v62 = vrot.slane %v10654_v6, 7  ;;  %v8520_v35 = vcombine.low %v8052_v60, %v10654_v6  ;;  %v8215_v6 = vld [vmem:[%s16999_s0 + $0x154] sm:$0xc] }
  0x99   :  { %v3650_v58 = vpop.permute.xlu0 %3649  ;;  %3029 = vrot.lane.b32.xlu1 %v8392_v21, %s9152_s7  ;;  %v8488_v20 = vcombine.low %v1619_v45, %v1622_v28  ;;  %v2459_v34 = vsel %vm9210_vm3, %v2457_v42, %v2458_v17  ;;  %v7871_v14 = vrot.slane %v7810_v26, 11  ;;  %v1142_v63 = vrot.slane %v7811_v4, 7  ;;  %v511_v60 = vld [vmem:[%s16999_s0 + $0xd4] sm:$0xc]  ;;  %v512_v26 = vld [vmem:[%s16999_s0 + $0xd8] sm:$0xf] }
  0x9a   :  { %v4325_v18 = vsel %vm4062_vm7, %v4232_v54, %v3650_v58  ;;  %v8580_v12 = vcombine.low %v2456_v11, %v2459_v34  ;;  %v2069_v19 = vrot.slane %v2067_v62, 4  ;;  %v7689_v36 = vrot.slane %v111_v16, 11  ;;  %v8217_v58 = vld [vmem:[%s16999_s0 + $0x15c] sm:$0x3]  ;;  %v7939_v4 = vld [vmem:[%s16999_s0 + $0x134] sm:$0xc] }
  0x9b   :  { %v2852_v31 = vpop.permute.xlu1 %2851  ;;  %3477 = vrot.lane.b32.xlu0 %v8488_v20, %s9154_s6  ;;  %v1140_v9 = vsel %vm9240_vm5, %v7871_v14, %v1139_v2  ;;  %v341_v40 = vrot.slane %v48_v52, 7  ;;  %v344_v49 = vrot.slane %v112_v1, 7  ;;  %v1143_v50 = vsel %vm9240_vm5, %v9538_v27, %v1142_v63  ;;  %v8216_v27 = vld [vmem:[%s16999_s0 + $0x158] sm:$0xf]  ;;  %v513_v42 = vld [vmem:[%s16999_s0 + $0xdc] sm:$0x3] }
  0x9c   :  { %8648 = vmatmul.mubr.msk.bf16.gmra.mrb[32].mxu1 %vm3965_vm6, %v8580_v12  ;;  %v7229_v15 = vunpack.c.l.bf16 %v1140_v9  ;;  %v8168_v43 = vrot.slane %v8116_v46, 11  ;;  %v2070_v53 = vrot.slane %v8117_v5, 7  ;;  %v3977_v61 = vsel %vm3965_vm6, %v8319_v8, %v2852_v31  ;;  %v7941_v34 = vld [vmem:[%s16999_s0 + $0x13c] sm:$0x3]  ;;  %v10760_v12 = vld [vmem:[%s16999_s0 + $0x40] sm:$0xf] }
  0x9d   :  { %v3810_v39 = vpop.permute.xlu0 %3809  ;;  %3221 = vrot.lane.b32.xlu1 %v8424_v29, %s9153_s20  ;;  %v4135_v2 = vsel %vm4127_vm8, %v4068_v47, %v3202_v41  ;;  %v7230_v17 = vunpack.c.l.bf16 %v1143_v50  ;;  %v342_v48 = vsel %vm9240_vm5, %v7689_v36, %v341_v40  ;;  %5267 = vmatprep.mubr.bf16.mxu1 %v17012_v51  ;;  %v343_v21 = vrot.slane %v341_v40, 4  ;;  %v7766_v36 = vld [vmem:[%s16999_s0 + $0x130] sm:$0xf] }
  0x9e   :  { %v4391_v37 = vsel %vm4127_vm8, %v4325_v18, %v3810_v39  ;;  %v7298_v41 = vsel %vm3965_vm6, %v7229_v15, 0.0  ;;  %v2068_v45 = vsel %vm9240_vm5, %v8168_v43, %v2067_v62  ;;  %v2071_v56 = vsel %vm9240_vm5, %v2069_v19, %v2070_v53  ;;  %v8054_v43 = vld [vmem:[%s16999_s0 + $0x190] sm:$0xf]  ;;  %v10784_v53 = vld [vmem:[%s16999_s0 + $0x194] sm:$0xf] }
  0x9f   :  { %v3012_v30 = vpop.permute.xlu1 %3011  ;;  %4844 = vmatprep.mubr.bf16.mxu0 %v4391_v37  ;;  %3669 = vrot.lane.b32.xlu0 %v8520_v35, %s9152_s7  ;;  %v8447_v54 = vcombine.low %v1140_v9, %v1143_v50  ;;  %v7299_v0 = vadd.f32 %v7298_v41, %v10622_v13  ;;  %v7300_v8 = vsel %vm3965_vm6, %v7230_v17, 0.0  ;;  %v8552_v11 = vcombine.low %v2068_v45, %v2071_v56  ;;  %v7940_v13 = vld [vmem:[%s16999_s0 + $0x138] sm:$0xf]  ;;  %v7767_v37 = vld [vmem:[%s16999_s0 + $0x134] sm:$0xf] }
  0xa0   :  { %4845 = vmatmul.mubr.bf16.gmra.mrb[8].mxu0 %v4135_v2  ;;  %v345_v16 = vsel %vm9240_vm5, %v343_v21, %v344_v49  ;;  %v8293_v28 = vrot.slane %v8215_v6, 10  ;;  %v2462_v31 = vrot.slane %v8216_v27, 6  ;;  %v2465_v29 = vrot.slane %v8217_v58, 6  ;;  %v8219_v6 = vld [vmem:[%s16999_s0 + $0x168] sm:$0xf] }
  0xa1   :  { %v3460_v47 = vpop.permute.xlu0 %3459  ;;  %v10750_v62 = vadd.f32 %v7300_v8, %v7299_v0  ;;  %v8361_v52 = vcombine.low %v342_v48, %v345_v16  ;;  %v7721_v1 = vrot.slane %v511_v60, 10  ;;  %v760_v20 = vrot.slane %v512_v26, 6  ;;  %v8218_v48 = vld [vmem:[%s16999_s0 + $0x164] sm:$0xc]  ;;  %v8220_v45 = vld [vmem:[%s16999_s0 + $0x16c] sm:$0x3] }
  0xa2   :  { %v2463_v35 = vsel %vm9210_vm3, %v8293_v28, %v2462_v31  ;;  %v2464_v14 = vrot.slane %v2462_v31, 4  ;;  %v763_v5 = vrot.slane %v513_v42, 6  ;;  %v8009_v33 = vrot.slane %v7939_v4, 10  ;;  %v9118_v41 = vld [vmem:[%s16999_s0 + $0x44] sm:$0xf] }
  0xa3   :  { %v3204_v18 = vpop.permute.xlu1 %3203  ;;  %2871 = vrot.lane.b32.xlu1 %v8361_v52, %s9154_s6  ;;  %3829 = vrot.lane.b32.xlu0 %v8552_v11, %s9153_s20  ;;  %v761_v39 = vsel %vm9210_vm3, %v7721_v1, %v760_v20  ;;  %v762_v19 = vrot.slane %v760_v20, 4  ;;  %v1625_v63 = vrot.slane %v7940_v13, 6  ;;  %v4070_v9 = vsel %vm4062_vm7, %v3977_v61, %v3012_v30  ;;  %v7812_v56 = vld [vmem:[%s16999_s0 + $0xa0] sm:$0x8]  ;;  %v7813_v60 = vld [vmem:[%s16999_s0 + $0xa8] sm:$0x7] }
  0xa4   :  { %v4235_v40 = vsel %vm3965_vm6, %v8447_v54, %v3460_v47  ;;  %v2466_v49 = vsel %vm9210_vm3, %v2464_v14, %v2465_v29  ;;  %v1628_v50 = vrot.slane %v7941_v34, 6  ;;  %v8320_v47 = vcombine.low %v10760_v12, %v9118_v41  ;;  %v50_v11 = vld [vmem:[%s16999_s0 + $0xe4] sm:$0xf]  ;;  %v113_v42 = vld [vmem:[%s16999_s0 + $0xe0] sm:$0x8] }
  0xa5   :  { %v3652_v46 = vpop.permute.xlu0 %3651  ;;  %v8581_v2 = vcombine.low %v2463_v35, %v2466_v49  ;;  %v764_v30 = vsel %vm9210_vm3, %v762_v19, %v763_v5  ;;  %v1626_v61 = vsel %vm9210_vm3, %v8009_v33, %v1625_v63  ;;  %v1627_v17 = vrot.slane %v1625_v63, 4  ;;  %v114_v13 = vld [vmem:[%s16999_s0 + $0xe8] sm:$0x7]  ;;  %v8118_v52 = vld [vmem:[%s16999_s0 + $0x190] sm:$0x8] }
  0xa6   :  { %v4327_v27 = vsel %vm4062_vm7, %v4235_v40, %v3652_v46  ;;  %v8393_v58 = vcombine.low %v761_v39, %v764_v30  ;;  %v8425_v54 = vcombine.low %v7766_v36, %v7767_v37  ;;  %v2074_v0 = vrot.slane %v10784_v53, 7 }
  0xa7   :  { %v10776_v15 = vpop.permute.xlu1 %2853  ;;  %8649 = vmatmul.mubr.msk.bf16.gmra.mrb[36].mxu1 %vm3965_vm6, %v8581_v2  ;;  %v1629_v26 = vsel %vm9210_vm3, %v1627_v17, %v1628_v50  ;;  %v4138_v28 = vsel %vm4127_vm8, %v4070_v9, %v3204_v18  ;;  %v8294_v31 = vrot.slane %v8218_v48, 10  ;;  %v2469_v29 = vrot.slane %v8219_v6, 6  ;;  %v8119_v18 = vld [vmem:[%s16999_s0 + $0x198] sm:$0x7]  ;;  %v515_v2 = vld [vmem:[%s16999_s0 + $0xe8] sm:$0xf] }
  0xa8   :  { %3031 = vrot.lane.b32.xlu1 %v8393_v58, %s9152_s7  ;;  %v8489_v4 = vcombine.low %v1626_v61, %v1629_v26  ;;  %v2076_v1 = vrot.slane %v2074_v0, 4  ;;  %v8521_v20 = vcombine.low %v8054_v43, %v10784_v53  ;;  %5277 = vmatprep.mubr.bf16.mxu1 %v17012_v51  ;;  %v2472_v34 = vrot.slane %v8220_v45, 6  ;;  %v514_v53 = vld [vmem:[%s16999_s0 + $0xe4] sm:$0xc]  ;;  %v7943_v58 = vld [vmem:[%s16999_s0 + $0x148] sm:$0xf] }
  0xa9   :  { %v3812_v21 = vpop.permute.xlu0 %3811  ;;  %v7872_v35 = vrot.slane %v7812_v56, 11  ;;  %v2470_v14 = vsel %vm9210_vm3, %v8294_v31, %v2469_v29  ;;  %v2471_v46 = vrot.slane %v2469_v29, 4  ;;  %v1149_v5 = vrot.slane %v7813_v60, 7  ;;  %v7944_v60 = vld [vmem:[%s16999_s0 + $0x14c] sm:$0x3] }
  0xaa   :  { %v4394_v8 = vsel %vm4127_vm8, %v4327_v27, %v3812_v21  ;;  %3479 = vrot.lane.b32.xlu0 %v8489_v4, %s9154_s6  ;;  %v7690_v12 = vrot.slane %v113_v42, 11  ;;  %v348_v19 = vrot.slane %v50_v11, 7  ;;  %v351_v63 = vrot.slane %v114_v13, 7  ;;  %v7942_v27 = vld [vmem:[%s16999_s0 + $0x144] sm:$0xc] }
  0xab   :  { %4854 = vmatprep.mubr.bf16.mxu0 %v4394_v8  ;;  %v10822_v16 = vpop.permute.xlu1 %3013  ;;  %v10845_v39 = vsel %vm9240_vm5, %v7872_v35, %v1146_v38  ;;  %v8169_v36 = vrot.slane %v8118_v52, 11  ;;  %v2473_v37 = vsel %vm9210_vm3, %v2471_v46, %v2472_v34  ;;  %v1150_v9 = vsel %vm9240_vm5, %v9798_v32, %v1149_v5  ;;  %v516_v32 = vld [vmem:[%s16999_s0 + $0xec] sm:$0x3]  ;;  %v8221_v26 = vld [vmem:[%s16999_s0 + $0x174] sm:$0xc] }
  0xac   :  { %4855 = vmatmul.mubr.bf16.gmra.mrb[12].mxu0 %v4138_v28  ;;  %3223 = vrot.lane.b32.xlu1 %v8425_v54, %s9153_s20  ;;  %v7231_v40 = vunpack.c.l.bf16 %v10845_v39  ;;  %v2077_v49 = vrot.slane %v8119_v18, 7  ;;  %v8582_v50 = vcombine.low %v2470_v14, %v2473_v37  ;;  %v7232_v38 = vunpack.c.l.bf16 %v1150_v9  ;;  %v8222_v8 = vld [vmem:[%s16999_s0 + $0x178] sm:$0xf]  ;;  %v8223_v11 = vld [vmem:[%s16999_s0 + $0x17c] sm:$0x3] }
  0xad   :  { %v10839_v33 = vpop.permute.xlu0 %3461  ;;  %v349_v43 = vsel %vm9240_vm5, %v7690_v12, %v348_v19  ;;  %v350_v61 = vrot.slane %v348_v19, 4  ;;  %v2075_v17 = vsel %vm9240_vm5, %v8169_v36, %v2074_v0  ;;  %v3980_v41 = vsel %vm3965_vm6, %v8320_v47, %v10776_v15  ;;  %v7768_v34 = vld [vmem:[%s16999_s0 + $0x140] sm:$0xf]  ;;  %v7769_v35 = vld [vmem:[%s16999_s0 + $0x144] sm:$0xf] }
  0xae   :  { %3671 = vrot.lane.b32.xlu0 %v8521_v20, %s9152_s7  ;;  %v7302_v30 = vsel %vm3965_vm6, %v7231_v40, 0.0  ;;  %v2078_v48 = vsel %vm9240_vm5, %v2076_v1, %v2077_v49  ;;  %v7304_v45 = vsel %vm3965_vm6, %v7232_v38, 0.0  ;;  %v8448_v54 = vcombine.low %v10845_v39, %v1150_v9  ;;  %v10921_v12 = vld [vmem:[%s16999_s0 + $0x1a4] sm:$0xf]  ;;  %v8056_v37 = vld [vmem:[%s16999_s0 + $0x1a0] sm:$0xf] }
  0xaf   :  { %v10854_v55 = vpop.permute.xlu1 %3205  ;;  %8650 = vmatmul.mubr.msk.bf16.gmra.mrb[40].mxu1 %vm3965_vm6, %v8582_v50  ;;  %v7303_v21 = vadd.f32 %v7302_v30, %v10750_v62  ;;  %v8553_v56 = vcombine.low %v2075_v17, %v2078_v48  ;;  %v352_v15 = vsel %vm9240_vm5, %v350_v61, %v351_v63  ;;  %v7722_v47 = vrot.slane %v514_v53, 10  ;;  %v7814_v40 = vld [vmem:[%s16999_s0 + $0xb0] sm:$0x8]  ;;  %v52_v53 = vld [vmem:[%s16999_s0 + $0xf4] sm:$0xf] }
  0xb0   :  { %v767_v0 = vrot.slane %v515_v2, 6  ;;  %5287 = vmatprep.mubr.bf16.mxu1 %v17012_v51  ;;  %v8362_v4 = vcombine.low %v349_v43, %v352_v15  ;;  %v770_v28 = vrot.slane %v516_v32, 6  ;;  %v8010_v31 = vrot.slane %v7942_v27, 10  ;;  %v7815_v43 = vld [vmem:[%s16999_s0 + $0xb8] sm:$0x7] }
  0xb1   :  { %v3654_v6 = vpop.permute.xlu0 %3653  ;;  %v10902_v42 = vadd.f32 %v7304_v45, %v7303_v21  ;;  %v1632_v52 = vrot.slane %v7943_v58, 6  ;;  %v1635_v1 = vrot.slane %v7944_v60, 6  ;;  %v10915_v18 = vrot.slane %v1160_v23, 4  ;;  %v115_v17 = vld [vmem:[%s16999_s0 + $0xf0] sm:$0x8] }
  0xb2   :  { %3831 = vrot.lane.b32.xlu0 %v8553_v56, %s9153_s20  ;;  %v768_v29 = vsel %vm9210_vm3, %v7722_v47, %v767_v0  ;;  %v769_v13 = vrot.slane %v767_v0, 4  ;;  %2873 = vrot.lane.b32.xlu1 %v8362_v4, %s9154_s6  ;;  %v8295_v14 = vrot.slane %v8221_v26, 10  ;;  %v2476_v46 = vrot.slane %v8222_v8, 6  ;;  %v116_v48 = vld [vmem:[%s16999_s0 + $0xf8] sm:$0x7] }
  0xb3   :  { %v10894_v62 = vpop.permute.xlu1 %2855  ;;  %v2479_v5 = vrot.slane %v8223_v11, 6  ;;  %v4072_v39 = vsel %vm4062_vm7, %v3980_v41, %v10822_v16  ;;  %v1633_v63 = vsel %vm9210_vm3, %v8010_v31, %v1632_v52  ;;  %v1634_v36 = vrot.slane %v1632_v52, 4  ;;  %v8120_v21 = vld [vmem:[%s16999_s0 + $0x1a0] sm:$0x8]  ;;  %v8121_v45 = vld [vmem:[%s16999_s0 + $0x1a8] sm:$0x7] }
  0xb4   :  { %v771_v19 = vsel %vm9210_vm3, %v769_v13, %v770_v28  ;;  %v4238_v16 = vsel %vm3965_vm6, %v8448_v54, %v10839_v33  ;;  %v2477_v50 = vsel %vm9210_vm3, %v8295_v14, %v2476_v46  ;;  %v2478_v38 = vrot.slane %v2476_v46, 4  ;;  %v8224_v56 = vld [vmem:[%s16999_s0 + $0x184] sm:$0xc]  ;;  %v31_v60 = vld [vmem:[%s16999_s0 + $0x50] sm:$0xf] }
  0xb5   :  { %v3814_v20 = vpop.permute.xlu0 %3813  ;;  %v8394_v49 = vcombine.low %v768_v29, %v771_v19  ;;  %v10949_v2 = vrot.slane %v1167_v25, 4  ;;  %v4329_v32 = vsel %vm4062_vm7, %v4238_v16, %v3654_v6  ;;  %v1636_v33 = vsel %vm9210_vm3, %v1634_v36, %v1635_v1  ;;  %v8225_v31 = vld [vmem:[%s16999_s0 + $0x188] sm:$0xf]  ;;  %v518_v16 = vld [vmem:[%s16999_s0 + $0xf8] sm:$0xf] }
  0xb6   :  { %v2081_v30 = vrot.slane %v10921_v12, 7  ;;  %v8490_v27 = vcombine.low %v1633_v63, %v1636_v33  ;;  %v2480_v6 = vsel %vm9210_vm3, %v2478_v38, %v2479_v5  ;;  %v8426_v58 = vcombine.low %v7768_v34, %v7769_v35  ;;  %v9119_v5 = vld [vmem:[%s16999_s0 + $0x54] sm:$0xf]  ;;  %v7946_v33 = vld [vmem:[%s16999_s0 + $0x158] sm:$0xf] }
  0xb7   :  { %v10932_v9 = vpop.permute.xlu1 %3015  ;;  %3033 = vrot.lane.b32.xlu1 %v8394_v49, %s9152_s7  ;;  %v4397_v41 = vsel %vm4127_vm8, %v4329_v32, %v3814_v20  ;;  %v8583_v26 = vcombine.low %v2477_v50, %v2480_v6  ;;  %v8522_v15 = vcombine.low %v8056_v37, %v10921_v12  ;;  %v4141_v47 = vsel %vm4127_vm8, %v4072_v39, %v10854_v55  ;;  %v8226_v55 = vld [vmem:[%s16999_s0 + $0x18c] sm:$0x3]  ;;  %v519_v49 = vld [vmem:[%s16999_s0 + $0xfc] sm:$0x3]  ;;  %v7945_v32 = vld [vmem:[%s16999_s0 + $0x154] sm:$0xc] }
  0xb8   :  { %v2083_v54 = vrot.slane %v2081_v30, 4  ;;  %4864 = vmatprep.mubr.bf16.mxu0 %v4397_v41  ;;  %3481 = vrot.lane.b32.xlu0 %v8490_v27, %s9154_s6  ;;  %v7873_v8 = vrot.slane %v7814_v40, 11  ;;  %v1156_v11 = vrot.slane %v7815_v43, 7  ;;  %v7691_v4 = vrot.slane %v115_v17, 11 }
  0xb9   :  { %v10955_v61 = vpop.permute.xlu0 %3463  ;;  %4865 = vmatmul.mubr.bf16.gmra.mrb[16].mxu0 %v4141_v47  ;;  %v355_v28 = vrot.slane %v52_v53, 7  ;;  %8651 = vmatmul.mubr.msk.bf16.gmra.mrb[44].mxu1 %vm3965_vm6, %v8583_v26  ;;  %v358_v29 = vrot.slane %v116_v48, 7  ;;  %v8170_v13 = vrot.slane %v8120_v21, 11  ;;  %v2084_v52 = vrot.slane %v8121_v45, 7  ;;  %v11058_v47 = vld [vmem:[%s16999_s0 + $0x150] sm:$0xf] }
  0xba   :  { %v8296_v1 = vrot.slane %v8224_v56, 10  ;;  %v1154_v34 = vsel %vm9240_vm5, %v7873_v8, %v1153_v22  ;;  %v1157_v35 = vsel %vm9240_vm5, %v10138_v59, %v1156_v11  ;;  %5297 = vmatprep.mubr.bf16.mxu1 %v17012_v51  ;;  %v8321_v12 = vcombine.low %v31_v60, %v9119_v5  ;;  %v517_v59 = vld [vmem:[%s16999_s0 + $0xf4] sm:$0xc]  ;;  %v8228_v5 = vld [vmem:[%s16999_s0 + $0x198] sm:$0xf] }
  0xbb   :  { %v10982_v0 = vpop.permute.xlu1 %3207  ;;  %3225 = vrot.lane.b32.xlu1 %v8426_v58, %s9153_s20  ;;  %v356_v14 = vsel %vm9240_vm5, %v7691_v4, %v355_v28  ;;  %v357_v46 = vrot.slane %v355_v28, 4  ;;  %v7233_v39 = vunpack.c.l.bf16 %v1154_v34  ;;  %v7234_v3 = vunpack.c.l.bf16 %v1157_v35  ;;  %v7947_v58 = vld [vmem:[%s16999_s0 + $0x15c] sm:$0x3]  ;;  %v11063_v8 = vld [vmem:[%s16999_s0 + $0x1b4] sm:$0xf] }
  0xbc   :  { %v2082_v22 = vsel %vm9240_vm5, %v8170_v13, %v2081_v30  ;;  %3673 = vrot.lane.b32.xlu0 %v8522_v15, %s9152_s7  ;;  %v2085_v36 = vsel %vm9240_vm5, %v2083_v54, %v2084_v52  ;;  %v2483_v37 = vrot.slane %v8225_v31, 6  ;;  %v2486_v40 = vrot.slane %v8226_v55, 6  ;;  %v11073_v13 = vld [vmem:[%s16999_s0 + $0x1b0] sm:$0xf]  ;;  %v11080_v55 = vld [vmem:[%s16999_s0 + $0xe4] sm:$0xf] }
  0xbd   :  { %v10992_v20 = vpop.permute.xlu0 %3655  ;;  %v359_v63 = vsel %vm9240_vm5, %v357_v46, %v358_v29  ;;  %v8449_v50 = vcombine.low %v1154_v34, %v1157_v35  ;;  %v7306_v38 = vsel %vm3965_vm6, %v7233_v39, 0.0  ;;  %v7308_v43 = vsel %vm3965_vm6, %v7234_v3, 0.0  ;;  %v7771_v29 = vld [vmem:[%s16999_s0 + $0x154] sm:$0xf] }
  0xbe   :  { %v8363_v53 = vcombine.low %v356_v14, %v359_v63  ;;  %v7307_v17 = vadd.f32 %v7306_v38, %v10902_v42  ;;  %v8554_v48 = vcombine.low %v2082_v22, %v2085_v36  ;;  %v2484_v27 = vsel %vm9210_vm3, %v8296_v1, %v2483_v37  ;;  %v11046_v42 = vld [vmem:[%s16999_s0 + $0x60] sm:$0xf]  ;;  %v8227_v46 = vld [vmem:[%s16999_s0 + $0x194] sm:$0xc]  ;;  %v8229_v22 = vld [vmem:[%s16999_s0 + $0x19c] sm:$0x3] }
  0xbf   :  { %v11013_v19 = vpop.permute.xlu1 %2857  ;;  %v2485_v6 = vrot.slane %v2483_v37, 4  ;;  %v3983_v41 = vsel %vm3965_vm6, %v8321_v12, %v10894_v62  ;;  %v7723_v21 = vrot.slane %v517_v59, 10  ;;  %v774_v45 = vrot.slane %v518_v16, 6  ;;  %v7816_v59 = vld [vmem:[%s16999_s0 + $0xc0] sm:$0x8] }
  0xc0   :  { %2875 = vrot.lane.b32.xlu1 %v8363_v53, %s9154_s6  ;;  %v777_v56 = vrot.slane %v519_v49, 6  ;;  %v11050_v26 = vadd.f32 %v7308_v43, %v7307_v17  ;;  %3833 = vrot.lane.b32.xlu0 %v8554_v48, %s9153_s20  ;;  %v8011_v62 = vrot.slane %v7945_v32, 10  ;;  %v1639_v15 = vrot.slane %v7946_v33, 6  ;;  %v7817_v16 = vld [vmem:[%s16999_s0 + $0xc8] sm:$0x7] }
  0xc1   :  { %v3816_v30 = vpop.permute.xlu0 %3815  ;;  %v2487_v54 = vsel %vm9210_vm3, %v2485_v6, %v2486_v40  ;;  %v775_v4 = vsel %vm9210_vm3, %v7723_v21, %v774_v45  ;;  %v776_v28 = vrot.slane %v774_v45, 4  ;;  %v1642_v31 = vrot.slane %v7947_v58, 6  ;;  %v54_v49 = vld [vmem:[%s16999_s0 + $0x1c4] sm:$0xf]  ;;  %v118_v33 = vld [vmem:[%s16999_s0 + $0x1c8] sm:$0x7] }
  0xc2   :  { %v8584_v11 = vcombine.low %v2484_v27, %v2487_v54  ;;  %v1174_v1 = vrot.slane %v11080_v55, 7  ;;  %v4241_v34 = vsel %vm3965_vm6, %v8449_v50, %v10955_v61  ;;  %v1640_v35 = vsel %vm9210_vm3, %v8011_v62, %v1639_v15  ;;  %v117_v50 = vld [vmem:[%s16999_s0 + $0x1c0] sm:$0x8]  ;;  %v8122_v17 = vld [vmem:[%s16999_s0 + $0x1b0] sm:$0x8] }
  0xc3   :  { %v11048_v60 = vpop.permute.xlu1 %3017  ;;  %v1641_v14 = vrot.slane %v1639_v15, 4  ;;  %v4074_v12 = vsel %vm4062_vm7, %v3983_v41, %v10932_v9  ;;  %v4331_v61 = vsel %vm4062_vm7, %v4241_v34, %v10992_v20  ;;  %v778_v39 = vsel %vm9210_vm3, %v776_v28, %v777_v56  ;;  %v9121_v20 = vld [vmem:[%s16999_s0 + $0x64] sm:$0xf]  ;;  %v521_v34 = vld [vmem:[%s16999_s0 + $0x1c8] sm:$0xf] }
  0xc4   :  { %8652 = vmatmul.mubr.msk.bf16.gmra.mrb[48].mxu1 %vm3965_vm6, %v8584_v11  ;;  %v2088_v3 = vrot.slane %v11063_v8, 7  ;;  %v8395_v9 = vcombine.low %v775_v4, %v778_v39  ;;  %v8322_v37 = vcombine.low %v11046_v42, %v9121_v20  ;;  %v8427_v40 = vcombine.low %v11058_v47, %v7771_v29 }
  0xc5   :  { %v11075_v52 = vpop.permute.xlu0 %3465  ;;  %v1643_v36 = vsel %vm9210_vm3, %v1641_v14, %v1642_v31  ;;  %5307 = vmatprep.mubr.bf16.mxu1 %v17012_v51  ;;  %v8523_v53 = vcombine.low %v11073_v13, %v11063_v8  ;;  %v4400_v32 = vsel %vm4127_vm8, %v4331_v61, %v3816_v30  ;;  %v4144_v27 = vsel %vm4127_vm8, %v4074_v12, %v10982_v0  ;;  %v8123_v0 = vld [vmem:[%s16999_s0 + $0x1b8] sm:$0x7]  ;;  %v520_v13 = vld [vmem:[%s16999_s0 + $0x1c4] sm:$0xc]  ;;  %v522_v12 = vld [vmem:[%s16999_s0 + $0x1cc] sm:$0x3] }
  0xc6   :  { %v8491_v38 = vcombine.low %v1640_v35, %v1643_v36  ;;  %v2090_v43 = vrot.slane %v2088_v3, 4  ;;  %3035 = vrot.lane.b32.xlu1 %v8395_v9, %s9152_s7  ;;  %4874 = vmatprep.mubr.bf16.mxu0 %v4400_v32  ;;  %v8297_v6 = vrot.slane %v8227_v46, 10  ;;  %v2490_v58 = vrot.slane %v8228_v5, 6  ;;  %v7948_v61 = vld [vmem:[%s16999_s0 + $0x224] sm:$0xc] }
  0xc7   :  { %v11107_v63 = vpop.permute.xlu1 %3209  ;;  %v2493_v41 = vrot.slane %v8229_v22, 6  ;;  %4875 = vmatmul.mubr.bf16.gmra.mrb[20].mxu0 %v4144_v27  ;;  %v7874_v30 = vrot.slane %v7816_v59, 11  ;;  %v1163_v21 = vrot.slane %v7817_v16, 7  ;;  %v7692_v45 = vrot.slane %v117_v50, 11  ;;  %v7950_v36 = vld [vmem:[%s16999_s0 + $0x22c] sm:$0x3] }
  0xc8   :  { %3483 = vrot.lane.b32.xlu0 %v8491_v38, %s9154_s6  ;;  %v362_v56 = vrot.slane %v54_v49, 7  ;;  %v2491_v54 = vsel %vm9210_vm3, %v8297_v6, %v2490_v58  ;;  %v2492_v62 = vrot.slane %v2490_v58, 4  ;;  %v365_v15 = vrot.slane %v118_v33, 7  ;;  %v8230_v50 = vld [vmem:[%s16999_s0 + $0x1a4] sm:$0xc] }
  0xc9   :  { %v11135_v48 = vpop.permute.xlu0 %3657  ;;  %v8171_v47 = vrot.slane %v8122_v17, 11  ;;  %v11152_v8 = vsel %vm9240_vm5, %v7874_v30, %v1160_v23  ;;  %v11157_v11 = vsel %vm9240_vm5, %v10915_v18, %v1163_v21  ;;  %v11165_v29 = vrot.slane %v1174_v1, 4  ;;  %v8231_v38 = vld [vmem:[%s16999_s0 + $0x1a8] sm:$0xf]  ;;  %v11225_v58 = vld [vmem:[%s16999_s0 + $0x220] sm:$0xf] }
  0xca   :  { %v363_v4 = vsel %vm9240_vm5, %v7692_v45, %v362_v56  ;;  %v364_v28 = vrot.slane %v362_v56, 4  ;;  %3227 = vrot.lane.b32.xlu1 %v8427_v40, %s9153_s20  ;;  %v2494_v10 = vsel %vm9210_vm3, %v2492_v62, %v2493_v41  ;;  %v7235_v23 = vunpack.c.l.bf16 %v11152_v8 }
  0xcb   :  { %v11141_v42 = vpop.permute.xlu1 %2859  ;;  %v7236_v18 = vunpack.c.l.bf16 %v11157_v11  ;;  %v8585_v35 = vcombine.low %v2491_v54, %v2494_v10  ;;  %v2089_v46 = vsel %vm9240_vm5, %v8171_v47, %v2088_v3  ;;  %v2091_v5 = vrot.slane %v8123_v0, 7  ;;  %v7949_v3 = vld [vmem:[%s16999_s0 + $0x228] sm:$0xf]  ;;  %v11235_v54 = vld [vmem:[%s16999_s0 + $0x284] sm:$0xf] }
  0xcc   :  { %3675 = vrot.lane.b32.xlu0 %v8523_v53, %s9152_s7  ;;  %v366_v14 = vsel %vm9240_vm5, %v364_v28, %v365_v15  ;;  %v7310_v22 = vsel %vm3965_vm6, %v7235_v23, 0.0  ;;  %v3986_v20 = vsel %vm3965_vm6, %v8322_v37, %v11013_v19  ;;  %v7724_v49 = vrot.slane %v520_v13, 10  ;;  %v11242_v47 = vld [vmem:[%s16999_s0 + $0x224] sm:$0xf]  ;;  %v7819_v13 = vld [vmem:[%s16999_s0 + $0xd8] sm:$0x7] }
  0xcd   :  { %v11161_v31 = vpop.permute.xlu0 %3817  ;;  %v7312_v59 = vsel %vm3965_vm6, %v7236_v18, 0.0  ;;  %v8364_v9 = vcombine.low %v363_v4, %v366_v14  ;;  %8653 = vmatmul.mubr.msk.bf16.gmra.mrb[52].mxu1 %vm3965_vm6, %v8585_v35  ;;  %v7311_v40 = vadd.f32 %v7310_v22, %v11050_v26  ;;  %v2092_v16 = vsel %vm9240_vm5, %v2090_v43, %v2091_v5  ;;  %v8232_v43 = vld [vmem:[%s16999_s0 + $0x1ac] sm:$0x3]  ;;  %v7818_v18 = vld [vmem:[%s16999_s0 + $0xd0] sm:$0x8] }
  0xce   :  { %v8555_v19 = vcombine.low %v2089_v46, %v2092_v16  ;;  %v781_v37 = vrot.slane %v521_v34, 6  ;;  %v784_v32 = vrot.slane %v522_v12, 6  ;;  %v8012_v26 = vrot.slane %v7948_v61, 10  ;;  %5317 = vmatprep.mubr.bf16.mxu1 %v17012_v51  ;;  %v56_v46 = vld [vmem:[%s16999_s0 + $0x1d4] sm:$0xf] }
  0xcf   :  { %v11189_v39 = vpop.permute.xlu1 %3019  ;;  %2877 = vrot.lane.b32.xlu1 %v8364_v9, %s9154_s6  ;;  %v8450_v33 = vcombine.low %v11152_v8, %v11157_v11  ;;  %v11220_v17 = vadd.f32 %v7312_v59, %v7311_v40  ;;  %v1646_v27 = vrot.slane %v7949_v3, 6  ;;  %v1649_v6 = vrot.slane %v7950_v36, 6  ;;  %v8060_v8 = vld [vmem:[%s16999_s0 + $0x280] sm:$0xf]  ;;  %v119_v5 = vld [vmem:[%s16999_s0 + $0x1d0] sm:$0x8] }
  0xd0   :  { %3835 = vrot.lane.b32.xlu0 %v8555_v19, %s9153_s20  ;;  %v782_v30 = vsel %vm9210_vm3, %v7724_v49, %v781_v37  ;;  %v783_v21 = vrot.slane %v781_v37, 4  ;;  %v8298_v45 = vrot.slane %v8230_v50, 10  ;;  %v2497_v56 = vrot.slane %v8231_v38, 6  ;;  %v120_v9 = vld [vmem:[%s16999_s0 + $0x1d8] sm:$0x7] }
  0xd1   :  { %v11211_v53 = vpop.permute.xlu0 %3467  ;;  %v1647_v62 = vsel %vm9210_vm3, %v8012_v26, %v1646_v27  ;;  %v1648_v15 = vrot.slane %v1646_v27, 4  ;;  %v2500_v0 = vrot.slane %v8232_v43, 6  ;;  %v4076_v4 = vsel %vm4062_vm7, %v3986_v20, %v11048_v60  ;;  %v8124_v3 = vld [vmem:[%s16999_s0 + $0x280] sm:$0x8]  ;;  %v8125_v36 = vld [vmem:[%s16999_s0 + $0x288] sm:$0x7] }
  0xd2   :  { %v785_v28 = vsel %vm9210_vm3, %v783_v21, %v784_v32  ;;  %v2498_v10 = vsel %vm9210_vm3, %v8298_v45, %v2497_v56  ;;  %v2499_v23 = vrot.slane %v2497_v56, 4  ;;  %v4244_v34 = vsel %vm3965_vm6, %v8450_v33, %v11075_v52  ;;  %v8233_v49 = vld [vmem:[%s16999_s0 + $0x1b4] sm:$0xc]  ;;  %v8234_v50 = vld [vmem:[%s16999_s0 + $0x1b8] sm:$0xf] }
  0xd3   :  { %v11227_v41 = vpop.permute.xlu1 %3211  ;;  %v8396_v35 = vcombine.low %v782_v30, %v785_v28  ;;  %v1650_v60 = vsel %vm9210_vm3, %v1648_v15, %v1649_v6  ;;  %v2095_v14 = vrot.slane %v11235_v54, 7  ;;  %v4333_v61 = vsel %vm4062_vm7, %v4244_v34, %v11135_v48  ;;  %v35_v19 = vld [vmem:[%s16999_s0 + $0x70] sm:$0xf]  ;;  %v9122_v56 = vld [vmem:[%s16999_s0 + $0x74] sm:$0xf] }
  0xd4   :  { %v8492_v52 = vcombine.low %v1647_v62, %v1650_v60  ;;  %v2501_v22 = vsel %vm9210_vm3, %v2499_v23, %v2500_v0  ;;  %v8428_v59 = vcombine.low %v11225_v58, %v11242_v47  ;;  %v8524_v40 = vcombine.low %v8060_v8, %v11235_v54  ;;  %v524_v23 = vld [vmem:[%s16999_s0 + $0x1d8] sm:$0xf]  ;;  %v525_v60 = vld [vmem:[%s16999_s0 + $0x1dc] sm:$0x3] }
  0xd5   :  { %v11247_v11 = vpop.permute.xlu0 %3659  ;;  %3037 = vrot.lane.b32.xlu1 %v8396_v35, %s9152_s7  ;;  %v8586_v48 = vcombine.low %v2498_v10, %v2501_v22  ;;  %v2097_v20 = vrot.slane %v2095_v14, 4  ;;  %v4403_v16 = vsel %vm4127_vm8, %v4333_v61, %v11161_v31  ;;  %v4147_v31 = vsel %vm4127_vm8, %v4076_v4, %v11107_v63  ;;  %v523_v10 = vld [vmem:[%s16999_s0 + $0x1d4] sm:$0xc] }
  0xd6   :  { %3485 = vrot.lane.b32.xlu0 %v8492_v52, %s9154_s6  ;;  %4884 = vmatprep.mubr.bf16.mxu0 %v4403_v16  ;;  %v7875_v37 = vrot.slane %v7818_v18, 11  ;;  %v1170_v32 = vrot.slane %v7819_v13, 7  ;;  %v7693_v26 = vrot.slane %v119_v5, 11  ;;  %v369_v43 = vrot.slane %v56_v46, 7 }
  0xd7   :  { %v11272_v12 = vpop.permute.xlu1 %2861  ;;  %8654 = vmatmul.mubr.msk.bf16.gmra.mrb[56].mxu1 %vm3965_vm6, %v8586_v48  ;;  %4885 = vmatmul.mubr.bf16.gmra.mrb[24].mxu0 %v4147_v31  ;;  %v372_v33 = vrot.slane %v120_v9, 7  ;;  %v8172_v27 = vrot.slane %v8124_v3, 11  ;;  %v2098_v6 = vrot.slane %v8125_v36, 7  ;;  %v8299_v21 = vrot.slane %v8233_v49, 10 }
  0xd8   :  { %v1168_v30 = vsel %vm9240_vm5, %v7875_v37, %v1167_v25  ;;  %v1171_v63 = vsel %vm9240_vm5, %v10949_v2, %v1170_v32  ;;  %5327 = vmatprep.mubr.bf16.mxu1 %v17012_v51  ;;  %v2504_v45 = vrot.slane %v8234_v50, 6  ;;  %v8323_v54 = vcombine.low %v35_v19, %v9122_v56  ;;  %v8235_v25 = vld [vmem:[%s16999_s0 + $0x1bc] sm:$0x3]  ;;  %v11378_v19 = vld [vmem:[%s16999_s0 + $0x294] sm:$0xf] }
  0xd9   :  { %v11299_v38 = vpop.permute.xlu0 %3819  ;;  %3229 = vrot.lane.b32.xlu1 %v8428_v59, %s9153_s20  ;;  %v8451_v62 = vcombine.low %v1168_v30, %v1171_v63  ;;  %v7237_v57 = vunpack.c.l.bf16 %v1168_v30  ;;  %v7238_v15 = vunpack.c.l.bf16 %v1171_v63  ;;  %v370_v2 = vsel %vm9240_vm5, %v7693_v26, %v369_v43  ;;  %v7952_v59 = vld [vmem:[%s16999_s0 + $0x238] sm:$0xf]  ;;  %v11406_v56 = vld [vmem:[%s16999_s0 + $0x290] sm:$0xf] }
  0xda   :  { %3677 = vrot.lane.b32.xlu0 %v8524_v40, %s9152_s7  ;;  %v371_v8 = vrot.slane %v369_v43, 4  ;;  %v2096_v4 = vsel %vm9240_vm5, %v8172_v27, %v2095_v14  ;;  %v2099_v28 = vsel %vm9240_vm5, %v2097_v20, %v2098_v6  ;;  %v2505_v35 = vsel %vm9210_vm3, %v8299_v21, %v2504_v45  ;;  %v7951_v14 = vld [vmem:[%s16999_s0 + $0x234] sm:$0xc]  ;;  %v7953_v20 = vld [vmem:[%s16999_s0 + $0x23c] sm:$0x3] }
  0xdb   :  { %v11308_v58 = vpop.permute.xlu1 %3021  ;;  %v7314_v18 = vsel %vm3965_vm6, %v7237_v57, 0.0  ;;  %v7316_v13 = vsel %vm3965_vm6, %v7238_v15, 0.0  ;;  %v8556_v34 = vcombine.low %v2096_v4, %v2099_v28  ;;  %v2506_v52 = vrot.slane %v2504_v45, 4  ;;  %v7774_v43 = vld [vmem:[%s16999_s0 + $0x230] sm:$0xf] }
  0xdc   :  { %v7315_v5 = vadd.f32 %v7314_v18, %v11220_v17  ;;  %v373_v61 = vsel %vm9240_vm5, %v371_v8, %v372_v33  ;;  %v2507_v22 = vrot.slane %v8235_v25, 6  ;;  %v3989_v9 = vsel %vm3965_vm6, %v8323_v54, %v11141_v42  ;;  %v11373_v42 = vld [vmem:[%s16999_s0 + $0x80] sm:$0xf]  ;;  %v11389_v33 = vld [vmem:[%s16999_s0 + $0x234] sm:$0xf] }
  0xdd   :  { %v11325_v0 = vpop.permute.xlu0 %3469  ;;  %v8365_v3 = vcombine.low %v370_v2, %v373_v61  ;;  %v7725_v36 = vrot.slane %v523_v10, 10  ;;  %v788_v48 = vrot.slane %v524_v23, 6  ;;  %v791_v49 = vrot.slane %v525_v60, 6  ;;  %v11396_v6 = vld [vmem:[%s16999_s0 + $0xf4] sm:$0xf] }
  0xde   :  { %v11365_v40 = vadd.f32 %v7316_v13, %v7315_v5  ;;  %3837 = vrot.lane.b32.xlu0 %v8556_v34, %s9153_s20  ;;  %v2508_v16 = vsel %vm9210_vm3, %v2506_v52, %v2507_v22  ;;  %v8013_v50 = vrot.slane %v7951_v14, 10  ;;  %v1653_v26 = vrot.slane %v7952_v59, 6  ;;  %v8236_v54 = vld [vmem:[%s16999_s0 + $0x284] sm:$0xc]  ;;  %v8238_v25 = vld [vmem:[%s16999_s0 + $0x28c] sm:$0x3] }
  0xdf   :  { %v11350_v46 = vpop.permute.xlu1 %3213  ;;  %2879 = vrot.lane.b32.xlu1 %v8365_v3, %s9154_s6  ;;  %v8587_v31 = vcombine.low %v2505_v35, %v2508_v16  ;;  %v789_v37 = vsel %vm9210_vm3, %v7725_v36, %v788_v48  ;;  %v790_v32 = vrot.slane %v788_v48, 4  ;;  %v1181_v30 = vrot.slane %v11396_v6, 7  ;;  %v9124_v28 = vld [vmem:[%s16999_s0 + $0x84] sm:$0xf]  ;;  %v7820_v18 = vld [vmem:[%s16999_s0 + $0xe0] sm:$0x8] }
  0xe0   :  { %v4078_v63 = vsel %vm4062_vm7, %v3989_v9, %v11189_v39  ;;  %v4247_v21 = vsel %vm3965_vm6, %v8451_v62, %v11211_v53  ;;  %v1656_v45 = vrot.slane %v7953_v20, 6  ;;  %v1654_v39 = vsel %vm9210_vm3, %v8013_v50, %v1653_v26  ;;  %v8237_v62 = vld [vmem:[%s16999_s0 + $0x288] sm:$0xf]  ;;  %v58_v5 = vld [vmem:[%s16999_s0 + $0x1e4] sm:$0xf] }
  0xe1   :  { %v11363_v17 = vpop.permute.xlu0 %3661  ;;  %8655 = vmatmul.mubr.msk.bf16.gmra.mrb[60].mxu1 %vm3965_vm6, %v8587_v31  ;;  %v792_v57 = vsel %vm9210_vm3, %v790_v32, %v791_v49  ;;  %v1655_v15 = vrot.slane %v1653_v26, 4  ;;  %v2102_v53 = vrot.slane %v11378_v19, 7  ;;  %v4335_v8 = vsel %vm4062_vm7, %v4247_v21, %v11247_v11  ;;  %v7821_v13 = vld [vmem:[%s16999_s0 + $0xe8] sm:$0x7]  ;;  %v121_v11 = vld [vmem:[%s16999_s0 + $0x1e0] sm:$0x8] }
  0xe2   :  { %v8397_v4 = vcombine.low %v789_v37, %v792_v57  ;;  %v8324_v10 = vcombine.low %v11373_v42, %v9124_v28  ;;  %v8429_v23 = vcombine.low %v7774_v43, %v11389_v33  ;;  %5337 = vmatprep.mubr.bf16.mxu1 %v17012_v51  ;;  %v8525_v60 = vcombine.low %v11406_v56, %v11378_v19  ;;  %v122_v61 = vld [vmem:[%s16999_s0 + $0x1e8] sm:$0x7]  ;;  %v8127_v36 = vld [vmem:[%s16999_s0 + $0x298] sm:$0x7] }
  0xe3   :  { %v11391_v27 = vpop.permute.xlu1 %2863  ;;  %v1657_v34 = vsel %vm9210_vm3, %v1655_v15, %v1656_v45  ;;  %v2104_v35 = vrot.slane %v2102_v53, 4  ;;  %v4406_v14 = vsel %vm4127_vm8, %v4335_v8, %v11299_v38  ;;  %v4150_v59 = vsel %vm4127_vm8, %v4078_v63, %v11227_v41  ;;  %v8126_v38 = vld [vmem:[%s16999_s0 + $0x290] sm:$0x8] }
  0xe4   :  { %3039 = vrot.lane.b32.xlu1 %v8397_v4, %s9152_s7  ;;  %v8493_v22 = vcombine.low %v1654_v39, %v1657_v34  ;;  %4894 = vmatprep.mubr.bf16.mxu0 %v4406_v14  ;;  %v8300_v9 = vrot.slane %v8236_v54, 10  ;;  %v2511_v3 = vrot.slane %v8237_v62, 6  ;;  %v2514_v48 = vrot.slane %v8238_v25, 6  ;;  %v528_v62 = vld [vmem:[%s16999_s0 + $0x1ec] sm:$0x3] }
  0xe5   :  { %v11423_v2 = vpop.permute.xlu0 %3821  ;;  %4895 = vmatmul.mubr.bf16.gmra.mrb[28].mxu0 %v4150_v59  ;;  %v7876_v20 = vrot.slane %v7820_v18, 11  ;;  %v1177_v16 = vrot.slane %v7821_v13, 7  ;;  %v7694_v49 = vrot.slane %v121_v11, 11  ;;  %v376_v19 = vrot.slane %v58_v5, 7  ;;  %v7954_v25 = vld [vmem:[%s16999_s0 + $0x244] sm:$0xc] }
  0xe6   :  { %3487 = vrot.lane.b32.xlu0 %v8493_v22, %s9154_s6  ;;  %v2512_v41 = vsel %vm9210_vm3, %v8300_v9, %v2511_v3  ;;  %v2513_v42 = vrot.slane %v2511_v3, 4  ;;  %v379_v31 = vrot.slane %v122_v61, 7  ;;  %v8173_v26 = vrot.slane %v8126_v38, 11  ;;  %v7955_v18 = vld [vmem:[%s16999_s0 + $0x248] sm:$0xf] }
  0xe7   :  { %v11454_v52 = vpop.permute.xlu1 %3023  ;;  %v1175_v37 = vsel %vm9240_vm5, %v7876_v20, %v1174_v1  ;;  %v1178_v32 = vsel %vm9240_vm5, %v11165_v29, %v1177_v16  ;;  %v2105_v43 = vrot.slane %v8127_v36, 7  ;;  %v11481_v21 = vrot.slane %v1181_v30, 4  ;;  %v526_v1 = vld [vmem:[%s16999_s0 + $0x1e4] sm:$0xc]  ;;  %v527_v29 = vld [vmem:[%s16999_s0 + $0x1e8] sm:$0xf] }
  0xe8   :  { %3231 = vrot.lane.b32.xlu1 %v8429_v23, %s9153_s20  ;;  %v2515_v55 = vsel %vm9210_vm3, %v2513_v42, %v2514_v48  ;;  %v7239_v45 = vunpack.c.l.bf16 %v1175_v37  ;;  %v7240_v56 = vunpack.c.l.bf16 %v1178_v32  ;;  %v377_v57 = vsel %vm9240_vm5, %v7694_v49, %v376_v19  ;;  %v7956_v13 = vld [vmem:[%s16999_s0 + $0x24c] sm:$0x3]  ;;  %v7776_v48 = vld [vmem:[%s16999_s0 + $0x240] sm:$0xf]  ;;  %v11547_v42 = vld [vmem:[%s16999_s0 + $0x244] sm:$0xf] }
  0xe9   :  { %v11465_v50 = vpop.permute.xlu0 %3471  ;;  %v8588_v54 = vcombine.low %v2512_v41, %v2515_v55  ;;  %v378_v39 = vrot.slane %v376_v19, 4  ;;  %v2103_v15 = vsel %vm9240_vm5, %v8173_v26, %v2102_v53  ;;  %v3992_v4 = vsel %vm3965_vm6, %v8324_v10, %v11272_v12  ;;  %17248 = vst [vmem:[#allocation2_spill] sm:$0xff] %v11547_v42  ;;  %v8064_v19 = vld [vmem:[%s16999_s0 + $0x2a0] sm:$0xf] }
  0xea   :  { %3679 = vrot.lane.b32.xlu0 %v8525_v60, %s9152_s7  ;;  %v7318_v28 = vsel %vm3965_vm6, %v7239_v45, 0.0  ;;  %v7320_v23 = vsel %vm3965_vm6, %v7240_v56, 0.0  ;;  %v2106_v53 = vsel %vm9240_vm5, %v2104_v35, %v2105_v43  ;;  %v8452_v12 = vcombine.low %v1175_v37, %v1178_v32  ;;  %v8239_v35 = vld [vmem:[%s16999_s0 + $0x294] sm:$0xc]  ;;  %v8240_v60 = vld [vmem:[%s16999_s0 + $0x298] sm:$0xf] }
  0xeb   :  { %v11477_v63 = vpop.permute.xlu1 %3215  ;;  %8656 = vmatmul.mubr.msk.bf16.gmra.mrb[64].mxu1 %vm3965_vm6, %v8588_v54  ;;  %v7319_v10 = vadd.f32 %v7318_v28, %v11365_v40  ;;  %v380_v11 = vsel %vm9240_vm5, %v378_v39, %v379_v31  ;;  %v8557_v34 = vcombine.low %v2103_v15, %v2106_v53  ;;  %v7726_v61 = vrot.slane %v526_v1, 10  ;;  %v8241_v40 = vld [vmem:[%s16999_s0 + $0x29c] sm:$0x3]  ;;  %v8065_v43 = vld [vmem:[%s16999_s0 + $0x2a4] sm:$0xf] }
  0xec   :  { %v8366_v5 = vcombine.low %v377_v57, %v380_v11  ;;  %v795_v22 = vrot.slane %v527_v29, 6  ;;  %v798_v59 = vrot.slane %v528_v62, 6  ;;  %5347 = vmatprep.mubr.bf16.mxu1 %v17012_v51  ;;  %v8014_v3 = vrot.slane %v7954_v25, 10  ;;  %v7822_v29 = vld [vmem:[%s16999_s0 + $0xf0] sm:$0x8] }
  0xed   :  { %v11502_v8 = vpop.permute.xlu0 %3663  ;;  %v11533_v9 = vadd.f32 %v7320_v23, %v7319_v10  ;;  %v1660_v38 = vrot.slane %v7955_v18, 6  ;;  %v1663_v36 = vrot.slane %v7956_v13, 6  ;;  %v8301_v41 = vrot.slane %v8239_v35, 10  ;;  %v7823_v54 = vld [vmem:[%s16999_s0 + $0xf8] sm:$0x7] }
  0xee   :  { %2881 = vrot.lane.b32.xlu1 %v8366_v5, %s9154_s6  ;;  %3839 = vrot.lane.b32.xlu0 %v8557_v34, %s9153_s20  ;;  %v796_v16 = vsel %vm9210_vm3, %v7726_v61, %v795_v22  ;;  %v797_v49 = vrot.slane %v795_v22, 4  ;;  %v2518_v32 = vrot.slane %v8240_v60, 6  ;;  %v2521_v26 = vrot.slane %v8241_v40, 6  ;;  %v60_v57 = vld [vmem:[%s16999_s0 + $0x1f4] sm:$0xf] }
  0xef   :  { %v11527_v14 = vpop.permute.xlu1 %2865  ;;  %v1661_v31 = vsel %vm9210_vm3, %v8014_v3, %v1660_v38  ;;  %v1662_v37 = vrot.slane %v1660_v38, 4  ;;  %v4080_v45 = vsel %vm4062_vm7, %v3992_v4, %v11308_v58  ;;  %v4250_v56 = vsel %vm3965_vm6, %v8452_v12, %v11325_v0  ;;  %v123_v53 = vld [vmem:[%s16999_s0 + $0x1f0] sm:$0x8]  ;;  %v8128_v18 = vld [vmem:[%s16999_s0 + $0x2a0] sm:$0x8] }
  0xf0   :  { %v799_v1 = vsel %vm9210_vm3, %v797_v49, %v798_v59  ;;  %v2519_v0 = vsel %vm9210_vm3, %v8301_v41, %v2518_v32  ;;  %v2520_v15 = vrot.slane %v2518_v32, 4  ;;  %v4337_v25 = vsel %vm4062_vm7, %v4250_v56, %v11363_v17  ;;  %v124_v11 = vld [vmem:[%s16999_s0 + $0x1f8] sm:$0x7]  ;;  %v8129_v34 = vld [vmem:[%s16999_s0 + $0x2a8] sm:$0x7] }
  0xf1   :  { %v11538_v20 = vpop.permute.xlu0 %3823  ;;  %v8398_v39 = vcombine.low %v796_v16, %v799_v1  ;;  %v1664_v58 = vsel %vm9210_vm3, %v1662_v37, %v1663_v36  ;;  %v8430_v28 = vcombine.low %v7776_v48, %v11547_v42  ;;  %v2109_v23 = vrot.slane %v8065_v43, 7  ;;  %v11611_v22 = vld [vmem:[%s16999_s0 + $0x104] sm:$0xf]  ;;  %v8243_v36 = vld [vmem:[%s16999_s0 + $0x2a8] sm:$0xf] }
  0xf2   :  { %v8494_v4 = vcombine.low %v1661_v31, %v1664_v58  ;;  %v2522_v13 = vsel %vm9210_vm3, %v2520_v15, %v2521_v26  ;;  %v8526_v12 = vcombine.low %v8064_v19, %v8065_v43  ;;  %v4409_v17 = vsel %vm4127_vm8, %v4337_v25, %v11423_v2  ;;  %v39_v31 = vld [vmem:[%s16999_s0 + $0x90] sm:$0xf]  ;;  %v7957_v15 = vld [vmem:[%s16999_s0 + $0x254] sm:$0xc] }
  0xf3   :  { %v11557_v55 = vpop.permute.xlu1 %3025  ;;  %3041 = vrot.lane.b32.xlu1 %v8398_v39, %s9152_s7  ;;  %v4153_v10 = vsel %vm4127_vm8, %v4080_v45, %v11350_v46  ;;  %v8589_v60 = vcombine.low %v2519_v0, %v2522_v13  ;;  %v2111_v5 = vrot.slane %v2109_v23, 4  ;;  %4904 = vmatprep.mubr.bf16.mxu0 %v4409_v17  ;;  %v7877_v61 = vrot.slane %v7822_v29, 11  ;;  %v8242_v46 = vld [vmem:[%s16999_s0 + $0x2a4] sm:$0xc]  ;;  %v529_v29 = vld [vmem:[%s16999_s0 + $0x1f4] sm:$0xc] }
  0xf4   :  { %3489 = vrot.lane.b32.xlu0 %v8494_v4, %s9154_s6  ;;  %v1184_v2 = vrot.slane %v7823_v54, 7  ;;  %v1188_v59 = vrot.slane %v11611_v22, 7  ;;  %4905 = vmatmul.mubr.bf16.gmra.mrb[32].mxu0 %v4153_v10  ;;  %v7695_v40 = vrot.slane %v123_v53, 11  ;;  %v383_v3 = vrot.slane %v60_v57, 7  ;;  %v530_v54 = vld [vmem:[%s16999_s0 + $0x1f8] sm:$0xf] }
  0xf5   :  { %v11578_v62 = vpop.permute.xlu0 %3473  ;;  %v8174_v38 = vrot.slane %v8128_v18, 11  ;;  %8657 = vmatmul.mubr.msk.bf16.gmra.mrb[68].mxu1 %vm3965_vm6, %v8589_v60  ;;  %v11624_v16 = vsel %vm9240_vm5, %v7877_v61, %v1181_v30  ;;  %v386_v41 = vrot.slane %v124_v11, 7  ;;  %v2112_v19 = vrot.slane %v8129_v34, 7  ;;  %v531_v0 = vld [vmem:[%s16999_s0 + $0x1fc] sm:$0x3] }
  0xf6   :  { %v11629_v49 = vsel %vm9240_vm5, %v11481_v21, %v1184_v2  ;;  %v7241_v37 = vunpack.c.l.bf16 %v11624_v16  ;;  %v384_v30 = vsel %vm9240_vm5, %v7695_v40, %v383_v3  ;;  %5357 = vmatprep.mubr.bf16.mxu1 %v17012_v51  ;;  %v8244_v21 = vld [vmem:[%s16999_s0 + $0x2ac] sm:$0x3]  ;;  %v8302_v32 = vrot.slane %v8242_v46, 10  ;;  %v9126_v4 = vld [vmem:[%s16999_s0 + $0x94] sm:$0xf] }
  0xf7   :  { %v11602_v35 = vpop.permute.xlu1 %3217  ;;  %3233 = vrot.lane.b32.xlu1 %v8430_v28, %s9153_s20  ;;  %v7242_v6 = vunpack.c.l.bf16 %v11629_v49  ;;  %v385_v43 = vrot.slane %v383_v3, 4  ;;  %v2110_v45 = vsel %vm9240_vm5, %v8174_v38, %v2109_v23  ;;  %v2113_v56 = vsel %vm9240_vm5, %v2111_v5, %v2112_v19  ;;  %v7958_v13 = vld [vmem:[%s16999_s0 + $0x258] sm:$0xf] }
  0xf8   :  { %3681 = vrot.lane.b32.xlu0 %v8526_v12, %s9152_s7  ;;  %v2525_v1 = vrot.slane %v8243_v36, 6  ;;  %v7322_v57 = vsel %vm3965_vm6, %v7241_v37, 0.0  ;;  %v8558_v58 = vcombine.low %v2110_v45, %v2113_v56  ;;  %v8325_v28 = vcombine.low %v39_v31, %v9126_v4  ;;  %v7959_v12 = vld [vmem:[%s16999_s0 + $0x25c] sm:$0x3]  ;;  %v11693_v36 = vld [vmem:[%s16999_s0 + $0x2b4] sm:$0xf] }
  0xf9   :  { %v11617_v48 = vpop.permute.xlu0 %3665  ;;  %v7324_v39 = vsel %vm3965_vm6, %v7242_v6, 0.0  ;;  %v7323_v23 = vadd.f32 %v7322_v57, %v11533_v9  ;;  %v387_v53 = vsel %vm9240_vm5, %v385_v43, %v386_v41  ;;  %v2528_v11 = vrot.slane %v8244_v21, 6  ;;  %v11704_v37 = vld [vmem:[%s16999_s0 + $0xa0] sm:$0xf]  ;;  %v7778_v21 = vld [vmem:[%s16999_s0 + $0x250] sm:$0xf] }
  0xfa   :  { %v2527_v18 = vrot.slane %v2525_v1, 4  ;;  %v8367_v17 = vcombine.low %v384_v30, %v387_v53  ;;  %v2526_v10 = vsel %vm9210_vm3, %v8302_v32, %v2525_v1  ;;  %v7727_v34 = vrot.slane %v529_v29, 10  ;;  %v8066_v56 = vld [vmem:[%s16999_s0 + $0x2b0] sm:$0xf]  ;;  %v8245_v29 = vld [vmem:[%s16999_s0 + $0x2b4] sm:$0xc] }
  0xfb   :  { %v11643_v26 = vpop.permute.xlu1 %2867  ;;  %v11682_v9 = vadd.f32 %v7324_v39, %v7323_v23  ;;  %v802_v5 = vrot.slane %v530_v54, 6  ;;  %v805_v61 = vrot.slane %v531_v0, 6  ;;  %v8015_v2 = vrot.slane %v7957_v15, 10  ;;  %v8246_v0 = vld [vmem:[%s16999_s0 + $0x2b8] sm:$0xf] }
  0xfc   :  { %3841 = vrot.lane.b32.xlu0 %v8558_v58, %s9153_s20  ;;  %v8453_v46 = vcombine.low %v11624_v16, %v11629_v49  ;;  %2883 = vrot.lane.b32.xlu1 %v8367_v17, %s9154_s6  ;;  %v2529_v40 = vsel %vm9210_vm3, %v2527_v18, %v2528_v11  ;;  %v1667_v3 = vrot.slane %v7958_v13, 6  ;;  %v1670_v38 = vrot.slane %v7959_v12, 6  ;;  %v8247_v15 = vld [vmem:[%s16999_s0 + $0x2bc] sm:$0x3]  ;;  %v9127_v23 = vld [vmem:[%s16999_s0 + $0xa4] sm:$0xf] }
  0xfd   :  { %v11664_v25 = vpop.permute.xlu0 %3825  ;;  %v3995_v19 = vsel %vm3965_vm6, %v8325_v28, %v11391_v27  ;;  %v8590_v31 = vcombine.low %v2526_v10, %v2529_v40  ;;  %v803_v16 = vsel %vm9210_vm3, %v7727_v34, %v802_v5  ;;  %v804_v49 = vrot.slane %v802_v5, 4  ;;  %v11714_v27 = vld [vmem:[%s16999_s0 + $0x254] sm:$0xf]  ;;  %v7825_v18 = vld [vmem:[%s16999_s0 + $0x108] sm:$0x7] }
  0xfe   :  { %v1668_v6 = vsel %vm9210_vm3, %v8015_v2, %v1667_v3  ;;  %v1669_v30 = vrot.slane %v1667_v3, 4  ;;  %v1190_v43 = vrot.slane %v1188_v59, 4  ;;  %v2116_v1 = vrot.slane %v11693_v36, 7  ;;  %v62_v13 = vld [vmem:[%s16999_s0 + $0x204] sm:$0xf] }
  0xff   :  { %v11680_v60 = vpop.permute.xlu1 %3027  ;;  %8658 = vmatmul.mubr.msk.bf16.gmra.mrb[72].mxu1 %vm3965_vm6, %v8590_v31  ;;  %v806_v45 = vsel %vm9210_vm3, %v804_v49, %v805_v61  ;;  %v4082_v54 = vsel %vm4062_vm7, %v3995_v19, %v11454_v52  ;;  %v4253_v57 = vsel %vm3965_vm6, %v8453_v46, %v11465_v50  ;;  %v7824_v52 = vld [vmem:[%s16999_s0 + $0x100] sm:$0x8]  ;;  %v8326_v53 = vcombine.low %v11704_v37, %v9127_v23  ;;  %v126_v34 = vld [vmem:[%s16999_s0 + $0x208] sm:$0x7]  ;;  %v8130_v5 = vld [vmem:[%s16999_s0 + $0x2b0] sm:$0x8] }
 0x100   :  { %v8399_v39 = vcombine.low %v803_v16, %v806_v45  ;;  %v1671_v58 = vsel %vm9210_vm3, %v1669_v30, %v1670_v38  ;;  %5367 = vmatprep.mubr.bf16.mxu1 %v17012_v51  ;;  %v4339_v50 = vsel %vm4062_vm7, %v4253_v57, %v11502_v8  ;;  %v125_v12 = vld [vmem:[%s16999_s0 + $0x200] sm:$0x8]  ;;  %v8431_v8 = vcombine.low %v7778_v21, %v11714_v27  ;;  %v8131_v37 = vld [vmem:[%s16999_s0 + $0x2b8] sm:$0x7]  ;;  %v532_v57 = vld [vmem:[%s16999_s0 + $0x204] sm:$0xc] }
 0x101   :  { %v11695_v41 = vpop.permute.xlu0 %3475  ;;  %v8495_v28 = vcombine.low %v1668_v6, %v1671_v58  ;;  %v2118_v17 = vrot.slane %v2116_v1, 4  ;;  %v8527_v10 = vcombine.low %v8066_v56, %v11693_v36  ;;  %v4412_v11 = vsel %vm4127_vm8, %v4339_v50, %v11538_v20  ;;  %v534_v50 = vld [vmem:[%s16999_s0 + $0x20c] sm:$0x3] }
 0x102   :  { %3043 = vrot.lane.b32.xlu1 %v8399_v39, %s9152_s7  ;;  %4914 = vmatprep.mubr.bf16.mxu0 %v4412_v11  ;;  %v4156_v61 = vsel %vm4127_vm8, %v4082_v54, %v11477_v63  ;;  %v8303_v2 = vrot.slane %v8245_v29, 10  ;;  %v2532_v46 = vrot.slane %v8246_v0, 6  ;;  %v2535_v40 = vrot.slane %v8247_v15, 6  ;;  %v11802_v29 = vld [vmem:[%s16999_s0 + $0x114] sm:$0xf] }
 0x103   :  { %v11716_v32 = vpop.permute.xlu1 %3219  ;;  %3491 = vrot.lane.b32.xlu0 %v8495_v28, %s9154_s6  ;;  %4915 = vmatmul.mubr.bf16.gmra.mrb[36].mxu0 %v4156_v61  ;;  %v7878_v20 = vrot.slane %v7824_v52, 11  ;;  %v1191_v38 = vrot.slane %v7825_v18, 7  ;;  %v7696_v36 = vrot.slane %v125_v12, 11  ;;  %v390_v19 = vrot.slane %v62_v13, 7  ;;  %v533_v39 = vld [vmem:[%s16999_s0 + $0x208] sm:$0xf] }
 0x104   :  { %v2533_v31 = vsel %vm9210_vm3, %v8303_v2, %v2532_v46  ;;  %v2534_v16 = vrot.slane %v2532_v46, 4  ;;  %v393_v49 = vrot.slane %v126_v34, 7  ;;  %v8175_v63 = vrot.slane %v8130_v5, 11  ;;  %v7960_v28 = vld [vmem:[%s16999_s0 + $0x264] sm:$0xc] }
 0x105   :  { %v11746_v4 = vpop.permute.xlu0 %3667  ;;  %v11791_v30 = vsel %vm9240_vm5, %v7878_v20, %v1188_v59  ;;  %v11795_v21 = vsel %vm9240_vm5, %v1190_v43, %v1191_v38  ;;  %v391_v45 = vsel %vm9240_vm5, %v7696_v36, %v390_v19  ;;  %v392_v56 = vrot.slane %v390_v19, 4  ;;  %v8248_v61 = vld [vmem:[%s16999_s0 + $0x2c4] sm:$0xc]  ;;  %v8249_v2 = vld [vmem:[%s16999_s0 + $0x2c8] sm:$0xf] }
 0x106   :  { %3235 = vrot.lane.b32.xlu1 %v8431_v8, %s9153_s20  ;;  %v1195_v54 = vrot.slane %v11802_v29, 7  ;;  %v2536_v22 = vsel %vm9210_vm3, %v2534_v16, %v2535_v40  ;;  %v7243_v59 = vunpack.c.l.bf16 %v11791_v30  ;;  %v7244_v43 = vunpack.c.l.bf16 %v11795_v21  ;;  %v7962_v8 = vld [vmem:[%s16999_s0 + $0x26c] sm:$0x3] }
 0x107   :  { %v11777_v3 = vpop.permute.xlu1 %2869  ;;  %3683 = vrot.lane.b32.xlu0 %v8527_v10, %s9152_s7  ;;  %v8591_v58 = vcombine.low %v2533_v31, %v2536_v22  ;;  %v394_v0 = vsel %vm9240_vm5, %v392_v56, %v393_v49  ;;  %v2117_v15 = vsel %vm9240_vm5, %v8175_v63, %v2116_v1  ;;  %v2119_v52 = vrot.slane %v8131_v37, 7  ;;  %v7961_v1 = vld [vmem:[%s16999_s0 + $0x268] sm:$0xf] }
 0x108   :  { %v7326_v18 = vsel %vm3965_vm6, %v7243_v59, 0.0  ;;  %v7328_v13 = vsel %vm3965_vm6, %v7244_v43, 0.0  ;;  %v8368_v12 = vcombine.low %v391_v45, %v394_v0  ;;  %v3998_v10 = vsel %vm3965_vm6, %v8326_v53, %v11527_v14  ;;  %v11867_v45 = vld [vmem:[%s16999_s0 + $0x124] sm:$0xf]  ;;  %v11880_v43 = vld [vmem:[%s16999_s0 + $0x134] sm:$0xf] }
 0x109   :  { %v11784_v6 = vpop.permute.xlu0 %3827  ;;  %8659 = vmatmul.mubr.msk.bf16.gmra.mrb[76].mxu1 %vm3965_vm6, %v8591_v58  ;;  %v7327_v11 = vadd.f32 %v7326_v18, %v11682_v9  ;;  %v2120_v34 = vsel %vm9240_vm5, %v2118_v17, %v2119_v52  ;;  %v7728_v5 = vrot.slane %v532_v57, 10  ;;  %v809_v14 = vrot.slane %v533_v39, 6  ;;  %v8250_v9 = vld [vmem:[%s16999_s0 + $0x2cc] sm:$0x3]  ;;  %v11875_v59 = vld [vmem:[%s16999_s0 + $0x2c4] sm:$0xf] }
 0x10a   :  { %2885 = vrot.lane.b32.xlu1 %v8368_v12, %s9154_s6  ;;  %v8559_v46 = vcombine.low %v2117_v15, %v2120_v34  ;;  %v812_v53 = vrot.slane %v534_v50, 6  ;;  %v8016_v40 = vrot.slane %v7960_v28, 10  ;;  %5377 = vmatprep.mubr.bf16.mxu1 %v17012_v51  ;;  %v8454_v20 = vcombine.low %v11791_v30, %v11795_v21  ;;  %v7780_v15 = vld [vmem:[%s16999_s0 + $0x260] sm:$0xf]  ;;  %v11893_v52 = vld [vmem:[%s16999_s0 + $0x264] sm:$0xf] }
 0x10b   :  { %v11826_v23 = vpop.permute.xlu1 %3029  ;;  %v11857_v38 = vadd.f32 %v7328_v13, %v7327_v11  ;;  %v1674_v36 = vrot.slane %v7961_v1, 6  ;;  %v1677_v19 = vrot.slane %v7962_v8, 6  ;;  %v810_v31 = vsel %vm9210_vm3, %v7728_v5, %v809_v14  ;;  %v11900_v28 = vld [vmem:[%s16999_s0 + $0x144] sm:$0xf]  ;;  %v8068_v8 = vld [vmem:[%s16999_s0 + $0x2c0] sm:$0xf] }
 0x10c   :  { %3843 = vrot.lane.b32.xlu0 %v8559_v46, %s9153_s20  ;;  %v811_v16 = vrot.slane %v809_v14, 4  ;;  %v8304_v49 = vrot.slane %v8248_v61, 10  ;;  %v2539_v37 = vrot.slane %v8249_v2, 6  ;;  %v17014_v30 = vrot.slane %v11867_v45, 7 }
 0x10d   :  { %v11853_v17 = vpop.permute.xlu0 %3477  ;;  %v1675_v21 = vsel %vm9210_vm3, %v8016_v40, %v1674_v36  ;;  %v1676_v56 = vrot.slane %v1674_v36, 4  ;;  %v2542_v22 = vrot.slane %v8250_v9, 6  ;;  %v17011_v57 = vrot.slane %v11880_v43, 7  ;;  %v127_v40 = vld [vmem:[%s16999_s0 + $0x210] sm:$0x8] }
 0x10e   :  { %v813_v39 = vsel %vm9210_vm3, %v811_v16, %v812_v53  ;;  %v2540_v58 = vsel %vm9210_vm3, %v8304_v49, %v2539_v37  ;;  %v2541_v0 = vrot.slane %v2539_v37, 4  ;;  %v17010_v18 = vrot.slane %v11900_v28, 7  ;;  %v64_v53 = vld [vmem:[%s16999_s0 + $0x214] sm:$0xf] }
 0x10f   :  { %v11862_v63 = vpop.permute.xlu1 %3221  ;;  %v4084_v13 = vsel %vm4062_vm7, %v3998_v10, %v11557_v55  ;;  %v8400_v12 = vcombine.low %v810_v31, %v813_v39  ;;  %v1678_v1 = vsel %vm9210_vm3, %v1676_v56, %v1677_v19  ;;  %v4256_v11 = vsel %vm3965_vm6, %v8454_v20, %v11578_v62  ;;  %v7826_v55 = vld [vmem:[%s16999_s0 + $0x110] sm:$0x8]  ;;  %v7827_v10 = vld [vmem:[%s16999_s0 + $0x118] sm:$0x7]  ;;  %v8132_v31 = vld [vmem:[%s16999_s0 + $0x2c0] sm:$0x8] }
 0x110   :  { %v8496_v34 = vcombine.low %v1675_v21, %v1678_v1  ;;  %v2543_v5 = vsel %vm9210_vm3, %v2541_v0, %v2542_v22  ;;  %v2123_v61 = vrot.slane %v11875_v59, 7  ;;  %v1197_v2 = vrot.slane %v1195_v54, 4  ;;  %v128_v19 = vld [vmem:[%s16999_s0 + $0x218] sm:$0x7]  ;;  %v11965_v22 = vld [vmem:[%s16999_s0 + $0x154] sm:$0xf] }
 0x111   :  { %v11895_v50 = vpop.permute.xlu0 %3669  ;;  %v4341_v62 = vsel %vm4062_vm7, %v4256_v11, %v11617_v48  ;;  %3045 = vrot.lane.b32.xlu1 %v8400_v12, %s9152_s7  ;;  %v8592_v46 = vcombine.low %v2540_v58, %v2543_v5  ;;  %v8432_v14 = vcombine.low %v7780_v15, %v11893_v52  ;;  %v11935_v9 = vrot.slane %v17014_v30, 4  ;;  %v8133_v15 = vld [vmem:[%s16999_s0 + $0x2c8] sm:$0x7]  ;;  %v8251_v11 = vld [vmem:[%s16999_s0 + $0x2d4] sm:$0xc] }
 0x112   :  { %v11939_v48 = vrot.slane %v17011_v57, 4  ;;  %3493 = vrot.lane.b32.xlu0 %v8496_v34, %s9154_s6  ;;  %v8528_v20 = vcombine.low %v8068_v8, %v11875_v59  ;;  %v4415_v36 = vsel %vm4127_vm8, %v4341_v62, %v11664_v25  ;;  %v11955_v49 = vrot.slane %v17010_v18, 4  ;;  %v8134_v57 = vld [vmem:[%s16999_s0 + $0x2d0] sm:$0x8] }
 0x113   :  { %8660 = vmatmul.mubr.msk.bf16.gmra.mrb[80].mxu1 %vm3965_vm6, %v8592_v46  ;;  %4924 = vmatprep.mubr.bf16.mxu0 %v4415_v36  ;;  %v4159_v25 = vsel %vm4127_vm8, %v4084_v13, %v11602_v35  ;;  %v7879_v37 = vrot.slane %v7826_v55, 11  ;;  %v1198_v21 = vrot.slane %v7827_v10, 7  ;;  %v17009_v59 = vrot.slane %v11965_v22, 7  ;;  %v43_v35 = vld [vmem:[%s16999_s0 + $0xb0] sm:$0xf] }
 0x114   :  { %v2125_v39 = vrot.slane %v2123_v61, 4  ;;  %4925 = vmatmul.mubr.bf16.gmra.mrb[40].mxu0 %v4159_v25  ;;  %v7697_v58 = vrot.slane %v127_v40, 11  ;;  %v397_v0 = vrot.slane %v64_v53, 7  ;;  %5387 = vmatprep.mubr.bf16.mxu1 %v17012_v51  ;;  %v400_v1 = vrot.slane %v128_v19, 7  ;;  %v8252_v55 = vld [vmem:[%s16999_s0 + $0x2d8] sm:$0xf] }
 0x115   :  { %v11951_v16 = vpop.permute.xlu1 %2871  ;;  %v11960_v56 = vpop.permute.xlu0 %3829  ;;  %3237 = vrot.lane.b32.xlu1 %v8432_v14, %s9153_s20  ;;  %v11980_v13 = vsel %vm9240_vm5, %v7879_v37, %v1195_v54  ;;  %v11984_v12 = vsel %vm9240_vm5, %v1197_v2, %v1198_v21  ;;  %v8176_v8 = vrot.slane %v8132_v31, 11  ;;  %v17006_v34 = vrot.slane %v11242_v47, 7  ;;  %v8253_v10 = vld [vmem:[%s16999_s0 + $0x2dc] sm:$0x3]  ;;  %v535_v53 = vld [vmem:[%s16999_s0 + $0x214] sm:$0xc] }
 0x116   :  { %v17007_v5 = vrot.slane %v11389_v33, 7  ;;  %3685 = vrot.lane.b32.xlu0 %v8528_v20, %s9152_s7  ;;  %v7245_v29 = vunpack.c.l.bf16 %v11980_v13  ;;  %v7246_v54 = vunpack.c.l.bf16 %v11984_v12  ;;  %v398_v2 = vsel %vm9240_vm5, %v7697_v58, %v397_v0  ;;  %v536_v40 = vld [vmem:[%s16999_s0 + $0x218] sm:$0xf]  ;;  %v9133_v36 = vld [vmem:[%s16999_s0 + $0xb4] sm:$0xf] }
 0x117   :  { %v399_v62 = vrot.slane %v397_v0, 4  ;;  %v2124_v46 = vsel %vm9240_vm5, %v8176_v8, %v2123_v61  ;;  %v2126_v14 = vrot.slane %v8133_v15, 7  ;;  %v8327_v19 = vcombine.low %v43_v35, %v9133_v36  ;;  %v537_v37 = vld [vmem:[%s16999_s0 + $0x21c] sm:$0x3]  ;;  %v7963_v35 = vld [vmem:[%s16999_s0 + $0x274] sm:$0xc] }
 0x118   :  { %v7330_v31 = vsel %vm3965_vm6, %v7245_v29, 0.0  ;;  %v7332_v61 = vsel %vm3965_vm6, %v7246_v54, 0.0  ;;  %v8305_v25 = vrot.slane %v8251_v11, 10  ;;  %v2546_v15 = vrot.slane %v8252_v55, 6  ;;  %v7964_v8 = vld [vmem:[%s16999_s0 + $0x278] sm:$0xf] }
 0x119   :  { %v7331_v21 = vadd.f32 %v7330_v31, %v11857_v38  ;;  %v401_v58 = vsel %vm9240_vm5, %v399_v62, %v400_v1  ;;  %v2127_v0 = vsel %vm9240_vm5, %v2125_v39, %v2126_v14  ;;  %v8455_v38 = vcombine.low %v11980_v13, %v11984_v12  ;;  %v7965_v39 = vld [vmem:[%s16999_s0 + $0x27c] sm:$0x3] }
 0x11a   :  { %v12010_v20 = vpop.permute.xlu1 %3031  ;;  %v8369_v29 = vcombine.low %v398_v2, %v401_v58  ;;  %v8560_v54 = vcombine.low %v2124_v46, %v2127_v0  ;;  %v2549_v1 = vrot.slane %v8253_v10, 6  ;;  %v2547_v62 = vsel %vm9210_vm3, %v8305_v25, %v2546_v15  ;;  %v7782_v0 = vld [vmem:[%s16999_s0 + $0x270] sm:$0xf] }
 0x11b   :  { %v12038_v55 = vadd.f32 %v7332_v61, %v7331_v21  ;;  %v2548_v14 = vrot.slane %v2546_v15, 4  ;;  %v7729_v36 = vrot.slane %v535_v53, 10  ;;  %v816_v31 = vrot.slane %v536_v40, 6  ;;  %v12061_v15 = vld [vmem:[%s16999_s0 + $0x274] sm:$0xf] }
 0x11c   :  { %v12031_v11 = vpop.permute.xlu0 %3479  ;;  %2887 = vrot.lane.b32.xlu1 %v8369_v29, %s9154_s6  ;;  %3845 = vrot.lane.b32.xlu0 %v8560_v54, %s9153_s20  ;;  %v819_v13 = vrot.slane %v537_v37, 6  ;;  %v8017_v12 = vrot.slane %v7963_v35, 10  ;;  %v1681_v2 = vrot.slane %v7964_v8, 6  ;;  %v17008_v46 = vrot.slane %v11547_v42, 7  ;;  %v12070_v8 = vld [vmem:[%s16999_s0 + $0xc0] sm:$0xf] }
 0x11d   :  { %v4001_v61 = vsel %vm3965_vm6, %v8327_v19, %v11643_v26  ;;  %v2550_v25 = vsel %vm9210_vm3, %v2548_v14, %v2549_v1  ;;  %v1684_v21 = vrot.slane %v7965_v39, 6  ;;  %v817_v40 = vsel %vm9210_vm3, %v7729_v36, %v816_v31  ;;  %v12063_v26 = vpop.f32.mrb[0].mxu1  ;;  %v8070_v29 = vld [vmem:[%s16999_s0 + $0x2d0] sm:$0xf]  ;;  %v12078_v54 = vld [vmem:[%s16999_s0 + $0x2d4] sm:$0xf] }
 0x11e   :  { %v12044_v10 = vpop.permute.xlu1 %3223  ;;  %v8593_v58 = vcombine.low %v2547_v62, %v2550_v25  ;;  %v818_v37 = vrot.slane %v816_v31, 4  ;;  %17249 = vst [vmem:[#allocation3_spill] sm:$0xff] %v12063_v26  ;;  %v1682_v19 = vsel %vm9210_vm3, %v8017_v12, %v1681_v2  ;;  %v1683_v35 = vrot.slane %v1681_v2, 4  ;;  %v8254_v1 = vld [vmem:[%s16999_s0 + $0x2e4] sm:$0xc]  ;;  %v12083_v39 = vpop.f32.mrb[1].mxu1 }
 0x11f   :  { %17250 = vst [vmem:[#allocation4_spill] sm:$0xff] %v12083_v39  ;;  %v12087_v62 = vrot.slane %v17009_v59, 4  ;;  %v4086_v14 = vsel %vm4062_vm7, %v4001_v61, %v11680_v60  ;;  %v4259_v36 = vsel %vm3965_vm6, %v8455_v38, %v11695_v41  ;;  %v8255_v12 = vld [vmem:[%s16999_s0 + $0x2e8] sm:$0xf]  ;;  %v8256_v2 = vld [vmem:[%s16999_s0 + $0x2ec] sm:$0x3] }
 0x120   :  { %v12051_v53 = vpop.permute.xlu0 %3671  ;;  %8661 = vmatmul.mubr.msk.bf16.gmra.mrb[84].mxu1 %vm3965_vm6, %v8593_v58  ;;  %v820_v31 = vsel %vm9210_vm3, %v818_v37, %v819_v13  ;;  %v12102_v25 = vpop.f32.mrb[2].mxu1  ;;  %v12106_v60 = vrot.slane %v17006_v34, 4  ;;  %v4343_v41 = vsel %vm4062_vm7, %v4259_v36, %v11746_v4  ;;  %v1685_v13 = vsel %vm9210_vm3, %v1683_v35, %v1684_v21  ;;  %v7828_v61 = vld [vmem:[%s16999_s0 + $0x120] sm:$0x8]  ;;  %v7829_v58 = vld [vmem:[%s16999_s0 + $0x128] sm:$0x7] }
 0x121   :  { %17251 = vst [vmem:[#allocation5_spill] sm:$0xff] %v12102_v25  ;;  %v8401_v38 = vcombine.low %v817_v40, %v820_v31  ;;  %5397 = vmatprep.mubr.bf16.mxu1 %v17012_v51  ;;  %v12119_v37 = vpop.f32.mrb[3].mxu1  ;;  %v12123_v44 = vrot.slane %v17007_v5, 4  ;;  %v8497_v4 = vcombine.low %v1682_v19, %v1685_v13  ;;  %v2130_v40 = vrot.slane %v12078_v54, 7  ;;  %v66_v35 = vld [vmem:[%s16999_s0 + $0x224] sm:$0xf] }
 0x122   :  { %17252 = vst [vmem:[#allocation6_spill] sm:$0xff] %v12119_v37  ;;  %v4418_v21 = vsel %vm4127_vm8, %v4343_v41, %v11784_v6  ;;  %v129_v36 = vld [vmem:[%s16999_s0 + $0x220] sm:$0x8]  ;;  %v12140_v19 = vrot.slane %v17008_v46, 4  ;;  %v8433_v6 = vcombine.low %v7782_v0, %v12061_v15  ;;  %v4162_v41 = vsel %vm4127_vm8, %v4086_v14, %v11716_v32  ;;  %v130_v5 = vld [vmem:[%s16999_s0 + $0x228] sm:$0x7] }
 0x123   :  { %17253 = vst [vmem:[#allocation7_spill] sm:$0xff] %v12123_v44  ;;  %3047 = vrot.lane.b32.xlu1 %v8401_v38, %s9152_s7  ;;  %4934 = vmatprep.mubr.bf16.mxu0 %v4418_v21  ;;  %v8306_v13 = vrot.slane %v8254_v1, 10  ;;  %v9134_v46 = vld [vmem:[%s16999_s0 + $0xc4] sm:$0xf]  ;;  %v8529_v38 = vcombine.low %v8070_v29, %v12078_v54  ;;  %v2553_v0 = vrot.slane %v8255_v12, 6  ;;  %v2556_v21 = vrot.slane %v8256_v2, 6 }
 0x124   :  { %v12134_v31 = vpop.permute.xlu1 %2873  ;;  %v12136_v34 = vpop.permute.xlu0 %3831  ;;  %17254 = vst [vmem:[#allocation8_spill] sm:$0xff] %v12140_v19  ;;  %3495 = vrot.lane.b32.xlu0 %v8497_v4, %s9154_s6  ;;  %v8328_v59 = vcombine.low %v12070_v8, %v9134_v46  ;;  %4935 = vmatmul.mubr.bf16.gmra.mrb[44].mxu0 %v4162_v41  ;;  %v7880_v18 = vrot.slane %v7828_v61, 11  ;;  %v1205_v32 = vrot.slane %v7829_v58, 7  ;;  %v7698_v1 = vrot.slane %v129_v36, 11  ;;  %v8135_v46 = vld [vmem:[%s16999_s0 + $0x2d8] sm:$0x7] }
 0x125   :  { %v404_v14 = vrot.slane %v66_v35, 7  ;;  %v2132_v4 = vrot.slane %v2130_v40, 4  ;;  %v2554_v51 = vsel %vm9210_vm3, %v8306_v13, %v2553_v0  ;;  %v2555_v30 = vrot.slane %v2553_v0, 4  ;;  %v539_v35 = vld [vmem:[%s16999_s0 + $0x228] sm:$0xf]  ;;  %v12397_v39 = vpop.f32.mrb[4].mxu1 }
 0x126   :  { %v407_v37 = vrot.slane %v130_v5, 7  ;;  %v17255_v29 = vrot.slane %v11867_v45, 7  ;;  %v12175_v12 = vsel %vm9240_vm5, %v11935_v9, %v1205_v32  ;;  %v17015_v61 = vrot.slane %v11714_v27, 7  ;;  %v538_v9 = vld [vmem:[%s16999_s0 + $0x224] sm:$0xc]  ;;  %17258 = vst [vmem:[#allocation9_spill] sm:$0xff] %v12397_v39 }
 0x127   :  { %3239 = vrot.lane.b32.xlu1 %v8433_v6, %s9153_s20  ;;  %v405_v5 = vsel %vm9240_vm5, %v7698_v1, %v404_v14  ;;  %v406_v2 = vrot.slane %v404_v14, 4  ;;  %v2557_v45 = vsel %vm9210_vm3, %v2555_v30, %v2556_v21  ;;  %v8177_v13 = vrot.slane %v8134_v57, 11  ;;  %v7966_v0 = vld [vmem:[%s16999_s0 + $0x284] sm:$0xc]  ;;  %v7968_v57 = vld [vmem:[%s16999_s0 + $0x28c] sm:$0x3] }
 0x128   :  { %v12170_v54 = vsel %vm9240_vm5, %v7880_v18, %v17255_v29  ;;  %3687 = vrot.lane.b32.xlu0 %v8529_v38, %s9152_s7  ;;  %v7248_v18 = vunpack.c.l.bf16 %v12175_v12  ;;  %v8594_v6 = vcombine.low %v2554_v51, %v2557_v45  ;;  %v2133_v30 = vrot.slane %v8135_v46, 7  ;;  %v540_v38 = vld [vmem:[%s16999_s0 + $0x22c] sm:$0x3]  ;;  %v7967_v51 = vld [vmem:[%s16999_s0 + $0x288] sm:$0xf]  ;;  %v12409_v44 = vpop.f32.mrb[5].mxu1 }
 0x129   :  { %v12163_v8 = vpop.permute.xlu1 %3033  ;;  %v7247_v58 = vunpack.c.l.bf16 %v12170_v54  ;;  %v408_v41 = vsel %vm9240_vm5, %v406_v2, %v407_v37  ;;  %v4004_v14 = vsel %vm3965_vm6, %v8328_v59, %v11777_v3  ;;  %v2131_v29 = vsel %vm9240_vm5, %v8177_v13, %v2130_v40  ;;  %v8257_v2 = vld [vmem:[%s16999_s0 + $0x2f4] sm:$0xc]  ;;  %v8258_v45 = vld [vmem:[%s16999_s0 + $0x2f8] sm:$0xf]  ;;  %v8259_v40 = vld [vmem:[%s16999_s0 + $0x2fc] sm:$0x3] }
 0x12a   :  { %v12191_v36 = vpop.permute.xlu0 %3481  ;;  %v7336_v32 = vsel %vm3965_vm6, %v7248_v18, 0.0  ;;  %v8370_v1 = vcombine.low %v405_v5, %v408_v41  ;;  %8662 = vmatmul.mubr.msk.bf16.gmra.mrb[88].mxu1 %vm3965_vm6, %v8594_v6  ;;  %v2134_v5 = vsel %vm9240_vm5, %v2132_v4, %v2133_v30  ;;  %v7730_v59 = vrot.slane %v538_v9, 10  ;;  %v7971_v25 = vld [vmem:[%s16999_s0 + $0x29c] sm:$0x3]  ;;  %17259 = vst [vmem:[#allocation10_spill] sm:$0xff] %v12409_v44 }
 0x12b   :  { %v7334_v21 = vsel %vm3965_vm6, %v7247_v58, 0.0  ;;  %v8561_v3 = vcombine.low %v2131_v29, %v2134_v5  ;;  %v823_v58 = vrot.slane %v539_v35, 6  ;;  %v17256_v18 = vmov 0   ;;  %v12259_v29 = vld [vmem:[%s16999_s0 + $0x2e4] sm:$0xf] }
 0x12c   :  { %v7335_v46 = vadd.f32 %v7334_v21, %v12038_v55  ;;  %2889 = vrot.lane.b32.xlu1 %v8370_v1, %s9154_s6  ;;  %v826_v55 = vrot.slane %v540_v38, 6  ;;  %5407 = vmatprep.mubr.bf16.mxu1 %v17256_v18  ;;  %v8018_v41 = vrot.slane %v7966_v0, 10  ;;  %v1688_v13 = vrot.slane %v7967_v51, 6  ;;  %v12242_v1 = vld [vmem:[%s16999_s0 + $0x250] sm:$0x8] }
 0x12d   :  { %v12209_v37 = vpop.permute.xlu1 %3225  ;;  %v1691_v30 = vrot.slane %v7968_v57, 6  ;;  %v8456_v21 = vcombine.low %v12170_v54, %v12175_v12  ;;  %3847 = vrot.lane.b32.xlu0 %v8561_v3, %s9153_s20  ;;  %v824_v9 = vsel %vm9210_vm3, %v7730_v59, %v823_v58  ;;  %v825_v35 = vrot.slane %v823_v58, 4  ;;  %v7784_v12 = vld [vmem:[%s16999_s0 + $0x280] sm:$0xf] }
 0x12e   :  { %v12230_v4 = vpop.permute.xlu0 %3673  ;;  %v12232_v6 = vadd.f32 %v7336_v32, %v7335_v46  ;;  %v8307_v38 = vrot.slane %v8257_v2, 10  ;;  %v1689_v0 = vsel %vm9210_vm3, %v8018_v41, %v1688_v13  ;;  %v1690_v32 = vrot.slane %v1688_v13, 4  ;;  %v12254_v46 = vld [vmem:[%s16999_s0 + $0x284] sm:$0xf]  ;;  %v12266_v2 = vld [vmem:[%s16999_s0 + $0x258] sm:$0x7] }
 0x12f   :  { %v2560_v51 = vrot.slane %v8258_v45, 6  ;;  %v2563_v57 = vrot.slane %v8259_v40, 6  ;;  %v827_v54 = vsel %vm9210_vm3, %v825_v35, %v826_v55  ;;  %v8072_v55 = vld [vmem:[%s16999_s0 + $0x2e0] sm:$0xf] }
 0x130   :  { %v8402_v45 = vcombine.low %v824_v9, %v827_v54  ;;  %v1692_v3 = vsel %vm9210_vm3, %v1690_v32, %v1691_v30  ;;  %v12281_v13 = vld [vmem:[%s16999_s0 + $0x260] sm:$0x8]  ;;  %v4088_v30 = vsel %vm4062_vm7, %v4004_v14, %v11826_v23  ;;  %v4262_v9 = vsel %vm3965_vm6, %v8456_v21, %v11853_v17  ;;  %v7831_v17 = vld [vmem:[%s16999_s0 + $0x138] sm:$0x7]  ;;  %v131_v14 = vld [vmem:[%s16999_s0 + $0x230] sm:$0x8] }
 0x131   :  { %v2561_v59 = vsel %vm9210_vm3, %v8307_v38, %v2560_v51  ;;  %v2562_v58 = vrot.slane %v2560_v51, 4  ;;  %v8498_v35 = vcombine.low %v1689_v0, %v1692_v3  ;;  %v7830_v38 = vld [vmem:[%s16999_s0 + $0x130] sm:$0x8]  ;;  %v4345_v32 = vsel %vm4062_vm7, %v4262_v9, %v11895_v50 }
 0x132   :  { %v12261_v5 = vpop.permute.xlu1 %2875  ;;  %v12275_v40 = vpop.permute.xlu0 %3833  ;;  %3049 = vrot.lane.b32.xlu1 %v8402_v45, %s9152_s7  ;;  %v8434_v54 = vcombine.low %v7784_v12, %v12254_v46  ;;  %v2137_v23 = vrot.slane %v12259_v29, 7  ;;  %v8530_v0 = vcombine.low %v8072_v55, %v12259_v29  ;;  %v68_v12 = vld [vmem:[%s16999_s0 + $0x234] sm:$0xf]  ;;  %v8136_v45 = vld [vmem:[%s16999_s0 + $0x2e0] sm:$0x8]  ;;  %v12316_v3 = vrot.slane %v17015_v61, 4 }
 0x133   :  { %v2564_v51 = vsel %vm9210_vm3, %v2562_v58, %v2563_v57  ;;  %3497 = vrot.lane.b32.xlu0 %v8498_v35, %s9154_s6  ;;  %v4421_v57 = vsel %vm4127_vm8, %v4345_v32, %v11960_v56  ;;  %v132_v29 = vld [vmem:[%s16999_s0 + $0x238] sm:$0x7]  ;;  %v8137_v56 = vld [vmem:[%s16999_s0 + $0x2e8] sm:$0x7]  ;;  %v7881_v55 = vrot.slane %v7830_v38, 11  ;;  %v1212_v9 = vrot.slane %v7831_v17, 7 }
 0x134   :  { %v8595_v50 = vcombine.low %v2561_v59, %v2564_v51  ;;  %v2139_v58 = vrot.slane %v2137_v23, 4  ;;  %4944 = vmatprep.mubr.bf16.mxu0 %v4421_v57  ;;  %v4165_v59 = vsel %vm4127_vm8, %v4088_v30, %v11862_v63  ;;  %v7699_v35 = vrot.slane %v131_v14, 11  ;;  %v8260_v32 = vld [vmem:[%s16999_s0 + $0x304] sm:$0xc]  ;;  %v8261_v63 = vld [vmem:[%s16999_s0 + $0x308] sm:$0xf] }
 0x135   :  { %4945 = vmatmul.mubr.bf16.gmra.mrb[48].mxu0 %v4165_v59  ;;  %v8178_v41 = vrot.slane %v8136_v45, 11  ;;  %v17257_v38 = vrot.slane %v11880_v43, 7  ;;  %v414_v14 = vrot.slane %v132_v29, 7  ;;  %v47_v45 = vld [vmem:[%s16999_s0 + $0xd0] sm:$0xf] }
 0x136   :  { %8663 = vmatmul.mubr.msk.bf16.gmra.mrb[92].mxu1 %vm3965_vm6, %v8595_v50  ;;  %3241 = vrot.lane.b32.xlu1 %v8434_v54, %s9153_s20  ;;  %v411_v50 = vrot.slane %v68_v12, 7  ;;  %v12350_v54 = vsel %vm9240_vm5, %v11939_v48, %v1212_v9  ;;  %v2140_v12 = vrot.slane %v8137_v56, 7  ;;  %v8262_v48 = vld [vmem:[%s16999_s0 + $0x30c] sm:$0x3]  ;;  %v541_v57 = vld [vmem:[%s16999_s0 + $0x234] sm:$0xc] }
 0x137   :  { %3689 = vrot.lane.b32.xlu0 %v8530_v0, %s9152_s7  ;;  %v12345_v17 = vsel %vm9240_vm5, %v7881_v55, %v17257_v38  ;;  %5417 = vmatprep.mubr.bf16.mxu1 %v17256_v18  ;;  %v7250_v43 = vunpack.c.l.bf16 %v12350_v54  ;;  %v8308_v55 = vrot.slane %v8260_v32, 10  ;;  %v2138_v56 = vsel %vm9240_vm5, %v8178_v41, %v2137_v23  ;;  %v543_v41 = vld [vmem:[%s16999_s0 + $0x23c] sm:$0x3]  ;;  %v7969_v23 = vld [vmem:[%s16999_s0 + $0x294] sm:$0xc] }
 0x138   :  { %v12330_v51 = vpop.permute.xlu1 %3035  ;;  %v7249_v0 = vunpack.c.l.bf16 %v12345_v17  ;;  %v412_v59 = vsel %vm9240_vm5, %v7699_v35, %v411_v50  ;;  %v413_v29 = vrot.slane %v411_v50, 4  ;;  %v2141_v9 = vsel %vm9240_vm5, %v2139_v58, %v2140_v12  ;;  %v542_v35 = vld [vmem:[%s16999_s0 + $0x238] sm:$0xf] }
 0x139   :  { %v2567_v38 = vrot.slane %v8261_v63, 6  ;;  %v7340_v50 = vsel %vm3965_vm6, %v7250_v43, 0.0  ;;  %v8562_v61 = vcombine.low %v2138_v56, %v2141_v9  ;;  %v9135_v63 = vld [vmem:[%s16999_s0 + $0xd4] sm:$0xf]  ;;  %v7970_v9 = vld [vmem:[%s16999_s0 + $0x298] sm:$0xf] }
 0x13a   :  { %v12338_v30 = vpop.permute.xlu0 %3483  ;;  %v7338_v32 = vsel %vm3965_vm6, %v7249_v0, 0.0  ;;  %v8329_v12 = vcombine.low %v47_v45, %v9135_v63  ;;  %v415_v43 = vsel %vm9240_vm5, %v413_v29, %v414_v14  ;;  %v2570_v45 = vrot.slane %v8262_v48, 6  ;;  %v12405_v14 = vld [vmem:[%s16999_s0 + $0x268] sm:$0x7] }
 0x13b   :  { %v7339_v0 = vadd.f32 %v7338_v32, %v12232_v6  ;;  %v2569_v56 = vrot.slane %v2567_v38, 4  ;;  %v8371_v26 = vcombine.low %v412_v59, %v415_v43  ;;  %3849 = vrot.lane.b32.xlu0 %v8562_v61, %s9153_s20  ;;  %v2568_v6 = vsel %vm9210_vm3, %v8308_v55, %v2567_v38 }
 0x13c   :  { %v12373_v21 = vpop.permute.xlu1 %3227  ;;  %v7731_v32 = vrot.slane %v541_v57, 10  ;;  %v830_v63 = vrot.slane %v542_v35, 6  ;;  %v833_v19 = vrot.slane %v543_v41, 6  ;;  %v8019_v42 = vrot.slane %v7969_v23, 10 }
 0x13d   :  { %v12407_v29 = vadd.f32 %v7340_v50, %v7339_v0  ;;  %v8457_v61 = vcombine.low %v12345_v17, %v12350_v54  ;;  %2891 = vrot.lane.b32.xlu1 %v8371_v26, %s9154_s6  ;;  %v2571_v57 = vsel %vm9210_vm3, %v2569_v56, %v2570_v45  ;;  %v1695_v59 = vrot.slane %v7970_v9, 6  ;;  %v7786_v0 = vld [vmem:[%s16999_s0 + $0x290] sm:$0xf]  ;;  %v12455_v9 = vld [vmem:[%s16999_s0 + $0x294] sm:$0xf] }
 0x13e   :  { %v12383_v58 = vpop.permute.xlu0 %3675  ;;  %v1698_v48 = vrot.slane %v7971_v25, 6  ;;  %v4007_v38 = vsel %vm3965_vm6, %v8329_v12, %v11951_v16  ;;  %v8596_v35 = vcombine.low %v2568_v6, %v2571_v57  ;;  %v831_v50 = vsel %vm9210_vm3, %v7731_v32, %v830_v63  ;;  %v12460_v6 = vld [vmem:[%s16999_s0 + $0x2f4] sm:$0xf]  ;;  %v8264_v45 = vld [vmem:[%s16999_s0 + $0x318] sm:$0xf] }
 0x13f   :  { %v832_v41 = vrot.slane %v830_v63, 4  ;;  %v17260_v17 = vrot.slane %v11714_v27, 7  ;;  %v17261_v26 = vrot.slane %v12242_v1, 11  ;;  %v1261_v25 = vrot.slane %v12405_v14, 7  ;;  %v8074_v27 = vld [vmem:[%s16999_s0 + $0x2f0] sm:$0xf] }
 0x140   :  { %v1696_v16 = vsel %vm9210_vm3, %v8019_v42, %v1695_v59  ;;  %v1697_v12 = vrot.slane %v1695_v59, 4  ;;  %v17263_v1 = vrot.slane %v11893_v52, 7  ;;  %v17264_v43 = vrot.slane %v12281_v13, 11  ;;  %8664 = vmatmul.mubr.msk.bf16.gmra.mrb[96].mxu1 %vm3965_vm6, %v8596_v35  ;;  %v8263_v13 = vld [vmem:[%s16999_s0 + $0x314] sm:$0xc]  ;;  %v12481_v35 = vpop.f32.mrb[6].mxu1 }
 0x141   :  { %v12416_v55 = vpop.permute.xlu1 %2877  ;;  %v12430_v54 = vsel %vm9240_vm5, %v17261_v26, %v17260_v17  ;;  %v834_v42 = vsel %vm9210_vm3, %v832_v41, %v833_v19  ;;  %v4090_v19 = vsel %vm4062_vm7, %v4007_v38, %v12010_v20  ;;  %v4265_v32 = vsel %vm3965_vm6, %v8457_v61, %v12031_v11  ;;  %5427 = vmatprep.mubr.bf16.mxu1 %v17256_v18  ;;  %v8265_v57 = vld [vmem:[%s16999_s0 + $0x31c] sm:$0x3]  ;;  %v7832_v59 = vld [vmem:[%s16999_s0 + $0x140] sm:$0x8]  ;;  %v12494_v17 = vpop.f32.mrb[7].mxu1 }
 0x142   :  { %v12422_v23 = vpop.permute.xlu0 %3835  ;;  %17262 = vst [vmem:[#allocation11_spill] sm:$0xff] %v12430_v54  ;;  %v12447_v56 = vsel %vm9240_vm5, %v17264_v43, %v17263_v1  ;;  %v8403_v14 = vcombine.low %v831_v50, %v834_v42  ;;  %v1699_v63 = vsel %vm9210_vm3, %v1697_v12, %v1698_v48  ;;  %17266 = vst [vmem:[#allocation13_spill] sm:$0xff] %v12481_v35  ;;  %v17267_v11 = vmov %v17263_v1  ;;  %v7833_v50 = vld [vmem:[%s16999_s0 + $0x148] sm:$0x7]  ;;  %v133_v41 = vld [vmem:[%s16999_s0 + $0x240] sm:$0x8] }
 0x143   :  { %17265 = vst [vmem:[#allocation12_spill] sm:$0xff] %v12447_v56  ;;  %v1260_v61 = vrot.slane %v17267_v11, 4  ;;  %v4347_v48 = vsel %vm4062_vm7, %v4265_v32, %v12051_v53  ;;  %v8499_v38 = vcombine.low %v1696_v16, %v1699_v63  ;;  %17268 = vst [vmem:[#allocation14_spill] sm:$0xff] %v12494_v17  ;;  %v8435_v52 = vcombine.low %v7786_v0, %v12455_v9  ;;  %v70_v16 = vld [vmem:[%s16999_s0 + $0x244] sm:$0xf] }
 0x144   :  { %3051 = vrot.lane.b32.xlu1 %v8403_v14, %s9152_s7  ;;  %v2144_v12 = vrot.slane %v12460_v6, 7  ;;  %v4424_v53 = vsel %vm4127_vm8, %v4347_v48, %v12136_v34  ;;  %v8531_v43 = vcombine.low %v8074_v27, %v12460_v6  ;;  %v4168_v42 = vsel %vm4127_vm8, %v4090_v19, %v12044_v10  ;;  %v134_v34 = vld [vmem:[%s16999_s0 + $0x248] sm:$0x7]  ;;  %v8138_v14 = vld [vmem:[%s16999_s0 + $0x2f0] sm:$0x8] }
 0x145   :  { %3499 = vrot.lane.b32.xlu0 %v8499_v38, %s9154_s6  ;;  %4954 = vmatprep.mubr.bf16.mxu0 %v4424_v53  ;;  %v8309_v0 = vrot.slane %v8263_v13, 10  ;;  %v2574_v32 = vrot.slane %v8264_v45, 6  ;;  %v2577_v11 = vrot.slane %v8265_v57, 6  ;;  %v7882_v48 = vrot.slane %v7832_v59, 11  ;;  %v49_v13 = vld [vmem:[%s16999_s0 + $0xe0] sm:$0xf] }
 0x146   :  { %4955 = vmatmul.mubr.bf16.gmra.mrb[52].mxu0 %v4168_v42  ;;  %v1219_v27 = vrot.slane %v7833_v50, 7  ;;  %v7700_v6 = vrot.slane %v133_v41, 11  ;;  %v12521_v10 = vsel %vm9240_vm5, %v1260_v61, %v1261_v25  ;;  %v418_v38 = vrot.slane %v70_v16, 7  ;;  %v8139_v50 = vld [vmem:[%s16999_s0 + $0x2f8] sm:$0x7] }
 0x147   :  { %v12505_v1 = vpop.permute.xlu1 %3037  ;;  %17269 = vst [vmem:[#allocation15_spill] sm:$0xff] %v12521_v10  ;;  %v2575_v45 = vsel %vm9210_vm3, %v8309_v0, %v2574_v32  ;;  %v2576_v19 = vrot.slane %v2574_v32, 4  ;;  %v17270_v57 = vrot.slane %v11900_v28, 7  ;;  %v421_v61 = vrot.slane %v134_v34, 7  ;;  %v545_v0 = vld [vmem:[%s16999_s0 + $0x248] sm:$0xf] }
 0x148   :  { %v12517_v63 = vpop.permute.xlu0 %3485  ;;  %3243 = vrot.lane.b32.xlu1 %v8435_v52, %s9153_s20  ;;  %v1220_v25 = vsel %vm9240_vm5, %v11955_v49, %v1219_v27  ;;  %v8179_v41 = vrot.slane %v8138_v14, 11  ;;  %v2146_v16 = vrot.slane %v2144_v12, 4  ;;  %v544_v49 = vld [vmem:[%s16999_s0 + $0x244] sm:$0xc]  ;;  %v546_v27 = vld [vmem:[%s16999_s0 + $0x24c] sm:$0x3] }
 0x149   :  { %v1217_v59 = vsel %vm9240_vm5, %v7882_v48, %v17270_v57  ;;  %3691 = vrot.lane.b32.xlu0 %v8531_v43, %s9152_s7  ;;  %v2578_v28 = vsel %vm9210_vm3, %v2576_v19, %v2577_v11  ;;  %v7252_v42 = vunpack.c.l.bf16 %v1220_v25  ;;  %v9136_v34 = vld [vmem:[%s16999_s0 + $0xe4] sm:$0xf]  ;;  %v419_v11 = vsel %vm9240_vm5, %v7700_v6, %v418_v38  ;;  %v7973_v6 = vld [vmem:[%s16999_s0 + $0x2a8] sm:$0xf] }
 0x14a   :  { %v7251_v52 = vunpack.c.l.bf16 %v1217_v59  ;;  %v8330_v43 = vcombine.low %v49_v13, %v9136_v34  ;;  %v8597_v14 = vcombine.low %v2575_v45, %v2578_v28  ;;  %v420_v48 = vrot.slane %v418_v38, 4  ;;  %v7972_v19 = vld [vmem:[%s16999_s0 + $0x2a4] sm:$0xc] }
 0x14b   :  { %v12539_v53 = vpop.permute.xlu1 %3229  ;;  %v7344_v20 = vsel %vm3965_vm6, %v7252_v42, 0.0  ;;  %v2145_v13 = vsel %vm9240_vm5, %v8179_v41, %v2144_v12  ;;  %v2147_v45 = vrot.slane %v8139_v50, 7  ;;  %v8458_v38 = vcombine.low %v1217_v59, %v1220_v25  ;;  %v8267_v59 = vld [vmem:[%s16999_s0 + $0x328] sm:$0xf] }
 0x14c   :  { %v12550_v32 = vpop.permute.xlu0 %3677  ;;  %v7342_v57 = vsel %vm3965_vm6, %v7251_v52, 0.0  ;;  %8665 = vmatmul.mubr.msk.bf16.gmra.mrb[100].mxu1 %vm3965_vm6, %v8597_v14  ;;  %v422_v34 = vsel %vm9240_vm5, %v420_v48, %v421_v61  ;;  %v7732_v26 = vrot.slane %v544_v49, 10  ;;  %v7974_v52 = vld [vmem:[%s16999_s0 + $0x2ac] sm:$0x3]  ;;  %v837_v50 = vrot.slane %v545_v0, 6 }
 0x14d   :  { %v7343_v28 = vadd.f32 %v7342_v57, %v12407_v29  ;;  %v8372_v42 = vcombine.low %v419_v11, %v422_v34  ;;  %v2148_v12 = vsel %vm9240_vm5, %v2146_v16, %v2147_v45  ;;  %v840_v41 = vrot.slane %v546_v27, 6  ;;  %5437 = vmatprep.mubr.bf16.mxu1 %v17256_v18  ;;  %v8266_v29 = vld [vmem:[%s16999_s0 + $0x324] sm:$0xc]  ;;  %v8268_v16 = vld [vmem:[%s16999_s0 + $0x32c] sm:$0x3] }
 0x14e   :  { %v8563_v61 = vcombine.low %v2145_v13, %v2148_v12  ;;  %v8020_v49 = vrot.slane %v7972_v19, 10  ;;  %v1702_v14 = vrot.slane %v7973_v6, 6  ;;  %v4010_v11 = vsel %vm3965_vm6, %v8330_v43, %v12134_v31  ;;  %v12606_v31 = vld [vmem:[%s16999_s0 + $0x270] sm:$0x8]  ;;  %v12624_v12 = vld [vmem:[%s16999_s0 + $0x278] sm:$0x7] }
 0x14f   :  { %v12586_v25 = vadd.f32 %v7344_v20, %v7343_v28  ;;  %2893 = vrot.lane.b32.xlu1 %v8372_v42, %s9154_s6  ;;  %v838_v48 = vsel %vm9210_vm3, %v7732_v26, %v837_v50  ;;  %v839_v27 = vrot.slane %v837_v50, 4  ;;  %v1705_v20 = vrot.slane %v7974_v52, 6  ;;  %v7788_v52 = vld [vmem:[%s16999_s0 + $0x2a0] sm:$0xf]  ;;  %v12619_v42 = vld [vmem:[%s16999_s0 + $0x304] sm:$0xf] }
 0x150   :  { %v12598_v57 = vpop.permute.xlu0 %3837  ;;  %3851 = vrot.lane.b32.xlu0 %v8563_v61, %s9153_s20  ;;  %v1703_v19 = vsel %vm9210_vm3, %v8020_v49, %v1702_v14  ;;  %v1704_v13 = vrot.slane %v1702_v14, 4  ;;  %v8310_v45 = vrot.slane %v8266_v29, 10  ;;  %v2581_v6 = vrot.slane %v8267_v59, 6  ;;  %v8076_v29 = vld [vmem:[%s16999_s0 + $0x300] sm:$0xf] }
 0x151   :  { %v12591_v0 = vpop.permute.xlu1 %2879  ;;  %v1265_v43 = vrot.slane %v12061_v15, 7  ;;  %v4268_v26 = vsel %vm3965_vm6, %v8458_v38, %v12191_v36  ;;  %v841_v28 = vsel %vm9210_vm3, %v839_v27, %v840_v41  ;;  %v2584_v34 = vrot.slane %v8268_v16, 6  ;;  %v12755_v15 = vld [vmem:[%s16999_s0 + $0x288] sm:$0x7] }
 0x152   :  { %v8404_v50 = vcombine.low %v838_v48, %v841_v28  ;;  %v1706_v36 = vsel %vm9210_vm3, %v1704_v13, %v1705_v20  ;;  %v2582_v38 = vsel %vm9210_vm3, %v8310_v45, %v2581_v6  ;;  %v2583_v41 = vrot.slane %v2581_v6, 4  ;;  %v12647_v48 = vld [vmem:[%s16999_s0 + $0x2a4] sm:$0xf]  ;;  %v135_v13 = vld [vmem:[%s16999_s0 + $0x250] sm:$0x8] }
 0x153   :  { %v17271_v59 = vrot.slane %v12266_v2, 7  ;;  %v4092_v49 = vsel %vm4062_vm7, %v4010_v11, %v12163_v8  ;;  %v4349_v14 = vsel %vm4062_vm7, %v4268_v26, %v12230_v4  ;;  %v8500_v16 = vcombine.low %v1703_v19, %v1706_v36  ;;  %v7834_v2 = vld [vmem:[%s16999_s0 + $0x150] sm:$0x8]  ;;  %v72_v19 = vld [vmem:[%s16999_s0 + $0x254] sm:$0xf] }
 0x154   :  { %3053 = vrot.lane.b32.xlu1 %v8404_v50, %s9152_s7  ;;  %v2585_v8 = vsel %vm9210_vm3, %v2583_v41, %v2584_v34  ;;  %v8436_v4 = vcombine.low %v7788_v52, %v12647_v48  ;;  %v2151_v11 = vrot.slane %v12619_v42, 7  ;;  %v4427_v20 = vsel %vm4127_vm8, %v4349_v14, %v12275_v40  ;;  %v12681_v40 = vld [vmem:[%s16999_s0 + $0x280] sm:$0x8]  ;;  %v136_v50 = vld [vmem:[%s16999_s0 + $0x258] sm:$0x7] }
 0x155   :  { %v12638_v61 = vsel %vm9240_vm5, %v12316_v3, %v17271_v59  ;;  %v7835_v3 = vld [vmem:[%s16999_s0 + $0x158] sm:$0x7]  ;;  %v17273_v26 = vunpack.c.l.bf16 %v12447_v56  ;;  %3501 = vrot.lane.b32.xlu0 %v8500_v16, %s9154_s6  ;;  %v8598_v34 = vcombine.low %v2582_v38, %v2585_v8  ;;  %v8532_v52 = vcombine.low %v8076_v29, %v12619_v42  ;;  %4964 = vmatprep.mubr.bf16.mxu0 %v4427_v20  ;;  %v8140_v42 = vld [vmem:[%s16999_s0 + $0x300] sm:$0x8]  ;;  %v8141_v20 = vld [vmem:[%s16999_s0 + $0x308] sm:$0x7] }
 0x156   :  { %v12655_v27 = vpop.permute.xlu1 %3039  ;;  %v7889_v59 = vrot.slane %v12606_v31, 11  ;;  %v7883_v16 = vrot.slane %v7834_v2, 11  ;;  %v12701_v38 = vrot.slane %v1265_v43, 4  ;;  %v1226_v29 = vrot.slane %v7835_v3, 7 }
 0x157   :  { %v12676_v28 = vsel %vm3965_vm6, %v17273_v26, 0.0  ;;  %v4171_v26 = vsel %vm4127_vm8, %v4092_v49, %v12209_v37  ;;  %8666 = vmatmul.mubr.msk.bf16.gmra.mrb[104].mxu1 %vm3965_vm6, %v8598_v34  ;;  %v7701_v8 = vrot.slane %v135_v13, 11  ;;  %v425_v31 = vrot.slane %v72_v19, 7  ;;  %v8269_v19 = vld [vmem:[%s16999_s0 + $0x334] sm:$0xc] }
 0x158   :  { %17274 = vst [vmem:[#allocation17_spill] sm:$0xff] %v12676_v28  ;;  %v12688_v36 = vpop.permute.xlu0 %3487  ;;  %4965 = vmatmul.mubr.bf16.gmra.mrb[56].mxu0 %v4171_v26  ;;  %3245 = vrot.lane.b32.xlu1 %v8436_v4, %s9153_s20  ;;  %v2153_v2 = vrot.slane %v2151_v11, 4  ;;  %v17276_v14 = vrot.slane %v11965_v22, 7  ;;  %v428_v3 = vrot.slane %v136_v50, 7  ;;  %v51_v13 = vld [vmem:[%s16999_s0 + $0xf0] sm:$0xf]  ;;  %v12728_v22 = vsel %vm9240_vm5, %v12087_v62, %v1226_v29 }
 0x159   :  { %5447 = vmatprep.mubr.bf16.mxu1 %v17256_v18  ;;  %3693 = vrot.lane.b32.xlu0 %v8532_v52, %s9152_s7  ;;  %v426_v50 = vsel %vm9240_vm5, %v7701_v8, %v425_v31  ;;  %v8270_v26 = vld [vmem:[%s16999_s0 + $0x338] sm:$0xf]  ;;  %v12742_v52 = vsel %vm9240_vm5, %v7889_v59, %v1265_v43  ;;  %v7254_v29 = vunpack.c.l.bf16 %v12728_v22  ;;  %v8180_v6 = vrot.slane %v8140_v42, 11  ;;  %v8271_v8 = vld [vmem:[%s16999_s0 + $0x33c] sm:$0x3] }
 0x15a   :  { %v12707_v37 = vpop.permute.xlu1 %3231  ;;  %v12715_v34 = vsel %vm9240_vm5, %v7883_v16, %v17276_v14  ;;  %v427_v14 = vrot.slane %v425_v31, 4  ;;  %17277 = vst [vmem:[#allocation19_spill] sm:$0xff] %v12742_v52  ;;  %v547_v31 = vld [vmem:[%s16999_s0 + $0x254] sm:$0xc]  ;;  %v2154_v62 = vrot.slane %v8141_v20, 7  ;;  %v8311_v42 = vrot.slane %v8269_v19, 10 }
 0x15b   :  { %v12670_v45 = vpop.f32.mrb[0].mxu0  ;;  %v7253_v4 = vunpack.c.l.bf16 %v12715_v34  ;;  %v548_v49 = vld [vmem:[%s16999_s0 + $0x258] sm:$0xf]  ;;  %v17278_v56 = vrot.slane %v12254_v46, 7  ;;  %v7348_v44 = vsel %vm3965_vm6, %v7254_v29, 0.0  ;;  %v1275_v54 = vrot.slane %v12755_v15, 7 }
 0x15c   :  { %17272 = vst [vmem:[#allocation16_spill] sm:$0xff] %v12670_v45  ;;  %v12690_v41 = vpop.f32.mrb[1].mxu0  ;;  %v12736_v16 = vpop.permute.xlu0 %3679  ;;  %v429_v59 = vsel %vm9240_vm5, %v427_v14, %v428_v3  ;;  %v7975_v20 = vld [vmem:[%s16999_s0 + $0x2b4] sm:$0xc]  ;;  %v2152_v3 = vsel %vm9240_vm5, %v8180_v6, %v2151_v11  ;;  %v2155_v19 = vsel %vm9240_vm5, %v2153_v2, %v2154_v62  ;;  %v2591_v14 = vrot.slane %v8271_v8, 6 }
 0x15d   :  { %17275 = vst [vmem:[#allocation18_spill] sm:$0xff] %v12690_v41  ;;  %v7346_v43 = vsel %vm3965_vm6, %v7253_v4, 0.0  ;;  %v1274_v17 = vrot.slane %v17278_v56, 4  ;;  %v8373_v39 = vcombine.low %v426_v50, %v429_v59  ;;  %v549_v4 = vld [vmem:[%s16999_s0 + $0x25c] sm:$0x3]  ;;  %v2588_v56 = vrot.slane %v8270_v26, 6 }
 0x15e   :  { %v7347_v35 = vadd.f32 %v7346_v43, %v12586_v25  ;;  %v7976_v25 = vld [vmem:[%s16999_s0 + $0x2b8] sm:$0xf]  ;;  %v7977_v50 = vld [vmem:[%s16999_s0 + $0x2bc] sm:$0x3]  ;;  %v9137_v11 = vld [vmem:[%s16999_s0 + $0xf4] sm:$0xf]  ;;  %v8564_v26 = vcombine.low %v2152_v3, %v2155_v19 }
 0x15f   :  { %v8331_v6 = vcombine.low %v51_v13, %v9137_v11  ;;  %2895 = vrot.lane.b32.xlu1 %v8373_v39, %s9154_s6  ;;  %v7733_v62 = vrot.slane %v547_v31, 10  ;;  %v2589_v8 = vsel %vm9210_vm3, %v8311_v42, %v2588_v56  ;;  %v2590_v59 = vrot.slane %v2588_v56, 4  ;;  %v12797_v45 = vpop.f32.mrb[8].mxu1 }
 0x160   :  { %v12783_v29 = vpop.permute.xlu1 %2881  ;;  %v12785_v43 = vpop.permute.xlu0 %3839  ;;  %v12790_v2 = vadd.f32 %v7348_v44, %v7347_v35  ;;  %v844_v28 = vrot.slane %v548_v49, 6  ;;  %v847_v41 = vrot.slane %v549_v4, 6  ;;  %17280 = vst [vmem:[#allocation21_spill] sm:$0xff] %v12797_v45  ;;  %3853 = vrot.lane.b32.xlu0 %v8564_v26, %s9153_s20  ;;  %v8021_v44 = vrot.slane %v7975_v20, 10  ;;  %v12816_v20 = vld [vmem:[%s16999_s0 + $0x290] sm:$0x8] }
 0x161   :  { %17279 = vst [vmem:[#allocation20_spill] sm:$0xff] %v12783_v29  ;;  %v12795_v29 = vpop.f32.mrb[2].mxu0  ;;  %v1709_v35 = vrot.slane %v7976_v25, 6  ;;  %v1712_v13 = vrot.slane %v7977_v50, 6  ;;  %v12803_v31 = vpop.f32.mrb[9].mxu1  ;;  %v8459_v42 = vcombine.low %v12715_v34, %v12728_v22  ;;  %v2592_v49 = vsel %vm9210_vm3, %v2590_v59, %v2591_v14 }
 0x162   :  { %v12801_v39 = vpop.f32.mrb[3].mxu0  ;;  %17281 = vst [vmem:[#allocation22_spill] sm:$0xff] %v12803_v31  ;;  %v845_v4 = vsel %vm9210_vm3, %v7733_v62, %v844_v28  ;;  %v846_v3 = vrot.slane %v844_v28, 4  ;;  %v12811_v15 = vpop.f32.mrb[10].mxu1  ;;  %v4013_v19 = vsel %vm3965_vm6, %v8331_v6, %v12261_v5  ;;  %v8599_v56 = vcombine.low %v2589_v8, %v2592_v49  ;;  %v12841_v6 = vld [vmem:[%s16999_s0 + $0x298] sm:$0x7] }
 0x163   :  { %17282 = vst [vmem:[#allocation23_spill] sm:$0xff] %v12811_v15  ;;  %v1710_v34 = vsel %vm9210_vm3, %v8021_v44, %v1709_v35  ;;  %v1711_v22 = vrot.slane %v1709_v35, 4  ;;  %v12824_v25 = vpop.f32.mrb[11].mxu1  ;;  %v17284_v28 = vunpack.c.l.bf16 %v12521_v10  ;;  %v17285_v11 = vrot.slane %v12624_v12, 7  ;;  %v7790_v8 = vld [vmem:[%s16999_s0 + $0x2b0] sm:$0xf] }
 0x164   :  { %17283 = vst [vmem:[#allocation24_spill] sm:$0xff] %v12824_v25  ;;  %v1279_v26 = vrot.slane %v12455_v9, 7  ;;  %v848_v62 = vsel %vm9210_vm3, %v846_v3, %v847_v41  ;;  %v7265_v59 = vunpack.c.l.bf16 %v12742_v52  ;;  %v17288_v44 = vrot.slane %v12681_v40, 11  ;;  %8667 = vmatmul.mubr.msk.bf16.gmra.mrb[108].mxu1 %vm3965_vm6, %v8599_v56  ;;  %v8078_v49 = vld [vmem:[%s16999_s0 + $0x310] sm:$0xf]  ;;  %v12871_v40 = vpop.f32.mrb[12].mxu1 }
 0x165   :  { %v12822_v14 = vpop.permute.xlu1 %3041  ;;  %v12829_v50 = vsel %vm3965_vm6, %v17284_v28, 0.0  ;;  %v12836_v5 = vsel %vm9240_vm5, %v12701_v38, %v17285_v11  ;;  %v17287_v38 = vrot.slane %v12254_v46, 7  ;;  %v8405_v9 = vcombine.low %v845_v4, %v848_v62  ;;  %v12869_v46 = vld [vmem:[%s16999_s0 + $0x314] sm:$0xf]  ;;  %17290 = vst [vmem:[#allocation27_spill] sm:$0xff] %v12871_v40  ;;  %5457 = vmatprep.mubr.bf16.mxu1 %v17256_v18 }
 0x166   :  { %17286 = vst [vmem:[#allocation25_spill] sm:$0xff] %v12836_v5  ;;  %v12849_v12 = vpop.permute.xlu0 %3489  ;;  %v1713_v41 = vsel %vm9210_vm3, %v1711_v22, %v1712_v13  ;;  %v12877_v56 = vsel %vm9240_vm5, %v1274_v17, %v1275_v54  ;;  %v4094_v13 = vsel %vm4062_vm7, %v4013_v19, %v12330_v51  ;;  %v4271_v4 = vsel %vm3965_vm6, %v8459_v42, %v12338_v30  ;;  %v12886_v28 = vld [vmem:[%s16999_s0 + $0x2b4] sm:$0xf]  ;;  %v8272_v11 = vld [vmem:[%s16999_s0 + $0x344] sm:$0xc]  ;;  %v12892_v54 = vpop.f32.mrb[13].mxu1 }
 0x167   :  { %v12858_v35 = vsel %vm9240_vm5, %v17288_v44, %v17287_v38  ;;  %v12873_v3 = vpop.f32.mrb[4].mxu0  ;;  %17292 = vst [vmem:[#allocation29_spill] sm:$0xff] %v12877_v56  ;;  %v8501_v22 = vcombine.low %v1710_v34, %v1713_v41  ;;  %17293 = vst [vmem:[#allocation30_spill] sm:$0xff] %v12892_v54  ;;  %v7266_v17 = vunpack.c.l.bf16 %v12836_v5  ;;  %v7891_v51 = vrot.slane %v12816_v20, 11  ;;  %3055 = vrot.lane.b32.xlu1 %v8405_v9, %s9152_s7  ;;  %v8273_v19 = vld [vmem:[%s16999_s0 + $0x348] sm:$0xf] }
 0x168   :  { %17289 = vst [vmem:[#allocation26_spill] sm:$0xff] %v12858_v35  ;;  %17291 = vst [vmem:[#allocation28_spill] sm:$0xff] %v12873_v3  ;;  %v4351_v30 = vsel %vm4062_vm7, %v4271_v4, %v12383_v58  ;;  %v8437_v42 = vcombine.low %v7790_v8, %v12886_v28  ;;  %v8274_v34 = vld [vmem:[%s16999_s0 + $0x34c] sm:$0x3]  ;;  %v12908_v38 = vpop.f32.mrb[5].mxu0  ;;  %v1281_v20 = vrot.slane %v1279_v26, 4  ;;  %v8533_v58 = vcombine.low %v8078_v49, %v12869_v46 }
 0x169   :  { %v12906_v62 = vpop.permute.xlu1 %3233  ;;  %17295 = vst [vmem:[#allocation32_spill] sm:$0xff] %v12908_v38  ;;  %v1282_v44 = vrot.slane %v12841_v6, 7  ;;  %3503 = vrot.lane.b32.xlu0 %v8501_v22, %s9154_s6  ;;  %v4430_v8 = vsel %vm4127_vm8, %v4351_v30, %v12422_v23  ;;  %v12918_v9 = vld [vmem:[%s16999_s0 + $0x220] sm:$0x8]  ;;  %v12923_v41 = vld [vmem:[%s16999_s0 + $0x228] sm:$0x7]  ;;  %v7267_v22 = vunpack.c.l.bf16 %v12858_v35  ;;  %v7268_v30 = vunpack.c.l.bf16 %v12877_v56 }
 0x16a   :  { %17294 = vst [vmem:[#allocation31_spill] sm:$0xff] %v12906_v62  ;;  %v137_v6 = vld [vmem:[%s16999_s0 + $0x260] sm:$0x8]  ;;  %v12928_v4 = vpop.permute.xlu0 %3681  ;;  %v12930_v49 = vpop.f32.mrb[14].mxu1  ;;  %4974 = vmatprep.mubr.bf16.mxu0 %v4430_v8  ;;  %v4174_v52 = vsel %vm4127_vm8, %v4094_v13, %v12373_v21  ;;  %v74_v5 = vld [vmem:[%s16999_s0 + $0x264] sm:$0xf]  ;;  %v12960_v10 = vsel %vm9240_vm5, %v7891_v51, %v1279_v26 }
 0x16b   :  { %17296 = vst [vmem:[#allocation33_spill] sm:$0xff] %v12930_v49  ;;  %v138_v54 = vld [vmem:[%s16999_s0 + $0x268] sm:$0x7]  ;;  %v12943_v40 = vpop.f32.mrb[6].mxu0  ;;  %v12945_v49 = vpop.f32.mrb[15].mxu1  ;;  %v2158_v23 = vrot.slane %v12869_v46, 7  ;;  %4975 = vmatmul.mubr.bf16.gmra.mrb[60].mxu0 %v4174_v52  ;;  %3247 = vrot.lane.b32.xlu1 %v8437_v42, %s9153_s20 }
 0x16c   :  { %17297 = vst [vmem:[#allocation34_spill] sm:$0xff] %v12943_v40  ;;  %17298 = vst [vmem:[#allocation35_spill] sm:$0xff] %v12945_v49  ;;  %v8312_v35 = vrot.slane %v8272_v11, 10  ;;  %v2595_v8 = vrot.slane %v8273_v19, 6  ;;  %v2598_v56 = vrot.slane %v8274_v34, 6  ;;  %v12948_v25 = vpop.f32.mrb[7].mxu0 }
 0x16d   :  { %17299 = vst [vmem:[#allocation36_spill] sm:$0xff] %v12948_v25  ;;  %v12950_v21 = vpop.f32.mrb[16].mxu1  ;;  %v12953_v13 = vsel %vm3965_vm6, %v7265_v59, 0.0  ;;  %v12956_v15 = vsel %vm3965_vm6, %v7266_v17, 0.0  ;;  %v12965_v52 = vld [vmem:[%s16999_s0 + $0x2a0] sm:$0x8]  ;;  %v12972_v59 = vsel %vm9240_vm5, %v1281_v20, %v1282_v44  ;;  %3695 = vrot.lane.b32.xlu0 %v8533_v58, %s9152_s7 }
 0x16e   :  { %17300 = vst [vmem:[#allocation37_spill] sm:$0xff] %v12950_v21  ;;  %v7702_v46 = vrot.slane %v137_v6, 11  ;;  %v12968_v11 = vpop.f32.mrb[17].mxu1  ;;  %v12977_v17 = vld [vmem:[%s16999_s0 + $0x1c0] sm:$0xf]  ;;  %v2596_v26 = vsel %vm9210_vm3, %v8312_v35, %v2595_v8  ;;  %v2597_v51 = vrot.slane %v2595_v8, 4  ;;  %v12996_v35 = vpop.permute.xlu1 %2883 }
 0x16f   :  { %17301 = vst [vmem:[#allocation38_spill] sm:$0xff] %v12968_v11  ;;  %v432_v19 = vrot.slane %v74_v5, 7  ;;  %v8142_v42 = vld [vmem:[%s16999_s0 + $0x310] sm:$0x8]  ;;  %v8143_v34 = vld [vmem:[%s16999_s0 + $0x318] sm:$0x7]  ;;  %v12998_v8 = vpop.permute.xlu0 %3841 }
 0x170   :  { %v12989_v20 = vsel %vm3965_vm6, %v7267_v22, 0.0  ;;  %v7884_v44 = vrot.slane %v12918_v9, 11  ;;  %v1233_v58 = vrot.slane %v12923_v41, 7  ;;  %v435_v6 = vrot.slane %v138_v54, 7  ;;  %v550_v5 = vld [vmem:[%s16999_s0 + $0x264] sm:$0xc] }
 0x171   :  { %v13001_v11 = vsel %vm3965_vm6, %v7268_v30, 0.0  ;;  %v2160_v22 = vrot.slane %v2158_v23, 4  ;;  %v2599_v9 = vsel %vm9210_vm3, %v2597_v51, %v2598_v56  ;;  %v551_v54 = vld [vmem:[%s16999_s0 + $0x268] sm:$0xf]  ;;  %v552_v41 = vld [vmem:[%s16999_s0 + $0x26c] sm:$0x3]  ;;  %v433_v56 = vsel %vm9240_vm5, %v7702_v46, %v432_v19 }
 0x172   :  { %v7978_v49 = vld [vmem:[%s16999_s0 + $0x2c4] sm:$0xc]  ;;  %v13015_v30 = vpop.f32.mrb[18].mxu1  ;;  %v8600_v45 = vcombine.low %v2596_v26, %v2599_v9  ;;  %v434_v51 = vrot.slane %v432_v19, 4  ;;  %v7979_v25 = vld [vmem:[%s16999_s0 + $0x2c8] sm:$0xf] }
 0x173   :  { %17302 = vst [vmem:[#allocation39_spill] sm:$0xff] %v13015_v30  ;;  %v13017_v31 = vpop.f32.mrb[8].mxu0  ;;  %v13025_v40 = vpop.f32.mrb[19].mxu1  ;;  %v7892_v3 = vrot.slane %v12965_v52, 11  ;;  %v2161_v62 = vrot.slane %v8143_v34, 7  ;;  %v17307_v19 = vrot.slane %v11242_v47, 7  ;;  %v13047_v52 = vsel %vm9240_vm5, %v12106_v60, %v1233_v58 }
 0x174   :  { %17303 = vst [vmem:[#allocation40_spill] sm:$0xff] %v13017_v31  ;;  %17304 = vst [vmem:[#allocation41_spill] sm:$0xff] %v13025_v40  ;;  %v13027_v38 = vpop.f32.mrb[9].mxu0  ;;  %v8181_v31 = vrot.slane %v8142_v42, 11  ;;  %v9138_v46 = vld [vmem:[%s16999_s0 + $0x1c4] sm:$0xf]  ;;  %8668 = vmatmul.mubr.msk.bf16.gmra.mrb[112].mxu1 %vm3965_vm6, %v8600_v45  ;;  %v436_v42 = vsel %vm9240_vm5, %v434_v51, %v435_v6  ;;  %v13072_v40 = vpop.permute.xlu1 %3043 }
 0x175   :  { %17305 = vst [vmem:[#allocation42_spill] sm:$0xff] %v13027_v38  ;;  %v13031_v21 = vpop.f32.mrb[10].mxu0  ;;  %v8332_v26 = vcombine.low %v12977_v17, %v9138_v46  ;;  %v13042_v9 = vsel %vm9240_vm5, %v7884_v44, %v17307_v19  ;;  %v7980_v17 = vld [vmem:[%s16999_s0 + $0x2cc] sm:$0x3]  ;;  %v8275_v47 = vld [vmem:[%s16999_s0 + $0x354] sm:$0xc]  ;;  %v8374_v34 = vcombine.low %v433_v56, %v436_v42  ;;  %v2162_v44 = vsel %vm9240_vm5, %v2160_v22, %v2161_v62 }
 0x176   :  { %17306 = vst [vmem:[#allocation43_spill] sm:$0xff] %v13031_v21  ;;  %v8276_v45 = vld [vmem:[%s16999_s0 + $0x358] sm:$0xf]  ;;  %v2159_v60 = vsel %vm9240_vm5, %v8181_v31, %v2158_v23  ;;  %v7734_v58 = vrot.slane %v550_v5, 10  ;;  %5467 = vmatprep.mubr.bf16.mxu1 %v17256_v18  ;;  %v8277_v6 = vld [vmem:[%s16999_s0 + $0x35c] sm:$0x3]  ;;  %v8460_v62 = vcombine.low %v13042_v9, %v13047_v52  ;;  %v13079_v21 = vpop.permute.xlu0 %3491 }
 0x177   :  { %v13068_v51 = vpop.f32.mrb[11].mxu0  ;;  %v13070_v46 = vpop.f32.mrb[20].mxu1  ;;  %v8565_v19 = vcombine.low %v2159_v60, %v2162_v44  ;;  %v851_v30 = vrot.slane %v551_v54, 6  ;;  %v854_v56 = vrot.slane %v552_v41, 6  ;;  %v8022_v42 = vrot.slane %v7978_v49, 10  ;;  %2897 = vrot.lane.b32.xlu1 %v8374_v34, %s9154_s6 }
 0x178   :  { %17308 = vst [vmem:[#allocation44_spill] sm:$0xff] %v13068_v51  ;;  %17309 = vst [vmem:[#allocation45_spill] sm:$0xff] %v13070_v46  ;;  %v13074_v31 = vpop.f32.mrb[21].mxu1  ;;  %v1716_v23 = vrot.slane %v7979_v25, 6  ;;  %v1719_v5 = vrot.slane %v7980_v17, 6  ;;  %v8313_v22 = vrot.slane %v8275_v47, 10  ;;  %v4016_v17 = vsel %vm3965_vm6, %v8332_v26, %v12416_v55 }
 0x179   :  { %17310 = vst [vmem:[#allocation46_spill] sm:$0xff] %v13074_v31  ;;  %v13081_v51 = vpop.f32.mrb[22].mxu1  ;;  %v13086_v49 = vld [vmem:[%s16999_s0 + $0x2a8] sm:$0x7]  ;;  %3855 = vrot.lane.b32.xlu0 %v8565_v19, %s9153_s20  ;;  %v852_v54 = vsel %vm9210_vm3, %v7734_v58, %v851_v30  ;;  %v853_v41 = vrot.slane %v851_v30, 4  ;;  %v2602_v60 = vrot.slane %v8276_v45, 6  ;;  %v7255_v47 = vunpack.c.l.bf16 %v13042_v9 }
 0x17a   :  { %17311 = vst [vmem:[#allocation47_spill] sm:$0xff] %v13081_v51  ;;  %v2605_v34 = vrot.slane %v8277_v6, 6  ;;  %v13091_v25 = vpop.f32.mrb[23].mxu1  ;;  %v1717_v44 = vsel %vm9210_vm3, %v8022_v42, %v1716_v23  ;;  %v1718_v51 = vrot.slane %v1716_v23, 4  ;;  %v7792_v19 = vld [vmem:[%s16999_s0 + $0x2c0] sm:$0xf]  ;;  %v7256_v58 = vunpack.c.l.bf16 %v13047_v52  ;;  %v13119_v52 = vpop.permute.xlu1 %3235 }
 0x17b   :  { %17312 = vst [vmem:[#allocation48_spill] sm:$0xff] %v13091_v25  ;;  %v855_v30 = vsel %vm9210_vm3, %v853_v41, %v854_v56  ;;  %v2603_v45 = vsel %vm9210_vm3, %v8313_v22, %v2602_v60  ;;  %v2604_v6 = vrot.slane %v2602_v60, 4  ;;  %v13109_v55 = vld [vmem:[%s16999_s0 + $0x2c4] sm:$0xf]  ;;  %v8080_v26 = vld [vmem:[%s16999_s0 + $0x320] sm:$0xf]  ;;  %v13136_v31 = vpop.permute.xlu0 %3683 }
 0x17c   :  { %v13117_v9 = vld [vmem:[%s16999_s0 + $0x324] sm:$0xf]  ;;  %17313 = vst [vmem:[#allocation49_spill] sm:$0xff] %v13119_v52  ;;  %v17314_v56 = vrot.slane %v12647_v48, 7  ;;  %v8406_v22 = vcombine.low %v852_v54, %v855_v30  ;;  %v1720_v41 = vsel %vm9210_vm3, %v1718_v51, %v1719_v5  ;;  %v7838_v60 = vld [vmem:[%s16999_s0 + $0x230] sm:$0x8]  ;;  %v4274_v54 = vsel %vm3965_vm6, %v8460_v62, %v12517_v63 }
 0x17d   :  { %v7839_v25 = vld [vmem:[%s16999_s0 + $0x238] sm:$0x7]  ;;  %17316 = vst [vmem:[#allocation51_spill] sm:$0xff] %v13136_v31  ;;  %v13138_v46 = vpop.f32.mrb[24].mxu1  ;;  %v8502_v30 = vcombine.low %v1717_v44, %v1720_v41  ;;  %v2606_v51 = vsel %vm9210_vm3, %v2604_v6, %v2605_v34  ;;  %v76_v5 = vld [vmem:[%s16999_s0 + $0x274] sm:$0xf]  ;;  %v8438_v62 = vcombine.low %v7792_v19, %v13109_v55  ;;  %v8534_v19 = vcombine.low %v8080_v26, %v13117_v9 }
 0x17e   :  { %v13125_v42 = vsel %vm9240_vm5, %v7892_v3, %v17314_v56  ;;  %17317 = vst [vmem:[#allocation52_spill] sm:$0xff] %v13138_v46  ;;  %v4096_v3 = vsel %vm4062_vm7, %v4016_v17, %v12505_v1  ;;  %v139_v56 = vld [vmem:[%s16999_s0 + $0x270] sm:$0x8]  ;;  %v4353_v1 = vsel %vm4062_vm7, %v4274_v54, %v12550_v32  ;;  %3057 = vrot.lane.b32.xlu1 %v8406_v22, %s9152_s7  ;;  %v2165_v34 = vrot.slane %v13117_v9, 7  ;;  %v140_v17 = vld [vmem:[%s16999_s0 + $0x278] sm:$0x7] }
 0x17f   :  { %17315 = vst [vmem:[#allocation50_spill] sm:$0xff] %v13125_v42  ;;  %v13152_v23 = vpop.f32.mrb[12].mxu0  ;;  %v8601_v63 = vcombine.low %v2603_v45, %v2606_v51  ;;  %v8144_v44 = vld [vmem:[%s16999_s0 + $0x320] sm:$0x8]  ;;  %v13165_v6 = vpop.f32.mrb[25].mxu1  ;;  %v7356_v41 = vsel %vm3965_vm6, %v7255_v47, 0.0  ;;  %3505 = vrot.lane.b32.xlu0 %v8502_v30, %s9154_s6  ;;  %v4433_v45 = vsel %vm4127_vm8, %v4353_v1, %v12598_v57  ;;  %v4177_v26 = vsel %vm4127_vm8, %v4096_v3, %v12539_v53 }
 0x180   :  { %17318 = vst [vmem:[#allocation53_spill] sm:$0xff] %v13152_v23  ;;  %17319 = vst [vmem:[#allocation54_spill] sm:$0xff] %v13165_v6  ;;  %v7357_v32 = vsel %vm3965_vm6, %v7256_v58, 0.0  ;;  %v8145_v22 = vld [vmem:[%s16999_s0 + $0x328] sm:$0x7]  ;;  %v13176_v54 = vpop.f32.mrb[13].mxu0  ;;  %4984 = vmatprep.mubr.bf16.mxu0 %v4433_v45  ;;  %v13192_v30 = vpop.permute.xlu1 %2885 }
 0x181   :  { %17320 = vst [vmem:[#allocation55_spill] sm:$0xff] %v13176_v54  ;;  %v13178_v51 = vpop.f32.mrb[26].mxu1  ;;  %v17322_v6 = vrot.slane %v12647_v48, 7  ;;  %8669 = vmatmul.mubr.msk.bf16.gmra.mrb[116].mxu1 %vm3965_vm6, %v8601_v63  ;;  %v2167_v58 = vrot.slane %v2165_v34, 4  ;;  %v7885_v57 = vrot.slane %v7838_v60, 11  ;;  %17323 = vst [vmem:[#allocation57_spill] sm:$0xff] %v13192_v30  ;;  %4985 = vmatmul.mubr.bf16.gmra.mrb[64].mxu0 %v4177_v26 }
 0x182   :  { %17321 = vst [vmem:[#allocation56_spill] sm:$0xff] %v13178_v51  ;;  %v13190_v9 = vld [vmem:[%s16999_s0 + $0x364] sm:$0xc]  ;;  %v13194_v1 = vpop.f32.mrb[14].mxu0  ;;  %v13199_v48 = vld [vmem:[%s16999_s0 + $0x1d0] sm:$0xf]  ;;  %5477 = vmatprep.mubr.bf16.mxu1 %v17256_v18  ;;  %v7358_v51 = vadd.f32 %v7357_v32, %v7356_v41  ;;  %3249 = vrot.lane.b32.xlu1 %v8438_v62, %s9153_s20 }
 0x183   :  { %v13182_v47 = vrot.slane %v17322_v6, 4  ;;  %17324 = vst [vmem:[#allocation58_spill] sm:$0xff] %v13194_v1  ;;  %v1240_v63 = vrot.slane %v7839_v25, 7  ;;  %v7703_v6 = vrot.slane %v139_v56, 11  ;;  %v439_v45 = vrot.slane %v76_v5, 7  ;;  %v13202_v60 = vpop.f32.mrb[27].mxu1  ;;  %v13216_v56 = vpop.permute.xlu0 %3843  ;;  %3697 = vrot.lane.b32.xlu0 %v8534_v19, %s9152_s7 }
 0x184   :  { %v442_v53 = vrot.slane %v140_v17, 7  ;;  %17325 = vst [vmem:[#allocation59_spill] sm:$0xff] %v13202_v60  ;;  %v13204_v3 = vpop.f32.mrb[15].mxu0  ;;  %v17327_v46 = vrot.slane %v11389_v33, 7  ;;  %v8182_v26 = vrot.slane %v8144_v44, 11  ;;  %v2168_v25 = vrot.slane %v8145_v22, 7 }
 0x185   :  { %17326 = vst [vmem:[#allocation60_spill] sm:$0xff] %v13204_v3  ;;  %v8279_v5 = vld [vmem:[%s16999_s0 + $0x368] sm:$0xf]  ;;  %17328 = vst [vmem:[#allocation61_spill] sm:$0xff] %v13216_v56  ;;  %v13218_v17 = vpop.f32.mrb[28].mxu1  ;;  %v440_v62 = vsel %vm9240_vm5, %v7703_v6, %v439_v45  ;;  %v441_v44 = vrot.slane %v439_v45, 4 }
 0x186   :  { %v13211_v1 = vsel %vm9240_vm5, %v7885_v57, %v17327_v46  ;;  %17329 = vst [vmem:[#allocation62_spill] sm:$0xff] %v13218_v17  ;;  %v17330_v41 = vld [vmem:[#allocation7_spill] sm:$0xff]  ;;  %v553_v22 = vld [vmem:[%s16999_s0 + $0x274] sm:$0xc]  ;;  %v13235_v19 = vpop.f32.mrb[29].mxu1  ;;  %v7350_v57 = vrot.slane %v12790_v2, 4  ;;  %v2169_v6 = vsel %vm9240_vm5, %v2167_v58, %v2168_v25 }
 0x187   :  { %v13224_v33 = vsel %vm9240_vm5, %v17330_v41, %v1240_v63  ;;  %v7257_v46 = vunpack.c.l.bf16 %v13211_v1  ;;  %v8280_v32 = vld [vmem:[%s16999_s0 + $0x36c] sm:$0x3]  ;;  %17331 = vst [vmem:[#allocation7_spill] sm:$0xff] %v13235_v19  ;;  %v2166_v41 = vsel %vm9240_vm5, %v8182_v26, %v2165_v34  ;;  %v554_v45 = vld [vmem:[%s16999_s0 + $0x278] sm:$0xf]  ;;  %v13249_v60 = vpop.f32.mrb[30].mxu1  ;;  %v443_v3 = vsel %vm9240_vm5, %v441_v44, %v442_v53 }
 0x188   :  { %v7258_v63 = vunpack.c.l.bf16 %v13224_v33  ;;  %v555_v17 = vld [vmem:[%s16999_s0 + $0x27c] sm:$0x3]  ;;  %17332 = vst [vmem:[#allocation63_spill] sm:$0xff] %v13249_v60  ;;  %v8566_v54 = vcombine.low %v2166_v41, %v2169_v6  ;;  %v8314_v34 = vrot.slane %v13190_v9, 10  ;;  %v7981_v58 = vld [vmem:[%s16999_s0 + $0x2d4] sm:$0xc]  ;;  %v8375_v30 = vcombine.low %v440_v62, %v443_v3 }
 0x189   :  { %v7359_v19 = vsel %vm3965_vm6, %v7257_v46, 0.0  ;;  %v13258_v26 = vpop.f32.mrb[31].mxu1  ;;  %v9139_v25 = vld [vmem:[%s16999_s0 + $0x1d4] sm:$0xf]  ;;  %v7982_v9 = vld [vmem:[%s16999_s0 + $0x2d8] sm:$0xf]  ;;  %v8461_v41 = vcombine.low %v13211_v1, %v13224_v33 }
 0x18a   :  { %17333 = vst [vmem:[#allocation64_spill] sm:$0xff] %v13258_v26  ;;  %v8333_v60 = vcombine.low %v13199_v48, %v9139_v25  ;;  %v7360_v23 = vadd.f32 %v7359_v19, %v7358_v51  ;;  %v7361_v46 = vsel %vm3965_vm6, %v7258_v63, 0.0  ;;  %v7983_v53 = vld [vmem:[%s16999_s0 + $0x2dc] sm:$0x3]  ;;  %v13271_v44 = vpop.f32.mrb[32].mxu1  ;;  %3857 = vrot.lane.b32.xlu0 %v8566_v54, %s9153_s20  ;;  %v2609_v48 = vrot.slane %v8279_v5, 6  ;;  %v13276_v63 = vpop.permute.xlu1 %3045  ;;  %2899 = vrot.lane.b32.xlu1 %v8375_v30, %s9154_s6 }
 0x18b   :  { %17334 = vst [vmem:[#allocation65_spill] sm:$0xff] %v13271_v44  ;;  %v2612_v51 = vrot.slane %v8280_v32, 6  ;;  %v7735_v19 = vrot.slane %v553_v22, 10  ;;  %17335 = vst [vmem:[#allocation66_spill] sm:$0xff] %v13276_v63  ;;  %v13278_v3 = vpop.f32.mrb[33].mxu1  ;;  %v858_v25 = vrot.slane %v554_v45, 6  ;;  %v13288_v54 = vpop.permute.xlu0 %3493 }
 0x18c   :  { %17336 = vst [vmem:[#allocation67_spill] sm:$0xff] %v13278_v3  ;;  %v13283_v62 = vld [vmem:[%s16999_s0 + $0x2b0] sm:$0x8]  ;;  %v13285_v6 = vadd.f32 %v7361_v46, %v7360_v23  ;;  %v861_v1 = vrot.slane %v555_v17, 6  ;;  %v8023_v33 = vrot.slane %v7981_v58, 10  ;;  %17337 = vst [vmem:[#allocation68_spill] sm:$0xff] %v13288_v54  ;;  %v2610_v22 = vsel %vm9210_vm3, %v8314_v34, %v2609_v48 }
 0x18d   :  { %v13290_v5 = vpop.f32.mrb[34].mxu1  ;;  %v13295_v32 = vld [vmem:[%s16999_s0 + $0x2b8] sm:$0x7]  ;;  %v2611_v3 = vrot.slane %v2609_v48, 4  ;;  %v1723_v23 = vrot.slane %v7982_v9, 6  ;;  %v1726_v46 = vrot.slane %v7983_v53, 6  ;;  %v859_v58 = vsel %vm9210_vm3, %v7735_v19, %v858_v25 }
 0x18e   :  { %17338 = vst [vmem:[#allocation69_spill] sm:$0xff] %v13290_v5  ;;  %v13299_v44 = vpop.f32.mrb[35].mxu1  ;;  %v17340_v30 = vrot.slane %v13086_v49, 7  ;;  %v860_v5 = vrot.slane %v858_v25, 4  ;;  %v13314_v34 = vld [vmem:[%s16999_s0 + $0x2d0] sm:$0xf]  ;;  %v4019_v49 = vsel %vm3965_vm6, %v8333_v60, %v12591_v0  ;;  %v13347_v45 = vpop.permute.xlu1 %3237 }
 0x18f   :  { %17339 = vst [vmem:[#allocation70_spill] sm:$0xff] %v13299_v44  ;;  %v13316_v9 = vpop.f32.mrb[36].mxu1  ;;  %v13328_v53 = vld [vmem:[%s16999_s0 + $0x2c8] sm:$0x7]  ;;  %v2613_v48 = vsel %vm9210_vm3, %v2611_v3, %v2612_v51  ;;  %v1724_v19 = vsel %vm9210_vm3, %v8023_v33, %v1723_v23  ;;  %v1725_v25 = vrot.slane %v1723_v23, 4  ;;  %17343 = vst [vmem:[#allocation73_spill] sm:$0xff] %v13347_v45  ;;  %v13352_v3 = vadd.f32 %v7350_v57, %v12790_v2  ;;  %v13370_v57 = vpop.permute.xlu0 %3685 }
 0x190   :  { %v13306_v17 = vsel %vm9240_vm5, %v13182_v47, %v17340_v30  ;;  %17342 = vst [vmem:[#allocation72_spill] sm:$0xff] %v13316_v9  ;;  %v13323_v47 = vld [vmem:[%s16999_s0 + $0x2c0] sm:$0x8]  ;;  %v13337_v0 = vld [vmem:[%s16999_s0 + $0x330] sm:$0xf]  ;;  %v13349_v51 = vpop.f32.mrb[37].mxu1  ;;  %v8602_v23 = vcombine.low %v2610_v22, %v2613_v48  ;;  %v862_v9 = vsel %vm9210_vm3, %v860_v5, %v861_v1  ;;  %v4277_v5 = vsel %vm3965_vm6, %v8461_v41, %v12688_v36 }
 0x191   :  { %17341 = vst [vmem:[#allocation71_spill] sm:$0xff] %v13306_v17  ;;  %v13342_v60 = vld [vmem:[%s16999_s0 + $0x334] sm:$0xf]  ;;  %17344 = vst [vmem:[#allocation74_spill] sm:$0xff] %v13349_v51  ;;  %v8282_v26 = vld [vmem:[%s16999_s0 + $0x378] sm:$0xf]  ;;  %v8407_v48 = vcombine.low %v859_v58, %v862_v9  ;;  %v1727_v33 = vsel %vm9210_vm3, %v1725_v25, %v1726_v46  ;;  %v4098_v36 = vsel %vm4062_vm7, %v4019_v49, %v12655_v27 }
 0x192   :  { %v8281_v30 = vld [vmem:[%s16999_s0 + $0x374] sm:$0xc]  ;;  %v13368_v2 = vld [vmem:[%s16999_s0 + $0x37c] sm:$0x3]  ;;  %17345 = vst [vmem:[#allocation75_spill] sm:$0xff] %v13370_v57  ;;  %v13372_v22 = vpop.f32.mrb[38].mxu1  ;;  %8670 = vmatmul.mubr.msk.bf16.gmra.mrb[120].mxu1 %vm3965_vm6, %v8602_v23  ;;  %v4355_v41 = vsel %vm4062_vm7, %v4277_v5, %v12736_v16  ;;  %v8503_v46 = vcombine.low %v1724_v19, %v1727_v33 }
 0x193   :  { %v13360_v44 = vld [vmem:[%s16999_s0 + $0x2d4] sm:$0xf]  ;;  %17346 = vst [vmem:[#allocation76_spill] sm:$0xff] %v13372_v22  ;;  %v13382_v51 = vld [vmem:[%s16999_s0 + $0x2d0] sm:$0x8]  ;;  %v13387_v57 = vpop.f32.mrb[16].mxu0  ;;  %3059 = vrot.lane.b32.xlu1 %v8407_v48, %s9152_s7  ;;  %v4436_v16 = vsel %vm4127_vm8, %v4355_v41, %v12785_v43  ;;  %5487 = vmatprep.mubr.bf16.mxu1 %v17256_v18  ;;  %v8535_v43 = vcombine.low %v13337_v0, %v13342_v60 }
 0x194   :  { %v7840_v45 = vld [vmem:[%s16999_s0 + $0x240] sm:$0x8]  ;;  %17347 = vst [vmem:[#allocation77_spill] sm:$0xff] %v13387_v57  ;;  %v13389_v22 = vpop.f32.mrb[39].mxu1  ;;  %v7841_v58 = vld [vmem:[%s16999_s0 + $0x248] sm:$0x7]  ;;  %v8439_v27 = vcombine.low %v13314_v34, %v13360_v44  ;;  %3507 = vrot.lane.b32.xlu0 %v8503_v46, %s9154_s6  ;;  %4994 = vmatprep.mubr.bf16.mxu0 %v4436_v16  ;;  %v4180_v41 = vsel %vm4127_vm8, %v4098_v36, %v12707_v37 }
 0x195   :  { %17348 = vst [vmem:[#allocation78_spill] sm:$0xff] %v13389_v22  ;;  %v13400_v9 = vpop.f32.mrb[17].mxu0  ;;  %v13402_v25 = vpop.f32.mrb[40].mxu1  ;;  %v17351_v22 = vrot.slane %v12886_v28, 7  ;;  %v8315_v49 = vrot.slane %v8281_v30, 10  ;;  %v2172_v18 = vrot.slane %v13342_v60, 7  ;;  %4995 = vmatmul.mubr.bf16.gmra.mrb[68].mxu0 %v4180_v41 }
 0x196   :  { %17349 = vst [vmem:[#allocation79_spill] sm:$0xff] %v13400_v9  ;;  %17350 = vst [vmem:[#allocation80_spill] sm:$0xff] %v13402_v25  ;;  %v78_v19 = vld [vmem:[%s16999_s0 + $0x284] sm:$0xf]  ;;  %v141_v33 = vld [vmem:[%s16999_s0 + $0x280] sm:$0x8] }
 0x197   :  { %v13406_v1 = vrot.slane %v17351_v22, 4  ;;  %v13420_v23 = vpop.f32.mrb[18].mxu0  ;;  %v13422_v22 = vpop.f32.mrb[41].mxu1  ;;  %v2619_v34 = vrot.slane %v13368_v2, 6  ;;  %v7886_v25 = vrot.slane %v7840_v45, 11  ;;  %v17357_v0 = vrot.slane %v13109_v55, 7  ;;  %3251 = vrot.lane.b32.xlu1 %v8439_v27, %s9153_s20 }
 0x198   :  { %17352 = vst [vmem:[#allocation81_spill] sm:$0xff] %v13420_v23  ;;  %17353 = vst [vmem:[#allocation82_spill] sm:$0xff] %v13422_v22  ;;  %v13430_v30 = vpop.f32.mrb[19].mxu0  ;;  %v13432_v48 = vpop.f32.mrb[42].mxu1  ;;  %v2616_v22 = vrot.slane %v8282_v26, 6  ;;  %v1247_v37 = vrot.slane %v7841_v58, 7  ;;  %3699 = vrot.lane.b32.xlu0 %v8535_v43, %s9152_s7 }
 0x199   :  { %17354 = vst [vmem:[#allocation83_spill] sm:$0xff] %v13430_v30  ;;  %17355 = vst [vmem:[#allocation84_spill] sm:$0xff] %v13432_v48  ;;  %v142_v46 = vld [vmem:[%s16999_s0 + $0x288] sm:$0x7]  ;;  %v13440_v5 = vpop.f32.mrb[43].mxu1  ;;  %v13444_v60 = vrot.slane %v17357_v0, 4  ;;  %v13491_v23 = vpop.permute.xlu1 %2887 }
 0x19a   :  { %17356 = vst [vmem:[#allocation85_spill] sm:$0xff] %v13440_v5  ;;  %v8146_v26 = vld [vmem:[%s16999_s0 + $0x330] sm:$0x8]  ;;  %v2617_v45 = vsel %vm9210_vm3, %v8315_v49, %v2616_v22  ;;  %v2618_v2 = vrot.slane %v2616_v22, 4  ;;  %v17358_v36 = vld [vmem:[#allocation2_spill] sm:$0xff]  ;;  %v7704_v16 = vrot.slane %v141_v33, 11 }
 0x19b   :  { %v17359_v5 = vrot.slane %v17358_v36, 7  ;;  %v8147_v58 = vld [vmem:[%s16999_s0 + $0x338] sm:$0x7]  ;;  %v556_v41 = vld [vmem:[%s16999_s0 + $0x284] sm:$0xc]  ;;  %v13466_v27 = vpop.f32.mrb[44].mxu1 }
 0x19c   :  { %17360 = vst [vmem:[#allocation2_spill] sm:$0xff] %v13466_v27  ;;  %v17361_v49 = vld [vmem:[#allocation8_spill] sm:$0xff]  ;;  %v446_v33 = vrot.slane %v78_v19, 7  ;;  %v557_v36 = vld [vmem:[%s16999_s0 + $0x288] sm:$0xf]  ;;  %v13481_v27 = vpop.permute.xlu0 %3845  ;;  %v13483_v43 = vpop.f32.mrb[45].mxu1 }
 0x19d   :  { %v13458_v0 = vsel %vm9240_vm5, %v7886_v25, %v17359_v5  ;;  %v13472_v22 = vsel %vm9240_vm5, %v17361_v49, %v1247_v37  ;;  %v449_v5 = vrot.slane %v142_v46, 7  ;;  %v558_v48 = vld [vmem:[%s16999_s0 + $0x28c] sm:$0x3]  ;;  %17362 = vst [vmem:[#allocation8_spill] sm:$0xff] %v13481_v27  ;;  %17363 = vst [vmem:[#allocation86_spill] sm:$0xff] %v13483_v43  ;;  %v2174_v30 = vrot.slane %v2172_v18, 4 }
 0x19e   :  { %v7259_v25 = vunpack.c.l.bf16 %v13458_v0  ;;  %v2620_v37 = vsel %vm9210_vm3, %v2618_v2, %v2619_v34  ;;  %v7260_v49 = vunpack.c.l.bf16 %v13472_v22  ;;  %v8183_v19 = vrot.slane %v8146_v26, 11  ;;  %v7984_v46 = vld [vmem:[%s16999_s0 + $0x2e4] sm:$0xc]  ;;  %17364 = vst [vmem:[#allocation87_spill] sm:$0xff] %v13491_v23  ;;  %v13493_v9 = vpop.f32.mrb[46].mxu1  ;;  %v17367_v23 = vld [vmem:[#allocation11_spill] sm:$0xff] }
 0x19f   :  { %17365 = vst [vmem:[#allocation88_spill] sm:$0xff] %v13493_v9  ;;  %v8603_v57 = vcombine.low %v2617_v45, %v2620_v37  ;;  %v447_v43 = vsel %vm9240_vm5, %v7704_v16, %v446_v33  ;;  %v448_v54 = vrot.slane %v446_v33, 4  ;;  %v7985_v34 = vld [vmem:[%s16999_s0 + $0x2e8] sm:$0xf]  ;;  %v13501_v26 = vpop.f32.mrb[47].mxu1  ;;  %v17368_v38 = vunpack.c.l.bf16 %v17367_v23 }
 0x1a0   :  { %v7363_v27 = vsel %vm3965_vm6, %v7259_v25, 0.0  ;;  %17366 = vst [vmem:[#allocation89_spill] sm:$0xff] %v13501_v26  ;;  %v7365_v63 = vsel %vm3965_vm6, %v7260_v49, 0.0  ;;  %v17369_v25 = vunpack.c.l.bf16 %v12638_v61  ;;  %v7986_v16 = vld [vmem:[%s16999_s0 + $0x2ec] sm:$0x3]  ;;  %v7736_v49 = vrot.slane %v556_v41, 10 }
 0x1a1   :  { %v7364_v2 = vadd.f32 %v7363_v27, %v13285_v6  ;;  %v7367_v45 = vsel %vm3965_vm6, %v17368_v38, 0.0  ;;  %8671 = vmatmul.mubr.msk.bf16.gmra.mrb[124].mxu1 %vm3965_vm6, %v8603_v57  ;;  %v450_v33 = vsel %vm9240_vm5, %v448_v54, %v449_v5  ;;  %v2173_v6 = vsel %vm9240_vm5, %v8183_v19, %v2172_v18  ;;  %v13519_v26 = vpop.f32.mrb[48].mxu1  ;;  %v7859_v57 = vld [vmem:[%s16999_s0 + $0x2d8] sm:$0x7]  ;;  %v13535_v19 = vpop.permute.xlu1 %3047 }
 0x1a2   :  { %v7369_v37 = vsel %vm3965_vm6, %v17369_v25, 0.0  ;;  %v2175_v27 = vrot.slane %v8147_v58, 7  ;;  %17370 = vst [vmem:[#allocation11_spill] sm:$0xff] %v13519_v26  ;;  %v8376_v9 = vcombine.low %v447_v43, %v450_v33  ;;  %v865_v52 = vrot.slane %v557_v36, 6  ;;  %v13521_v56 = vpop.f32.mrb[49].mxu1  ;;  %v13528_v58 = vpop.permute.xlu0 %3495 }
 0x1a3   :  { %v7366_v38 = vadd.f32 %v7365_v63, %v7364_v2  ;;  %v868_v25 = vrot.slane %v558_v48, 6  ;;  %17371 = vst [vmem:[#allocation90_spill] sm:$0xff] %v13521_v56  ;;  %v8024_v5 = vrot.slane %v7984_v46, 10  ;;  %v1730_v31 = vrot.slane %v7985_v34, 6  ;;  %v13530_v41 = vpop.f32.mrb[50].mxu1  ;;  %v17374_v34 = vld [vmem:[#allocation16_spill] sm:$0xff] }
 0x1a4   :  { %v2176_v54 = vsel %vm9240_vm5, %v2174_v30, %v2175_v27  ;;  %v1733_v18 = vrot.slane %v7986_v16, 6  ;;  %17372 = vst [vmem:[#allocation91_spill] sm:$0xff] %v13530_v41  ;;  %2901 = vrot.lane.b32.xlu1 %v8376_v9, %s9154_s6  ;;  %v866_v36 = vsel %vm9210_vm3, %v7736_v49, %v865_v52  ;;  %v867_v43 = vrot.slane %v865_v52, 4  ;;  %v13537_v2 = vpop.f32.mrb[51].mxu1  ;;  %v17375_v16 = vld [vmem:[#allocation3_spill] sm:$0xff] }
 0x1a5   :  { %v7368_v63 = vadd.f32 %v7367_v45, %v7366_v38  ;;  %v8567_v48 = vcombine.low %v2173_v6, %v2176_v54  ;;  %17373 = vst [vmem:[#allocation92_spill] sm:$0xff] %v13537_v2  ;;  %v1731_v30 = vsel %vm9210_vm3, %v8024_v5, %v1730_v31  ;;  %v1732_v46 = vrot.slane %v1730_v31, 4  ;;  %v13545_v45 = vpop.f32.mrb[20].mxu0  ;;  %v7860_v41 = vld [vmem:[%s16999_s0 + $0x2e0] sm:$0x8] }
 0x1a6   :  { %v13543_v33 = vadd.f32 %v17375_v16, %v17374_v34  ;;  %v17377_v9 = vrot.slane %v13360_v44, 7  ;;  %v1310_v27 = vrot.slane %v7859_v57, 7  ;;  %v869_v52 = vsel %vm9210_vm3, %v867_v43, %v868_v25  ;;  %v13553_v31 = vpop.f32.mrb[21].mxu0  ;;  %v13572_v16 = vpop.permute.xlu0 %3687 }
 0x1a7   :  { %v7370_v49 = vadd.f32 %v7369_v37, %v7368_v63  ;;  %3859 = vrot.lane.b32.xlu0 %v8567_v48, %s9153_s20  ;;  %v17378_v38 = vmov 0.0   ;;  %v17379_v54 = vrot.slane %v12886_v28, 7  ;;  %v17380_v5 = vrot.slane %v13283_v62, 11  ;;  %v57_v37 = vld [vmem:[%s16999_s0 + $0x1e0] sm:$0xf]  ;;  %v17383_v48 = vld [vmem:[#allocation4_spill] sm:$0xff] }
 0x1a8   :  { %17376 = vst [vmem:[#allocation16_spill] sm:$0xff] %v13543_v33  ;;  %v1309_v6 = vrot.slane %v17377_v9, 4  ;;  %8817 = vmatprep.mubr.msk.bf16.mxu1 %vm9157_vm9, %v17378_v38  ;;  %v8408_v57 = vcombine.low %v866_v36, %v869_v52  ;;  %v1734_v25 = vsel %vm9210_vm3, %v1732_v46, %v1733_v18  ;;  %v17382_v63 = vld [vmem:[#allocation18_spill] sm:$0xff]  ;;  %v13574_v28 = vpop.f32.mrb[22].mxu0  ;;  %v17385_v62 = vrot.slane %v13295_v32, 7  ;;  %v17390_v46 = vld [vmem:[#allocation17_spill] sm:$0xff] }
 0x1a9   :  { %v13561_v34 = vsel %vm9240_vm5, %v17380_v5, %v17379_v54  ;;  %v13570_v43 = vadd.f32 %v17383_v48, %v17382_v63  ;;  %v17387_v36 = vrot.slane %v13109_v55, 7  ;;  %v17388_v52 = vrot.slane %v13323_v47, 11  ;;  %v13592_v5 = vpop.f32.mrb[23].mxu0 }
 0x1aa   :  { %17381 = vst [vmem:[#allocation3_spill] sm:$0xff] %v13561_v34  ;;  %v13581_v9 = vsel %vm9240_vm5, %v13406_v1, %v17385_v62  ;;  %v7372_v38 = vadd.f32 %v17390_v46, %v7370_v49  ;;  %v8504_v54 = vcombine.low %v1731_v30, %v1734_v25  ;;  %17391 = vst [vmem:[#allocation17_spill] sm:$0xff] %v13592_v5  ;;  %v7271_v32 = vunpack.c.l.bf16 %v13125_v42  ;;  %v13669_v33 = vpop.permute.xlu0 %3847 }
 0x1ab   :  { %17384 = vst [vmem:[#allocation18_spill] sm:$0xff] %v13570_v43  ;;  %17386 = vst [vmem:[#allocation4_spill] sm:$0xff] %v13581_v9  ;;  %v13589_v18 = vsel %vm9240_vm5, %v17388_v52, %v17387_v36  ;;  %v7272_v63 = vunpack.c.l.bf16 %v13306_v17  ;;  %v17392_v1 = vrot.slane %v13328_v53, 7  ;;  %v17394_v47 = vrot.slane %v13360_v44, 7  ;;  %3061 = vrot.lane.b32.xlu1 %v8408_v57, %s9152_s7  ;;  %v9140_v53 = vld [vmem:[%s16999_s0 + $0x1e4] sm:$0xf] }
 0x1ac   :  { %17389 = vst [vmem:[#allocation93_spill] sm:$0xff] %v13589_v18  ;;  %v17395_v48 = vrot.slane %v13382_v51, 11  ;;  %v7352_v49 = vrot.slane %v13352_v3, 2  ;;  %v8334_v25 = vcombine.low %v57_v37, %v9140_v53  ;;  %v7374_v44 = vadd.f32 %v12829_v50, %v7372_v38  ;;  %3509 = vrot.lane.b32.xlu0 %v8504_v54, %s9154_s6  ;;  %v13622_v51 = vpop.permute.xlu1 %3239  ;;  %v13667_v43 = vld [vmem:[%s16999_s0 + $0x304] sm:$0xf] }
 0x1ad   :  { %v13601_v55 = vsel %vm9240_vm5, %v13444_v60, %v17392_v1  ;;  %v13618_v60 = vsel %vm9240_vm5, %v1309_v6, %v1310_v27  ;;  %v17398_v62 = vunpack.c.l.bf16 %v12960_v10  ;;  %v7273_v36 = vunpack.c.l.bf16 %v13561_v34  ;;  %v59_v6 = vld [vmem:[%s16999_s0 + $0x1f0] sm:$0xf]  ;;  %v13633_v27 = vpop.f32.mrb[52].mxu1 }
 0x1ae   :  { %17393 = vst [vmem:[#allocation94_spill] sm:$0xff] %v13601_v55  ;;  %v13609_v30 = vsel %vm9240_vm5, %v17395_v48, %v17394_v47  ;;  %17397 = vst [vmem:[#allocation96_spill] sm:$0xff] %v13618_v60  ;;  %v7274_v52 = vunpack.c.l.bf16 %v13581_v9  ;;  %v7275_v37 = vunpack.c.l.bf16 %v13589_v18  ;;  %v17400_v50 = vunpack.c.l.bf16 %v12972_v59  ;;  %v13646_v47 = vld [vmem:[%s16999_s0 + $0x2e4] sm:$0xf]  ;;  %v13651_v48 = vld [vmem:[%s16999_s0 + $0x2f4] sm:$0xf] }
 0x1af   :  { %17396 = vst [vmem:[#allocation95_spill] sm:$0xff] %v13609_v30  ;;  %v7383_v57 = vsel %vm3965_vm6, %v17398_v62, 0.0  ;;  %17399 = vst [vmem:[#allocation97_spill] sm:$0xff] %v13633_v27  ;;  %v7276_v38 = vunpack.c.l.bf16 %v13601_v55  ;;  %v7277_v54 = vunpack.c.l.bf16 %v13609_v30  ;;  %v7376_v1 = vadd.f32 %v12953_v13, %v7374_v44  ;;  %v13653_v53 = vpop.f32.mrb[53].mxu1  ;;  %v13760_v18 = vld [vmem:[%s16999_s0 + $0x310] sm:$0x8] }
 0x1b0   :  { %v13638_v46 = vsel %vm3965_vm6, %v17400_v50, 0.0  ;;  %17401 = vst [vmem:[#allocation98_spill] sm:$0xff] %v13653_v53  ;;  %v13656_v62 = vsel %vm3965_vm6, %v7271_v32, 0.0  ;;  %v13659_v50 = vsel %vm3965_vm6, %v7272_v63, 0.0  ;;  %v7278_v13 = vunpack.c.l.bf16 %v13618_v60  ;;  %v13671_v27 = vpop.f32.mrb[54].mxu1  ;;  %v17403_v53 = vld [vmem:[#allocation20_spill] sm:$0xff] }
 0x1b1   :  { %v8462_v44 = vcombine.low %v13458_v0, %v13472_v22  ;;  %17402 = vst [vmem:[#allocation99_spill] sm:$0xff] %v13671_v27  ;;  %v13674_v32 = vadd.f32 %v7352_v49, %v13352_v3  ;;  %v4022_v63 = vsel %vm3965_vm6, %v8334_v25, %v17403_v53  ;;  %v7378_v2 = vadd.f32 %v12956_v15, %v7376_v1  ;;  %v9141_v0 = vld [vmem:[%s16999_s0 + $0x1f4] sm:$0xf]  ;;  %v7861_v27 = vld [vmem:[%s16999_s0 + $0x2e8] sm:$0x7]  ;;  %v13688_v3 = vpop.f32.mrb[55].mxu1 }
 0x1b2   :  { %v8335_v22 = vcombine.low %v59_v6, %v9141_v0  ;;  %17404 = vst [vmem:[#allocation20_spill] sm:$0xff] %v13688_v3  ;;  %v13691_v49 = vsel %vm3965_vm6, %v7273_v36, 0.0  ;;  %v13694_v15 = vsel %vm3965_vm6, %v7274_v52, 0.0  ;;  %v13697_v25 = vsel %vm3965_vm6, %v7275_v37, 0.0  ;;  %v7862_v6 = vld [vmem:[%s16999_s0 + $0x2f0] sm:$0x8]  ;;  %v13714_v3 = vpop.permute.xlu1 %2889 }
 0x1b3   :  { %v1314_v1 = vrot.slane %v13646_v47, 7  ;;  %v13704_v53 = vsel %vm3965_vm6, %v7276_v38, 0.0  ;;  %v13707_v0 = vsel %vm3965_vm6, %v7277_v54, 0.0  ;;  %v7380_v36 = vadd.f32 %v12989_v20, %v7378_v2  ;;  %v7864_v52 = vld [vmem:[%s16999_s0 + $0x300] sm:$0x8]  ;;  %v17405_v55 = vld [vmem:[#allocation5_spill] sm:$0xff] }
 0x1b4   :  { %v1321_v37 = vrot.slane %v13651_v48, 7  ;;  %v13717_v56 = vsel %vm3965_vm6, %v7278_v13, 0.0  ;;  %v4100_v38 = vsel %vm4062_vm7, %v4022_v63, %v12822_v14  ;;  %v4280_v54 = vsel %vm3965_vm6, %v8462_v44, %v12849_v12  ;;  %v7863_v20 = vld [vmem:[%s16999_s0 + $0x2f8] sm:$0x7]  ;;  %v13729_v2 = vld [vmem:[%s16999_s0 + $0x308] sm:$0x7] }
 0x1b5   :  { %v7896_v26 = vrot.slane %v7860_v41, 11  ;;  %v7382_v30 = vadd.f32 %v13001_v11, %v7380_v36  ;;  %v4357_v13 = vsel %vm4062_vm7, %v4280_v54, %v12928_v4  ;;  %v13736_v14 = vsel %vm3965_vm6, %v8335_v22, %v12996_v35  ;;  %v7796_v44 = vld [vmem:[%s16999_s0 + $0x2e0] sm:$0xf]  ;;  %v13745_v63 = vld [vmem:[%s16999_s0 + $0x344] sm:$0xf]  ;;  %v13750_v35 = vpop.permute.xlu0 %3497 }
 0x1b6   :  { %v1328_v12 = vrot.slane %v13667_v43, 7  ;;  %v1316_v41 = vrot.slane %v1314_v1, 4  ;;  %v1317_v11 = vrot.slane %v7861_v27, 7  ;;  %v7897_v36 = vrot.slane %v7862_v6, 11  ;;  %v8084_v4 = vld [vmem:[%s16999_s0 + $0x340] sm:$0xf] }
 0x1b7   :  { %v7898_v60 = vrot.slane %v7864_v52, 11  ;;  %v7384_v22 = vadd.f32 %v7383_v57, %v7382_v30  ;;  %v13755_v54 = vld [vmem:[%s16999_s0 + $0x314] sm:$0xf]  ;;  %v13765_v27 = vld [vmem:[%s16999_s0 + $0x318] sm:$0x7]  ;;  %v1323_v6 = vrot.slane %v1321_v37, 4  ;;  %v13769_v30 = vadd.f32 %v17405_v55, %v12795_v29 }
 0x1b8   :  { %v1324_v52 = vrot.slane %v7863_v20, 7  ;;  %v13773_v57 = vsel %vm9240_vm5, %v7896_v26, %v1314_v1  ;;  %v8440_v34 = vcombine.low %v7796_v44, %v13646_v47  ;;  %v17408_v9 = vld [vmem:[#allocation6_spill] sm:$0xff]  ;;  %v2179_v17 = vrot.slane %v13745_v63, 7  ;;  %v80_v20 = vld [vmem:[%s16999_s0 + $0x294] sm:$0xf]  ;;  %v13787_v55 = vpop.f32.mrb[24].mxu0 }
 0x1b9   :  { %17406 = vst [vmem:[#allocation5_spill] sm:$0xff] %v13769_v30  ;;  %17407 = vst [vmem:[#allocation100_spill] sm:$0xff] %v13773_v57  ;;  %v13778_v42 = vadd.f32 %v17408_v9, %v12801_v39  ;;  %v143_v29 = vld [vmem:[%s16999_s0 + $0x290] sm:$0x8]  ;;  %v13789_v26 = vpop.f32.mrb[56].mxu1  ;;  %v7386_v47 = vadd.f32 %v13638_v46, %v7384_v22  ;;  %v1330_v1 = vrot.slane %v1328_v12, 4  ;;  %v8536_v9 = vcombine.low %v8084_v4, %v13745_v63 }
 0x1ba   :  { %17410 = vst [vmem:[#allocation101_spill] sm:$0xff] %v13787_v55  ;;  %17411 = vst [vmem:[#allocation102_spill] sm:$0xff] %v13789_v26  ;;  %v1331_v39 = vrot.slane %v13729_v2, 7  ;;  %v144_v44 = vld [vmem:[%s16999_s0 + $0x298] sm:$0x7]  ;;  %v13799_v30 = vpop.f32.mrb[25].mxu0  ;;  %v13803_v55 = vsel %vm9240_vm5, %v1316_v41, %v1317_v11  ;;  %v13807_v46 = vsel %vm9240_vm5, %v7897_v36, %v1321_v37  ;;  %v13811_v2 = vsel %vm9240_vm5, %v7898_v60, %v1328_v12 }
 0x1bb   :  { %17409 = vst [vmem:[#allocation6_spill] sm:$0xff] %v13778_v42  ;;  %v13797_v42 = vpop.permute.xlu1 %3049  ;;  %17412 = vst [vmem:[#allocation103_spill] sm:$0xff] %v13799_v30  ;;  %3253 = vrot.lane.b32.xlu1 %v8440_v34, %s9153_s20  ;;  %v4439_v63 = vsel %vm4127_vm8, %v4357_v13, %v12998_v8  ;;  %v8148_v4 = vld [vmem:[%s16999_s0 + $0x340] sm:$0x8]  ;;  %v8149_v41 = vld [vmem:[%s16999_s0 + $0x348] sm:$0x7]  ;;  %v7388_v37 = vadd.f32 %v13656_v62, %v7386_v47  ;;  %v13827_v60 = vsel %vm9240_vm5, %v1323_v6, %v1324_v52 }
 0x1bc   :  { %17413 = vst [vmem:[#allocation104_spill] sm:$0xff] %v13807_v46  ;;  %17414 = vst [vmem:[#allocation105_spill] sm:$0xff] %v13811_v2  ;;  %v13822_v11 = vpop.f32.mrb[26].mxu0  ;;  %3701 = vrot.lane.b32.xlu0 %v8536_v9, %s9152_s7  ;;  %5004 = vmatprep.mubr.bf16.mxu0 %v4439_v63  ;;  %v7705_v8 = vrot.slane %v143_v29, 11  ;;  %v559_v13 = vld [vmem:[%s16999_s0 + $0x294] sm:$0xc]  ;;  %v13845_v9 = vpop.permute.xlu0 %3689 }
 0x1bd   :  { %17415 = vst [vmem:[#allocation106_spill] sm:$0xff] %v13822_v11  ;;  %17416 = vst [vmem:[#allocation107_spill] sm:$0xff] %v13827_v60  ;;  %v13834_v12 = vpop.f32.mrb[27].mxu0  ;;  %v13836_v36 = vpop.f32.mrb[57].mxu1  ;;  %v1335_v62 = vrot.slane %v13755_v54, 7  ;;  %v2181_v6 = vrot.slane %v2179_v17, 4  ;;  %v7390_v34 = vadd.f32 %v13659_v50, %v7388_v37 }
 0x1be   :  { %17417 = vst [vmem:[#allocation108_spill] sm:$0xff] %v13834_v12  ;;  %17418 = vst [vmem:[#allocation109_spill] sm:$0xff] %v13836_v36  ;;  %v17419_v52 = vld [vmem:[#allocation31_spill] sm:$0xff]  ;;  %v560_v29 = vld [vmem:[%s16999_s0 + $0x298] sm:$0xf]  ;;  %v13847_v63 = vpop.f32.mrb[58].mxu1  ;;  %v13852_v36 = vsel %vm9240_vm5, %v1330_v1, %v1331_v39  ;;  %v7279_v12 = vunpack.c.l.bf16 %v13773_v57 }
 0x1bf   :  { %v4183_v47 = vsel %vm4127_vm8, %v4100_v38, %v17419_v52  ;;  %17420 = vst [vmem:[#allocation31_spill] sm:$0xff] %v13847_v63  ;;  %17421 = vst [vmem:[#allocation110_spill] sm:$0xff] %v13852_v36  ;;  %v453_v22 = vrot.slane %v80_v20, 7  ;;  %v456_v26 = vrot.slane %v144_v44, 7  ;;  %v561_v38 = vld [vmem:[%s16999_s0 + $0x29c] sm:$0x3]  ;;  %v7392_v1 = vadd.f32 %v13691_v49, %v7390_v34 }
 0x1c0   :  { %5005 = vmatmul.mubr.bf16.gmra.mrb[72].mxu0 %v4183_v47  ;;  %v13857_v52 = vpop.f32.mrb[59].mxu1  ;;  %v8184_v11 = vrot.slane %v8148_v4, 11  ;;  %v2182_v30 = vrot.slane %v8149_v41, 7  ;;  %v7737_v63 = vrot.slane %v559_v13, 10  ;;  %v7987_v50 = vld [vmem:[%s16999_s0 + $0x2f4] sm:$0xc]  ;;  %v13870_v47 = vpop.permute.xlu1 %3241 }
 0x1c1   :  { %17422 = vst [vmem:[#allocation111_spill] sm:$0xff] %v13857_v52  ;;  %v454_v39 = vsel %vm9240_vm5, %v7705_v8, %v453_v22  ;;  %v455_v44 = vrot.slane %v453_v22, 4  ;;  %v7988_v37 = vld [vmem:[%s16999_s0 + $0x2f8] sm:$0xf]  ;;  %v872_v13 = vrot.slane %v560_v29, 6  ;;  %v875_v49 = vrot.slane %v561_v38, 6 }
 0x1c2   :  { %v2180_v4 = vsel %vm9240_vm5, %v8184_v11, %v2179_v17  ;;  %v2183_v41 = vsel %vm9240_vm5, %v2181_v6, %v2182_v30  ;;  %v7989_v34 = vld [vmem:[%s16999_s0 + $0x2fc] sm:$0x3]  ;;  %v7394_v8 = vadd.f32 %v13694_v15, %v7392_v1  ;;  %v8025_v52 = vrot.slane %v7987_v50, 10  ;;  %v13884_v30 = vpop.permute.xlu0 %3849  ;;  %v13886_v6 = vpop.f32.mrb[60].mxu1  ;;  %v17424_v1 = vld [vmem:[#allocation28_spill] sm:$0xff] }
 0x1c3   :  { %v457_v22 = vsel %vm9240_vm5, %v455_v44, %v456_v26  ;;  %v8568_v20 = vcombine.low %v2180_v4, %v2183_v41  ;;  %v873_v17 = vsel %vm9210_vm3, %v7737_v63, %v872_v13  ;;  %v874_v11 = vrot.slane %v872_v13, 4  ;;  %17423 = vst [vmem:[#allocation112_spill] sm:$0xff] %v13886_v6  ;;  %v17425_v26 = vld [vmem:[#allocation9_spill] sm:$0xff]  ;;  %v13894_v50 = vpop.f32.mrb[61].mxu1  ;;  %v17429_v4 = vld [vmem:[#allocation10_spill] sm:$0xff] }
 0x1c4   :  { %v8377_v57 = vcombine.low %v454_v39, %v457_v22  ;;  %v1737_v5 = vrot.slane %v7988_v37, 6  ;;  %v7396_v29 = vadd.f32 %v13697_v25, %v7394_v8  ;;  %v1337_v38 = vrot.slane %v1335_v62, 4  ;;  %17427 = vst [vmem:[#allocation9_spill] sm:$0xff] %v13894_v50  ;;  %v17428_v25 = vld [vmem:[#allocation32_spill] sm:$0xff] }
 0x1c5   :  { %3861 = vrot.lane.b32.xlu0 %v8568_v20, %s9153_s20  ;;  %v1740_v15 = vrot.slane %v7989_v34, 6  ;;  %v13892_v44 = vadd.f32 %v17425_v26, %v17424_v1  ;;  %v876_v63 = vsel %vm9210_vm3, %v874_v11, %v875_v49  ;;  %v13903_v41 = vadd.f32 %v17429_v4, %v17428_v25  ;;  %v13905_v20 = vpop.f32.mrb[62].mxu1  ;;  %v7798_v49 = vld [vmem:[%s16999_s0 + $0x2f0] sm:$0xf]  ;;  %v17437_v4 = vld [vmem:[#allocation34_spill] sm:$0xff] }
 0x1c6   :  { %2903 = vrot.lane.b32.xlu1 %v8377_v57, %s9154_s6  ;;  %v1738_v39 = vsel %vm9210_vm3, %v8025_v52, %v1737_v5  ;;  %v1739_v37 = vrot.slane %v1737_v5, 4  ;;  %17431 = vst [vmem:[#allocation10_spill] sm:$0xff] %v13905_v20  ;;  %v7398_v13 = vadd.f32 %v13704_v53, %v7396_v29  ;;  %v7281_v34 = vunpack.c.l.bf16 %v13807_v46  ;;  %v13914_v52 = vpop.permute.xlu1 %2891  ;;  %v13916_v5 = vpop.f32.mrb[63].mxu1 }
 0x1c7   :  { %17426 = vst [vmem:[#allocation28_spill] sm:$0xff] %v13892_v44  ;;  %17430 = vst [vmem:[#allocation32_spill] sm:$0xff] %v13903_v41  ;;  %v8463_v57 = vcombine.low %v17367_v23, %v12638_v61  ;;  %v8409_v8 = vcombine.low %v873_v17, %v876_v63  ;;  %v17433_v22 = vrot.slane %v13760_v18, 11  ;;  %v7282_v53 = vunpack.c.l.bf16 %v13827_v60  ;;  %v8086_v23 = vld [vmem:[%s16999_s0 + $0x350] sm:$0xf]  ;;  %v13936_v18 = vpop.f32.mrb[28].mxu0 }
 0x1c8   :  { %17432 = vst [vmem:[#allocation113_spill] sm:$0xff] %v13916_v5  ;;  %v7283_v29 = vunpack.c.l.bf16 %v13811_v2  ;;  %v1741_v61 = vsel %vm9210_vm3, %v1739_v37, %v1740_v15  ;;  %v13934_v17 = vld [vmem:[%s16999_s0 + $0x354] sm:$0xf]  ;;  %v17435_v1 = vrot.slane %v13765_v27, 7  ;;  %v7403_v15 = vsel %vm3965_vm6, %v7279_v12, 0.0  ;;  %v13946_v37 = vpop.f32.mrb[29].mxu0  ;;  %v13961_v12 = vpop.permute.xlu0 %3499 }
 0x1c9   :  { %v13922_v11 = vsel %vm9240_vm5, %v17433_v22, %v1335_v62  ;;  %v7400_v62 = vadd.f32 %v13707_v0, %v7398_v13  ;;  %v8505_v63 = vcombine.low %v1738_v39, %v1741_v61  ;;  %v4102_v25 = vsel %vm4062_vm7, %v13736_v14, %v13072_v40  ;;  %v17438_v22 = vld [vmem:[#allocation13_spill] sm:$0xff]  ;;  %v17440_v13 = vld [vmem:[#allocation36_spill] sm:$0xff]  ;;  %v13963_v39 = vpop.f32.mrb[30].mxu0  ;;  %v563_v44 = vld [vmem:[%s16999_s0 + $0x2a8] sm:$0xf] }
 0x1ca   :  { %17434 = vst [vmem:[#allocation114_spill] sm:$0xff] %v13922_v11  ;;  %v13943_v26 = vsel %vm9240_vm5, %v1337_v38, %v17435_v1  ;;  %3063 = vrot.lane.b32.xlu1 %v8409_v8, %s9152_s7  ;;  %v13954_v0 = vadd.f32 %v17438_v22, %v17437_v4  ;;  %v8441_v27 = vcombine.low %v7798_v49, %v13651_v48  ;;  %v17441_v38 = vld [vmem:[#allocation14_spill] sm:$0xff]  ;;  %v2186_v14 = vrot.slane %v13934_v17, 7  ;;  %v13976_v49 = vpop.f32.mrb[31].mxu0 }
 0x1cb   :  { %17436 = vst [vmem:[#allocation115_spill] sm:$0xff] %v13943_v26  ;;  %v13959_v1 = vadd.f32 %v17441_v38, %v17440_v13  ;;  %v7402_v61 = vadd.f32 %v13717_v56, %v7400_v62  ;;  %v4283_v40 = vsel %vm3965_vm6, %v8463_v57, %v13079_v21  ;;  %3511 = vrot.lane.b32.xlu0 %v8505_v63, %s9154_s6  ;;  %v13974_v48 = vld [vmem:[%s16999_s0 + $0x2a4] sm:$0xf]  ;;  %v17444_v56 = vunpack.c.l.bf16 %v13803_v55  ;;  %v17445_v21 = vld [vmem:[#allocation51_spill] sm:$0xff]  ;;  %v17446_v38 = vld [vmem:[#allocation61_spill] sm:$0xff] }
 0x1cc   :  { %17439 = vst [vmem:[#allocation34_spill] sm:$0xff] %v13954_v0  ;;  %v8537_v8 = vcombine.low %v8086_v23, %v13934_v17  ;;  %17443 = vst [vmem:[#allocation36_spill] sm:$0xff] %v13974_v48  ;;  %v4359_v57 = vsel %vm4062_vm7, %v4283_v40, %v17445_v21  ;;  %v145_v23 = vld [vmem:[%s16999_s0 + $0x2a0] sm:$0x8]  ;;  %v146_v17 = vld [vmem:[%s16999_s0 + $0x2a8] sm:$0x7]  ;;  %v7284_v63 = vunpack.c.l.bf16 %v13852_v36  ;;  %v7285_v22 = vunpack.c.l.bf16 %v13922_v11 }
 0x1cd   :  { %17442 = vst [vmem:[#allocation13_spill] sm:$0xff] %v13959_v1  ;;  %v7405_v62 = vsel %vm3965_vm6, %v17444_v56, 0.0  ;;  %v7404_v13 = vadd.f32 %v7403_v15, %v7402_v61  ;;  %v4442_v4 = vsel %vm4127_vm8, %v4359_v57, %v17446_v38  ;;  %v8150_v40 = vld [vmem:[%s16999_s0 + $0x350] sm:$0x8]  ;;  %v8151_v56 = vld [vmem:[%s16999_s0 + $0x358] sm:$0x7]  ;;  %v14003_v1 = vpop.permute.xlu1 %3051  ;;  %v7286_v0 = vunpack.c.l.bf16 %v13943_v26 }
 0x1ce   :  { %v562_v21 = vld [vmem:[%s16999_s0 + $0x2a4] sm:$0xc]  ;;  %v7407_v15 = vsel %vm3965_vm6, %v7281_v34, 0.0  ;;  %v14010_v61 = vld [vmem:[%s16999_s0 + $0x200] sm:$0xf]  ;;  %3255 = vrot.lane.b32.xlu1 %v8441_v27, %s9153_s20  ;;  %v2188_v57 = vrot.slane %v2186_v14, 4  ;;  %5014 = vmatprep.mubr.bf16.mxu0 %v4442_v4 }
 0x1cf   :  { %v17447_v38 = vld [vmem:[#allocation49_spill] sm:$0xff]  ;;  %v14018_v11 = vpop.f32.mrb[64].mxu1  ;;  %v7406_v26 = vadd.f32 %v7405_v62, %v7404_v13  ;;  %v7409_v34 = vsel %vm3965_vm6, %v7282_v53, 0.0  ;;  %v7411_v5 = vsel %vm3965_vm6, %v7283_v29, 0.0  ;;  %3703 = vrot.lane.b32.xlu0 %v8537_v8, %s9152_s7  ;;  %v7706_v27 = vrot.slane %v145_v23, 11 }
 0x1d0   :  { %v4186_v41 = vsel %vm4127_vm8, %v4102_v25, %v17447_v38  ;;  %17448 = vst [vmem:[#allocation14_spill] sm:$0xff] %v14018_v11  ;;  %v564_v4 = vld [vmem:[%s16999_s0 + $0x2ac] sm:$0x3]  ;;  %v14026_v25 = vpop.permute.xlu0 %3691  ;;  %v14028_v38 = vpop.f32.mrb[65].mxu1  ;;  %v460_v2 = vrot.slane %v13974_v48, 7  ;;  %v463_v11 = vrot.slane %v146_v17, 7 }
 0x1d1   :  { %5015 = vmatmul.mubr.bf16.gmra.mrb[76].mxu0 %v4186_v41  ;;  %17449 = vst [vmem:[#allocation51_spill] sm:$0xff] %v14028_v38  ;;  %v8185_v62 = vrot.slane %v8150_v40, 11  ;;  %v2189_v13 = vrot.slane %v8151_v56, 7  ;;  %v14031_v53 = vpop.f32.mrb[66].mxu1  ;;  %v7408_v29 = vadd.f32 %v7407_v15, %v7406_v26  ;;  %v7413_v8 = vsel %vm3965_vm6, %v7284_v63, 0.0  ;;  %v14057_v15 = vpop.permute.xlu1 %3243 }
 0x1d2   :  { %17450 = vst [vmem:[#allocation61_spill] sm:$0xff] %v14031_v53  ;;  %v7738_v41 = vrot.slane %v562_v21, 10  ;;  %v879_v23 = vrot.slane %v563_v44, 6  ;;  %v7990_v36 = vld [vmem:[%s16999_s0 + $0x304] sm:$0xc]  ;;  %v14037_v20 = vpop.f32.mrb[67].mxu1  ;;  %v461_v38 = vsel %vm9240_vm5, %v7706_v27, %v460_v2 }
 0x1d3   :  { %17451 = vst [vmem:[#allocation49_spill] sm:$0xff] %v14037_v20  ;;  %v462_v50 = vrot.slane %v460_v2, 4  ;;  %v2187_v17 = vsel %vm9240_vm5, %v8185_v62, %v2186_v14  ;;  %v2190_v26 = vsel %vm9240_vm5, %v2188_v57, %v2189_v13  ;;  %v7991_v44 = vld [vmem:[%s16999_s0 + $0x308] sm:$0xf]  ;;  %v7992_v63 = vld [vmem:[%s16999_s0 + $0x30c] sm:$0x3]  ;;  %v7410_v40 = vadd.f32 %v7409_v34, %v7408_v29 }
 0x1d4   :  { %v9142_v56 = vld [vmem:[%s16999_s0 + $0x204] sm:$0xf]  ;;  %v8569_v21 = vcombine.low %v2187_v17, %v2190_v26  ;;  %v880_v14 = vsel %vm9210_vm3, %v7738_v41, %v879_v23  ;;  %v881_v27 = vrot.slane %v879_v23, 4  ;;  %v882_v62 = vrot.slane %v564_v4, 6  ;;  %v14062_v6 = vpop.permute.xlu0 %3851  ;;  %v17452_v17 = vld [vmem:[#allocation40_spill] sm:$0xff]  ;;  %v17453_v26 = vld [vmem:[#allocation21_spill] sm:$0xff] }
 0x1d5   :  { %v8336_v2 = vcombine.low %v14010_v61, %v9142_v56  ;;  %v464_v57 = vsel %vm9240_vm5, %v462_v50, %v463_v11  ;;  %v8026_v13 = vrot.slane %v7990_v36, 10  ;;  %v7412_v20 = vadd.f32 %v7411_v5, %v7410_v40  ;;  %v17455_v50 = vld [vmem:[#allocation42_spill] sm:$0xff]  ;;  %v7995_v48 = vld [vmem:[%s16999_s0 + $0x31c] sm:$0x3] }
 0x1d6   :  { %v8378_v34 = vcombine.low %v461_v38, %v464_v57  ;;  %3863 = vrot.lane.b32.xlu0 %v8569_v21, %s9153_s20  ;;  %v1744_v29 = vrot.slane %v7991_v44, 6  ;;  %v1747_v53 = vrot.slane %v7992_v63, 6  ;;  %v7415_v61 = vsel %vm3965_vm6, %v7285_v22, 0.0  ;;  %v17456_v11 = vld [vmem:[#allocation22_spill] sm:$0xff]  ;;  %v17458_v44 = vld [vmem:[#allocation15_spill] sm:$0xff]  ;;  %v17459_v63 = vld [vmem:[#allocation12_spill] sm:$0xff] }
 0x1d7   :  { %v883_v41 = vsel %vm9210_vm3, %v881_v27, %v882_v62  ;;  %v14069_v56 = vadd.f32 %v17453_v26, %v17452_v17  ;;  %v14073_v36 = vadd.f32 %v17456_v11, %v17455_v50  ;;  %v7414_v5 = vadd.f32 %v7413_v8, %v7412_v20  ;;  %v7800_v21 = vld [vmem:[%s16999_s0 + $0x300] sm:$0xf]  ;;  %v14087_v20 = vld [vmem:[%s16999_s0 + $0x364] sm:$0xf]  ;;  %v14089_v8 = vpop.f32.mrb[32].mxu0  ;;  %v17460_v57 = vld [vmem:[#allocation57_spill] sm:$0xff] }
 0x1d8   :  { %2905 = vrot.lane.b32.xlu1 %v8378_v34, %s9154_s6  ;;  %v8410_v4 = vcombine.low %v880_v14, %v883_v41  ;;  %v1745_v38 = vsel %vm9210_vm3, %v8026_v13, %v1744_v29  ;;  %v1746_v23 = vrot.slane %v1744_v29, 4  ;;  %v7417_v22 = vsel %vm3965_vm6, %v7286_v0, 0.0  ;;  %v8088_v62 = vld [vmem:[%s16999_s0 + $0x360] sm:$0xf]  ;;  %v14098_v13 = vpop.permute.xlu1 %2893  ;;  %v14100_v34 = vpop.f32.mrb[33].mxu0  ;;  %v17463_v26 = vld [vmem:[#allocation23_spill] sm:$0xff] }
 0x1d9   :  { %17454 = vst [vmem:[#allocation40_spill] sm:$0xff] %v14069_v56  ;;  %17457 = vst [vmem:[#allocation21_spill] sm:$0xff] %v14073_v36  ;;  %v8464_v40 = vcombine.low %v17459_v63, %v17458_v44  ;;  %v7416_v14 = vadd.f32 %v7415_v61, %v7414_v5  ;;  %v4028_v27 = vsel %vm3965_vm6, %v8336_v2, %v17460_v57  ;;  %v17461_v29 = vrot.slane %v13674_v32, 1  ;;  %v17462_v61 = vld [vmem:[#allocation43_spill] sm:$0xff]  ;;  %v14109_v2 = vpop.permute.xlu0 %3501  ;;  %v17466_v44 = vld [vmem:[#allocation24_spill] sm:$0xff]  ;;  %v14122_v57 = vpop.f32.mrb[68].mxu1 }
 0x1da   :  { %v1748_v0 = vsel %vm9210_vm3, %v1746_v23, %v1747_v53  ;;  %v14107_v50 = vadd.f32 %v17463_v26, %v17462_v61  ;;  %v14111_v53 = vpop.f32.mrb[34].mxu0  ;;  %v8442_v5 = vcombine.low %v7800_v21, %v13667_v43  ;;  %v17465_v23 = vld [vmem:[#allocation44_spill] sm:$0xff]  ;;  %17468 = vst [vmem:[#allocation15_spill] sm:$0xff] %v14122_v57  ;;  %v8538_v43 = vcombine.low %v8088_v62, %v14087_v20  ;;  %v14135_v21 = vpop.f32.mrb[69].mxu1  ;;  %v17473_v26 = vld [vmem:[#allocation75_spill] sm:$0xff] }
 0x1db   :  { %v7355_v41 = vadd.f32 %v17461_v29, %v13674_v32  ;;  %v8506_v17 = vcombine.low %v1745_v38, %v1748_v0  ;;  %v7418_v11 = vadd.f32 %v7417_v22, %v7416_v14  ;;  %v14117_v63 = vadd.f32 %v17466_v44, %v17465_v23  ;;  %v14120_v38 = vpop.f32.mrb[35].mxu0  ;;  %v17469_v0 = vld [vmem:[#allocation66_spill] sm:$0xff]  ;;  %v17470_v61 = vld [vmem:[#allocation68_spill] sm:$0xff]  ;;  %17472 = vst [vmem:[#allocation57_spill] sm:$0xff] %v14135_v21 }
 0x1dc   :  { %17464 = vst [vmem:[#allocation42_spill] sm:$0xff] %v14107_v50  ;;  %3065 = vrot.lane.b32.xlu1 %v8410_v4, %s9152_s7  ;;  %v2193_v32 = vrot.slane %v14087_v20, 7  ;;  %v4104_v29 = vsel %vm4062_vm7, %v4028_v27, %v17469_v0  ;;  %v4286_v22 = vsel %vm3965_vm6, %v8464_v40, %v17470_v61  ;;  %v14133_v4 = vld [vmem:[%s16999_s0 + $0x2b4] sm:$0xf]  ;;  %v147_v27 = vld [vmem:[%s16999_s0 + $0x2b0] sm:$0x8]  ;;  %v14168_v36 = vpop.permute.xlu1 %3053 }
 0x1dd   :  { %17467 = vst [vmem:[#allocation22_spill] sm:$0xff] %v14117_v63  ;;  %3513 = vrot.lane.b32.xlu0 %v8506_v17, %s9154_s6  ;;  %17471 = vst [vmem:[#allocation12_spill] sm:$0xff] %v14133_v4  ;;  %v7419_v14 = vrot.slane %v7418_v11, 4  ;;  %v4361_v23 = vsel %vm4062_vm7, %v4286_v22, %v17473_v26  ;;  %v148_v40 = vld [vmem:[%s16999_s0 + $0x2b8] sm:$0x7]  ;;  %v14145_v20 = vpop.f32.mrb[70].mxu1 }
 0x1de   :  { %17474 = vst [vmem:[#allocation43_spill] sm:$0xff] %v14145_v20  ;;  %v14147_v62 = vmul.f32 0.00390625, %v7355_v41  ;;  %v17475_v17 = vld [vmem:[#allocation8_spill] sm:$0xff]  ;;  %v8152_v0 = vld [vmem:[%s16999_s0 + $0x360] sm:$0x8]  ;;  %v14157_v22 = vpop.f32.mrb[71].mxu1  ;;  %v14178_v20 = vpop.permute.xlu0 %3693 }
 0x1df   :  { %v4445_v44 = vsel %vm4127_vm8, %v4361_v23, %v17475_v17  ;;  %v8153_v61 = vld [vmem:[%s16999_s0 + $0x368] sm:$0x7]  ;;  %17476 = vst [vmem:[#allocation23_spill] sm:$0xff] %v14157_v22  ;;  %v7420_v26 = vadd.f32 %v7419_v14, %v7418_v11  ;;  %v2195_v63 = vrot.slane %v2193_v32, 4  ;;  %v17477_v41 = vld [vmem:[#allocation73_spill] sm:$0xff]  ;;  %v7707_v11 = vrot.slane %v147_v27, 11 }
 0x1e0   :  { %3257 = vrot.lane.b32.xlu1 %v8442_v5, %s9153_s20  ;;  %5024 = vmatprep.mubr.bf16.mxu0 %v4445_v44  ;;  %v4189_v50 = vsel %vm4127_vm8, %v4104_v29, %v17477_v41  ;;  %v565_v23 = vld [vmem:[%s16999_s0 + $0x2b4] sm:$0xc]  ;;  %v566_v17 = vld [vmem:[%s16999_s0 + $0x2b8] sm:$0xf]  ;;  %v467_v5 = vrot.slane %v14133_v4, 7  ;;  %v470_v14 = vrot.slane %v148_v40, 7 }
 0x1e1   :  { %3705 = vrot.lane.b32.xlu0 %v8538_v43, %s9152_s7  ;;  %5025 = vmatmul.mubr.bf16.gmra.mrb[80].mxu0 %v4189_v50  ;;  %v567_v29 = vld [vmem:[%s16999_s0 + $0x2bc] sm:$0x3]  ;;  %v7421_v44 = vrot.slane %v7420_v26, 2  ;;  %v8186_v41 = vrot.slane %v8152_v0, 11  ;;  %v2196_v56 = vrot.slane %v8153_v61, 7  ;;  %v7428_v50 = vpack.c.bf16 %v14147_v62, %v14147_v62  ;;  %v14197_v46 = vpop.f32.mrb[72].mxu1 }
 0x1e2   :  { %v7993_v22 = vld [vmem:[%s16999_s0 + $0x314] sm:$0xc]  ;;  %v63_v43 = vld [vmem:[%s16999_s0 + $0x210] sm:$0xf]  ;;  %v468_v27 = vsel %vm9240_vm5, %v7707_v11, %v467_v5  ;;  %v469_v40 = vrot.slane %v467_v5, 4  ;;  %v7739_v21 = vrot.slane %v565_v23, 10 }
 0x1e3   :  { %v7422_v0 = vadd.f32 %v7421_v44, %v7420_v26  ;;  %v2194_v61 = vsel %vm9240_vm5, %v8186_v41, %v2193_v32  ;;  %v2197_v57 = vsel %vm9240_vm5, %v2195_v63, %v2196_v56  ;;  %v886_v4 = vrot.slane %v566_v17, 6  ;;  %v7994_v62 = vld [vmem:[%s16999_s0 + $0x318] sm:$0xf]  ;;  %17478 = vst [vmem:[#allocation44_spill] sm:$0xff] %v14197_v46  ;;  %v14201_v5 = vpop.f32.mrb[73].mxu1  ;;  %v14205_v41 = vpop.permute.xlu1 %3245 }
 0x1e4   :  { %v471_v26 = vsel %vm9240_vm5, %v469_v40, %v470_v14  ;;  %v8570_v23 = vcombine.low %v2194_v61, %v2197_v57  ;;  %v889_v11 = vrot.slane %v567_v29, 6  ;;  %v8027_v32 = vrot.slane %v7993_v22, 10  ;;  %17479 = vst [vmem:[#allocation24_spill] sm:$0xff] %v14201_v5  ;;  %v14207_v60 = vpop.f32.mrb[74].mxu1  ;;  %v9143_v46 = vld [vmem:[%s16999_s0 + $0x214] sm:$0xf] }
 0x1e5   :  { %v7423_v56 = vrot.slane %v7422_v0, 1  ;;  %v8379_v63 = vcombine.low %v468_v27, %v471_v26  ;;  %v887_v17 = vsel %vm9210_vm3, %v7739_v21, %v886_v4  ;;  %v888_v44 = vrot.slane %v886_v4, 4  ;;  %17480 = vst [vmem:[#allocation66_spill] sm:$0xff] %v14207_v60  ;;  %v17481_v29 = vld [vmem:[#allocation53_spill] sm:$0xff]  ;;  %v17482_v40 = vld [vmem:[#allocation27_spill] sm:$0xff]  ;;  %v14217_v61 = vpop.f32.mrb[75].mxu1 }
 0x1e6   :  { %v8337_v14 = vcombine.low %v63_v43, %v9143_v46  ;;  %3865 = vrot.lane.b32.xlu0 %v8570_v23, %s9153_s20  ;;  %v1751_v57 = vrot.slane %v7994_v62, 6  ;;  %v1754_v22 = vrot.slane %v7995_v48, 6  ;;  %v14215_v27 = vadd.f32 %v17482_v40, %v17481_v29  ;;  %17484 = vst [vmem:[#allocation75_spill] sm:$0xff] %v14217_v61  ;;  %v17485_v26 = vld [vmem:[#allocation55_spill] sm:$0xff]  ;;  %v17486_v60 = vld [vmem:[#allocation30_spill] sm:$0xff]  ;;  %v17489_v43 = vld [vmem:[#allocation33_spill] sm:$0xff]  ;;  %v14230_v48 = vpop.permute.xlu0 %3853 }
 0x1e7   :  { %v7424_v4 = vadd.f32 %v7423_v56, %v7422_v0  ;;  %2907 = vrot.lane.b32.xlu1 %v8379_v63, %s9154_s6  ;;  %v890_v21 = vsel %vm9210_vm3, %v888_v44, %v889_v11  ;;  %v14224_v5 = vadd.f32 %v17486_v60, %v17485_v26  ;;  %v17488_v46 = vld [vmem:[#allocation58_spill] sm:$0xff]  ;;  %v17491_v23 = vld [vmem:[#allocation25_spill] sm:$0xff]  ;;  %v17492_v29 = vld [vmem:[#allocation19_spill] sm:$0xff]  ;;  %v14236_v63 = vpop.f32.mrb[36].mxu0 }
 0x1e8   :  { %17483 = vst [vmem:[#allocation68_spill] sm:$0xff] %v14215_v27  ;;  %v14228_v62 = vadd.f32 %v17489_v43, %v17488_v46  ;;  %v8465_v40 = vcombine.low %v17492_v29, %v17491_v23  ;;  %v8411_v61 = vcombine.low %v887_v17, %v890_v21  ;;  %v1752_v0 = vsel %vm9210_vm3, %v8027_v32, %v1751_v57  ;;  %v7802_v60 = vld [vmem:[%s16999_s0 + $0x310] sm:$0xf]  ;;  %v8091_v44 = vld [vmem:[%s16999_s0 + $0x374] sm:$0xf]  ;;  %v14244_v26 = vpop.f32.mrb[37].mxu0 }
 0x1e9   :  { %17487 = vst [vmem:[#allocation8_spill] sm:$0xff] %v14224_v5  ;;  %v1753_v56 = vrot.slane %v1751_v57, 4  ;;  %v7427_v11 = vmul.f32 0.00390625, %v7424_v4  ;;  %v17493_v46 = vld [vmem:[#allocation87_spill] sm:$0xff]  ;;  %v8090_v57 = vld [vmem:[%s16999_s0 + $0x370] sm:$0xf]  ;;  %v7436_v21 = vunpack.c.l.b16 %v7428_v50 }
 0x1ea   :  { %17490 = vst [vmem:[#allocation73_spill] sm:$0xff] %v14228_v62  ;;  %v4031_v17 = vsel %vm3965_vm6, %v8337_v14, %v17493_v46  ;;  %v14253_v4 = vpop.f32.mrb[38].mxu0  ;;  %v65_v29 = vld [vmem:[%s16999_s0 + $0x220] sm:$0xf]  ;;  %v14259_v14 = vpop.permute.xlu1 %2895  ;;  %v17494_v46 = vld [vmem:[#allocation60_spill] sm:$0xff]  ;;  %v17495_v50 = vld [vmem:[#allocation35_spill] sm:$0xff] }
 0x1eb   :  { %v1755_v32 = vsel %vm9210_vm3, %v1753_v56, %v1754_v22  ;;  %v7429_v43 = vpack.c.bf16 %v7427_v11, %v7427_v11  ;;  %3067 = vrot.lane.b32.xlu1 %v8411_v61, %s9152_s7  ;;  %v14261_v7 = vpop.f32.mrb[39].mxu0  ;;  %v4289_v22 = vsel %vm3965_vm6, %v8465_v40, %v13528_v58  ;;  %v8443_v56 = vcombine.low %v7802_v60, %v13755_v54  ;;  %v8154_v61 = vld [vmem:[%s16999_s0 + $0x370] sm:$0x8]  ;;  %v14278_v54 = vpop.permute.xlu0 %3503  ;;  %v9144_v40 = vld [vmem:[%s16999_s0 + $0x224] sm:$0xf] }
 0x1ec   :  { %v8507_v23 = vcombine.low %v1752_v0, %v1755_v32  ;;  %v14268_v11 = vadd.f32 %v17495_v50, %v17494_v46  ;;  %v2200_v62 = vrot.slane %v8091_v44, 7  ;;  %v4106_v32 = vsel %vm4062_vm7, %v4031_v17, %v13535_v19  ;;  %v8155_v19 = vld [vmem:[%s16999_s0 + $0x378] sm:$0x7]  ;;  %v14288_v17 = vpop.f32.mrb[76].mxu1  ;;  %v8740_v50 = vld [vmem:[%s17002_s4 + $0x1] ss:$0 sm:$0xff] }
 0x1ed   :  { %v7437_v0 = vunpack.c.l.b16 %v7429_v43  ;;  %v4363_v5 = vsel %vm4062_vm7, %v4289_v22, %v13572_v16  ;;  %v8539_v58 = vcombine.low %v8090_v57, %v8091_v44  ;;  %v8338_v60 = vcombine.low %v65_v29, %v9144_v40  ;;  %v14292_v43 = vpop.f32.mrb[77].mxu1 }
 0x1ee   :  { %17496 = vst [vmem:[#allocation53_spill] sm:$0xff] %v14268_v11  ;;  %3515 = vrot.lane.b32.xlu0 %v8507_v23, %s9154_s6  ;;  %v4448_v46 = vsel %vm4127_vm8, %v4363_v5, %v13669_v33  ;;  %v2202_v44 = vrot.slane %v2200_v62, 4  ;;  %v8187_v57 = vrot.slane %v8154_v61, 11  ;;  %v4192_v29 = vsel %vm4127_vm8, %v4106_v32, %v13622_v51  ;;  %v17497_v33 = vld [vmem:[#allocation29_spill] sm:$0xff]  ;;  %v17498_v5 = vld [vmem:[#allocation26_spill] sm:$0xff]  ;;  %v14301_v40 = vpop.f32.mrb[78].mxu1  ;;  %v14310_v51 = vpop.permute.xlu1 %3055 }
 0x1ef   :  { %v7439_v16 = vsel %vm7438_vm10, %v7437_v0, %v7436_v21  ;;  %3259 = vrot.lane.b32.xlu1 %v8443_v56, %s9153_s20  ;;  %5034 = vmatprep.mubr.bf16.mxu0 %v4448_v46  ;;  %v8466_v22 = vcombine.low %v17498_v5, %v17497_v33  ;;  %v2203_v56 = vrot.slane %v8155_v19, 7  ;;  %v17499_v61 = vld [vmem:[#allocation77_spill] sm:$0xff]  ;;  %v14312_v32 = vpop.f32.mrb[79].mxu1  ;;  %v17502_v33 = vld [vmem:[#allocation79_spill] sm:$0xff] }
 0x1f0   :  { %v7440_v23 = vpack.c.b16 %v7439_v16, %v7439_v16  ;;  %5035 = vmatmul.mubr.bf16.gmra.mrb[84].mxu0 %v4192_v29  ;;  %v2201_v21 = vsel %vm9240_vm5, %v8187_v57, %v2200_v62  ;;  %v17500_v0 = vld [vmem:[#allocation37_spill] sm:$0xff]  ;;  %v4034_v16 = vsel %vm3965_vm6, %v8338_v60, %v13714_v3  ;;  %v17506_v62 = vld [vmem:[#allocation39_spill] sm:$0xff] }
 0x1f1   :  { %v14308_v46 = vadd.f32 %v17500_v0, %v17499_v61  ;;  %v17505_v5 = vld [vmem:[#allocation81_spill] sm:$0xff]  ;;  %v2204_v57 = vsel %vm9240_vm5, %v2202_v44, %v2203_v56  ;;  %v67_v61 = vld [vmem:[%s16999_s0 + $0x230] sm:$0xf]  ;;  %v14330_v0 = vpop.permute.xlu0 %3695  ;;  %v4292_v3 = vsel %vm3965_vm6, %v8466_v22, %v13750_v35  ;;  %v17507_v56 = vld [vmem:[#allocation83_spill] sm:$0xff] }
 0x1f2   :  { %3707 = vrot.lane.b32.xlu0 %v8539_v58, %s9152_s7  ;;  %8818 = vmatmul.mubr.msk.bf16.vlgmr.msra.gmra.mrb[128].mxu1 %vm3965_vm6, %v7440_v23  ;;  %v17503_v58 = vld [vmem:[#allocation38_spill] sm:$0xff]  ;;  %v14323_v19 = vadd.f32 %v17506_v62, %v17505_v5  ;;  %v8571_v60 = vcombine.low %v2201_v21, %v2204_v57  ;;  %v4108_v23 = vsel %vm4062_vm7, %v4034_v16, %v13797_v42  ;;  %v14351_v22 = vpop.permute.xlu1 %3247  ;;  %v17510_v16 = vld [vmem:[#allocation45_spill] sm:$0xff]  ;;  %v14362_v62 = vpop.f32.mrb[80].mxu1 }
 0x1f3   :  { %17501 = vst [vmem:[#allocation27_spill] sm:$0xff] %v14308_v46  ;;  %v14319_v29 = vadd.f32 %v17503_v58, %v17502_v33  ;;  %7538 = vrot.lane.b32.xlu1 %v8740_v50, %s9153_s20  ;;  %v4365_v33 = vsel %vm4062_vm7, %v4292_v3, %v13845_v9  ;;  %v8339_v44 = vcombine.low %v67_v61, %v9145_v24  ;;  %v17508_v58 = vld [vmem:[#allocation41_spill] sm:$0xff]  ;;  %v8739_v9 = vld [vmem:[%s17003_s3 + $0x1] ss:$0 sm:$0xff]  ;;  %17512 = vst [vmem:[#allocation33_spill] sm:$0xff] %v14362_v62  ;;  %v14372_v3 = vpop.f32.mrb[40].mxu0 }
 0x1f4   :  { %v14345_v50 = vadd.f32 %v17508_v58, %v17507_v56  ;;  %v4451_v35 = vsel %vm4127_vm8, %v4365_v33, %v13884_v30  ;;  %v8467_v42 = vcombine.low %v12960_v10, %v12972_v59  ;;  %v4195_v21 = vsel %vm4127_vm8, %v4108_v23, %v13870_v47  ;;  %v17513_v30 = vld [vmem:[#allocation46_spill] sm:$0xff]  ;;  %v17515_v10 = vld [vmem:[#allocation47_spill] sm:$0xff]  ;;  %v17520_v58 = vld [vmem:[#allocation17_spill] sm:$0xff] }
 0x1f5   :  { %17504 = vst [vmem:[#allocation55_spill] sm:$0xff] %v14319_v29  ;;  %5044 = vmatprep.mubr.bf16.mxu0 %v4451_v35  ;;  %v14360_v5 = vadd.f32 %v17510_v16, %v13545_v45  ;;  %v14366_v57 = vadd.f32 %v17513_v30, %v13553_v31  ;;  %v14370_v59 = vadd.f32 %v17515_v10, %v13574_v28  ;;  %v3856_v61 = vpop.permute.xlu0 %3855  ;;  %v14379_v45 = vpop.f32.mrb[81].mxu1  ;;  %v69_v28 = vld [vmem:[%s16999_s0 + $0x240] sm:$0xf]  ;;  %v17523_v16 = vld [vmem:[#allocation71_spill] sm:$0xff] }
 0x1f6   :  { %3867 = vrot.lane.b32.xlu0 %v8571_v60, %s9153_s20  ;;  %17509 = vst [vmem:[#allocation30_spill] sm:$0xff] %v14345_v50  ;;  %v4037_v47 = vsel %vm3965_vm6, %v8339_v44, %v13914_v52  ;;  %v14376_v60 = vpop.f32.mrb[41].mxu0  ;;  %17517 = vst [vmem:[#allocation87_spill] sm:$0xff] %v14379_v45  ;;  %v4295_v31 = vsel %vm3965_vm6, %v8467_v42, %v13961_v12  ;;  %v14388_v33 = vpop.f32.mrb[82].mxu1  ;;  %v17521_v12 = vld [vmem:[#allocation48_spill] sm:$0xff]  ;;  %v17524_v30 = vld [vmem:[#allocation50_spill] sm:$0xff] }
 0x1f7   :  { %17511 = vst [vmem:[#allocation58_spill] sm:$0xff] %v14360_v5  ;;  %17514 = vst [vmem:[#allocation25_spill] sm:$0xff] %v14366_v57  ;;  %v14386_v23 = vpop.f32.mrb[42].mxu0  ;;  %v4367_v52 = vsel %vm4062_vm7, %v4295_v31, %v14026_v25  ;;  %v14394_v44 = vpop.f32.mrb[83].mxu1  ;;  %v4110_v56 = vsel %vm4062_vm7, %v4037_v47, %v14003_v1  ;;  %v14400_v35 = vadd.f32 %v17521_v12, %v17520_v58  ;;  %v17525_v31 = vld [vmem:[#allocation101_spill] sm:$0xff]  ;;  %v17528_v12 = vld [vmem:[#allocation103_spill] sm:$0xff] }
 0x1f8   :  { %5045 = vmatmul.mubr.bf16.gmra.mrb[88].mxu0 %v4195_v21  ;;  %17516 = vst [vmem:[#allocation19_spill] sm:$0xff] %v14370_v59  ;;  %17518 = vst [vmem:[#allocation60_spill] sm:$0xff] %v14388_v33  ;;  %v14392_v24 = vpop.f32.mrb[43].mxu0  ;;  %v4454_v42 = vsel %vm4127_vm8, %v4367_v52, %v14062_v6  ;;  %v9146_v21 = vld [vmem:[%s16999_s0 + $0x244] sm:$0xf]  ;;  %v8468_v10 = vcombine.low %v17524_v30, %v17523_v16  ;;  %v4198_v58 = vsel %vm4127_vm8, %v4110_v56, %v14057_v15  ;;  %v17532_v45 = vld [vmem:[#allocation56_spill] sm:$0xff] }
 0x1f9   :  { %17519 = vst [vmem:[#allocation35_spill] sm:$0xff] %v14394_v44  ;;  %17522 = vst [vmem:[#allocation29_spill] sm:$0xff] %v14400_v35  ;;  %v8340_v25 = vcombine.low %v69_v28, %v9146_v21  ;;  %5054 = vmatprep.mubr.bf16.mxu0 %v4454_v42  ;;  %v17526_v44 = vld [vmem:[#allocation52_spill] sm:$0xff]  ;;  %v3506_v47 = vpop.permute.xlu0 %3505  ;;  %v17529_v6 = vld [vmem:[#allocation54_spill] sm:$0xff] }
 0x1fa   :  { %7528 = vrot.lane.b32.xlu0 %v8739_v9, %s9153_s20  ;;  %v2898_v9 = vpop.permute.xlu1 %2897  ;;  %v14411_v1 = vadd.f32 %v17526_v44, %v17525_v31  ;;  %v14417_v52 = vadd.f32 %v17529_v6, %v17528_v12  ;;  %v17531_v33 = vld [vmem:[#allocation106_spill] sm:$0xff]  ;;  %v4298_v44 = vsel %vm3965_vm6, %v8468_v10, %v14109_v2  ;;  %v71_v15 = vld [vmem:[%s16999_s0 + $0x250] sm:$0xf]  ;;  %v17535_v16 = vld [vmem:[#allocation59_spill] sm:$0xff]  ;;  %v14442_v10 = vpop.f32.mrb[84].mxu1 }
 0x1fb   :  { %v14421_v62 = vadd.f32 %v17532_v45, %v17531_v33  ;;  %v4040_v28 = vsel %vm3965_vm6, %v8340_v25, %v14098_v13  ;;  %v4369_v42 = vsel %vm4062_vm7, %v4298_v44, %v14178_v20  ;;  %v17534_v21 = vld [vmem:[#allocation108_spill] sm:$0xff]  ;;  %v17538_v33 = vld [vmem:[#allocation3_spill] sm:$0xff]  ;;  %17539 = vst [vmem:[#allocation38_spill] sm:$0xff] %v14442_v10  ;;  %v17540_v12 = vld [vmem:[#allocation62_spill] sm:$0xff] }
 0x1fc   :  { %17527 = vst [vmem:[#allocation26_spill] sm:$0xff] %v14411_v1  ;;  %17530 = vst [vmem:[#allocation77_spill] sm:$0xff] %v14417_v52  ;;  %v14434_v30 = vadd.f32 %v17535_v16, %v17534_v21  ;;  %v4457_v45 = vsel %vm4127_vm8, %v4369_v42, %v14230_v48  ;;  %v4112_v13 = vsel %vm4062_vm7, %v4040_v28, %v14168_v36  ;;  %v17537_v2 = vld [vmem:[#allocation4_spill] sm:$0xff]  ;;  %v14451_v48 = vpop.f32.mrb[85].mxu1  ;;  %v17543_v36 = vld [vmem:[#allocation7_spill] sm:$0xff] }
 0x1fd   :  { %17533 = vst [vmem:[#allocation37_spill] sm:$0xff] %v14421_v62  ;;  %v8469_v25 = vcombine.low %v17538_v33, %v17537_v2  ;;  %v3698_v20 = vpop.permute.xlu0 %3697  ;;  %v9147_v31 = vld [vmem:[%s16999_s0 + $0x254] sm:$0xf]  ;;  %v14449_v6 = vadd.f32 %v17540_v12, %v13936_v18  ;;  %17542 = vst [vmem:[#allocation39_spill] sm:$0xff] %v14451_v48  ;;  %v14455_v28 = vadd.f32 %v17543_v36, %v13946_v37  ;;  %v17545_v44 = vld [vmem:[#allocation63_spill] sm:$0xff]  ;;  %v14461_v21 = vpop.f32.mrb[86].mxu1 }
 0x1fe   :  { %v3058_v56 = vpop.permute.xlu1 %3057  ;;  %17536 = vst [vmem:[#allocation79_spill] sm:$0xff] %v14434_v30  ;;  %v14459_v42 = vadd.f32 %v17545_v44, %v13963_v39  ;;  %17547 = vst [vmem:[#allocation45_spill] sm:$0xff] %v14461_v21  ;;  %v4201_v16 = vsel %vm4127_vm8, %v4112_v13, %v14205_v41  ;;  %v14469_v2 = vpop.f32.mrb[44].mxu0  ;;  %v73_v41 = vld [vmem:[%s16999_s0 + $0x260] sm:$0xf]  ;;  %v17549_v13 = vld [vmem:[#allocation64_spill] sm:$0xff] }
 0x1ff   :  { %17541 = vst [vmem:[#allocation81_spill] sm:$0xff] %v14449_v6  ;;  %17544 = vst [vmem:[#allocation83_spill] sm:$0xff] %v14455_v28  ;;  %v4301_v18 = vsel %vm3965_vm6, %v8469_v25, %v14278_v54  ;;  %v14475_v33 = vpop.f32.mrb[45].mxu0  ;;  %v17551_v36 = vld [vmem:[#allocation94_spill] sm:$0xff]  ;;  %v17691_v10 = vld [vmem:[#allocation13_spill] sm:$0xff] }
 0x200   :  { %5055 = vmatmul.mubr.bf16.gmra.mrb[92].mxu0 %v4198_v58  ;;  %v8341_v58 = vcombine.low %v71_v15, %v9147_v31  ;;  %17546 = vst [vmem:[#allocation41_spill] sm:$0xff] %v14459_v42  ;;  %v14465_v15 = vpop.f32.mrb[87].mxu1  ;;  %v4371_v39 = vsel %vm4062_vm7, %v4301_v18, %v14330_v0  ;;  %v14482_v31 = vadd.f32 %v17549_v13, %v13976_v49  ;;  %v4940_v12 = vpop.f32.mrb[46].mxu0  ;;  %v9148_v49 = vld [vmem:[%s16999_s0 + $0x264] sm:$0xf] }
 0x201   :  { %5064 = vmatprep.mubr.bf16.mxu0 %v4457_v45  ;;  %17548 = vst [vmem:[#allocation46_spill] sm:$0xff] %v14465_v15  ;;  %v4460_v54 = vsel %vm4127_vm8, %v4371_v39, %v3856_v61  ;;  %v3858_v25 = vpop.permute.xlu0 %3857  ;;  %v4942_v44 = vpop.f32.mrb[47].mxu0  ;;  %v8342_v13 = vcombine.low %v73_v41, %v9148_v49  ;;  %v17555_v61 = vld [vmem:[#allocation67_spill] sm:$0xff] }
 0x202   :  { %v3250_v45 = vpop.permute.xlu1 %3249  ;;  %v4043_v37 = vsel %vm3965_vm6, %v8341_v58, %v14259_v14  ;;  %17550 = vst [vmem:[#allocation47_spill] sm:$0xff] %v14482_v31  ;;  %v17552_v14 = vld [vmem:[#allocation93_spill] sm:$0xff]  ;;  %v14498_v39 = vadd.f32 %v17555_v61, %v14100_v34  ;;  %v17561_v61 = vld [vmem:[#allocation70_spill] sm:$0xff] }
 0x203   :  { %v8470_v58 = vcombine.low %v17552_v14, %v17551_v36  ;;  %v4114_v0 = vsel %vm4062_vm7, %v4043_v37, %v14310_v51  ;;  %v14507_v37 = vpop.f32.mrb[88].mxu1  ;;  %v4046_v34 = vsel %vm3965_vm6, %v8342_v13, %v2898_v9 }
 0x204   :  { %17556 = vst [vmem:[#allocation48_spill] sm:$0xff] %v14498_v39  ;;  %v4204_v51 = vsel %vm4127_vm8, %v4114_v0, %v14351_v22  ;;  %17559 = vst [vmem:[#allocation50_spill] sm:$0xff] %v14507_v37  ;;  %v14510_v49 = vpop.f32.mrb[89].mxu1  ;;  %v75_v22 = vld [vmem:[%s16999_s0 + $0x270] sm:$0xf]  ;;  %v4116_v9 = vsel %vm4062_vm7, %v4046_v34, %v3058_v56  ;;  %v17573_v34 = vld [vmem:[#allocation78_spill] sm:$0xff] }
 0x205   :  { %17560 = vst [vmem:[#allocation101_spill] sm:$0xff] %v14510_v49  ;;  %v14518_v15 = vpop.f32.mrb[90].mxu1  ;;  %v17611_v49 = vld [vmem:[#allocation99_spill] sm:$0xff] }
 0x206   :  { %v2900_v14 = vpop.permute.xlu1 %2899  ;;  %v3508_v41 = vpop.permute.xlu0 %3507  ;;  %17563 = vst [vmem:[#allocation103_spill] sm:$0xff] %v14518_v15 }
 0x208   :  { %5065 = vmatmul.mubr.bf16.gmra.mrb[96].mxu0 %v4201_v16  ;;  %v17553_v16 = vld [vmem:[#allocation65_spill] sm:$0xff] }
 0x209   :  { %5074 = vmatprep.mubr.bf16.mxu0 %v4460_v54  ;;  %v14491_v18 = vadd.f32 %v17553_v16, %v14089_v8  ;;  %v17557_v54 = vld [vmem:[#allocation69_spill] sm:$0xff]  ;;  %v4304_v8 = vsel %vm3965_vm6, %v8470_v58, %v3506_v47  ;;  %v14523_v47 = vpop.f32.mrb[91].mxu1 }
 0x20a   :  { %v14502_v36 = vadd.f32 %v17557_v54, %v14111_v53  ;;  %v4373_v16 = vsel %vm4062_vm7, %v4304_v8, %v3698_v20  ;;  %v14515_v53 = vadd.f32 %v17561_v61, %v14120_v38  ;;  %17564 = vst [vmem:[#allocation54_spill] sm:$0xff] %v14523_v47  ;;  %v17565_v20 = vld [vmem:[#allocation72_spill] sm:$0xff]  ;;  %v3060_v0 = vpop.permute.xlu1 %3059  ;;  %v17567_v38 = vld [vmem:[#allocation74_spill] sm:$0xff]  ;;  %v3700_v61 = vpop.permute.xlu0 %3699  ;;  %v14546_v47 = vadd.f32 %v17573_v34, %v14261_v7 }
 0x20b   :  { %17554 = vst [vmem:[#allocation17_spill] sm:$0xff] %v14491_v18  ;;  %v4463_v54 = vsel %vm4127_vm8, %v4373_v16, %v3858_v25  ;;  %v14527_v58 = vadd.f32 %v17565_v20, %v14236_v63  ;;  %v14532_v13 = vadd.f32 %v17567_v38, %v14244_v26  ;;  %v17569_v25 = vld [vmem:[#allocation76_spill] sm:$0xff]  ;;  %v4207_v63 = vsel %vm4127_vm8, %v4116_v9, %v3250_v45  ;;  %v17572_v20 = vld [vmem:[#allocation95_spill] sm:$0xff]  ;;  %v14553_v15 = vpop.f32.mrb[92].mxu1  ;;  %v17578_v45 = vld [vmem:[#allocation82_spill] sm:$0xff] }
 0x20c   :  { %17558 = vst [vmem:[#allocation71_spill] sm:$0xff] %v14502_v36  ;;  %17562 = vst [vmem:[#allocation52_spill] sm:$0xff] %v14515_v53  ;;  %v9149_v8 = vld [vmem:[%s16999_s0 + $0x274] sm:$0xf]  ;;  %v14558_v9 = vadd.f32 %v17578_v45, %v14376_v60 }
 0x20d   :  { %17566 = vst [vmem:[#allocation106_spill] sm:$0xff] %v14527_v58  ;;  %17568 = vst [vmem:[#allocation56_spill] sm:$0xff] %v14532_v13  ;;  %v8343_v16 = vcombine.low %v75_v22, %v9149_v8  ;;  %v17575_v26 = vld [vmem:[#allocation80_spill] sm:$0xff] }
 0x20e   :  { %17574 = vst [vmem:[#allocation59_spill] sm:$0xff] %v14546_v47  ;;  %17577 = vst [vmem:[#allocation3_spill] sm:$0xff] %v14553_v15  ;;  %v17580_v8 = vld [vmem:[#allocation84_spill] sm:$0xff] }
 0x20f   :  { %v4049_v38 = vsel %vm3965_vm6, %v8343_v16, %v2900_v14  ;;  %17579 = vst [vmem:[#allocation62_spill] sm:$0xff] %v14558_v9  ;;  %v14562_v7 = vadd.f32 %v17580_v8, %v14386_v23 }
 0x210   :  { %5075 = vmatmul.mubr.bf16.gmra.mrb[100].mxu0 %v4204_v51  ;;  %v14536_v51 = vadd.f32 %v17569_v25, %v14253_v4  ;;  %v14550_v4 = vadd.f32 %v17575_v26, %v14372_v3  ;;  %v3252_v25 = vpop.permute.xlu1 %3251  ;;  %v4118_v3 = vsel %vm4062_vm7, %v4049_v38, %v3060_v0  ;;  %v17587_v0 = vld [vmem:[#allocation2_spill] sm:$0xff] }
 0x211   :  { %5084 = vmatprep.mubr.bf16.mxu0 %v4463_v54  ;;  %v17571_v54 = vld [vmem:[#allocation96_spill] sm:$0xff]  ;;  %17581 = vst [vmem:[#allocation7_spill] sm:$0xff] %v14562_v7  ;;  %v4210_v8 = vsel %vm4127_vm8, %v4118_v3, %v3252_v25  ;;  %v17589_v38 = vld [vmem:[#allocation86_spill] sm:$0xff] }
 0x212   :  { %17570 = vst [vmem:[#allocation108_spill] sm:$0xff] %v14536_v51  ;;  %v8471_v56 = vcombine.low %v17572_v20, %v17571_v54  ;;  %17576 = vst [vmem:[#allocation4_spill] sm:$0xff] %v14550_v4  ;;  %v14564_v54 = vpop.f32.mrb[93].mxu1  ;;  %v17583_v20 = vld [vmem:[#allocation85_spill] sm:$0xff]  ;;  %v17598_v3 = vld [vmem:[#allocation90_spill] sm:$0xff] }
 0x213   :  { %17582 = vst [vmem:[#allocation63_spill] sm:$0xff] %v14564_v54  ;;  %v14570_v34 = vadd.f32 %v17583_v20, %v14392_v24  ;;  %v14573_v26 = vpop.f32.mrb[94].mxu1  ;;  %v14584_v24 = vadd.f32 %v17589_v38, %v14475_v33  ;;  %v17601_v33 = vld [vmem:[#allocation91_spill] sm:$0xff]  ;;  %v17609_v54 = vld [vmem:[#allocation98_spill] sm:$0xff] }
 0x214   :  { %v4307_v22 = vsel %vm3965_vm6, %v8471_v56, %v3508_v41  ;;  %17585 = vst [vmem:[#allocation94_spill] sm:$0xff] %v14573_v26  ;;  %v14575_v45 = vpop.f32.mrb[95].mxu1  ;;  %v17595_v26 = vld [vmem:[#allocation11_spill] sm:$0xff] }
 0x215   :  { %v4375_v14 = vsel %vm4062_vm7, %v4307_v22, %v3700_v61  ;;  %17584 = vst [vmem:[#allocation64_spill] sm:$0xff] %v14570_v34  ;;  %17586 = vst [vmem:[#allocation93_spill] sm:$0xff] %v14575_v45  ;;  %v14580_v61 = vadd.f32 %v17587_v0, %v14469_v2  ;;  %v17591_v22 = vld [vmem:[#allocation88_spill] sm:$0xff]  ;;  %v14595_v25 = vpop.f32.mrb[96].mxu1 }
 0x216   :  { %17590 = vst [vmem:[#allocation67_spill] sm:$0xff] %v14584_v24  ;;  %17597 = vst [vmem:[#allocation74_spill] sm:$0xff] %v14595_v25  ;;  %v14600_v0 = vpop.f32.mrb[97].mxu1 }
 0x217   :  { %17588 = vst [vmem:[#allocation65_spill] sm:$0xff] %v14580_v61  ;;  %17600 = vst [vmem:[#allocation96_spill] sm:$0xff] %v14600_v0 }
 0x218   :  { %5085 = vmatmul.mubr.bf16.gmra.mrb[104].mxu0 %v4207_v63  ;;  %v4946_v63 = vpop.f32.mrb[48].mxu0 }
 0x219   :  { %v3860_v16 = vpop.permute.xlu0 %3859  ;;  %v4948_v41 = vpop.f32.mrb[49].mxu0  ;;  %v14593_v45 = vadd.f32 %v17595_v26, %v4946_v63  ;;  %v77_v63 = vld [vmem:[%s16999_s0 + $0x280] sm:$0xf] }
 0x21a   :  { %v4466_v60 = vsel %vm4127_vm8, %v4375_v14, %v3860_v16  ;;  %v4950_v56 = vpop.f32.mrb[50].mxu0  ;;  %v14587_v14 = vadd.f32 %v17591_v22, %v4940_v12  ;;  %v17593_v16 = vld [vmem:[#allocation89_spill] sm:$0xff]  ;;  %v14598_v2 = vadd.f32 %v17598_v3, %v4948_v41  ;;  %v17605_v22 = vld [vmem:[#allocation92_spill] sm:$0xff] }
 0x21b   :  { %5094 = vmatprep.mubr.bf16.mxu0 %v4466_v60  ;;  %v4952_v23 = vpop.f32.mrb[51].mxu0  ;;  %v14590_v20 = vadd.f32 %v17593_v16, %v4942_v44  ;;  %v2902_v60 = vpop.permute.xlu1 %2901  ;;  %17596 = vst [vmem:[#allocation72_spill] sm:$0xff] %v14593_v45  ;;  %v14603_v38 = vadd.f32 %v17601_v33, %v4950_v56  ;;  %v17607_v3 = vld [vmem:[#allocation97_spill] sm:$0xff]  ;;  %v9150_v33 = vld [vmem:[%s16999_s0 + $0x284] sm:$0xf] }
 0x21c   :  { %17592 = vst [vmem:[#allocation69_spill] sm:$0xff] %v14587_v14  ;;  %17599 = vst [vmem:[#allocation76_spill] sm:$0xff] %v14598_v2  ;;  %v14613_v16 = vadd.f32 %v17605_v22, %v4952_v23  ;;  %v4956_v41 = vpop.f32.mrb[52].mxu0  ;;  %v17613_v22 = vld [vmem:[#allocation20_spill] sm:$0xff] }
 0x21d   :  { %17594 = vst [vmem:[#allocation70_spill] sm:$0xff] %v14590_v20  ;;  %17602 = vst [vmem:[#allocation95_spill] sm:$0xff] %v14603_v38  ;;  %v14616_v25 = vadd.f32 %v17607_v3, %v4956_v41  ;;  %v4958_v0 = vpop.f32.mrb[53].mxu0  ;;  %v17615_v41 = vld [vmem:[#allocation100_spill] sm:$0xff] }
 0x21e   :  { %v3510_v44 = vpop.permute.xlu0 %3509  ;;  %17606 = vst [vmem:[#allocation82_spill] sm:$0xff] %v14613_v16  ;;  %v4960_v56 = vpop.f32.mrb[54].mxu0  ;;  %v14622_v15 = vadd.f32 %v17609_v54, %v4958_v0  ;;  %v8472_v3 = vcombine.low %v17615_v41, %v13803_v55 }
 0x21f   :  { %v3062_v26 = vpop.permute.xlu1 %3061  ;;  %17608 = vst [vmem:[#allocation84_spill] sm:$0xff] %v14616_v25  ;;  %v14625_v37 = vadd.f32 %v17611_v49, %v4960_v56 }
 0x220   :  { %5095 = vmatmul.mubr.bf16.gmra.mrb[108].mxu0 %v4210_v8  ;;  %v14605_v8 = vpop.f32.mrb[98].mxu1  ;;  %17610 = vst [vmem:[#allocation85_spill] sm:$0xff] %v14622_v15  ;;  %v4310_v0 = vsel %vm3965_vm6, %v8472_v3, %v3510_v44  ;;  %v9151_v3 = vld [vmem:[%s16999_s0 + $0x294] sm:$0xf] }
 0x221   :  { %17603 = vst [vmem:[#allocation78_spill] sm:$0xff] %v14605_v8  ;;  %v14607_v12 = vpop.f32.mrb[99].mxu1  ;;  %v4962_v8 = vpop.f32.mrb[55].mxu0  ;;  %17612 = vst [vmem:[#allocation2_spill] sm:$0xff] %v14625_v37 }
 0x222   :  { %17604 = vst [vmem:[#allocation80_spill] sm:$0xff] %v14607_v12  ;;  %v8344_v12 = vcombine.low %v77_v63, %v9150_v33  ;;  %v14628_v16 = vadd.f32 %v17613_v22, %v4962_v8  ;;  %v14632_v38 = vpop.f32.mrb[100].mxu1 }
 0x223   :  { %17616 = vst [vmem:[#allocation88_spill] sm:$0xff] %v14632_v38  ;;  %v14635_v63 = vpop.f32.mrb[101].mxu1 }
 0x224   :  { %17614 = vst [vmem:[#allocation86_spill] sm:$0xff] %v14628_v16  ;;  %v4052_v21 = vsel %vm3965_vm6, %v8344_v12, %v2902_v60  ;;  %17617 = vst [vmem:[#allocation89_spill] sm:$0xff] %v14635_v63  ;;  %v14637_v33 = vpop.f32.mrb[102].mxu1  ;;  %v79_v60 = vld [vmem:[%s16999_s0 + $0x290] sm:$0xf] }
 0x225   :  { %17618 = vst [vmem:[#allocation11_spill] sm:$0xff] %v14637_v33  ;;  %v14639_v54 = vpop.f32.mrb[103].mxu1  ;;  %v4120_v49 = vsel %vm4062_vm7, %v4052_v21, %v3062_v26  ;;  %v17620_v21 = vld [vmem:[#allocation102_spill] sm:$0xff]  ;;  %v17632_v16 = vld [vmem:[#allocation104_spill] sm:$0xff] }
 0x226   :  { %17619 = vst [vmem:[#allocation90_spill] sm:$0xff] %v14639_v54 }
 0x22b   :  { %v4966_v33 = vpop.f32.mrb[56].mxu0 }
 0x22c   :  { %v14650_v26 = vadd.f32 %v17620_v21, %v4966_v33  ;;  %v4968_v44 = vpop.f32.mrb[57].mxu0  ;;  %v17628_v21 = vld [vmem:[#allocation111_spill] sm:$0xff] }
 0x22d   :  { %v3254_v25 = vpop.permute.xlu1 %3253 }
 0x22e   :  { %v3702_v23 = vpop.permute.xlu0 %3701  ;;  %v4213_v41 = vsel %vm4127_vm8, %v4120_v49, %v3254_v25  ;;  %17621 = vst [vmem:[#allocation91_spill] sm:$0xff] %v14650_v26  ;;  %v17623_v25 = vld [vmem:[#allocation109_spill] sm:$0xff]  ;;  %v17631_v26 = vld [vmem:[#allocation107_spill] sm:$0xff] }
 0x22f   :  { %v4377_v8 = vsel %vm4062_vm7, %v4310_v0, %v3702_v23  ;;  %v14652_v23 = vpop.f32.mrb[104].mxu1  ;;  %v8345_v0 = vcombine.low %v79_v60, %v9151_v3  ;;  %v14658_v49 = vadd.f32 %v17623_v25, %v4968_v44  ;;  %v8473_v37 = vcombine.low %v17632_v16, %v17631_v26 }
 0x230   :  { %17622 = vst [vmem:[#allocation92_spill] sm:$0xff] %v14652_v23 }
 0x231   :  { %17624 = vst [vmem:[#allocation97_spill] sm:$0xff] %v14658_v49  ;;  %v17647_v49 = vld [vmem:[#allocation113_spill] sm:$0xff] }
 0x237   :  { %v3862_v56 = vpop.permute.xlu0 %3861 }
 0x238   :  { %v2904_v22 = vpop.permute.xlu1 %2903  ;;  %v4469_v55 = vsel %vm4127_vm8, %v4377_v8, %v3862_v56  ;;  %v4970_v8 = vpop.f32.mrb[58].mxu0 }
 0x239   :  { %5104 = vmatprep.mubr.bf16.mxu0 %v4469_v55  ;;  %v14660_v56 = vpop.f32.mrb[105].mxu1  ;;  %v17626_v55 = vld [vmem:[#allocation31_spill] sm:$0xff]  ;;  %v4972_v63 = vpop.f32.mrb[59].mxu0  ;;  %v4055_v44 = vsel %vm3965_vm6, %v8345_v0, %v2904_v22 }
 0x23a   :  { %5105 = vmatmul.mubr.bf16.gmra.mrb[112].mxu0 %v4213_v41  ;;  %17625 = vst [vmem:[#allocation98_spill] sm:$0xff] %v14660_v56  ;;  %v14663_v41 = vadd.f32 %v17626_v55, %v4970_v8  ;;  %v14666_v38 = vadd.f32 %v17628_v21, %v4972_v63  ;;  %v14668_v23 = vpop.f32.mrb[106].mxu1 }
 0x23b   :  { %17630 = vst [vmem:[#allocation100_spill] sm:$0xff] %v14668_v23  ;;  %v14672_v60 = vpop.f32.mrb[107].mxu1 }
 0x23c   :  { %v3064_v12 = vpop.permute.xlu1 %3063  ;;  %17627 = vst [vmem:[#allocation99_spill] sm:$0xff] %v14663_v41  ;;  %17629 = vst [vmem:[#allocation20_spill] sm:$0xff] %v14666_v38  ;;  %v14680_v16 = vpop.f32.mrb[108].mxu1  ;;  %v17645_v38 = vld [vmem:[#allocation110_spill] sm:$0xff] }
 0x23d   :  { %v3512_v54 = vpop.permute.xlu0 %3511  ;;  %17633 = vst [vmem:[#allocation102_spill] sm:$0xff] %v14672_v60  ;;  %v4122_v25 = vsel %vm4062_vm7, %v4055_v44, %v3064_v12  ;;  %17634 = vst [vmem:[#allocation109_spill] sm:$0xff] %v14680_v16  ;;  %v14682_v26 = vpop.f32.mrb[109].mxu1 }
 0x23e   :  { %v4313_v8 = vsel %vm3965_vm6, %v8473_v37, %v3512_v54  ;;  %17635 = vst [vmem:[#allocation31_spill] sm:$0xff] %v14682_v26  ;;  %v14684_v22 = vpop.f32.mrb[110].mxu1  ;;  %v81_v37 = vld [vmem:[%s16999_s0 + $0x2a0] sm:$0xf] }
 0x23f   :  { %17636 = vst [vmem:[#allocation111_spill] sm:$0xff] %v14684_v22  ;;  %v14689_v54 = vpop.f32.mrb[111].mxu1  ;;  %v17643_v26 = vld [vmem:[#allocation10_spill] sm:$0xff] }
 0x240   :  { %v3256_v3 = vpop.permute.xlu1 %3255  ;;  %17637 = vst [vmem:[#allocation107_spill] sm:$0xff] %v14689_v54  ;;  %v17646_v54 = vld [vmem:[#allocation105_spill] sm:$0xff] }
 0x241   :  { %v3704_v33 = vpop.permute.xlu0 %3703  ;;  %v4216_v23 = vsel %vm4127_vm8, %v4122_v25, %v3256_v3  ;;  %v17641_v25 = vld [vmem:[#allocation9_spill] sm:$0xff]  ;;  %v8474_v41 = vcombine.low %v17646_v54, %v17645_v38 }
 0x242   :  { %v4379_v55 = vsel %vm4062_vm7, %v4313_v8, %v3704_v33  ;;  %v17638_v33 = vld [vmem:[#allocation36_spill] sm:$0xff] }
 0x243   :  { %v8346_v44 = vcombine.low %v81_v37, %v17638_v33  ;;  %v17639_v8 = vld [vmem:[#allocation112_spill] sm:$0xff] }
 0x247   :  { %v14707_v33 = vpop.f32.mrb[112].mxu1 }
 0x248   :  { %v3864_v56 = vpop.permute.xlu0 %3863  ;;  %17649 = vst [vmem:[#allocation10_spill] sm:$0xff] %v14707_v33 }
 0x249   :  { %v4472_v63 = vsel %vm4127_vm8, %v4379_v55, %v3864_v56  ;;  %v4976_v56 = vpop.f32.mrb[60].mxu0 }
 0x24a   :  { %v2906_v21 = vpop.permute.xlu1 %2905  ;;  %5114 = vmatprep.mubr.bf16.mxu0 %v4472_v63  ;;  %v14693_v3 = vadd.f32 %v17639_v8, %v4976_v56 }
 0x24b   :  { %5115 = vmatmul.mubr.bf16.gmra.mrb[116].mxu0 %v4216_v23  ;;  %v4978_v23 = vpop.f32.mrb[61].mxu0  ;;  %v4058_v37 = vsel %vm3965_vm6, %v8346_v44, %v2906_v21 }
 0x24c   :  { %17640 = vst [vmem:[#allocation104_spill] sm:$0xff] %v14693_v3  ;;  %v14696_v55 = vadd.f32 %v17641_v25, %v4978_v23  ;;  %v4980_v63 = vpop.f32.mrb[62].mxu0  ;;  %v14711_v25 = vpop.f32.mrb[113].mxu1 }
 0x24d   :  { %v14699_v16 = vadd.f32 %v17643_v26, %v4980_v63  ;;  %v4982_v60 = vpop.f32.mrb[63].mxu0  ;;  %17650 = vst [vmem:[#allocation110_spill] sm:$0xff] %v14711_v25  ;;  %v17660_v25 = vld [vmem:[#allocation51_spill] sm:$0xff] }
 0x24e   :  { %v3066_v0 = vpop.permute.xlu1 %3065  ;;  %17642 = vst [vmem:[#allocation36_spill] sm:$0xff] %v14696_v55  ;;  %v14704_v15 = vadd.f32 %v17647_v49, %v4982_v60 }
 0x24f   :  { %v3514_v12 = vpop.permute.xlu0 %3513  ;;  %17644 = vst [vmem:[#allocation112_spill] sm:$0xff] %v14699_v16  ;;  %v4124_v8 = vsel %vm4062_vm7, %v4058_v37, %v3066_v0  ;;  %v14714_v16 = vpop.f32.mrb[114].mxu1 }
 0x250   :  { %17648 = vst [vmem:[#allocation9_spill] sm:$0xff] %v14704_v15  ;;  %v4316_v23 = vsel %vm3965_vm6, %v8474_v41, %v3514_v12  ;;  %17651 = vst [vmem:[#allocation105_spill] sm:$0xff] %v14714_v16  ;;  %v14717_v49 = vpop.f32.mrb[115].mxu1  ;;  %v83_v41 = vld [vmem:[%s16999_s0 + $0x2b0] sm:$0xf] }
 0x251   :  { %17652 = vst [vmem:[#allocation113_spill] sm:$0xff] %v14717_v49  ;;  %v17653_v12 = vld [vmem:[#allocation12_spill] sm:$0xff] }
 0x252   :  { %v3258_v56 = vpop.permute.xlu1 %3257  ;;  %v8347_v0 = vcombine.low %v83_v41, %v17653_v12 }
 0x253   :  { %v3706_v22 = vpop.permute.xlu0 %3705  ;;  %v4219_v60 = vsel %vm4127_vm8, %v4124_v8, %v3258_v56  ;;  %v17658_v56 = vld [vmem:[#allocation14_spill] sm:$0xff] }
 0x254   :  { %v4381_v26 = vsel %vm4062_vm7, %v4316_v23, %v3706_v22  ;;  %v14724_v44 = vpop.f32.mrb[116].mxu1  ;;  %v4986_v37 = vpop.f32.mrb[64].mxu0 }
 0x255   :  { %17654 = vst [vmem:[#allocation12_spill] sm:$0xff] %v14724_v44  ;;  %v14726_v23 = vpop.f32.mrb[117].mxu1  ;;  %v14731_v8 = vadd.f32 %v17658_v56, %v4986_v37  ;;  %v17663_v44 = vld [vmem:[#allocation61_spill] sm:$0xff] }
 0x256   :  { %17655 = vst [vmem:[#allocation116_spill] sm:$0xff] %v14726_v23  ;;  %v14737_v12 = vpop.f32.mrb[118].mxu1 }
 0x257   :  { %17662 = vst [vmem:[#allocation14_spill] sm:$0xff] %v14737_v12  ;;  %v14742_v55 = vpop.f32.mrb[119].mxu1  ;;  %v17689_v12 = vld [vmem:[#allocation32_spill] sm:$0xff] }
 0x258   :  { %v3866_v63 = vpop.permute.xlu0 %3865  ;;  %17665 = vst [vmem:[#allocation61_spill] sm:$0xff] %v14742_v55 }
 0x259   :  { %v4475_v38 = vsel %vm4127_vm8, %v4381_v26, %v3866_v63  ;;  %v2908_v21 = vpop.permute.xlu1 %2907  ;;  %v17656_v26 = vld [vmem:[#allocation115_spill] sm:$0xff]  ;;  %v17657_v63 = vld [vmem:[#allocation114_spill] sm:$0xff] }
 0x25a   :  { %5124 = vmatprep.mubr.bf16.mxu0 %v4475_v38  ;;  %v8475_v38 = vcombine.low %v17657_v63, %v17656_v26  ;;  %17659 = vst [vmem:[#allocation115_spill] sm:$0xff] %v14731_v8  ;;  %v4061_v16 = vsel %vm3965_vm6, %v8347_v0, %v2908_v21  ;;  %v17666_v26 = vld [vmem:[#allocation49_spill] sm:$0xff]  ;;  %v17690_v8 = vld [vmem:[#allocation34_spill] sm:$0xff] }
 0x25b   :  { %5125 = vmatmul.mubr.bf16.gmra.mrb[120].mxu0 %v4219_v60  ;;  %v4988_v60 = vpop.f32.mrb[65].mxu0  ;;  %v5708_v3 = vmul.f32 %v17690_v8, %v17690_v8 }
 0x25c   :  { %v14735_v33 = vadd.f32 %v17660_v25, %v4988_v60  ;;  %v4990_v41 = vpop.f32.mrb[66].mxu0 }
 0x25d   :  { %v3068_v22 = vpop.permute.xlu1 %3067  ;;  %v14740_v15 = vadd.f32 %v17663_v44, %v4990_v41  ;;  %v4992_v23 = vpop.f32.mrb[67].mxu0 }
 0x25e   :  { %17661 = vst [vmem:[#allocation114_spill] sm:$0xff] %v14735_v33  ;;  %v14745_v63 = vadd.f32 %v17666_v26, %v4992_v23  ;;  %v4126_v37 = vsel %vm4062_vm7, %v4061_v16, %v3068_v22 }
 0x25f   :  { %17664 = vst [vmem:[#allocation51_spill] sm:$0xff] %v14740_v15 }
 0x260   :  { %v3516_v54 = vpop.permute.xlu0 %3515  ;;  %17667 = vst [vmem:[#allocation49_spill] sm:$0xff] %v14745_v63 }
 0x261   :  { %v4319_v56 = vsel %vm3965_vm6, %v8475_v38, %v3516_v54  ;;  %v3260_v21 = vpop.permute.xlu1 %3259  ;;  %v17672_v54 = vld [vmem:[#allocation15_spill] sm:$0xff]  ;;  %v17674_v38 = vld [vmem:[#allocation57_spill] sm:$0xff] }
 0x262   :  { %v4222_v44 = vsel %vm4127_vm8, %v4126_v37, %v3260_v21 }
 0x264   :  { %v3708_v49 = vpop.permute.xlu0 %3707 }
 0x265   :  { %v4383_v25 = vsel %vm4062_vm7, %v4319_v56, %v3708_v49  ;;  %v14752_v41 = vpop.f32.mrb[120].mxu1 }
 0x266   :  { %17668 = vst [vmem:[#allocation117_spill] sm:$0xff] %v14752_v41  ;;  %v14754_v55 = vpop.f32.mrb[121].mxu1 }
 0x267   :  { %17669 = vst [vmem:[#allocation118_spill] sm:$0xff] %v14754_v55  ;;  %v14756_v23 = vpop.f32.mrb[122].mxu1 }
 0x268   :  { %v3868_v0 = vpop.permute.xlu0 %3867  ;;  %17670 = vst [vmem:[#allocation119_spill] sm:$0xff] %v14756_v23  ;;  %v14758_v26 = vpop.f32.mrb[123].mxu1 }
 0x269   :  { %v4478_v60 = vsel %vm4127_vm8, %v4383_v25, %v3868_v0  ;;  %17671 = vst [vmem:[#allocation120_spill] sm:$0xff] %v14758_v26  ;;  %v4996_v16 = vpop.f32.mrb[68].mxu0  ;;  %v17676_v0 = vld [vmem:[#allocation43_spill] sm:$0xff] }
 0x26a   :  { %5134 = vmatprep.mubr.bf16.mxu0 %v4478_v60  ;;  %v14761_v22 = vadd.f32 %v17672_v54, %v4996_v16  ;;  %v4998_v49 = vpop.f32.mrb[69].mxu0  ;;  %v17678_v60 = vld [vmem:[#allocation23_spill] sm:$0xff]  ;;  %v17684_v54 = vld [vmem:[#allocation5_spill] sm:$0xff] }
 0x26b   :  { %5135 = vmatmul.mubr.bf16.gmra.mrb[124].mxu0 %v4222_v44  ;;  %v14764_v56 = vadd.f32 %v17674_v38, %v4998_v49  ;;  %v5000_v25 = vpop.f32.mrb[70].mxu0  ;;  %v5704_v49 = vmul.f32 %v17684_v54, %v17684_v54  ;;  %v17685_v38 = vld [vmem:[#allocation6_spill] sm:$0xff] }
 0x26c   :  { %17673 = vst [vmem:[#allocation15_spill] sm:$0xff] %v14761_v22  ;;  %v14767_v37 = vadd.f32 %v17676_v0, %v5000_v25  ;;  %v5002_v21 = vpop.f32.mrb[71].mxu0  ;;  %v5705_v41 = vmul.f32 %v17685_v38, %v17685_v38  ;;  %v17686_v25 = vld [vmem:[#allocation16_spill] sm:$0xff]  ;;  %v5570_v22 = vsel %vm3965_vm6, %v17689_v12, 0.0 }
 0x26d   :  { %17675 = vst [vmem:[#allocation57_spill] sm:$0xff] %v14764_v56  ;;  %v14770_v44 = vadd.f32 %v17678_v60, %v5002_v21  ;;  %v5702_v0 = vmul.f32 %v17686_v25, %v17686_v25  ;;  %v5568_v21 = vsel %vm3965_vm6, %v17685_v38, 0.0  ;;  %v17687_v60 = vld [vmem:[#allocation28_spill] sm:$0xff] }
 0x26e   :  { %17677 = vst [vmem:[#allocation43_spill] sm:$0xff] %v14767_v37  ;;  %v5900_v63 = vsel %vm3965_vm6, %v5705_v41, 0.0 }
 0x26f   :  { %17679 = vst [vmem:[#allocation23_spill] sm:$0xff] %v14770_v44  ;;  %v5707_v44 = vmul.f32 %v17689_v12, %v17689_v12  ;;  %v5830_v56 = vadd.f32 %v5704_v49, %v5702_v0  ;;  %v5709_v49 = vmul.f32 %v17691_v10, %v17691_v10 }
 0x271   :  { %v5902_v48 = vsel %vm3965_vm6, %v5707_v44, 0.0 }
 0x274   :  { %v14772_v55 = vpop.f32.mrb[124].mxu1 }
 0x275   :  { %17680 = vst [vmem:[#allocation121_spill] sm:$0xff] %v14772_v55  ;;  %v14774_v23 = vpop.f32.mrb[125].mxu1  ;;  %v5706_v55 = vmul.f32 %v17687_v60, %v17687_v60 }
 0x276   :  { %17681 = vst [vmem:[#allocation122_spill] sm:$0xff] %v14774_v23  ;;  %v14776_v26 = vpop.f32.mrb[126].mxu1  ;;  %v17688_v23 = vld [vmem:[#allocation18_spill] sm:$0xff] }
 0x277   :  { %17682 = vst [vmem:[#allocation123_spill] sm:$0xff] %v14776_v26  ;;  %v14778_v16 = vpop.f32.mrb[127].mxu1  ;;  %v5703_v26 = vmul.f32 %v17688_v23, %v17688_v23  ;;  %v5567_v37 = vsel %vm3965_vm6, %v17688_v23, 0.0  ;;  %v5831_v33 = vadd.f32 %v5830_v56, %v5706_v55  ;;  %v17693_v56 = vld [vmem:[#allocation21_spill] sm:$0xff] }
 0x278   :  { %17683 = vst [vmem:[#allocation124_spill] sm:$0xff] %v14778_v16  ;;  %v5498_v16 = vadd.f32 %v17684_v54, %v17686_v25  ;;  %v5569_v38 = vadd.f32 %v5568_v21, %v5567_v37  ;;  %v5572_v37 = vsel %vm3965_vm6, %v17691_v10, 0.0  ;;  %v17692_v21 = vld [vmem:[#allocation40_spill] sm:$0xff] }
 0x279   :  { %v5899_v25 = vsel %vm3965_vm6, %v5703_v26, 0.0  ;;  %v5710_v41 = vmul.f32 %v17692_v21, %v17692_v21  ;;  %v5832_v26 = vadd.f32 %v5831_v33, %v5708_v3  ;;  %v5714_v33 = vmul.f32 %v14215_v27, %v14215_v27 }
 0x27a   :  { %v5499_v15 = vadd.f32 %v5498_v16, %v17687_v60  ;;  %v5571_v54 = vadd.f32 %v5570_v22, %v5569_v38  ;;  %v5901_v0 = vadd.f32 %v5900_v63, %v5899_v25  ;;  %v5711_v16 = vmul.f32 %v17693_v56, %v17693_v56  ;;  %v17694_v60 = vld [vmem:[#allocation42_spill] sm:$0xff] }
 0x27b   :  { %v5574_v22 = vsel %vm3965_vm6, %v17693_v56, 0.0  ;;  %v5904_v38 = vsel %vm3965_vm6, %v5709_v49, 0.0  ;;  %v5833_v25 = vadd.f32 %v5832_v26, %v5710_v41  ;;  %v5712_v23 = vmul.f32 %v17694_v60, %v17694_v60  ;;  %v17696_v49 = vld [vmem:[#allocation8_spill] sm:$0xff] }
 0x27c   :  { %v5500_v55 = vadd.f32 %v5499_v15, %v17690_v8  ;;  %v5903_v12 = vadd.f32 %v5902_v48, %v5901_v0  ;;  %v5573_v44 = vadd.f32 %v5572_v37, %v5571_v54  ;;  %v5906_v15 = vsel %vm3965_vm6, %v5711_v16, 0.0  ;;  %v17695_v8 = vld [vmem:[#allocation22_spill] sm:$0xff] }
 0x27d   :  { %v5713_v2 = vmul.f32 %v17695_v8, %v17695_v8  ;;  %v5576_v3 = vsel %vm3965_vm6, %v17695_v8, 0.0  ;;  %v5715_v0 = vmul.f32 %v17696_v49, %v17696_v49  ;;  %v5834_v41 = vadd.f32 %v5833_v25, %v5712_v23 }
 0x27e   :  { %v5501_v63 = vadd.f32 %v5500_v55, %v17692_v21  ;;  %v5575_v10 = vadd.f32 %v5574_v22, %v5573_v44  ;;  %v5905_v48 = vadd.f32 %v5904_v38, %v5903_v12  ;;  %v5578_v55 = vsel %vm3965_vm6, %v17696_v49, 0.0  ;;  %v17697_v44 = vld [vmem:[#allocation73_spill] sm:$0xff] }
 0x27f   :  { %v5908_v26 = vsel %vm3965_vm6, %v5713_v2, 0.0  ;;  %v5835_v22 = vadd.f32 %v5834_v41, %v5714_v33  ;;  %v5716_v38 = vmul.f32 %v17697_v44, %v17697_v44  ;;  %v5717_v21 = vmul.f32 %v14268_v11, %v14268_v11 }
 0x280   :  { %v5502_v54 = vadd.f32 %v5501_v63, %v17694_v60  ;;  %v5907_v37 = vadd.f32 %v5906_v15, %v5905_v48  ;;  %v5577_v16 = vadd.f32 %v5576_v3, %v5575_v10  ;;  %v5910_v63 = vsel %vm3965_vm6, %v5715_v0, 0.0  ;;  %v17698_v3 = vld [vmem:[#allocation44_spill] sm:$0xff] }
 0x281   :  { %v5580_v23 = vsel %vm3965_vm6, %v14268_v11, 0.0  ;;  %v5718_v10 = vmul.f32 %v14308_v46, %v14308_v46  ;;  %v5719_v48 = vmul.f32 %v14319_v29, %v14319_v29  ;;  %v5836_v41 = vadd.f32 %v5835_v22, %v5716_v38  ;;  %v17702_v11 = vld [vmem:[#allocation66_spill] sm:$0xff]  ;;  %v17704_v38 = vld [vmem:[#allocation75_spill] sm:$0xff] }
 0x282   :  { %v5503_v12 = vadd.f32 %v5502_v54, %v14215_v27  ;;  %v5579_v56 = vadd.f32 %v5578_v55, %v5577_v16  ;;  %v5909_v15 = vadd.f32 %v5908_v26, %v5907_v37  ;;  %v5582_v37 = vsel %vm3965_vm6, %v14319_v29, 0.0  ;;  %v17700_v55 = vld [vmem:[#allocation24_spill] sm:$0xff] }
 0x283   :  { %v5912_v27 = vsel %vm3965_vm6, %v5717_v21, 0.0  ;;  %v5720_v22 = vmul.f32 %v14323_v19, %v14323_v19 }
 0x284   :  { %v5504_v25 = vadd.f32 %v5503_v12, %v17697_v44  ;;  %v5911_v0 = vadd.f32 %v5910_v63, %v5909_v15  ;;  %v5581_v49 = vadd.f32 %v5580_v23, %v5579_v56  ;;  %v5721_v56 = vmul.f32 %v14345_v50, %v14345_v50 }
 0x285   :  { %v5584_v23 = vsel %vm3965_vm6, %v14345_v50, 0.0  ;;  %v17779_v50 = vld [vmem:[#allocation43_spill] sm:$0xff] }
 0x286   :  { %v5505_v12 = vadd.f32 %v5504_v25, %v14308_v46  ;;  %v5583_v15 = vadd.f32 %v5582_v37, %v5581_v49  ;;  %v5913_v21 = vadd.f32 %v5912_v27, %v5911_v0  ;;  %v5723_v25 = vmul.f32 %v14366_v57, %v14366_v57 }
 0x287   :  { %v5586_v49 = vsel %vm3965_vm6, %v14366_v57, 0.0  ;;  %v5916_v37 = vsel %vm3965_vm6, %v5721_v56, 0.0  ;;  %v5727_v56 = vmul.f32 %v14417_v52, %v14417_v52  ;;  %v17728_v57 = vld [vmem:[#allocation82_spill] sm:$0xff] }
 0x293   :  { %v5006_v2 = vpop.f32.mrb[72].mxu0 }
 0x294   :  { %v14848_v33 = vadd.f32 %v17698_v3, %v5006_v2  ;;  %v5008_v54 = vpop.f32.mrb[73].mxu0  ;;  %v5837_v3 = vadd.f32 %v5836_v41, %v5718_v10  ;;  %v5506_v10 = vadd.f32 %v5505_v12, %v14323_v19  ;;  %v5918_v12 = vsel %vm3965_vm6, %v5723_v25, 0.0 }
 0x295   :  { %v14853_v16 = vadd.f32 %v17700_v55, %v5008_v54  ;;  %v5010_v26 = vpop.f32.mrb[74].mxu0  ;;  %v5914_v54 = vsel %vm3965_vm6, %v5719_v48, 0.0  ;;  %v5585_v48 = vadd.f32 %v5584_v23, %v5583_v15 }
 0x296   :  { %17699 = vst [vmem:[#allocation42_spill] sm:$0xff] %v14848_v33  ;;  %v14858_v44 = vadd.f32 %v17702_v11, %v5010_v26  ;;  %v5012_v2 = vpop.f32.mrb[75].mxu0  ;;  %v5722_v11 = vmul.f32 %v14360_v5, %v14360_v5  ;;  %v5915_v41 = vadd.f32 %v5914_v54, %v5913_v21  ;;  %v5838_v55 = vadd.f32 %v5837_v3, %v5720_v22 }
 0x297   :  { %17701 = vst [vmem:[#allocation22_spill] sm:$0xff] %v14853_v16  ;;  %v14863_v63 = vadd.f32 %v17704_v38, %v5012_v2  ;;  %v5507_v27 = vadd.f32 %v5506_v10, %v14360_v5  ;;  %v5724_v26 = vmul.f32 %v14370_v59, %v14370_v59  ;;  %v5587_v2 = vadd.f32 %v5586_v49, %v5585_v48 }
 0x298   :  { %17703 = vst [vmem:[#allocation44_spill] sm:$0xff] %v14858_v44  ;;  %v5839_v0 = vadd.f32 %v5838_v55, %v5722_v11  ;;  %v5725_v38 = vmul.f32 %v14400_v35, %v14400_v35  ;;  %v5917_v54 = vadd.f32 %v5916_v37, %v5915_v41  ;;  %v5588_v3 = vsel %vm3965_vm6, %v14400_v35, 0.0 }
 0x299   :  { %17705 = vst [vmem:[#allocation24_spill] sm:$0xff] %v14863_v63  ;;  %v5726_v22 = vmul.f32 %v14411_v1, %v14411_v1  ;;  %v5508_v15 = vadd.f32 %v5507_v27, %v14370_v59  ;;  %v5590_v11 = vsel %vm3965_vm6, %v14417_v52, 0.0  ;;  %v5589_v10 = vadd.f32 %v5588_v3, %v5587_v2  ;;  %v17777_v59 = vld [vmem:[#allocation90_spill] sm:$0xff] }
 0x29a   :  { %v5919_v21 = vadd.f32 %v5918_v12, %v5917_v54  ;;  %v5840_v23 = vadd.f32 %v5839_v0, %v5724_v26  ;;  %v5920_v25 = vsel %vm3965_vm6, %v5725_v38, 0.0  ;;  %v5728_v49 = vmul.f32 %v14421_v62, %v14421_v62 }
 0x29b   :  { %v5509_v41 = vadd.f32 %v5508_v15, %v14411_v1  ;;  %v5591_v37 = vadd.f32 %v5590_v11, %v5589_v10  ;;  %v5922_v27 = vsel %vm3965_vm6, %v5727_v56, 0.0  ;;  %v5729_v12 = vmul.f32 %v14434_v30, %v14434_v30 }
 0x29c   :  { %v5841_v55 = vadd.f32 %v5840_v23, %v5726_v22  ;;  %v5921_v2 = vadd.f32 %v5920_v25, %v5919_v21  ;;  %v5592_v38 = vsel %vm3965_vm6, %v14434_v30, 0.0  ;;  %v5730_v54 = vmul.f32 %v14449_v6, %v14449_v6  ;;  %v7529_v30 = vpop.permute.xlu0 %7528 }
 0x29d   :  { %v5510_v15 = vadd.f32 %v5509_v41, %v14421_v62  ;;  %v5731_v56 = vmul.f32 %v14455_v28, %v14455_v28  ;;  %v5594_v10 = vsel %vm3965_vm6, %v14455_v28, 0.0  ;;  %v5732_v52 = vmul.f32 %v14459_v42, %v14459_v42 }
 0x29e   :  { %v5923_v21 = vadd.f32 %v5922_v27, %v5921_v2  ;;  %v5842_v11 = vadd.f32 %v5841_v55, %v5728_v49  ;;  %v5733_v55 = vmul.f32 %v14482_v31, %v14482_v31  ;;  %v5735_v27 = vmul.f32 %v14498_v39, %v14498_v39 }
 0x29f   :  { %v5511_v41 = vadd.f32 %v5510_v15, %v14449_v6 }
 0x2a1   :  { %v5512_v2 = vadd.f32 %v5511_v41, %v14459_v42 }
 0x2a4   :  { %v5016_v48 = vpop.f32.mrb[76].mxu0 }
 0x2a5   :  { %v14901_v0 = vadd.f32 %v14288_v17, %v5016_v48  ;;  %v5018_v26 = vpop.f32.mrb[77].mxu0  ;;  %v5924_v48 = vsel %vm3965_vm6, %v5729_v12, 0.0 }
 0x2a6   :  { %v14908_v3 = vadd.f32 %v14292_v43, %v5018_v26  ;;  %v5020_v22 = vpop.f32.mrb[78].mxu0  ;;  %v5593_v43 = vadd.f32 %v5592_v38, %v5591_v37  ;;  %v5843_v26 = vadd.f32 %v5842_v11, %v5730_v54  ;;  %v5925_v49 = vadd.f32 %v5924_v48, %v5923_v21 }
 0x2a7   :  { %17706 = vst [vmem:[#allocation66_spill] sm:$0xff] %v14901_v0  ;;  %v14914_v17 = vadd.f32 %v14301_v40, %v5020_v22  ;;  %v5022_v23 = vpop.f32.mrb[79].mxu0  ;;  %v5926_v22 = vsel %vm3965_vm6, %v5731_v56, 0.0  ;;  %v5734_v37 = vmul.f32 %v14491_v18, %v14491_v18  ;;  %v5598_v54 = vsel %vm3965_vm6, %v14498_v39, 0.0 }
 0x2a8   :  { %17707 = vst [vmem:[#allocation75_spill] sm:$0xff] %v14908_v3  ;;  %v14919_v25 = vadd.f32 %v14312_v32, %v5022_v23  ;;  %v5595_v40 = vadd.f32 %v5594_v10, %v5593_v43  ;;  %v5596_v32 = vsel %vm3965_vm6, %v14482_v31, 0.0  ;;  %v5927_v12 = vadd.f32 %v5926_v22, %v5925_v49 }
 0x2a9   :  { %17708 = vst [vmem:[#allocation125_spill] sm:$0xff] %v14914_v17  ;;  %v5844_v38 = vadd.f32 %v5843_v26, %v5732_v52  ;;  %v5928_v56 = vsel %vm3965_vm6, %v5733_v55, 0.0  ;;  %v5513_v23 = vadd.f32 %v5512_v2, %v14491_v18  ;;  %v5736_v11 = vmul.f32 %v14502_v36, %v14502_v36 }
 0x2aa   :  { %17709 = vst [vmem:[#allocation126_spill] sm:$0xff] %v14919_v25  ;;  %v5597_v15 = vadd.f32 %v5596_v32, %v5595_v40  ;;  %v5930_v43 = vsel %vm3965_vm6, %v5735_v27, 0.0  ;;  %v5737_v48 = vmul.f32 %v14515_v53, %v14515_v53  ;;  %v5929_v41 = vadd.f32 %v5928_v56, %v5927_v12 }
 0x2ab   :  { %v5845_v21 = vadd.f32 %v5844_v38, %v5734_v37  ;;  %v5600_v52 = vsel %vm3965_vm6, %v14515_v53, 0.0  ;;  %v5738_v26 = vmul.f32 %v14527_v58, %v14527_v58  ;;  %v5739_v40 = vmul.f32 %v14532_v13, %v14532_v13 }
 0x2ac   :  { %v5599_v10 = vadd.f32 %v5598_v54, %v5597_v15  ;;  %v5931_v22 = vadd.f32 %v5930_v43, %v5929_v41  ;;  %v5514_v55 = vadd.f32 %v5513_v23, %v14502_v36  ;;  %v5602_v32 = vsel %vm3965_vm6, %v14532_v13, 0.0  ;;  %v17710_v15 = vld [vmem:[#allocation33_spill] sm:$0xff] }
 0x2ad   :  { %v5846_v49 = vadd.f32 %v5845_v21, %v5736_v11  ;;  %v5932_v27 = vsel %vm3965_vm6, %v5737_v48, 0.0  ;;  %v5740_v54 = vmul.f32 %v14536_v51, %v14536_v51  ;;  %v5934_v23 = vsel %vm3965_vm6, %v5739_v40, 0.0  ;;  %v17712_v11 = vld [vmem:[#allocation87_spill] sm:$0xff]  ;;  %v17756_v36 = vld [vmem:[#allocation9_spill] sm:$0xff] }
 0x2ae   :  { %v5601_v37 = vadd.f32 %v5600_v52, %v5599_v10  ;;  %v5515_v2 = vadd.f32 %v5514_v55, %v14527_v58  ;;  %v5741_v21 = vmul.f32 %v14546_v47, %v14546_v47  ;;  %v5933_v52 = vadd.f32 %v5932_v27, %v5931_v22 }
 0x2af   :  { %v5847_v38 = vadd.f32 %v5846_v49, %v5738_v26  ;;  %v5604_v26 = vsel %vm3965_vm6, %v14546_v47, 0.0  ;;  %v5742_v55 = vmul.f32 %v14550_v4, %v14550_v4  ;;  %v17714_v49 = vld [vmem:[#allocation60_spill] sm:$0xff]  ;;  %v5743_v40 = vmul.f32 %v14558_v9, %v14558_v9  ;;  %v17745_v47 = vld [vmem:[#allocation99_spill] sm:$0xff] }
 0x2b0   :  { %v5603_v41 = vadd.f32 %v5602_v32, %v5601_v37  ;;  %v17716_v37 = vld [vmem:[#allocation35_spill] sm:$0xff]  ;;  %v5606_v27 = vsel %vm3965_vm6, %v14558_v9, 0.0  ;;  %v5936_v58 = vsel %vm3965_vm6, %v5741_v21, 0.0 }
 0x2b1   :  { %v5848_v22 = vadd.f32 %v5847_v38, %v5740_v54  ;;  %v5938_v18 = vsel %vm3965_vm6, %v5743_v40, 0.0  ;;  %v5608_v38 = vsel %vm3965_vm6, %v14570_v34, 0.0  ;;  %v5746_v54 = vmul.f32 %v14580_v61, %v14580_v61 }
 0x2b2   :  { %v5605_v13 = vadd.f32 %v5604_v26, %v5603_v41  ;;  %v5747_v41 = vmul.f32 %v14584_v24, %v14584_v24 }
 0x2b4   :  { %v5026_v12 = vpop.f32.mrb[80].mxu0  ;;  %v5607_v39 = vadd.f32 %v5606_v27, %v5605_v13 }
 0x2b5   :  { %v14958_v56 = vadd.f32 %v17710_v15, %v5026_v12  ;;  %v5028_v43 = vpop.f32.mrb[81].mxu0 }
 0x2b6   :  { %v14964_v10 = vadd.f32 %v17712_v11, %v5028_v43  ;;  %v5030_v48 = vpop.f32.mrb[82].mxu0  ;;  %v5935_v43 = vadd.f32 %v5934_v23, %v5933_v52  ;;  %v5516_v11 = vadd.f32 %v5515_v2, %v14536_v51  ;;  %v5745_v23 = vmul.f32 %v14570_v34, %v14570_v34 }
 0x2b7   :  { %17711 = vst [vmem:[#allocation33_spill] sm:$0xff] %v14958_v56  ;;  %v14971_v12 = vadd.f32 %v17714_v49, %v5030_v48  ;;  %v5032_v32 = vpop.f32.mrb[83].mxu0  ;;  %v5849_v49 = vadd.f32 %v5848_v22, %v5742_v55  ;;  %v5610_v52 = vsel %vm3965_vm6, %v14584_v24, 0.0  ;;  %v5609_v55 = vadd.f32 %v5608_v38, %v5607_v39  ;;  %v17723_v24 = vld [vmem:[#allocation45_spill] sm:$0xff] }
 0x2b8   :  { %17713 = vst [vmem:[#allocation87_spill] sm:$0xff] %v14964_v10  ;;  %v14976_v15 = vadd.f32 %v17716_v37, %v5032_v32  ;;  %v5517_v48 = vadd.f32 %v5516_v11, %v14550_v4  ;;  %v5744_v32 = vmul.f32 %v14562_v7, %v14562_v7  ;;  %v5937_v2 = vadd.f32 %v5936_v58, %v5935_v43  ;;  %v17725_v4 = vld [vmem:[#allocation95_spill] sm:$0xff] }
 0x2b9   :  { %17715 = vst [vmem:[#allocation60_spill] sm:$0xff] %v14971_v12  ;;  %v5940_v40 = vsel %vm3965_vm6, %v5745_v23, 0.0  ;;  %v5611_v43 = vadd.f32 %v5610_v52, %v5609_v55  ;;  %v5942_v11 = vsel %vm3965_vm6, %v5747_v41, 0.0  ;;  %v5748_v22 = vmul.f32 %v14587_v14, %v14587_v14 }
 0x2ba   :  { %17717 = vst [vmem:[#allocation35_spill] sm:$0xff] %v14976_v15  ;;  %v5939_v21 = vadd.f32 %v5938_v18, %v5937_v2  ;;  %v5518_v13 = vadd.f32 %v5517_v48, %v14562_v7  ;;  %v5850_v26 = vadd.f32 %v5849_v49, %v5744_v32  ;;  %v5612_v18 = vsel %vm3965_vm6, %v14590_v20, 0.0 }
 0x2bb   :  { %v5749_v48 = vmul.f32 %v14590_v20, %v14590_v20  ;;  %v5750_v32 = vmul.f32 %v14593_v45, %v14593_v45  ;;  %v5613_v38 = vadd.f32 %v5612_v18, %v5611_v43  ;;  %v5752_v28 = vmul.f32 %v17725_v4, %v17725_v4 }
 0x2bc   :  { %v5519_v58 = vadd.f32 %v5518_v13, %v14580_v61  ;;  %v5851_v37 = vadd.f32 %v5850_v26, %v5746_v54  ;;  %v5941_v27 = vadd.f32 %v5940_v40, %v5939_v21  ;;  %v17718_v54 = vld [vmem:[#allocation76_spill] sm:$0xff]  ;;  %v17719_v13 = vld [vmem:[#allocation38_spill] sm:$0xff] }
 0x2bd   :  { %v5751_v41 = vmul.f32 %v17718_v54, %v17718_v54  ;;  %v5944_v55 = vsel %vm3965_vm6, %v5749_v48, 0.0  ;;  %v5614_v18 = vsel %vm3965_vm6, %v17718_v54, 0.0 }
 0x2be   :  { %v5943_v39 = vadd.f32 %v5942_v11, %v5941_v27  ;;  %v5520_v49 = vadd.f32 %v5519_v58, %v14587_v14  ;;  %v5852_v2 = vadd.f32 %v5851_v37, %v5748_v22  ;;  %v17721_v37 = vld [vmem:[#allocation39_spill] sm:$0xff] }
 0x2c0   :  { %v5521_v27 = vadd.f32 %v5520_v49, %v14593_v45  ;;  %v5853_v9 = vadd.f32 %v5852_v2, %v5750_v32  ;;  %v5946_v49 = vsel %vm3965_vm6, %v5751_v41, 0.0  ;;  %v5945_v1 = vadd.f32 %v5944_v55, %v5943_v39  ;;  %v17729_v2 = vld [vmem:[#allocation84_spill] sm:$0xff]  ;;  %v17730_v41 = vld [vmem:[#allocation85_spill] sm:$0xff] }
 0x2c1   :  { %v5616_v32 = vsel %vm3965_vm6, %v17728_v57, 0.0 }
 0x2c2   :  { %v5947_v5 = vadd.f32 %v5946_v49, %v5945_v1  ;;  %v17735_v49 = vld [vmem:[#allocation2_spill] sm:$0xff] }
 0x2c3   :  { %v5036_v23 = vpop.f32.mrb[84].mxu0 }
 0x2c4   :  { %v15014_v52 = vadd.f32 %v17719_v13, %v5036_v23  ;;  %v5038_v26 = vpop.f32.mrb[85].mxu0 }
 0x2c5   :  { %v15011_v21 = vpop.f32.mrb[128].mxu1  ;;  %v15022_v43 = vadd.f32 %v17721_v37, %v5038_v26  ;;  %v5040_v22 = vpop.f32.mrb[86].mxu0  ;;  %v17726_v37 = vld [vmem:[#allocation46_spill] sm:$0xff] }
 0x2c6   :  { %17720 = vst [vmem:[#allocation38_spill] sm:$0xff] %v15014_v52  ;;  %v7497_v40 = vsel %vm7496_vm11, %v15011_v21, 0.0  ;;  %v7506_v58 = vmul.f32 %v15011_v21, %v15011_v21  ;;  %v8819_v11 = vpop.f32.mrb[129].mxu1  ;;  %v15028_v48 = vadd.f32 %v17723_v24, %v5040_v22  ;;  %v5042_v61 = vpop.f32.mrb[87].mxu0  ;;  %v5753_v24 = vmul.f32 %v17728_v57, %v17728_v57 }
 0x2c7   :  { %17722 = vst [vmem:[#allocation39_spill] sm:$0xff] %v15022_v43  ;;  %v7498_v23 = vrot.slane %v7497_v40, 4  ;;  %v7493_v13 = vpop.f32.mrb[130].mxu1  ;;  %v15034_v6 = vadd.f32 %v17726_v37, %v5042_v61  ;;  %v5754_v22 = vmul.f32 %v17729_v2, %v17729_v2  ;;  %v5522_v61 = vadd.f32 %v5521_v27, %v17725_v4  ;;  %v17733_v27 = vld [vmem:[#allocation101_spill] sm:$0xff] }
 0x2c8   :  { %17724 = vst [vmem:[#allocation45_spill] sm:$0xff] %v15028_v48  ;;  %v7507_v11 = vsel %vm7496_vm11, %v7506_v58, 0.0  ;;  %v8820_v26 = vpop.f32.mrb[131].mxu1  ;;  %v5615_v13 = vadd.f32 %v5614_v18, %v5613_v38  ;;  %v5854_v37 = vadd.f32 %v5853_v9, %v5752_v28  ;;  %v5755_v38 = vmul.f32 %v17730_v41, %v17730_v41 }
 0x2c9   :  { %17727 = vst [vmem:[#allocation46_spill] sm:$0xff] %v15034_v6  ;;  %v7499_v45 = vadd.f32 %v7498_v23, %v7497_v40  ;;  %v7508_v54 = vrot.slane %v7507_v11, 4  ;;  %v5618_v40 = vsel %vm3965_vm6, %v17730_v41, 0.0  ;;  %v17731_v23 = vld [vmem:[#allocation50_spill] sm:$0xff]  ;;  %v5523_v1 = vadd.f32 %v5522_v61, %v17729_v2 }
 0x2ca   :  { %v5617_v57 = vadd.f32 %v5616_v32, %v5615_v13  ;;  %v5756_v4 = vmul.f32 %v17735_v49, %v17735_v49 }
 0x2cb   :  { %v7500_v58 = vrot.slane %v7499_v45, 2  ;;  %v7509_v26 = vadd.f32 %v7508_v54, %v7507_v11  ;;  %v5046_v39 = vpop.f32.mrb[88].mxu0  ;;  %v5948_v54 = vsel %vm3965_vm6, %v5753_v24, 0.0  ;;  %v5855_v11 = vadd.f32 %v5854_v37, %v5754_v22  ;;  %v17737_v24 = vld [vmem:[#allocation103_spill] sm:$0xff]  ;;  %v17739_v37 = vld [vmem:[#allocation54_spill] sm:$0xff] }
 0x2cc   :  { %v15049_v29 = vadd.f32 %v17731_v23, %v5046_v39  ;;  %v5048_v46 = vpop.f32.mrb[89].mxu0  ;;  %v5619_v20 = vadd.f32 %v5618_v40, %v5617_v57  ;;  %v17736_v39 = vld [vmem:[#allocation86_spill] sm:$0xff]  ;;  %v5949_v2 = vadd.f32 %v5948_v54, %v5947_v5  ;;  %v17741_v57 = vld [vmem:[#allocation91_spill] sm:$0xff] }
 0x2cd   :  { %v7501_v55 = vadd.f32 %v7500_v58, %v7499_v45  ;;  %v7510_v18 = vrot.slane %v7509_v26, 2  ;;  %v15054_v28 = vadd.f32 %v17733_v27, %v5048_v46  ;;  %v5050_v9 = vpop.f32.mrb[90].mxu0  ;;  %v5620_v23 = vsel %vm3965_vm6, %v17736_v39, 0.0 }
 0x2ce   :  { %17732 = vst [vmem:[#allocation50_spill] sm:$0xff] %v15049_v29  ;;  %v5052_v58 = vpop.f32.mrb[91].mxu0  ;;  %v5757_v13 = vmul.f32 %v17736_v39, %v17736_v39  ;;  %v15063_v32 = vadd.f32 %v17737_v24, %v5050_v9  ;;  %v5950_v46 = vsel %vm3965_vm6, %v5755_v38, 0.0  ;;  %v5758_v40 = vmul.f32 %v17741_v57, %v17741_v57 }
 0x2cf   :  { %17734 = vst [vmem:[#allocation101_spill] sm:$0xff] %v15054_v28  ;;  %v7502_v41 = vrot.slane %v7501_v55, 1  ;;  %v7511_v45 = vadd.f32 %v7510_v18, %v7509_v26  ;;  %v15067_v27 = vadd.f32 %v17739_v37, %v5052_v58  ;;  %v5524_v26 = vadd.f32 %v5523_v1, %v17735_v49  ;;  %v17742_v18 = vld [vmem:[#allocation97_spill] sm:$0xff]  ;;  %v17743_v49 = vld [vmem:[#allocation3_spill] sm:$0xff] }
 0x2d0   :  { %17738 = vst [vmem:[#allocation103_spill] sm:$0xff] %v15063_v32  ;;  %v5622_v14 = vsel %vm3965_vm6, %v17742_v18, 0.0  ;;  %v5759_v9 = vmul.f32 %v17742_v18, %v17742_v18  ;;  %v5621_v39 = vadd.f32 %v5620_v23, %v5619_v20  ;;  %v5952_v58 = vsel %vm3965_vm6, %v5757_v13, 0.0  ;;  %v17748_v23 = vld [vmem:[#allocation20_spill] sm:$0xff] }
 0x2d1   :  { %v7503_v61 = vadd.f32 %v7502_v41, %v7501_v55  ;;  %v7512_v22 = vrot.slane %v7511_v45, 1  ;;  %17740 = vst [vmem:[#allocation54_spill] sm:$0xff] %v15067_v27  ;;  %v5951_v41 = vadd.f32 %v5950_v46, %v5949_v2  ;;  %v5856_v55 = vadd.f32 %v5855_v11, %v5756_v4  ;;  %v17746_v4 = vld [vmem:[#allocation63_spill] sm:$0xff] }
 0x2d2   :  { %v5525_v54 = vadd.f32 %v5524_v26, %v17741_v57  ;;  %v5760_v2 = vmul.f32 %v17745_v47, %v17745_v47  ;;  %v5624_v13 = vsel %vm3965_vm6, %v17748_v23, 0.0  ;;  %v5761_v46 = vmul.f32 %v17748_v23, %v17748_v23 }
 0x2d3   :  { %v15076_v24 = vmul.f32 0.5, %v7503_v61  ;;  %v7513_v38 = vadd.f32 %v7512_v22, %v7511_v45  ;;  %v5056_v5 = vpop.f32.mrb[92].mxu0  ;;  %v5857_v18 = vadd.f32 %v5856_v55, %v5758_v40  ;;  %v5623_v61 = vadd.f32 %v5622_v14, %v5621_v39  ;;  %v17749_v40 = vld [vmem:[#allocation104_spill] sm:$0xff]  ;;  %v17750_v39 = vld [vmem:[#allocation94_spill] sm:$0xff] }
 0x2d4   :  { %v15083_v34 = vadd.f32 %v17743_v49, %v5056_v5  ;;  %v5058_v7 = vpop.f32.mrb[93].mxu0  ;;  %v5954_v45 = vsel %vm3965_vm6, %v5759_v9, 0.0  ;;  %v5953_v26 = vadd.f32 %v5952_v58, %v5951_v41  ;;  %v5762_v14 = vmul.f32 %v17749_v40, %v17749_v40  ;;  %v17754_v5 = vld [vmem:[#allocation36_spill] sm:$0xff] }
 0x2d5   :  { %v7514_v1 = vmul.f32 0.5, %v7513_v38  ;;  %v7515_v37 = vmul.f32 %v15076_v24, %v15076_v24  ;;  %v15088_v20 = vadd.f32 %v17746_v4, %v5058_v7  ;;  %v5060_v11 = vpop.f32.mrb[94].mxu0  ;;  %v17752_v7 = vld [vmem:[#allocation93_spill] sm:$0xff]  ;;  %v5526_v9 = vadd.f32 %v5525_v54, %v17745_v47 }
 0x2d6   :  { %17744 = vst [vmem:[#allocation3_spill] sm:$0xff] %v15083_v34  ;;  %v5062_v22 = vpop.f32.mrb[95].mxu0  ;;  %v15098_v38 = vadd.f32 %v17750_v39, %v5060_v11  ;;  %v5626_v4 = vsel %vm3965_vm6, %v17754_v5, 0.0  ;;  %v5763_v57 = vmul.f32 %v17754_v5, %v17754_v5  ;;  %v5858_v41 = vadd.f32 %v5857_v18, %v5760_v2 }
 0x2d7   :  { %17747 = vst [vmem:[#allocation63_spill] sm:$0xff] %v15088_v20  ;;  %v7516_v49 = vsub.f32 %v7514_v1, %v7515_v37  ;;  %v15101_v55 = vadd.f32 %v17752_v7, %v5062_v22  ;;  %v5955_v37 = vadd.f32 %v5954_v45, %v5953_v26  ;;  %v5625_v58 = vadd.f32 %v5624_v13, %v5623_v61  ;;  %v17755_v7 = vld [vmem:[#allocation112_spill] sm:$0xff]  ;;  %v17757_v45 = vld [vmem:[#allocation74_spill] sm:$0xff] }
 0x2d8   :  { %17751 = vst [vmem:[#allocation94_spill] sm:$0xff] %v15098_v38  ;;  %v5956_v23 = vsel %vm3965_vm6, %v5761_v46, 0.0  ;;  %v5527_v11 = vadd.f32 %v5526_v9, %v17749_v40  ;;  %v5859_v51 = vadd.f32 %v5858_v41, %v5762_v14  ;;  %v5764_v54 = vmul.f32 %v17755_v7, %v17755_v7  ;;  %v17759_v46 = vld [vmem:[#allocation115_spill] sm:$0xff]  ;;  %v17760_v26 = vld [vmem:[#allocation96_spill] sm:$0xff] }
 0x2d9   :  { %17753 = vst [vmem:[#allocation93_spill] sm:$0xff] %v15101_v55  ;;  %v7517_v1 = vmax.f32 %v7516_v49, 0.0  ;;  %v5627_v22 = vadd.f32 %v5626_v4, %v5625_v58  ;;  %v5958_v53 = vsel %vm3965_vm6, %v5763_v57, 0.0  ;;  %v5765_v5 = vmul.f32 %v17756_v36, %v17756_v36  ;;  %v17765_v40 = vld [vmem:[#allocation80_spill] sm:$0xff] }
 0x2da   :  { %v5957_v2 = vadd.f32 %v5956_v23, %v5955_v37  ;;  %v5628_v13 = vsel %vm3965_vm6, %v17756_v36, 0.0  ;;  %v5766_v49 = vmul.f32 %v17759_v46, %v17759_v46  ;;  %v6302_v57 = vlaneseq }
 0x2db   :  { %v7519_v39 = vadd.f32 1e-05, %v7517_v1  ;;  %v5066_v47 = vpop.f32.mrb[96].mxu0  ;;  %v5528_v4 = vadd.f32 %v5527_v11, %v17755_v7  ;;  %v17762_v1 = vld [vmem:[#allocation114_spill] sm:$0xff] }
 0x2dc   :  { %v15116_v18 = vadd.f32 %v17757_v45, %v5066_v47  ;;  %v5068_v61 = vpop.f32.mrb[97].mxu0  ;;  %v5767_v41 = vmul.f32 %v17762_v1, %v17762_v1  ;;  %v17763_v47 = vld [vmem:[#allocation78_spill] sm:$0xff]  ;;  %v5959_v37 = vadd.f32 %v5958_v53, %v5957_v2  ;;  %v5630_v45 = vsel %vm3965_vm6, %v17762_v1, 0.0  ;;  %v17768_v53 = vld [vmem:[#allocation49_spill] sm:$0xff] }
 0x2dd   :  { %9108 = vrsqrt.f32 %v7519_v39  ;;  %v15123_v14 = vadd.f32 %v17760_v26, %v5068_v61  ;;  %v5070_v9 = vpop.f32.mrb[98].mxu0  ;;  %v5860_v39 = vadd.f32 %v5859_v51, %v5764_v54  ;;  %v5629_v61 = vadd.f32 %v5628_v13, %v5627_v22 }
 0x2de   :  { %17758 = vst [vmem:[#allocation74_spill] sm:$0xff] %v15116_v18  ;;  %v15129_v58 = vadd.f32 %v17763_v47, %v5070_v9  ;;  %v5072_v23 = vpop.f32.mrb[99].mxu0  ;;  %v5960_v26 = vsel %vm3965_vm6, %v5765_v5, 0.0  ;;  %v5529_v11 = vadd.f32 %v5528_v4, %v17759_v46  ;;  %v5962_v42 = vsel %vm3965_vm6, %v5767_v41, 0.0  ;;  %v17767_v9 = vld [vmem:[#allocation51_spill] sm:$0xff] }
 0x2df   :  { %17761 = vst [vmem:[#allocation96_spill] sm:$0xff] %v15123_v14  ;;  %v15134_v36 = vadd.f32 %v17765_v40, %v5072_v23  ;;  %v5861_v7 = vadd.f32 %v5860_v39, %v5766_v49  ;;  %v5631_v31 = vadd.f32 %v5630_v45, %v5629_v61  ;;  %v5768_v47 = vmul.f32 %v17767_v9, %v17767_v9  ;;  %v17769_v41 = vld [vmem:[#allocation15_spill] sm:$0xff]  ;;  %v17770_v39 = vld [vmem:[#allocation88_spill] sm:$0xff] }
 0x2e0   :  { %17764 = vst [vmem:[#allocation78_spill] sm:$0xff] %v15129_v58  ;;  %v5769_v51 = vmul.f32 %v17768_v53, %v17768_v53  ;;  %v5961_v54 = vadd.f32 %v5960_v26, %v5959_v37  ;;  %v5632_v40 = vsel %vm3965_vm6, %v17768_v53, 0.0  ;;  %v7518_v22 = vsub.f32 %v15011_v21, %v15076_v24  ;;  %v17772_v26 = vld [vmem:[#allocation57_spill] sm:$0xff] }
 0x2e1   :  { %17766 = vst [vmem:[#allocation80_spill] sm:$0xff] %v15134_v36  ;;  %v9158_v5 = vmov 1966171168   ;;  %v15147_v49 = vshrl.u32 %v6302_v57, 7  ;;  %v5530_v4 = vadd.f32 %v5529_v11, %v17767_v9  ;;  %v5770_v23 = vmul.f32 %v17769_v41, %v17769_v41  ;;  %v17773_v24 = vld [vmem:[#allocation89_spill] sm:$0xff] }
 0x2e2   :  { %v7546_v2 = vunpack.c.l.s4 %v9158_v5  ;;  %v5963_v61 = vadd.f32 %v5962_v42, %v5961_v54  ;;  %v5634_v1 = vsel %vm3965_vm6, %v17772_v26, 0.0  ;;  %v5771_v21 = vmul.f32 %v17772_v26, %v17772_v26 }
 0x2e3   :  { %v5076_v13 = vpop.f32.mrb[100].mxu0  ;;  %v5862_v11 = vadd.f32 %v5861_v7, %v5768_v47  ;;  %v5633_v53 = vadd.f32 %v5632_v40, %v5631_v31  ;;  %v5964_v9 = vsel %vm3965_vm6, %v5769_v51, 0.0  ;;  %v5531_v54 = vadd.f32 %v5530_v4, %v17769_v41  ;;  %v7539_v31 = vpop.permute.xlu1 %7538  ;;  %v17780_v51 = vld [vmem:[#allocation23_spill] sm:$0xff] }
 0x2e4   :  { %v15153_v45 = vadd.f32 %v17770_v39, %v5076_v13  ;;  %v5078_v37 = vpop.f32.mrb[101].mxu0  ;;  %v17775_v13 = vld [vmem:[#allocation11_spill] sm:$0xff]  ;;  %v7547_v35 = vunpack.c.0.s8 %v7546_v2  ;;  %v5772_v7 = vmul.f32 %v17779_v50, %v17779_v50  ;;  %v5966_v47 = vsel %vm3965_vm6, %v5771_v21, 0.0 }
 0x2e5   :  { %v15160_v5 = vadd.f32 %v17773_v24, %v5078_v37  ;;  %v5080_v57 = vpop.f32.mrb[102].mxu0  ;;  %v5863_v37 = vadd.f32 %v5862_v11, %v5770_v23  ;;  %v5635_v24 = vadd.f32 %v5634_v1, %v5633_v53  ;;  %v5636_v40 = vsel %vm3965_vm6, %v17780_v51, 0.0 }
 0x2e6   :  { %17771 = vst [vmem:[#allocation88_spill] sm:$0xff] %v15153_v45  ;;  %v15164_v39 = vadd.f32 %v17775_v13, %v5080_v57  ;;  %v5082_v42 = vpop.f32.mrb[103].mxu0  ;;  %v5773_v57 = vmul.f32 %v17780_v51, %v17780_v51  ;;  %v5775_v1 = vmul.f32 %v14853_v16, %v14853_v16  ;;  %v7550_v53 = vsub.s32 %v7547_v35, %v15147_v49 }
 0x2e7   :  { %17774 = vst [vmem:[#allocation89_spill] sm:$0xff] %v15160_v5  ;;  %v9109_v46 = vpop.eup %9108  ;;  %v15168_v26 = vadd.f32 %v17777_v59, %v5082_v42  ;;  %v5774_v59 = vmul.f32 %v14848_v33, %v14848_v33  ;;  %v5864_v11 = vadd.f32 %v5863_v37, %v5772_v7  ;;  %v5637_v13 = vadd.f32 %v5636_v40, %v5635_v24  ;;  %v17781_v42 = vld [vmem:[#allocation92_spill] sm:$0xff] }
 0x2e8   :  { %17776 = vst [vmem:[#allocation11_spill] sm:$0xff] %v15164_v39  ;;  %v7521_v62 = vmul.f32 %v9109_v46, %v7518_v22  ;;  %v5965_v46 = vadd.f32 %v5964_v9, %v5963_v61  ;;  %v5532_v22 = vadd.f32 %v5531_v54, %v17779_v50  ;;  %v5638_v9 = vsel %vm3965_vm6, %v14853_v16, 0.0  ;;  %v17783_v54 = vld [vmem:[#allocation98_spill] sm:$0xff]  ;;  %v17785_v24 = vld [vmem:[#allocation100_spill] sm:$0xff] }
 0x2e9   :  { %17778 = vst [vmem:[#allocation90_spill] sm:$0xff] %v15168_v26  ;;  %v5776_v37 = vmul.f32 %v14858_v44, %v14858_v44  ;;  %v5970_v40 = vsel %vm3965_vm6, %v5775_v1, 0.0 }
 0x2ea   :  { %v7531_v4 = vmul.f32 %v7529_v30, %v7521_v62  ;;  %v5967_v21 = vadd.f32 %v5966_v47, %v5965_v46  ;;  %v5968_v30 = vsel %vm3965_vm6, %v5773_v57, 0.0  ;;  %v5533_v35 = vadd.f32 %v5532_v22, %v14848_v33  ;;  %v17787_v46 = vld [vmem:[#allocation102_spill] sm:$0xff] }
 0x2eb   :  { %v5086_v23 = vpop.f32.mrb[104].mxu0  ;;  %v5777_v57 = vmul.f32 %v14863_v63, %v14863_v63  ;;  %v5640_v22 = vsel %vm3965_vm6, %v14863_v63, 0.0 }
 0x2ec   :  { %v7541_v2 = vadd.f32 %v7539_v31, %v7531_v4  ;;  %v15184_v41 = vadd.f32 %v17781_v42, %v5086_v23  ;;  %v5088_v62 = vpop.f32.mrb[105].mxu0  ;;  %v5865_v31 = vadd.f32 %v5864_v11, %v5774_v59  ;;  %v5969_v23 = vadd.f32 %v5968_v30, %v5967_v21 }
 0x2ed   :  { %v15190_v51 = vadd.f32 %v17783_v54, %v5088_v62  ;;  %v5090_v50 = vpop.f32.mrb[106].mxu0  ;;  %v5639_v42 = vadd.f32 %v5638_v9, %v5637_v13  ;;  %v5779_v59 = vmul.f32 %v14908_v3, %v14908_v3  ;;  %v15209_v11 = vsub.s32 0, %v15147_v49 }
 0x2ee   :  { %17782 = vst [vmem:[#allocation92_spill] sm:$0xff] %v15184_v41  ;;  %v7542_v61 = vmax.f32 %v7541_v2, 0.0  ;;  %v15196_v7 = vadd.f32 %v17785_v24, %v5090_v50  ;;  %v5092_v47 = vpop.f32.mrb[107].mxu0  ;;  %v5971_v1 = vadd.f32 %v5970_v40, %v5969_v23  ;;  %v5534_v62 = vadd.f32 %v5533_v35, %v14858_v44 }
 0x2ef   :  { %17784 = vst [vmem:[#allocation98_spill] sm:$0xff] %v15190_v51  ;;  %v15202_v2 = vadd.f32 %v17787_v46, %v5092_v47  ;;  %v5866_v54 = vadd.f32 %v5865_v31, %v5776_v37  ;;  %v5778_v21 = vmul.f32 %v14901_v0, %v14901_v0  ;;  %v5641_v9 = vadd.f32 %v5640_v22, %v5639_v42  ;;  %v17793_v22 = vld [vmem:[#allocation111_spill] sm:$0xff] }
 0x2f0   :  { %17786 = vst [vmem:[#allocation100_spill] sm:$0xff] %v15196_v7  ;;  %v7543_v4 = vpack.c.bf16 %v7542_v61, %v7542_v61  ;;  %v5972_v61 = vsel %vm3965_vm6, %v5777_v57, 0.0  ;;  %v5642_v24 = vsel %vm3965_vm6, %v14908_v3, 0.0  ;;  %v5974_v47 = vsel %vm3965_vm6, %v5779_v59, 0.0  ;;  %v17791_v57 = vld [vmem:[#allocation31_spill] sm:$0xff] }
 0x2f1   :  { %17788 = vst [vmem:[#allocation102_spill] sm:$0xff] %v15202_v2  ;;  %v5781_v35 = vmul.f32 %v14919_v25, %v14919_v25  ;;  %v5535_v42 = vadd.f32 %v5534_v62, %v14901_v0  ;;  %v5867_v16 = vadd.f32 %v5866_v54, %v5778_v21  ;;  %v17795_v54 = vld [vmem:[#allocation107_spill] sm:$0xff] }
 0x2f2   :  { %v7551_v50 = vrot.slane %v7543_v4, %v7550_v53  ;;  %v17789_v4 = vld [vmem:[#allocation109_spill] sm:$0xff] }
 0x2f3   :  { %v5096_v30 = vpop.f32.mrb[108].mxu0  ;;  %v5976_v62 = vsel %vm3965_vm6, %v5781_v35, 0.0 }
 0x2f4   :  { %v7558_v13 = vrot.slane %v7551_v50, %v7550_v53  ;;  %v15219_v46 = vadd.f32 %v17789_v4, %v5096_v30  ;;  %v5098_v40 = vpop.f32.mrb[109].mxu0  ;;  %v5973_v50 = vadd.f32 %v5972_v61, %v5971_v1  ;;  %v5643_v30 = vadd.f32 %v5642_v24, %v5641_v9 }
 0x2f5   :  { %v15224_v23 = vadd.f32 %v17791_v57, %v5098_v40  ;;  %v5100_v53 = vpop.f32.mrb[110].mxu0  ;;  %v5644_v40 = vsel %vm3965_vm6, %v14919_v25, 0.0  ;;  %v5783_v1 = vmul.f32 %v14964_v10, %v14964_v10  ;;  %v5782_v9 = vmul.f32 %v14958_v56, %v14958_v56 }
 0x2f6   :  { %17790 = vst [vmem:[#allocation109_spill] sm:$0xff] %v15219_v46  ;;  %v7560_v31 = vunpack.i.h.s16 %v7558_v13  ;;  %v8741_v37 = vpack.i.b16 %v7558_v13, %v7558_v13  ;;  %v15228_v3 = vadd.f32 %v17793_v22, %v5100_v53  ;;  %v5102_v59 = vpop.f32.mrb[111].mxu0  ;;  %v5975_v63 = vadd.f32 %v5974_v47, %v5973_v50 }
 0x2f7   :  { %17792 = vst [vmem:[#allocation31_spill] sm:$0xff] %v15224_v23  ;;  %v5780_v13 = vmul.f32 %v14914_v17, %v14914_v17  ;;  %v15240_v21 = vadd.f32 %v17795_v54, %v5102_v59  ;;  %v5536_v24 = vadd.f32 %v5535_v42, %v14914_v17  ;;  %v5646_v47 = vsel %vm3965_vm6, %v14964_v10, 0.0  ;;  %v17849_v10 = vld [vmem:[#allocation64_spill] sm:$0xff] }
 0x2f8   :  { %17794 = vst [vmem:[#allocation111_spill] sm:$0xff] %v15228_v3  ;;  %v7562_v4 = vpack.i.b16 %v7560_v31, %v7560_v31  ;;  %v7566_v33 = vrot.slane %v8741_v37, %v15209_v11  ;;  %v5645_v50 = vadd.f32 %v5644_v40, %v5643_v30  ;;  %v5977_v35 = vadd.f32 %v5976_v62, %v5975_v63 }
 0x2f9   :  { %17796 = vst [vmem:[#allocation107_spill] sm:$0xff] %v15240_v21  ;;  %v5868_v53 = vadd.f32 %v5867_v16, %v5780_v13  ;;  %v5978_v22 = vsel %vm3965_vm6, %v5783_v1, 0.0  ;;  %v5537_v42 = vadd.f32 %v5536_v24, %v14958_v56  ;;  %v5787_v16 = vmul.f32 %v15022_v43, %v15022_v43  ;;  %v17850_v56 = vld [vmem:[#allocation69_spill] sm:$0xff] }
 0x2fa   :  { %v7570_v61 = vrot.slane %v7562_v4, %v15209_v11  ;;  %v7572_v57 = vpack.i.b16 %v7566_v33, %v7566_v33  ;;  %v5785_v33 = vmul.f32 %v14976_v15, %v14976_v15  ;;  %v5647_v25 = vadd.f32 %v5646_v47, %v5645_v50 }
 0x2fb   :  { %v5869_v0 = vadd.f32 %v5868_v53, %v5782_v9  ;;  %v5979_v13 = vadd.f32 %v5978_v22, %v5977_v35  ;;  %v5648_v40 = vsel %vm3965_vm6, %v14976_v15, 0.0  ;;  %v5786_v1 = vmul.f32 %v15014_v52, %v15014_v52 }
 0x2fc   :  { %v7579_v31 = vpack.i.b16 %v7570_v61, %v7570_v61  ;;  %v7577_v37 = vrot.slane %v7572_v57, %v15209_v11  ;;  %v5784_v61 = vmul.f32 %v14971_v12, %v14971_v12  ;;  %v5980_v62 = vsel %vm3965_vm6, %v5785_v33, 0.0 }
 0x2fd   :  { %v5538_v57 = vadd.f32 %v5537_v42, %v14971_v12  ;;  %v5650_v24 = vsel %vm3965_vm6, %v15022_v43, 0.0  ;;  %v5649_v47 = vadd.f32 %v5648_v40, %v5647_v25  ;;  %v5981_v53 = vadd.f32 %v5980_v62, %v5979_v13  ;;  %v17846_v43 = vld [vmem:[#allocation108_spill] sm:$0xff] }
 0x2fe   :  { %v8743_v59 = vcombine.high %v7577_v37, %v7577_v37  ;;  %v8742_v4 = vcombine.low %v7577_v37, %v7577_v37  ;;  %v7584_v54 = vrot.slane %v7579_v31, %v15209_v11  ;;  %v5870_v9 = vadd.f32 %v5869_v0, %v5784_v61 }
 0x2ff   :  { %v5982_v31 = vsel %vm3965_vm6, %v5787_v16, 0.0  ;;  %v5789_v37 = vmul.f32 %v15034_v6, %v15034_v6  ;;  %v5539_v50 = vadd.f32 %v5538_v57, %v15014_v52  ;;  %v5788_v0 = vmul.f32 %v15028_v48, %v15028_v48  ;;  %v17848_v52 = vld [vmem:[#allocation7_spill] sm:$0xff] }
 0x300   :  { %7597 = vrot.lane.b32.xlu1 %v8743_v59, %s9154_s6  ;;  %7595 = vrot.lane.b32.xlu0 %v8742_v4, %s9154_s6  ;;  %v8745_v63 = vcombine.high %v7584_v54, %v7584_v54  ;;  %v8744_v30 = vcombine.low %v7584_v54, %v7584_v54  ;;  %v5871_v35 = vadd.f32 %v5870_v9, %v5786_v1  ;;  %v5652_v59 = vsel %vm3965_vm6, %v15034_v6, 0.0 }
 0x301   :  { %v5651_v22 = vadd.f32 %v5650_v24, %v5649_v47  ;;  %v5791_v25 = vmul.f32 %v15054_v28, %v15054_v28  ;;  %v5983_v33 = vadd.f32 %v5982_v31, %v5981_v53  ;;  %v5790_v4 = vmul.f32 %v15049_v29, %v15049_v29 }
 0x302   :  { %v5984_v54 = vsel %vm3965_vm6, %v5789_v37, 0.0  ;;  %v5540_v42 = vadd.f32 %v5539_v50, %v15028_v48  ;;  %v5872_v61 = vadd.f32 %v5871_v35, %v5788_v0  ;;  %v5654_v16 = vsel %vm3965_vm6, %v15054_v28, 0.0  ;;  %v17797_v35 = vld [vmem:[#allocation10_spill] sm:$0xff]  ;;  %v17843_v28 = vld [vmem:[#allocation47_spill] sm:$0xff] }
 0x303   :  { %v5793_v13 = vmul.f32 %v15067_v27, %v15067_v27  ;;  %v5985_v40 = vadd.f32 %v5984_v54, %v5983_v33  ;;  %v5792_v57 = vmul.f32 %v15063_v32, %v15063_v32  ;;  %v5795_v24 = vmul.f32 %v15088_v20, %v15088_v20 }
 0x304   :  { %7601 = vrot.lane.b32.xlu1 %v8745_v63, %s9154_s6  ;;  %7599 = vrot.lane.b32.xlu0 %v8744_v30, %s9154_s6  ;;  %v5653_v63 = vadd.f32 %v5652_v59, %v5651_v22  ;;  %v5986_v30 = vsel %vm3965_vm6, %v5791_v25, 0.0  ;;  %v5541_v1 = vadd.f32 %v5540_v42, %v15049_v29  ;;  %v5873_v62 = vadd.f32 %v5872_v61, %v5790_v4  ;;  %v17799_v4 = vld [vmem:[#allocation110_spill] sm:$0xff]  ;;  %v17845_v29 = vld [vmem:[#allocation52_spill] sm:$0xff] }
 0x305   :  { %v5987_v47 = vadd.f32 %v5986_v30, %v5985_v40  ;;  %v5656_v31 = vsel %vm3965_vm6, %v15067_v27, 0.0  ;;  %v5988_v53 = vsel %vm3965_vm6, %v5793_v13, 0.0  ;;  %v5794_v50 = vmul.f32 %v15083_v34, %v15083_v34  ;;  %v17801_v30 = vld [vmem:[#allocation105_spill] sm:$0xff] }
 0x306   :  { %v5655_v9 = vadd.f32 %v5654_v16, %v5653_v63  ;;  %v5542_v25 = vadd.f32 %v5541_v1, %v15063_v32  ;;  %v5874_v33 = vadd.f32 %v5873_v62, %v5792_v57  ;;  %v5658_v59 = vsel %vm3965_vm6, %v15088_v20, 0.0  ;;  %v17803_v62 = vld [vmem:[#allocation113_spill] sm:$0xff] }
 0x307   :  { %v5990_v16 = vsel %vm3965_vm6, %v5795_v24, 0.0  ;;  %v5797_v63 = vmul.f32 %v15101_v55, %v15101_v55  ;;  %v5799_v24 = vmul.f32 %v15123_v14, %v15123_v14 }
 0x308   :  { %v5657_v61 = vadd.f32 %v5656_v31, %v5655_v9  ;;  %v5543_v1 = vadd.f32 %v5542_v25, %v15083_v34  ;;  %v5796_v9 = vmul.f32 %v15098_v38, %v15098_v38 }
 0x30d   :  { %v5106_v37 = vpop.f32.mrb[112].mxu0 }
 0x30e   :  { %v15299_v0 = vadd.f32 %v17797_v35, %v5106_v37  ;;  %v5108_v22 = vpop.f32.mrb[113].mxu0  ;;  %v5989_v37 = vadd.f32 %v5988_v53, %v5987_v47  ;;  %v5875_v35 = vadd.f32 %v5874_v33, %v5794_v50  ;;  %v5798_v47 = vmul.f32 %v15116_v18, %v15116_v18 }
 0x30f   :  { %v15305_v54 = vadd.f32 %v17799_v4, %v5108_v22  ;;  %v5110_v42 = vpop.f32.mrb[114].mxu0  ;;  %v5659_v22 = vadd.f32 %v5658_v59, %v5657_v61  ;;  %v5660_v4 = vsel %vm3965_vm6, %v15101_v55, 0.0  ;;  %v5544_v53 = vadd.f32 %v5543_v1, %v15098_v38 }
 0x310   :  { %17798 = vst [vmem:[#allocation10_spill] sm:$0xff] %v15299_v0  ;;  %v15311_v13 = vadd.f32 %v17801_v30, %v5110_v42  ;;  %v5112_v40 = vpop.f32.mrb[115].mxu0  ;;  %v5991_v31 = vadd.f32 %v5990_v16, %v5989_v37  ;;  %v5992_v42 = vsel %vm3965_vm6, %v5797_v63, 0.0  ;;  %v5662_v50 = vsel %vm3965_vm6, %v15123_v14, 0.0 }
 0x311   :  { %17800 = vst [vmem:[#allocation110_spill] sm:$0xff] %v15305_v54  ;;  %v15315_v57 = vadd.f32 %v17803_v62, %v5112_v40  ;;  %v5876_v25 = vadd.f32 %v5875_v35, %v5796_v9  ;;  %v5661_v33 = vadd.f32 %v5660_v4, %v5659_v22  ;;  %v5994_v59 = vsel %vm3965_vm6, %v5799_v24, 0.0 }
 0x312   :  { %17802 = vst [vmem:[#allocation105_spill] sm:$0xff] %v15311_v13  ;;  %v5801_v61 = vmul.f32 %v15134_v36, %v15134_v36  ;;  %v5993_v16 = vadd.f32 %v5992_v42, %v5991_v31  ;;  %v5545_v30 = vadd.f32 %v5544_v53, %v15116_v18  ;;  %v5800_v37 = vmul.f32 %v15129_v58, %v15129_v58 }
 0x313   :  { %17804 = vst [vmem:[#allocation113_spill] sm:$0xff] %v15315_v57  ;;  %v5877_v40 = vadd.f32 %v5876_v25, %v5798_v47  ;;  %v5663_v63 = vadd.f32 %v5662_v50, %v5661_v33  ;;  %v5664_v1 = vsel %vm3965_vm6, %v15134_v36, 0.0  ;;  %v5803_v35 = vmul.f32 %v15160_v5, %v15160_v5 }
 0x314   :  { %v5995_v62 = vadd.f32 %v5994_v59, %v5993_v16  ;;  %v5996_v22 = vsel %vm3965_vm6, %v5801_v61, 0.0  ;;  %v5802_v9 = vmul.f32 %v15153_v45, %v15153_v45  ;;  %v5546_v24 = vadd.f32 %v5545_v30, %v15129_v58  ;;  %v17805_v30 = vld [vmem:[#allocation12_spill] sm:$0xff] }
 0x315   :  { %v5666_v31 = vsel %vm3965_vm6, %v15160_v5, 0.0  ;;  %v5878_v4 = vadd.f32 %v5877_v40, %v5800_v37  ;;  %v5665_v42 = vadd.f32 %v5664_v1, %v5663_v63  ;;  %v5998_v50 = vsel %vm3965_vm6, %v5803_v35, 0.0  ;;  %v17807_v37 = vld [vmem:[#allocation116_spill] sm:$0xff] }
 0x316   :  { %v5997_v47 = vadd.f32 %v5996_v22, %v5995_v62  ;;  %v5547_v53 = vadd.f32 %v5546_v24, %v15153_v45  ;;  %v5805_v25 = vmul.f32 %v15168_v26, %v15168_v26  ;;  %v5804_v16 = vmul.f32 %v15164_v39, %v15164_v39 }
 0x317   :  { %v5879_v59 = vadd.f32 %v5878_v4, %v5802_v9  ;;  %v5667_v61 = vadd.f32 %v5666_v31, %v5665_v42  ;;  %v5668_v40 = vsel %vm3965_vm6, %v15168_v26, 0.0  ;;  %v5807_v63 = vmul.f32 %v15190_v51, %v15190_v51  ;;  %v17809_v9 = vld [vmem:[#allocation14_spill] sm:$0xff] }
 0x318   :  { %v5999_v35 = vadd.f32 %v5998_v50, %v5997_v47  ;;  %v5806_v22 = vmul.f32 %v15184_v41, %v15184_v41  ;;  %v5548_v4 = vadd.f32 %v5547_v53, %v15164_v39  ;;  %v6000_v42 = vsel %vm3965_vm6, %v5805_v25, 0.0 }
 0x319   :  { %v6002_v50 = vsel %vm3965_vm6, %v5807_v63, 0.0  ;;  %v5808_v25 = vmul.f32 %v15196_v7, %v15196_v7 }
 0x31a   :  { %v5549_v47 = vadd.f32 %v5548_v4, %v15184_v41 }
 0x31e   :  { %v5116_v33 = vpop.f32.mrb[116].mxu0 }
 0x31f   :  { %v15352_v14 = vadd.f32 %v17805_v30, %v5116_v33  ;;  %v5118_v5 = vpop.f32.mrb[117].mxu0  ;;  %v5670_v33 = vsel %vm3965_vm6, %v15190_v51, 0.0  ;;  %v17811_v30 = vld [vmem:[#allocation61_spill] sm:$0xff]  ;;  %v5672_v51 = vsel %vm3965_vm6, %v15202_v2, 0.0 }
 0x320   :  { %v15359_v62 = vadd.f32 %v17807_v37, %v5118_v5  ;;  %v5120_v1 = vpop.f32.mrb[118].mxu0  ;;  %v5880_v5 = vadd.f32 %v5879_v59, %v5804_v16  ;;  %v5669_v37 = vadd.f32 %v5668_v40, %v5667_v61  ;;  %v5811_v59 = vmul.f32 %v15224_v23, %v15224_v23 }
 0x321   :  { %17806 = vst [vmem:[#allocation12_spill] sm:$0xff] %v15352_v14  ;;  %v15364_v24 = vadd.f32 %v17809_v9, %v5120_v1  ;;  %v5122_v31 = vpop.f32.mrb[119].mxu0  ;;  %v5809_v1 = vmul.f32 %v15202_v2, %v15202_v2  ;;  %v6001_v9 = vadd.f32 %v6000_v42, %v5999_v35  ;;  %v5810_v16 = vmul.f32 %v15219_v46, %v15219_v46 }
 0x322   :  { %17808 = vst [vmem:[#allocation116_spill] sm:$0xff] %v15359_v62  ;;  %v15371_v45 = vadd.f32 %v17811_v30, %v5122_v31  ;;  %v5881_v18 = vadd.f32 %v5880_v5, %v5806_v22  ;;  %v5671_v53 = vadd.f32 %v5670_v33, %v5669_v37  ;;  %v5550_v40 = vadd.f32 %v5549_v47, %v15196_v7 }
 0x323   :  { %17810 = vst [vmem:[#allocation14_spill] sm:$0xff] %v15364_v24  ;;  %v6003_v61 = vadd.f32 %v6002_v50, %v6001_v9  ;;  %v6004_v63 = vsel %vm3965_vm6, %v5809_v1, 0.0  ;;  %v5674_v35 = vsel %vm3965_vm6, %v15224_v23, 0.0  ;;  %v6006_v42 = vsel %vm3965_vm6, %v5811_v59, 0.0 }
 0x324   :  { %17812 = vst [vmem:[#allocation61_spill] sm:$0xff] %v15371_v45  ;;  %v5882_v22 = vadd.f32 %v5881_v18, %v5808_v25  ;;  %v5673_v31 = vadd.f32 %v5672_v51, %v5671_v53  ;;  %v5551_v4 = vadd.f32 %v5550_v40, %v15219_v46  ;;  %v5813_v33 = vmul.f32 %v15240_v21, %v15240_v21 }
 0x325   :  { %v6005_v30 = vadd.f32 %v6004_v63, %v6003_v61  ;;  %v5812_v47 = vmul.f32 %v15228_v3, %v15228_v3  ;;  %v5676_v50 = vsel %vm3965_vm6, %v15240_v21, 0.0  ;;  %v5815_v18 = vmul.f32 %v15305_v54, %v15305_v54  ;;  %v17865_v21 = vld [vmem:[#allocation21_spill] sm:$0xff] }
 0x326   :  { %v5883_v5 = vadd.f32 %v5882_v22, %v5810_v16  ;;  %v5675_v37 = vadd.f32 %v5674_v35, %v5673_v31  ;;  %v5814_v1 = vmul.f32 %v15299_v0, %v15299_v0  ;;  %v5552_v9 = vadd.f32 %v5551_v4, %v15228_v3  ;;  %v17813_v22 = vld [vmem:[#allocation117_spill] sm:$0xff] }
 0x327   :  { %v6007_v51 = vadd.f32 %v6006_v42, %v6005_v30  ;;  %v6008_v53 = vsel %vm3965_vm6, %v5813_v33, 0.0  ;;  %v5678_v61 = vsel %vm3965_vm6, %v15305_v54, 0.0  ;;  %v6010_v63 = vsel %vm3965_vm6, %v5815_v18, 0.0 }
 0x328   :  { %v5884_v25 = vadd.f32 %v5883_v5, %v5812_v47  ;;  %v5677_v59 = vadd.f32 %v5676_v50, %v5675_v37  ;;  %v5553_v40 = vadd.f32 %v5552_v9, %v15299_v0  ;;  %v5817_v35 = vmul.f32 %v15315_v57, %v15315_v57  ;;  %v17815_v5 = vld [vmem:[#allocation118_spill] sm:$0xff]  ;;  %v17817_v9 = vld [vmem:[#allocation119_spill] sm:$0xff] }
 0x329   :  { %v6009_v4 = vadd.f32 %v6008_v53, %v6007_v51  ;;  %v5816_v33 = vmul.f32 %v15311_v13, %v15311_v13  ;;  %v5819_v18 = vmul.f32 %v15359_v62, %v15359_v62  ;;  %v5680_v51 = vsel %vm3965_vm6, %v15315_v57, 0.0  ;;  %v17819_v53 = vld [vmem:[#allocation120_spill] sm:$0xff] }
 0x32a   :  { %v5885_v30 = vadd.f32 %v5884_v25, %v5814_v1  ;;  %v5679_v50 = vadd.f32 %v5678_v61, %v5677_v59  ;;  %v5818_v1 = vmul.f32 %v15352_v14, %v15352_v14  ;;  %v6012_v59 = vsel %vm3965_vm6, %v5817_v35, 0.0  ;;  %v17862_v57 = vld [vmem:[#allocation28_spill] sm:$0xff] }
 0x32c   :  { %v5886_v61 = vadd.f32 %v5885_v30, %v5816_v33  ;;  %v5684_v33 = vsel %vm3965_vm6, %v15371_v45, 0.0 }
 0x32e   :  { %v5126_v16 = vpop.f32.mrb[120].mxu0  ;;  %v5887_v23 = vadd.f32 %v5886_v61, %v5818_v1 }
 0x32f   :  { %v15410_v31 = vadd.f32 %v17813_v22, %v5126_v16  ;;  %v5128_v42 = vpop.f32.mrb[121].mxu0  ;;  %v6011_v16 = vadd.f32 %v6010_v63, %v6009_v4  ;;  %v5554_v22 = vadd.f32 %v5553_v40, %v15311_v13  ;;  %v6014_v4 = vsel %vm3965_vm6, %v5819_v18, 0.0  ;;  %v17864_v13 = vld [vmem:[#allocation40_spill] sm:$0xff] }
 0x330   :  { %v15415_v37 = vadd.f32 %v17815_v5, %v5128_v42  ;;  %v5130_v47 = vpop.f32.mrb[122].mxu0  ;;  %v5682_v42 = vsel %vm3965_vm6, %v15359_v62, 0.0  ;;  %v5681_v5 = vadd.f32 %v5680_v51, %v5679_v50 }
 0x331   :  { %17814 = vst [vmem:[#allocation117_spill] sm:$0xff] %v15410_v31  ;;  %v15420_v54 = vadd.f32 %v17817_v9, %v5130_v47  ;;  %v5132_v0 = vpop.f32.mrb[123].mxu0  ;;  %v5555_v63 = vadd.f32 %v5554_v22, %v15352_v14  ;;  %v5821_v47 = vmul.f32 %v15371_v45, %v15371_v45  ;;  %v6013_v9 = vadd.f32 %v6012_v59, %v6011_v16  ;;  %v17860_v45 = vld [vmem:[#allocation16_spill] sm:$0xff] }
 0x332   :  { %17816 = vst [vmem:[#allocation118_spill] sm:$0xff] %v15415_v37  ;;  %v15427_v25 = vadd.f32 %v17819_v53, %v5132_v0  ;;  %v5820_v0 = vmul.f32 %v15364_v24, %v15364_v24  ;;  %v5683_v40 = vadd.f32 %v5682_v42, %v5681_v5  ;;  %v5823_v35 = vmul.f32 %v15415_v37, %v15415_v37 }
 0x333   :  { %17818 = vst [vmem:[#allocation119_spill] sm:$0xff] %v15420_v54  ;;  %v6015_v30 = vadd.f32 %v6014_v4, %v6013_v9  ;;  %v5822_v50 = vmul.f32 %v15410_v31, %v15410_v31  ;;  %v5556_v18 = vadd.f32 %v5555_v63, %v15364_v24  ;;  %v6016_v51 = vsel %vm3965_vm6, %v5821_v47, 0.0  ;;  %v17861_v24 = vld [vmem:[#allocation18_spill] sm:$0xff] }
 0x334   :  { %17820 = vst [vmem:[#allocation120_spill] sm:$0xff] %v15427_v25  ;;  %v5888_v16 = vadd.f32 %v5887_v23, %v5820_v0  ;;  %v5686_v1 = vsel %vm3965_vm6, %v15415_v37, 0.0  ;;  %v5685_v53 = vadd.f32 %v5684_v33, %v5683_v40  ;;  %v6018_v59 = vsel %vm3965_vm6, %v5823_v35, 0.0  ;;  %v17821_v33 = vld [vmem:[#allocation121_spill] sm:$0xff] }
 0x335   :  { %v5557_v22 = vadd.f32 %v5556_v18, %v15410_v31  ;;  %v5825_v61 = vmul.f32 %v15427_v25, %v15427_v25  ;;  %v6017_v42 = vadd.f32 %v6016_v51, %v6015_v30  ;;  %v5824_v4 = vmul.f32 %v15420_v54, %v15420_v54  ;;  %v17823_v30 = vld [vmem:[#allocation122_spill] sm:$0xff] }
 0x336   :  { %v5889_v5 = vadd.f32 %v5888_v16, %v5822_v50  ;;  %v5687_v63 = vadd.f32 %v5686_v1, %v5685_v53  ;;  %v5688_v23 = vsel %vm3965_vm6, %v15427_v25, 0.0  ;;  %v17851_v25 = vld [vmem:[#allocation70_spill] sm:$0xff] }
 0x337   :  { %v6019_v9 = vadd.f32 %v6018_v59, %v6017_v42  ;;  %v5558_v0 = vadd.f32 %v5557_v22, %v15420_v54  ;;  %v6020_v40 = vsel %vm3965_vm6, %v5825_v61, 0.0  ;;  %v17825_v59 = vld [vmem:[#allocation123_spill] sm:$0xff] }
 0x338   :  { %v5890_v37 = vadd.f32 %v5889_v5, %v5824_v4  ;;  %v5689_v16 = vadd.f32 %v5688_v23, %v5687_v63  ;;  %v17826_v4 = vld [vmem:[#allocation124_spill] sm:$0xff]  ;;  %v17852_v54 = vld [vmem:[#allocation95_spill] sm:$0xff] }
 0x339   :  { %v6021_v61 = vadd.f32 %v6020_v40, %v6019_v9 }
 0x33e   :  { %v5136_v47 = vpop.f32.mrb[124].mxu0 }
 0x33f   :  { %v15460_v35 = vadd.f32 %v17821_v33, %v5136_v47  ;;  %v5138_v18 = vpop.f32.mrb[125].mxu0 }
 0x340   :  { %v15463_v50 = vadd.f32 %v17823_v30, %v5138_v18  ;;  %v5140_v51 = vpop.f32.mrb[126].mxu0 }
 0x341   :  { %17822 = vst [vmem:[#allocation121_spill] sm:$0xff] %v15460_v35  ;;  %v5559_v1 = vadd.f32 %v5558_v0, %v15460_v35  ;;  %v5826_v53 = vmul.f32 %v15460_v35, %v15460_v35  ;;  %v15469_v42 = vadd.f32 %v17825_v59, %v5140_v51  ;;  %v5142_v22 = vpop.f32.mrb[127].mxu0 }
 0x342   :  { %17824 = vst [vmem:[#allocation122_spill] sm:$0xff] %v15463_v50  ;;  %v5690_v47 = vsel %vm3965_vm6, %v15463_v50, 0.0  ;;  %v5827_v5 = vmul.f32 %v15463_v50, %v15463_v50  ;;  %v15476_v33 = vadd.f32 %v17826_v4, %v5142_v22 }
 0x343   :  { %v5891_v63 = vadd.f32 %v5890_v37, %v5826_v53  ;;  %v5691_v23 = vadd.f32 %v5690_v47, %v5689_v16  ;;  %v5560_v0 = vadd.f32 %v5559_v1, %v15469_v42  ;;  %v5828_v18 = vmul.f32 %v15469_v42, %v15469_v42 }
 0x344   :  { %v6022_v30 = vsel %vm3965_vm6, %v5827_v5, 0.0  ;;  %v5692_v9 = vsel %vm3965_vm6, %v15476_v33, 0.0  ;;  %v5829_v40 = vmul.f32 %v15476_v33, %v15476_v33 }
 0x345   :  { %v6023_v51 = vadd.f32 %v6022_v30, %v6021_v61  ;;  %v5561_v59 = vrot.slane %v5560_v0, 4  ;;  %v5892_v50 = vadd.f32 %v5891_v63, %v5828_v18  ;;  %v5693_v22 = vadd.f32 %v5692_v9, %v5691_v23  ;;  %v6300_v23 = vld [vmem:[%s17003_s3] sm:$0x3] }
 0x346   :  { %v6024_v37 = vsel %vm3965_vm6, %v5829_v40, 0.0  ;;  %v6308_v63 = vsub.s32 1, %v15147_v49 }
 0x347   :  { %v5562_v16 = vadd.f32 %v5561_v59, %v5560_v0  ;;  %v5893_v53 = vrot.slane %v5892_v50, 4  ;;  %v5694_v1 = vrot.slane %v5693_v22, 4  ;;  %v6025_v47 = vadd.f32 %v6024_v37, %v6023_v51 }
 0x348   :  { %v15499_v49 = vrot.slane %v6300_v23, %v6308_v63 }
 0x349   :  { %v5563_v4 = vrot.slane %v5562_v16, 2  ;;  %v5894_v35 = vadd.f32 %v5893_v53, %v5892_v50  ;;  %v5695_v31 = vadd.f32 %v5694_v1, %v5693_v22  ;;  %v6026_v5 = vrot.slane %v6025_v47, 4  ;;  %v6440_v50 = vld [vmem:[%s17002_s4] sm:$0x3]  ;;  %v17841_v53 = vld [vmem:[#allocation79_spill] sm:$0xff] }
 0x34a   :  { %17828 = vst [vmem:[#allocation124_spill] sm:$0xff] %v15499_v49  ;;  %v15504_v22 = vrot.slane %v6440_v50, %v6308_v63  ;;  %v17832_v1 = vld [vmem:[#allocation34_spill] sm:$0xff] }
 0x34b   :  { %v5564_v62 = vadd.f32 %v5563_v4, %v5562_v16  ;;  %v5895_v14 = vrot.slane %v5894_v35, 2  ;;  %v5696_v46 = vrot.slane %v5695_v31, 2  ;;  %v6027_v41 = vadd.f32 %v6026_v5, %v6025_v47  ;;  %v17831_v16 = vld [vmem:[#allocation5_spill] sm:$0xff] }
 0x34c   :  { %17830 = vst [vmem:[#allocation128_spill] sm:$0xff] %v15504_v22  ;;  %v17840_v47 = vld [vmem:[#allocation37_spill] sm:$0xff] }
 0x34d   :  { %v5565_v20 = vrot.slane %v5564_v62, 1  ;;  %v5896_v34 = vadd.f32 %v5895_v14, %v5894_v35  ;;  %v5697_v61 = vadd.f32 %v5696_v46, %v5695_v31  ;;  %v6028_v30 = vrot.slane %v6027_v41, 2 }
 0x34e   :  { %v15497_v31 = vrot.slane %v6300_v23, %v15209_v11  ;;  %v15502_v35 = vrot.slane %v6440_v50, %v15209_v11  ;;  %v17834_v50 = vld [vmem:[#allocation13_spill] sm:$0xff] }
 0x34f   :  { %v5566_v0 = vadd.f32 %v5565_v20, %v5564_v62  ;;  %v5897_v18 = vrot.slane %v5896_v34, 1  ;;  %v5698_v9 = vrot.slane %v5697_v61, 1  ;;  %v6029_v40 = vadd.f32 %v6028_v30, %v6027_v41  ;;  %v17833_v30 = vld [vmem:[#allocation6_spill] sm:$0xff]  ;;  %v17839_v11 = vld [vmem:[#allocation29_spill] sm:$0xff] }
 0x350   :  { %17827 = vst [vmem:[#allocation123_spill] sm:$0xff] %v15497_v31  ;;  %17829 = vst [vmem:[#allocation127_spill] sm:$0xff] %v15502_v35  ;;  %v17842_v41 = vld [vmem:[#allocation41_spill] sm:$0xff] }
 0x351   :  { %v15494_v51 = vmul.f32 0.001953125, %v5566_v0  ;;  %v5898_v59 = vadd.f32 %v5897_v18, %v5896_v34  ;;  %v5699_v14 = vadd.f32 %v5698_v9, %v5697_v61  ;;  %v6030_v46 = vrot.slane %v6029_v40, 1  ;;  %v17835_v9 = vld [vmem:[#allocation73_spill] sm:$0xff]  ;;  %v17838_v61 = vld [vmem:[#allocation19_spill] sm:$0xff]  ;;  %v17858_v18 = vld [vmem:[#allocation112_spill] sm:$0xff] }
 0x353   :  { %v6032_v37 = vmul.f32 0.001953125, %v5898_v59  ;;  %v6034_v20 = vmul.f32 %v15494_v51, %v15494_v51  ;;  %v15510_v34 = vmul.f32 0.001953125, %v5699_v14  ;;  %v6031_v62 = vadd.f32 %v6030_v46, %v6029_v40  ;;  %v17836_v14 = vld [vmem:[#allocation53_spill] sm:$0xff]  ;;  %v17854_v46 = vld [vmem:[#allocation2_spill] sm:$0xff] }
 0x354   :  { %v6078_v40 = vsub.f32 %v17846_v43, %v15494_v51  ;;  %v17859_v43 = vld [vmem:[#allocation9_spill] sm:$0xff]  ;;  %v17888_v38 = vsub.f32 %v15469_v42, %v15494_v51  ;;  %v17889_v44 = vsub.f32 %v17831_v16, %v15494_v51  ;;  %v17890_v63 = vsub.f32 %v17832_v1, %v15494_v51 }
 0x355   :  { %v6036_v4 = vsub.f32 %v6032_v37, %v6034_v20  ;;  %v6035_v5 = vmul.f32 %v15510_v34, %v15510_v34  ;;  %v6033_v23 = vmul.f32 0.001953125, %v6031_v62  ;;  %v17837_v20 = vld [vmem:[#allocation30_spill] sm:$0xff]  ;;  %v17891_v15 = vsub.f32 %v17694_v60, %v15494_v51 }
 0x356   :  { %v17855_v37 = vld [vmem:[#allocation86_spill] sm:$0xff]  ;;  %v17892_v42 = vsub.f32 %v17835_v9, %v15494_v51  ;;  %v17893_v16 = vsub.f32 %v14323_v19, %v15494_v51  ;;  %v17894_v1 = vsub.f32 %v17838_v61, %v15494_v51  ;;  %v17895_v60 = vsub.f32 %v17840_v47, %v15494_v51 }
 0x357   :  { %v6038_v59 = vmax.f32 %v6036_v4, 0.0  ;;  %v6037_v62 = vsub.f32 %v6033_v23, %v6035_v5  ;;  %v17844_v23 = vld [vmem:[#allocation71_spill] sm:$0xff] }
 0x358   :  { %v6074_v0 = vsub.f32 %v17844_v23, %v15494_v51  ;;  %v17857_v23 = vld [vmem:[#allocation20_spill] sm:$0xff] }
 0x359   :  { %v6168_v4 = vadd.f32 1e-05, %v6038_v59  ;;  %v6039_v5 = vmax.f32 %v6037_v62, 0.0  ;;  %v17847_v59 = vld [vmem:[#allocation59_spill] sm:$0xff] }
 0x35b   :  { %9110 = vrsqrt.f32 %v6168_v4  ;;  %v6169_v62 = vadd.f32 1e-05, %v6039_v5  ;;  %v17853_v4 = vld [vmem:[#allocation82_spill] sm:$0xff]  ;;  %v17856_v5 = vld [vmem:[#allocation99_spill] sm:$0xff] }
 0x35d   :  { %9112 = vrsqrt.f32 %v6169_v62  ;;  %v17863_v62 = vld [vmem:[#allocation32_spill] sm:$0xff] }
 0x365   :  { %v15628_v26 = vpop.eup %9110 }
 0x366   :  { %v6298_v27 = vmul.f32 %v15628_v26, %v17888_v38  ;;  %v6174_v17 = vmul.f32 %v15628_v26, %v17889_v44  ;;  %v6178_v48 = vmul.f32 %v15628_v26, %v17890_v63  ;;  %v6182_v12 = vmul.f32 %v15628_v26, %v17891_v15 }
 0x367   :  { %v6186_v38 = vmul.f32 %v15628_v26, %v17892_v42  ;;  %v6190_v44 = vmul.f32 %v15628_v26, %v17893_v16  ;;  %v6194_v63 = vmul.f32 %v15628_v26, %v17894_v1  ;;  %v6198_v15 = vmul.f32 %v15628_v26, %v17895_v60  ;;  %v15670_v55 = vpop.eup %9112 }
 0x368   :  { %v6438_v9 = vmul.f32 %v15497_v31, %v6298_v27  ;;  %v17896_v42 = vsub.f32 %v17842_v41, %v15494_v51  ;;  %v6206_v16 = vmul.f32 %v15628_v26, %v6074_v0  ;;  %v6210_v61 = vmul.f32 %v15628_v26, %v6078_v40 }
 0x369   :  { %v17897_v1 = vsub.f32 %v15476_v33, %v15510_v34  ;;  %v17898_v60 = vsub.f32 %v17833_v30, %v15510_v34  ;;  %v17899_v27 = vsub.f32 %v17834_v50, %v15510_v34  ;;  %v17900_v0 = vsub.f32 %v17695_v8, %v15510_v34 }
 0x36a   :  { %v6202_v19 = vmul.f32 %v15628_v26, %v17896_v42  ;;  %v6578_v42 = vadd.f32 %v15502_v35, %v6438_v9  ;;  %v17901_v33 = vsub.f32 %v17836_v14, %v15510_v34  ;;  %v17902_v30 = vsub.f32 %v17837_v20, %v15510_v34 }
 0x36b   :  { %v6299_v47 = vmul.f32 %v15670_v55, %v17897_v1  ;;  %v6175_v58 = vmul.f32 %v15670_v55, %v17898_v60  ;;  %v6179_v41 = vmul.f32 %v15670_v55, %v17899_v27  ;;  %v6183_v40 = vmul.f32 %v15670_v55, %v17900_v0 }
 0x36c   :  { %v6187_v1 = vmul.f32 %v15670_v55, %v17901_v33  ;;  %v6191_v60 = vmul.f32 %v15670_v55, %v17902_v30  ;;  %v17903_v50 = vsub.f32 %v17839_v11, %v15510_v34  ;;  %v17904_v9 = vsub.f32 %v17841_v53, %v15510_v34 }
 0x36d   :  { %v6439_v8 = vmul.f32 %v15499_v49, %v6299_v47  ;;  %v17905_v14 = vsub.f32 %v17843_v28, %v15510_v34  ;;  %v17906_v20 = vsub.f32 %v17845_v29, %v15510_v34  ;;  %v6706_v11 = vmax.f32 %v6578_v42, 0.0 }
 0x36e   :  { %v6195_v27 = vmul.f32 %v15670_v55, %v17903_v50  ;;  %v6199_v0 = vmul.f32 %v15670_v55, %v17904_v9  ;;  %v17907_v47 = vsub.f32 %v17847_v59, %v15510_v34  ;;  %v17908_v53 = vsub.f32 %v17848_v52, %v15494_v51 }
 0x36f   :  { %v6203_v33 = vmul.f32 %v15670_v55, %v17905_v14  ;;  %v6207_v30 = vmul.f32 %v15670_v55, %v17906_v20  ;;  %v17909_v28 = vsub.f32 %v17849_v10, %v15510_v34  ;;  %v6579_v29 = vadd.f32 %v15504_v22, %v6439_v8 }
 0x370   :  { %v6211_v50 = vmul.f32 %v15670_v55, %v17907_v47  ;;  %v6214_v9 = vmul.f32 %v15628_v26, %v17908_v53  ;;  %v17910_v42 = vsub.f32 %v17850_v56, %v15494_v51  ;;  %v17911_v59 = vsub.f32 %v17851_v25, %v15510_v34 }
 0x371   :  { %v6215_v14 = vmul.f32 %v15670_v55, %v17909_v28  ;;  %v17912_v52 = vsub.f32 %v17852_v54, %v15494_v51  ;;  %v17913_v10 = vsub.f32 %v17853_v4, %v15510_v34  ;;  %v17914_v56 = vsub.f32 %v17854_v46, %v15494_v51 }
 0x372   :  { %v6218_v20 = vmul.f32 %v15628_v26, %v17910_v42  ;;  %v6219_v47 = vmul.f32 %v15670_v55, %v17911_v59  ;;  %v17915_v25 = vsub.f32 %v17855_v37, %v15510_v34  ;;  %v17916_v54 = vsub.f32 %v17856_v5, %v15494_v51  ;;  %v15787_v36 = vpop.permute.xlu1 %7597 }
 0x373   :  { %v6222_v53 = vmul.f32 %v15628_v26, %v17912_v52  ;;  %v6223_v8 = vmul.f32 %v15670_v55, %v17913_v10  ;;  %v6226_v28 = vmul.f32 %v15628_v26, %v17914_v56  ;;  %v6707_v52 = vmax.f32 %v6579_v29, 0.0 }
 0x374   :  { %v6227_v42 = vmul.f32 %v15670_v55, %v17915_v25  ;;  %v6230_v59 = vmul.f32 %v15628_v26, %v17916_v54  ;;  %v17917_v4 = vsub.f32 %v17857_v23, %v15510_v34  ;;  %v17918_v46 = vsub.f32 %v17858_v18, %v15494_v51 }
 0x375   :  { %v17919_v37 = vsub.f32 %v17859_v43, %v15510_v34  ;;  %v6314_v23 = vmul.f32 %v15497_v31, %v6174_v17  ;;  %v6315_v29 = vmul.f32 %v15499_v49, %v6175_v58  ;;  %v6318_v54 = vmul.f32 %v15497_v31, %v6178_v48 }
 0x376   :  { %v6231_v10 = vmul.f32 %v15670_v55, %v17917_v4  ;;  %v6234_v56 = vmul.f32 %v15628_v26, %v17918_v46  ;;  %v6319_v18 = vmul.f32 %v15499_v49, %v6179_v41  ;;  %v8809_v4 = vpack.c.bf16 %v6707_v52, %v6706_v11  ;;  %v15814_v52 = vpop.permute.xlu1 %7601 }
 0x377   :  { %v6235_v25 = vmul.f32 %v15670_v55, %v17919_v37  ;;  %v6322_v46 = vmul.f32 %v15497_v31, %v6182_v12  ;;  %v6323_v43 = vmul.f32 %v15499_v49, %v6183_v40  ;;  %v6326_v37 = vmul.f32 %v15497_v31, %v6186_v38  ;;  %17922 = vst [vmem:[#allocation5_spill] sm:$0xff] %v15814_v52 }
 0x378   :  { %v6327_v39 = vmul.f32 %v15499_v49, %v6187_v1  ;;  %v6330_v6 = vmul.f32 %v15497_v31, %v6190_v44  ;;  %v6331_v17 = vmul.f32 %v15499_v49, %v6191_v60  ;;  %v6334_v58 = vmul.f32 %v15497_v31, %v6194_v63  ;;  %7158 = vst.msk [vmem:[%s17004_s5 + $0x1f8] sm:$0xff] %vm15776_vm15, %v8809_v4 }
 0x379   :  { %v6335_v12 = vmul.f32 %v15499_v49, %v6195_v27  ;;  %v6338_v48 = vmul.f32 %v15497_v31, %v6198_v15  ;;  %v6339_v38 = vmul.f32 %v15499_v49, %v6199_v0  ;;  %v6342_v41 = vmul.f32 %v15497_v31, %v6202_v19  ;;  %7671 = vst.msk [vmem:[%s17004_s5 + $0x1fc] sm:$0xf] %vm7607_vm14, %v15814_v52 }
 0x37a   :  { %v6343_v44 = vmul.f32 %v15499_v49, %v6203_v33  ;;  %v6346_v40 = vmul.f32 %v15497_v31, %v6206_v16  ;;  %v6347_v63 = vmul.f32 %v15499_v49, %v6207_v30  ;;  %v6350_v1 = vmul.f32 %v15497_v31, %v6210_v61 }
 0x37b   :  { %v6351_v60 = vmul.f32 %v15499_v49, %v6211_v50  ;;  %v6354_v11 = vmul.f32 %v15497_v31, %v6214_v9  ;;  %v6355_v27 = vmul.f32 %v15499_v49, %v6215_v14  ;;  %v6358_v15 = vmul.f32 %v15497_v31, %v6218_v20 }
 0x37c   :  { %v6359_v0 = vmul.f32 %v15499_v49, %v6219_v47  ;;  %v6362_v19 = vmul.f32 %v15497_v31, %v6222_v53  ;;  %v6363_v33 = vmul.f32 %v15499_v49, %v6223_v8  ;;  %v6366_v16 = vmul.f32 %v15497_v31, %v6226_v28 }
 0x37d   :  { %v6367_v61 = vmul.f32 %v15499_v49, %v6227_v42  ;;  %v6370_v30 = vmul.f32 %v15497_v31, %v6230_v59  ;;  %v6371_v50 = vmul.f32 %v15499_v49, %v6231_v10  ;;  %v6374_v9 = vmul.f32 %v15497_v31, %v6234_v56 }
 0x37e   :  { %v6375_v14 = vmul.f32 %v15499_v49, %v6235_v25  ;;  %v15827_v20 = vadd.f32 %v15502_v35, %v6314_v23  ;;  %v15830_v47 = vadd.f32 %v15504_v22, %v6315_v29  ;;  %v15833_v53 = vadd.f32 %v15502_v35, %v6318_v54 }
 0x37f   :  { %v15836_v8 = vadd.f32 %v15504_v22, %v6319_v18  ;;  %v15839_v28 = vadd.f32 %v15502_v35, %v6322_v46  ;;  %v6463_v42 = vadd.f32 %v15504_v22, %v6323_v43  ;;  %v6466_v59 = vadd.f32 %v15502_v35, %v6326_v37 }
 0x380   :  { %v6467_v10 = vadd.f32 %v15504_v22, %v6327_v39  ;;  %v6470_v56 = vadd.f32 %v15502_v35, %v6330_v6  ;;  %v6471_v25 = vadd.f32 %v15504_v22, %v6331_v17  ;;  %v6474_v23 = vadd.f32 %v15502_v35, %v6334_v58 }
 0x381   :  { %v6475_v29 = vadd.f32 %v15504_v22, %v6335_v12  ;;  %v6478_v54 = vadd.f32 %v15502_v35, %v6338_v48  ;;  %v6479_v18 = vadd.f32 %v15504_v22, %v6339_v38  ;;  %v6482_v4 = vadd.f32 %v15502_v35, %v6342_v41 }
 0x382   :  { %v6483_v46 = vadd.f32 %v15504_v22, %v6343_v44  ;;  %v6486_v43 = vadd.f32 %v15502_v35, %v6346_v40  ;;  %v6487_v39 = vadd.f32 %v15504_v22, %v6347_v63  ;;  %v6490_v6 = vadd.f32 %v15502_v35, %v6350_v1 }
 0x383   :  { %v6491_v37 = vadd.f32 %v15504_v22, %v6351_v60  ;;  %v6494_v17 = vadd.f32 %v15502_v35, %v6354_v11  ;;  %v6495_v58 = vadd.f32 %v15504_v22, %v6355_v27  ;;  %v6498_v12 = vadd.f32 %v15502_v35, %v6358_v15 }
 0x384   :  { %v6499_v48 = vadd.f32 %v15504_v22, %v6359_v0  ;;  %v6502_v38 = vadd.f32 %v15502_v35, %v6362_v19  ;;  %v6503_v41 = vadd.f32 %v15504_v22, %v6363_v33  ;;  %v6506_v44 = vadd.f32 %v15502_v35, %v6366_v16 }
 0x385   :  { %v6507_v40 = vadd.f32 %v15504_v22, %v6367_v61  ;;  %v6510_v63 = vadd.f32 %v15502_v35, %v6370_v30  ;;  %v6511_v1 = vadd.f32 %v15504_v22, %v6371_v50  ;;  %v6514_v60 = vadd.f32 %v15502_v35, %v6374_v9 }
 0x386   :  { %v6515_v11 = vadd.f32 %v15504_v22, %v6375_v14  ;;  %v6582_v27 = vmax.f32 %v15827_v20, 0.0  ;;  %v6583_v15 = vmax.f32 %v15830_v47, 0.0  ;;  %v6586_v0 = vmax.f32 %v15833_v53, 0.0 }
 0x387   :  { %v6587_v19 = vmax.f32 %v15836_v8, 0.0  ;;  %v6590_v33 = vmax.f32 %v15839_v28, 0.0  ;;  %v6591_v16 = vmax.f32 %v6463_v42, 0.0  ;;  %v6594_v61 = vmax.f32 %v6466_v59, 0.0 }
 0x388   :  { %v6595_v52 = vmax.f32 %v6467_v10, 0.0  ;;  %v6598_v30 = vmax.f32 %v6470_v56, 0.0  ;;  %v6599_v49 = vmax.f32 %v6471_v25, 0.0  ;;  %v6602_v50 = vmax.f32 %v6474_v23, 0.0 }
 0x389   :  { %v6603_v31 = vmax.f32 %v6475_v29, 0.0  ;;  %v6606_v9 = vmax.f32 %v6478_v54, 0.0  ;;  %v6607_v35 = vmax.f32 %v6479_v18, 0.0  ;;  %v6610_v14 = vmax.f32 %v6482_v4, 0.0 }
 0x38a   :  { %v6611_v22 = vmax.f32 %v6483_v46, 0.0  ;;  %v6614_v20 = vmax.f32 %v6486_v43, 0.0  ;;  %v6615_v32 = vmax.f32 %v6487_v39, 0.0  ;;  %v6618_v47 = vmax.f32 %v6490_v6, 0.0 }
 0x38b   :  { %v6619_v7 = vmax.f32 %v6491_v37, 0.0  ;;  %v6622_v53 = vmax.f32 %v6494_v17, 0.0  ;;  %v6623_v2 = vmax.f32 %v6495_v58, 0.0  ;;  %v6626_v8 = vmax.f32 %v6498_v12, 0.0 }
 0x38c   :  { %v6627_v3 = vmax.f32 %v6499_v48, 0.0  ;;  %v6630_v28 = vmax.f32 %v6502_v38, 0.0  ;;  %v6631_v42 = vmax.f32 %v6503_v41, 0.0  ;;  %v6634_v59 = vmax.f32 %v6506_v44, 0.0  ;;  %v17925_v48 = vld [vmem:[#allocation104_spill] sm:$0xff] }
 0x38d   :  { %v6635_v10 = vmax.f32 %v6507_v40, 0.0  ;;  %v6638_v56 = vmax.f32 %v6510_v63, 0.0  ;;  %v6639_v25 = vmax.f32 %v6511_v1, 0.0  ;;  %v6642_v23 = vmax.f32 %v6514_v60, 0.0  ;;  %v17926_v41 = vld [vmem:[#allocation36_spill] sm:$0xff] }
 0x38e   :  { %v6643_v29 = vmax.f32 %v6515_v11, 0.0  ;;  %v8747_v54 = vpack.c.bf16 %v6583_v15, %v6582_v27  ;;  %v8749_v18 = vpack.c.bf16 %v6587_v19, %v6586_v0  ;;  %v8751_v4 = vpack.c.bf16 %v6591_v16, %v6590_v33  ;;  %v17933_v33 = vld [vmem:[#allocation68_spill] sm:$0xff] }
 0x38f   :  { %v8753_v46 = vpack.c.bf16 %v6595_v52, %v6594_v61  ;;  %v8755_v43 = vpack.c.bf16 %v6599_v49, %v6598_v30  ;;  %v8757_v39 = vpack.c.bf16 %v6603_v31, %v6602_v50  ;;  %v8759_v6 = vpack.c.bf16 %v6607_v35, %v6606_v9  ;;  %v17923_v49 = vld [vmem:[#allocation91_spill] sm:$0xff] }
 0x390   :  { %v8761_v37 = vpack.c.bf16 %v6611_v22, %v6610_v14  ;;  %v8763_v17 = vpack.c.bf16 %v6615_v32, %v6614_v20  ;;  %v8765_v58 = vpack.c.bf16 %v6619_v7, %v6618_v47  ;;  %v8767_v12 = vpack.c.bf16 %v6623_v2, %v6622_v53  ;;  %7096 = vst.msk [vmem:[%s17004_s5 + $0x8] sm:$0xff] %vm15776_vm15, %v8747_v54  ;;  %v17924_v22 = vld [vmem:[#allocation97_spill] sm:$0xff]  ;;  %v17937_v50 = vld [vmem:[#allocation27_spill] sm:$0xff]  ;;  %v17941_v53 = vld [vmem:[#allocation58_spill] sm:$0xff] }
 0x391   :  { %7098 = vst.msk [vmem:[%s17004_s5 + $0x18] sm:$0xff] %vm15776_vm15, %v8749_v18  ;;  %7100 = vst.msk [vmem:[%s17004_s5 + $0x28] sm:$0xff] %vm15776_vm15, %v8751_v4  ;;  %v8769_v32 = vpack.c.bf16 %v6627_v3, %v6626_v8  ;;  %v8771_v7 = vpack.c.bf16 %v6631_v42, %v6630_v28  ;;  %v8773_v2 = vpack.c.bf16 %v6635_v10, %v6634_v59  ;;  %v17939_v14 = vld [vmem:[#allocation55_spill] sm:$0xff]  ;;  %v17943_v28 = vld [vmem:[#allocation25_spill] sm:$0xff] }
 0x392   :  { %v8775_v31 = vpack.c.bf16 %v6639_v25, %v6638_v56  ;;  %7102 = vst.msk [vmem:[%s17004_s5 + $0x38] sm:$0xff] %vm15776_vm15, %v8753_v46  ;;  %7104 = vst.msk [vmem:[%s17004_s5 + $0x48] sm:$0xff] %vm15776_vm15, %v8755_v43  ;;  %v8777_v3 = vpack.c.bf16 %v6643_v29, %v6642_v23  ;;  %v6096_v35 = vsub.f32 %v17923_v49, %v15494_v51  ;;  %v17945_v10 = vld [vmem:[#allocation26_spill] sm:$0xff]  ;;  %v17947_v23 = vld [vmem:[#allocation77_spill] sm:$0xff] }
 0x393   :  { %7106 = vst.msk [vmem:[%s17004_s5 + $0x58] sm:$0xff] %vm15776_vm15, %v8757_v39  ;;  %7108 = vst.msk [vmem:[%s17004_s5 + $0x68] sm:$0xff] %vm15776_vm15, %v8759_v6  ;;  %v6097_v52 = vsub.f32 %v17924_v22, %v15510_v34  ;;  %v6100_v38 = vsub.f32 %v17925_v48, %v15494_v51  ;;  %v6101_v44 = vsub.f32 %v17926_v41, %v15510_v34  ;;  %v17949_v18 = vld [vmem:[#allocation81_spill] sm:$0xff]  ;;  %v17951_v43 = vld [vmem:[#allocation83_spill] sm:$0xff] }
 0x394   :  { %7609 = vst.msk [vmem:[%s17004_s5 + $0xc] sm:$0xf] %vm7607_vm14, %v15787_v36  ;;  %7611 = vst.msk [vmem:[%s17004_s5 + $0x1c] sm:$0xf] %vm7607_vm14, %v15787_v36  ;;  %v17927_v40 = vsub.f32 %v17860_v45, %v15494_v51  ;;  %v17928_v1 = vsub.f32 %v17861_v24, %v15510_v34  ;;  %v17929_v11 = vsub.f32 %v17862_v57, %v15494_v51  ;;  %v17959_v49 = vld [vmem:[#allocation56_spill] sm:$0xff] }
 0x395   :  { %7613 = vst.msk [vmem:[%s17004_s5 + $0x2c] sm:$0xf] %vm7607_vm14, %v15787_v36  ;;  %7615 = vst.msk [vmem:[%s17004_s5 + $0x3c] sm:$0xf] %vm7607_vm14, %v15787_v36  ;;  %v17930_v45 = vsub.f32 %v17863_v62, %v15510_v34  ;;  %v17931_v24 = vsub.f32 %v17864_v13, %v15494_v51  ;;  %v17932_v0 = vsub.f32 %v17865_v21, %v15510_v34  ;;  %v17935_v62 = vld [vmem:[#allocation8_spill] sm:$0xff] }
 0x396   :  { %7110 = vst.msk [vmem:[%s17004_s5 + $0x78] sm:$0xff] %vm15776_vm15, %v8761_v37  ;;  %7112 = vst.msk [vmem:[%s17004_s5 + $0x88] sm:$0xff] %vm15776_vm15, %v8763_v17  ;;  %v6172_v63 = vmul.f32 %v15628_v26, %v17927_v40  ;;  %v6173_v60 = vmul.f32 %v15670_v55, %v17928_v1  ;;  %v6176_v27 = vmul.f32 %v15628_v26, %v17929_v11  ;;  %v17953_v37 = vld [vmem:[#allocation17_spill] sm:$0xff]  ;;  %v17961_v41 = vld [vmem:[#allocation4_spill] sm:$0xff] }
 0x397   :  { %7114 = vst.msk [vmem:[%s17004_s5 + $0x98] sm:$0xff] %vm15776_vm15, %v8765_v58  ;;  %7116 = vst.msk [vmem:[%s17004_s5 + $0xa8] sm:$0xff] %vm15776_vm15, %v8767_v12  ;;  %v6177_v57 = vmul.f32 %v15670_v55, %v17930_v45  ;;  %v6180_v15 = vmul.f32 %v15628_v26, %v17931_v24  ;;  %v6181_v19 = vmul.f32 %v15670_v55, %v17932_v0  ;;  %v17955_v12 = vld [vmem:[#allocation48_spill] sm:$0xff]  ;;  %v17963_v11 = vld [vmem:[#allocation62_spill] sm:$0xff] }
 0x398   :  { %7617 = vst.msk [vmem:[%s17004_s5 + $0x4c] sm:$0xf] %vm7607_vm14, %v15787_v36  ;;  %7619 = vst.msk [vmem:[%s17004_s5 + $0x5c] sm:$0xf] %vm7607_vm14, %v15787_v36  ;;  %v17934_v16 = vsub.f32 %v17933_v33, %v15494_v51  ;;  %v17936_v13 = vsub.f32 %v17935_v62, %v15510_v34  ;;  %v17938_v21 = vsub.f32 %v17937_v50, %v15494_v51  ;;  %v17965_v0 = vld [vmem:[#allocation65_spill] sm:$0xff]  ;;  %v17967_v62 = vld [vmem:[#allocation67_spill] sm:$0xff] }
 0x399   :  { %7621 = vst.msk [vmem:[%s17004_s5 + $0x6c] sm:$0xf] %vm7607_vm14, %v15787_v36  ;;  %7623 = vst.msk [vmem:[%s17004_s5 + $0x7c] sm:$0xf] %vm7607_vm14, %v15787_v36  ;;  %v17940_v20 = vsub.f32 %v17939_v14, %v15510_v34  ;;  %v17942_v8 = vsub.f32 %v17941_v53, %v15494_v51  ;;  %v17944_v42 = vsub.f32 %v17943_v28, %v15510_v34  ;;  %v17971_v53 = vld [vmem:[#allocation76_spill] sm:$0xff] }
 0x39a   :  { %7118 = vst.msk [vmem:[%s17004_s5 + $0xb8] sm:$0xff] %vm15776_vm15, %v8769_v32  ;;  %7120 = vst.msk [vmem:[%s17004_s5 + $0xc8] sm:$0xff] %vm15776_vm15, %v8771_v7  ;;  %v6184_v61 = vmul.f32 %v15628_v26, %v17934_v16  ;;  %v6185_v30 = vmul.f32 %v15670_v55, %v17936_v13  ;;  %v6188_v9 = vmul.f32 %v15628_v26, %v17938_v21  ;;  %v17969_v21 = vld [vmem:[#allocation72_spill] sm:$0xff] }
 0x39b   :  { %7122 = vst.msk [vmem:[%s17004_s5 + $0xd8] sm:$0xff] %vm15776_vm15, %v8773_v2  ;;  %7124 = vst.msk [vmem:[%s17004_s5 + $0xe8] sm:$0xff] %vm15776_vm15, %v8775_v31  ;;  %v6189_v47 = vmul.f32 %v15670_v55, %v17940_v20  ;;  %v6193_v59 = vmul.f32 %v15670_v55, %v17944_v42  ;;  %v17946_v56 = vsub.f32 %v17945_v10, %v15494_v51  ;;  %v17957_v2 = vld [vmem:[#allocation106_spill] sm:$0xff]  ;;  %v17973_v42 = vld [vmem:[#allocation84_spill] sm:$0xff] }
 0x39c   :  { %7625 = vst.msk [vmem:[%s17004_s5 + $0x8c] sm:$0xf] %vm7607_vm14, %v15787_v36  ;;  %7627 = vst.msk [vmem:[%s17004_s5 + $0x9c] sm:$0xf] %vm7607_vm14, %v15787_v36  ;;  %v17948_v29 = vsub.f32 %v17947_v23, %v15510_v34  ;;  %v17950_v4 = vsub.f32 %v17949_v18, %v15494_v51  ;;  %v17952_v39 = vsub.f32 %v17951_v43, %v15510_v34  ;;  %v17975_v23 = vld [vmem:[#allocation85_spill] sm:$0xff] }
 0x39d   :  { %7629 = vst.msk [vmem:[%s17004_s5 + $0xac] sm:$0xf] %vm7607_vm14, %v15787_v36  ;;  %7631 = vst.msk [vmem:[%s17004_s5 + $0xbc] sm:$0xf] %vm7607_vm14, %v15787_v36  ;;  %v6196_v25 = vmul.f32 %v15628_v26, %v17946_v56  ;;  %v17954_v17 = vsub.f32 %v17953_v37, %v15494_v51  ;;  %v17956_v32 = vsub.f32 %v17955_v12, %v15510_v34 }
 0x39e   :  { %7126 = vst.msk [vmem:[%s17004_s5 + $0xf8] sm:$0xff] %vm15776_vm15, %v8777_v3  ;;  %v6197_v54 = vmul.f32 %v15670_v55, %v17948_v29  ;;  %v6200_v46 = vmul.f32 %v15628_v26, %v17950_v4  ;;  %v6201_v6 = vmul.f32 %v15670_v55, %v17952_v39  ;;  %v17958_v31 = vsub.f32 %v17957_v2, %v15494_v51 }
 0x39f   :  { %7633 = vst.msk [vmem:[%s17004_s5 + $0xcc] sm:$0xf] %vm7607_vm14, %v15787_v36  ;;  %7635 = vst.msk [vmem:[%s17004_s5 + $0xdc] sm:$0xf] %vm7607_vm14, %v15787_v36  ;;  %v6204_v58 = vmul.f32 %v15628_v26, %v17954_v17  ;;  %v6205_v7 = vmul.f32 %v15670_v55, %v17956_v32  ;;  %v17960_v22 = vsub.f32 %v17959_v49, %v15510_v34  ;;  %v17977_v17 = vld [vmem:[#allocation123_spill] sm:$0xff]  ;;  %v17978_v32 = vld [vmem:[#allocation124_spill] sm:$0xff] }
 0x3a0   :  { %7637 = vst.msk [vmem:[%s17004_s5 + $0xec] sm:$0xf] %vm7607_vm14, %v15787_v36  ;;  %7639 = vst.msk [vmem:[%s17004_s5 + $0xfc] sm:$0xf] %vm7607_vm14, %v15787_v36  ;;  %v6192_v36 = vmul.f32 %v15628_v26, %v17942_v8  ;;  %v6208_v3 = vmul.f32 %v15628_v26, %v17958_v31  ;;  %v17962_v40 = vsub.f32 %v17961_v41, %v15494_v51 }
 0x3a1   :  { %v6209_v48 = vmul.f32 %v15670_v55, %v17960_v22  ;;  %v17964_v45 = vsub.f32 %v17963_v11, %v15510_v34  ;;  %v17966_v33 = vsub.f32 %v17965_v0, %v15494_v51  ;;  %v17968_v13 = vsub.f32 %v17967_v62, %v15510_v34  ;;  %v17979_v11 = vld [vmem:[#allocation127_spill] sm:$0xff] }
 0x3a2   :  { %v6212_v1 = vmul.f32 %v15628_v26, %v17962_v40  ;;  %v17970_v14 = vsub.f32 %v17969_v21, %v15494_v51  ;;  %v17972_v8 = vsub.f32 %v17971_v53, %v15510_v34  ;;  %v17974_v10 = vsub.f32 %v17973_v42, %v15494_v51 }
 0x3a3   :  { %v6213_v24 = vmul.f32 %v15670_v55, %v17964_v45  ;;  %v6216_v16 = vmul.f32 %v15628_v26, %v17966_v33  ;;  %v6217_v50 = vmul.f32 %v15670_v55, %v17968_v13  ;;  %v17976_v29 = vsub.f32 %v17975_v23, %v15510_v34 }
 0x3a4   :  { %v6220_v20 = vmul.f32 %v15628_v26, %v17970_v14  ;;  %v6221_v28 = vmul.f32 %v15670_v55, %v17972_v8  ;;  %v6224_v56 = vmul.f32 %v15628_v26, %v17974_v10  ;;  %v6228_v4 = vmul.f32 %v15628_v26, %v6096_v35 }
 0x3a5   :  { %v6225_v18 = vmul.f32 %v15670_v55, %v17976_v29  ;;  %v6229_v43 = vmul.f32 %v15670_v55, %v6097_v52  ;;  %v6232_v39 = vmul.f32 %v15628_v26, %v6100_v38  ;;  %v6233_v37 = vmul.f32 %v15670_v55, %v6101_v44 }
 0x3a6   :  { %v6312_v12 = vmul.f32 %v17977_v17, %v6172_v63  ;;  %v6313_v2 = vmul.f32 %v17978_v32, %v6173_v60  ;;  %v6316_v31 = vmul.f32 %v17977_v17, %v6176_v27  ;;  %v6317_v49 = vmul.f32 %v17978_v32, %v6177_v57 }
 0x3a7   :  { %v6320_v22 = vmul.f32 %v17977_v17, %v6180_v15  ;;  %v6321_v41 = vmul.f32 %v17978_v32, %v6181_v19  ;;  %v6324_v35 = vmul.f32 %v17977_v17, %v6184_v61  ;;  %v6325_v52 = vmul.f32 %v17978_v32, %v6185_v30 }
 0x3a8   :  { %v6328_v38 = vmul.f32 %v17977_v17, %v6188_v9  ;;  %v6329_v44 = vmul.f32 %v17978_v32, %v6189_v47  ;;  %v6332_v63 = vmul.f32 %v17977_v17, %v6192_v36  ;;  %v6333_v60 = vmul.f32 %v17978_v32, %v6193_v59 }
 0x3a9   :  { %v6336_v27 = vmul.f32 %v17977_v17, %v6196_v25  ;;  %v6337_v57 = vmul.f32 %v17978_v32, %v6197_v54  ;;  %v6340_v15 = vmul.f32 %v17977_v17, %v6200_v46  ;;  %v6341_v19 = vmul.f32 %v17978_v32, %v6201_v6 }
 0x3aa   :  { %v6344_v61 = vmul.f32 %v17977_v17, %v6204_v58  ;;  %v6345_v30 = vmul.f32 %v17978_v32, %v6205_v7  ;;  %v6348_v9 = vmul.f32 %v17977_v17, %v6208_v3  ;;  %v6349_v47 = vmul.f32 %v17978_v32, %v6209_v48 }
 0x3ab   :  { %v6352_v36 = vmul.f32 %v17977_v17, %v6212_v1  ;;  %v6353_v59 = vmul.f32 %v17978_v32, %v6213_v24  ;;  %v6356_v25 = vmul.f32 %v17977_v17, %v6216_v16  ;;  %v6357_v54 = vmul.f32 %v17978_v32, %v6217_v50  ;;  %v17980_v24 = vld [vmem:[#allocation128_spill] sm:$0xff] }
 0x3ac   :  { %v6360_v46 = vmul.f32 %v17977_v17, %v6220_v20  ;;  %v6361_v6 = vmul.f32 %v17978_v32, %v6221_v28  ;;  %v6364_v58 = vmul.f32 %v17977_v17, %v6224_v56  ;;  %v6365_v7 = vmul.f32 %v17978_v32, %v6225_v18 }
 0x3ad   :  { %v6368_v3 = vmul.f32 %v17977_v17, %v6228_v4  ;;  %v6369_v48 = vmul.f32 %v17978_v32, %v6229_v43  ;;  %v6372_v40 = vmul.f32 %v17977_v17, %v6232_v39  ;;  %v6373_v1 = vmul.f32 %v17978_v32, %v6233_v37 }
 0x3ae   :  { %v16190_v45 = vadd.f32 %v17979_v11, %v6312_v12  ;;  %v16193_v0 = vadd.f32 %v17980_v24, %v6313_v2  ;;  %v16196_v33 = vadd.f32 %v17979_v11, %v6316_v31  ;;  %v16199_v16 = vadd.f32 %v17980_v24, %v6317_v49 }
 0x3af   :  { %v16202_v62 = vadd.f32 %v17979_v11, %v6320_v22  ;;  %v6461_v13 = vadd.f32 %v17980_v24, %v6321_v41  ;;  %v6464_v50 = vadd.f32 %v17979_v11, %v6324_v35  ;;  %v6465_v21 = vadd.f32 %v17980_v24, %v6325_v52 }
 0x3b0   :  { %v6468_v14 = vadd.f32 %v17979_v11, %v6328_v38  ;;  %v6469_v20 = vadd.f32 %v17980_v24, %v6329_v44  ;;  %v6472_v53 = vadd.f32 %v17979_v11, %v6332_v63  ;;  %v6473_v8 = vadd.f32 %v17980_v24, %v6333_v60 }
 0x3b1   :  { %v6476_v28 = vadd.f32 %v17979_v11, %v6336_v27  ;;  %v6477_v42 = vadd.f32 %v17980_v24, %v6337_v57  ;;  %v6480_v10 = vadd.f32 %v17979_v11, %v6340_v15  ;;  %v6481_v56 = vadd.f32 %v17980_v24, %v6341_v19 }
 0x3b2   :  { %v6484_v23 = vadd.f32 %v17979_v11, %v6344_v61  ;;  %v6485_v29 = vadd.f32 %v17980_v24, %v6345_v30  ;;  %v6488_v18 = vadd.f32 %v17979_v11, %v6348_v9  ;;  %v6489_v4 = vadd.f32 %v17980_v24, %v6349_v47 }
 0x3b3   :  { %v6492_v43 = vadd.f32 %v17979_v11, %v6352_v36  ;;  %v6493_v39 = vadd.f32 %v17980_v24, %v6353_v59  ;;  %v6496_v37 = vadd.f32 %v17979_v11, %v6356_v25  ;;  %v6497_v12 = vadd.f32 %v17980_v24, %v6357_v54 }
 0x3b4   :  { %v6500_v2 = vadd.f32 %v17979_v11, %v6360_v46  ;;  %v6501_v31 = vadd.f32 %v17980_v24, %v6361_v6  ;;  %v6504_v49 = vadd.f32 %v17979_v11, %v6364_v58  ;;  %v6505_v22 = vadd.f32 %v17980_v24, %v6365_v7 }
 0x3b5   :  { %v6508_v41 = vadd.f32 %v17979_v11, %v6368_v3  ;;  %v6509_v35 = vadd.f32 %v17980_v24, %v6369_v48  ;;  %v6512_v52 = vadd.f32 %v17979_v11, %v6372_v40  ;;  %v6513_v38 = vadd.f32 %v17980_v24, %v6373_v1 }
 0x3b6   :  { %v6580_v44 = vmax.f32 %v16190_v45, 0.0  ;;  %v6581_v63 = vmax.f32 %v16193_v0, 0.0  ;;  %v6584_v60 = vmax.f32 %v16196_v33, 0.0  ;;  %v6585_v27 = vmax.f32 %v16199_v16, 0.0 }
 0x3b7   :  { %v6588_v57 = vmax.f32 %v16202_v62, 0.0  ;;  %v6589_v15 = vmax.f32 %v6461_v13, 0.0  ;;  %v6592_v19 = vmax.f32 %v6464_v50, 0.0  ;;  %v6593_v61 = vmax.f32 %v6465_v21, 0.0 }
 0x3b8   :  { %v6596_v30 = vmax.f32 %v6468_v14, 0.0  ;;  %v6597_v9 = vmax.f32 %v6469_v20, 0.0  ;;  %v6600_v47 = vmax.f32 %v6472_v53, 0.0  ;;  %v6601_v36 = vmax.f32 %v6473_v8, 0.0 }
 0x3b9   :  { %v6604_v59 = vmax.f32 %v6476_v28, 0.0  ;;  %v6605_v25 = vmax.f32 %v6477_v42, 0.0  ;;  %v6608_v54 = vmax.f32 %v6480_v10, 0.0  ;;  %v6609_v46 = vmax.f32 %v6481_v56, 0.0 }
 0x3ba   :  { %v6612_v6 = vmax.f32 %v6484_v23, 0.0  ;;  %v6613_v58 = vmax.f32 %v6485_v29, 0.0  ;;  %v6616_v7 = vmax.f32 %v6488_v18, 0.0  ;;  %v6617_v3 = vmax.f32 %v6489_v4, 0.0  ;;  %v7596_v23 = vpop.permute.xlu0 %7595 }
 0x3bb   :  { %v6620_v48 = vmax.f32 %v6492_v43, 0.0  ;;  %v6621_v40 = vmax.f32 %v6493_v39, 0.0  ;;  %v6624_v1 = vmax.f32 %v6496_v37, 0.0  ;;  %v6625_v45 = vmax.f32 %v6497_v12, 0.0 }
 0x3bc   :  { %v6628_v0 = vmax.f32 %v6500_v2, 0.0  ;;  %v6629_v33 = vmax.f32 %v6501_v31, 0.0  ;;  %v6632_v16 = vmax.f32 %v6504_v49, 0.0  ;;  %v6633_v62 = vmax.f32 %v6505_v22, 0.0  ;;  %v17981_v49 = vld [vmem:[#allocation51_spill] sm:$0xff] }
 0x3bd   :  { %v6636_v13 = vmax.f32 %v6508_v41, 0.0  ;;  %v6637_v50 = vmax.f32 %v6509_v35, 0.0  ;;  %v6640_v21 = vmax.f32 %v6512_v52, 0.0  ;;  %v6641_v14 = vmax.f32 %v6513_v38, 0.0  ;;  %v17982_v41 = vld [vmem:[#allocation49_spill] sm:$0xff]  ;;  %v17983_v52 = vld [vmem:[#allocation43_spill] sm:$0xff] }
 0x3be   :  { %v8746_v20 = vpack.c.bf16 %v6581_v63, %v6580_v44  ;;  %v8748_v53 = vpack.c.bf16 %v6585_v27, %v6584_v60  ;;  %v8750_v8 = vpack.c.bf16 %v6589_v15, %v6588_v57  ;;  %v8752_v28 = vpack.c.bf16 %v6593_v61, %v6592_v19  ;;  %v17984_v44 = vld [vmem:[#allocation23_spill] sm:$0xff]  ;;  %v17985_v60 = vld [vmem:[#allocation44_spill] sm:$0xff]  ;;  %v17987_v19 = vld [vmem:[#allocation125_spill] sm:$0xff] }
 0x3bf   :  { %v8754_v42 = vpack.c.bf16 %v6597_v9, %v6596_v30  ;;  %v8756_v10 = vpack.c.bf16 %v6601_v36, %v6600_v47  ;;  %v8758_v56 = vpack.c.bf16 %v6605_v25, %v6604_v59  ;;  %v8760_v29 = vpack.c.bf16 %v6609_v46, %v6608_v54  ;;  %v17986_v57 = vld [vmem:[#allocation24_spill] sm:$0xff]  ;;  %v17988_v30 = vld [vmem:[#allocation126_spill] sm:$0xff]  ;;  %v17990_v59 = vld [vmem:[#allocation35_spill] sm:$0xff] }
 0x3c0   :  { %v8762_v18 = vpack.c.bf16 %v6613_v58, %v6612_v6  ;;  %v8764_v4 = vpack.c.bf16 %v6617_v3, %v6616_v7  ;;  %v8766_v43 = vpack.c.bf16 %v6621_v40, %v6620_v48  ;;  %7095 = vst.msk [vmem:[%s17004_s5] sm:$0xff] %vm15776_vm15, %v8746_v20  ;;  %7097 = vst.msk [vmem:[%s17004_s5 + $0x10] sm:$0xff] %vm15776_vm15, %v8748_v53  ;;  %v17989_v47 = vld [vmem:[#allocation60_spill] sm:$0xff]  ;;  %v17991_v54 = vld [vmem:[#allocation45_spill] sm:$0xff] }
 0x3c1   :  { %7099 = vst.msk [vmem:[%s17004_s5 + $0x20] sm:$0xff] %vm15776_vm15, %v8750_v8  ;;  %v8768_v39 = vpack.c.bf16 %v6625_v45, %v6624_v1  ;;  %v8770_v37 = vpack.c.bf16 %v6629_v33, %v6628_v0  ;;  %v8772_v12 = vpack.c.bf16 %v6633_v62, %v6632_v16  ;;  %v8774_v2 = vpack.c.bf16 %v6637_v50, %v6636_v13  ;;  %v17992_v6 = vld [vmem:[#allocation46_spill] sm:$0xff]  ;;  %v17993_v7 = vld [vmem:[#allocation103_spill] sm:$0xff]  ;;  %v17996_v0 = vld [vmem:[#allocation93_spill] sm:$0xff] }
 0x3c2   :  { %7101 = vst.msk [vmem:[%s17004_s5 + $0x30] sm:$0xff] %vm15776_vm15, %v8752_v28  ;;  %7103 = vst.msk [vmem:[%s17004_s5 + $0x40] sm:$0xff] %vm15776_vm15, %v8754_v42  ;;  %v8776_v31 = vpack.c.bf16 %v6641_v14, %v6640_v21  ;;  %v6106_v22 = vsub.f32 %v17981_v49, %v15494_v51  ;;  %v6107_v35 = vsub.f32 %v17982_v41, %v15510_v34  ;;  %v17994_v48 = vld [vmem:[#allocation54_spill] sm:$0xff]  ;;  %v17998_v13 = vld [vmem:[#allocation80_spill] sm:$0xff] }
 0x3c3   :  { %7105 = vst.msk [vmem:[%s17004_s5 + $0x50] sm:$0xff] %vm15776_vm15, %v8756_v10  ;;  %7107 = vst.msk [vmem:[%s17004_s5 + $0x60] sm:$0xff] %vm15776_vm15, %v8758_v56  ;;  %v6110_v38 = vsub.f32 %v17983_v52, %v15494_v51  ;;  %v6111_v63 = vsub.f32 %v17984_v44, %v15510_v34  ;;  %v6114_v27 = vsub.f32 %v17985_v60, %v15494_v51  ;;  %v17995_v1 = vld [vmem:[#allocation94_spill] sm:$0xff]  ;;  %v17999_v21 = vld [vmem:[#allocation11_spill] sm:$0xff] }
 0x3c4   :  { %7608 = vst.msk [vmem:[%s17004_s5 + $0x4] sm:$0xf] %vm7607_vm14, %v7596_v23  ;;  %7610 = vst.msk [vmem:[%s17004_s5 + $0x14] sm:$0xf] %vm7607_vm14, %v7596_v23  ;;  %v6115_v15 = vsub.f32 %v17986_v57, %v15510_v34  ;;  %v6118_v61 = vsub.f32 %v17987_v19, %v15494_v51  ;;  %v6119_v9 = vsub.f32 %v17988_v30, %v15510_v34  ;;  %v17997_v16 = vld [vmem:[#allocation78_spill] sm:$0xff]  ;;  %v18001_v8 = vld [vmem:[#allocation100_spill] sm:$0xff] }
 0x3c5   :  { %7612 = vst.msk [vmem:[%s17004_s5 + $0x24] sm:$0xf] %vm7607_vm14, %v7596_v23  ;;  %7614 = vst.msk [vmem:[%s17004_s5 + $0x34] sm:$0xf] %vm7607_vm14, %v7596_v23  ;;  %v6122_v36 = vsub.f32 %v17989_v47, %v15494_v51  ;;  %v6123_v25 = vsub.f32 %v17990_v59, %v15510_v34  ;;  %v6126_v46 = vsub.f32 %v17991_v54, %v15494_v51  ;;  %v18000_v20 = vld [vmem:[#allocation90_spill] sm:$0xff]  ;;  %v18003_v56 = vld [vmem:[#allocation111_spill] sm:$0xff] }
 0x3c6   :  { %7109 = vst.msk [vmem:[%s17004_s5 + $0x70] sm:$0xff] %vm15776_vm15, %v8760_v29  ;;  %7111 = vst.msk [vmem:[%s17004_s5 + $0x80] sm:$0xff] %vm15776_vm15, %v8762_v18  ;;  %v6127_v58 = vsub.f32 %v17992_v6, %v15510_v34  ;;  %v6130_v3 = vsub.f32 %v17993_v7, %v15494_v51  ;;  %v6131_v40 = vsub.f32 %v17994_v48, %v15510_v34  ;;  %v18002_v42 = vld [vmem:[#allocation102_spill] sm:$0xff]  ;;  %v18004_v29 = vld [vmem:[#allocation107_spill] sm:$0xff] }
 0x3c7   :  { %7113 = vst.msk [vmem:[%s17004_s5 + $0x90] sm:$0xff] %vm15776_vm15, %v8764_v4  ;;  %7115 = vst.msk [vmem:[%s17004_s5 + $0xa0] sm:$0xff] %vm15776_vm15, %v8766_v43  ;;  %v6134_v45 = vsub.f32 %v17995_v1, %v15494_v51  ;;  %v6135_v33 = vsub.f32 %v17996_v0, %v15510_v34  ;;  %v6138_v62 = vsub.f32 %v17997_v16, %v15494_v51  ;;  %v18005_v4 = vld [vmem:[#allocation105_spill] sm:$0xff]  ;;  %v18009_v41 = vld [vmem:[#allocation119_spill] sm:$0xff] }
 0x3c8   :  { %7616 = vst.msk [vmem:[%s17004_s5 + $0x44] sm:$0xf] %vm7607_vm14, %v7596_v23  ;;  %7618 = vst.msk [vmem:[%s17004_s5 + $0x54] sm:$0xf] %vm7607_vm14, %v7596_v23  ;;  %v6139_v50 = vsub.f32 %v17998_v13, %v15510_v34  ;;  %v6142_v14 = vsub.f32 %v17999_v21, %v15494_v51  ;;  %v6143_v53 = vsub.f32 %v18000_v20, %v15510_v34  ;;  %v18010_v44 = vld [vmem:[#allocation120_spill] sm:$0xff] }
 0x3c9   :  { %7620 = vst.msk [vmem:[%s17004_s5 + $0x64] sm:$0xf] %vm7607_vm14, %v7596_v23  ;;  %7622 = vst.msk [vmem:[%s17004_s5 + $0x74] sm:$0xf] %vm7607_vm14, %v7596_v23  ;;  %v6146_v28 = vsub.f32 %v18001_v8, %v15494_v51  ;;  %v6147_v10 = vsub.f32 %v18002_v42, %v15510_v34  ;;  %v6151_v18 = vsub.f32 %v18004_v29, %v15510_v34 }
 0x3ca   :  { %7117 = vst.msk [vmem:[%s17004_s5 + $0xb0] sm:$0xff] %vm15776_vm15, %v8768_v39  ;;  %7119 = vst.msk [vmem:[%s17004_s5 + $0xc0] sm:$0xff] %vm15776_vm15, %v8770_v37  ;;  %v6154_v43 = vsub.f32 %v18005_v4, %v15494_v51  ;;  %v18006_v39 = vld [vmem:[#allocation113_spill] sm:$0xff]  ;;  %v6162_v52 = vsub.f32 %v18009_v41, %v15494_v51  ;;  %v6163_v60 = vsub.f32 %v18010_v44, %v15510_v34 }
 0x3cb   :  { %7121 = vst.msk [vmem:[%s17004_s5 + $0xd0] sm:$0xff] %vm15776_vm15, %v8772_v12  ;;  %7123 = vst.msk [vmem:[%s17004_s5 + $0xe0] sm:$0xff] %vm15776_vm15, %v8774_v2  ;;  %v6155_v37 = vsub.f32 %v18006_v39, %v15510_v34  ;;  %v18007_v12 = vld [vmem:[#allocation14_spill] sm:$0xff]  ;;  %v6238_v57 = vmul.f32 %v15628_v26, %v6106_v22  ;;  %v6239_v19 = vmul.f32 %v15670_v55, %v6107_v35 }
 0x3cc   :  { %7624 = vst.msk [vmem:[%s17004_s5 + $0x84] sm:$0xf] %vm7607_vm14, %v7596_v23  ;;  %7626 = vst.msk [vmem:[%s17004_s5 + $0x94] sm:$0xf] %vm7607_vm14, %v7596_v23  ;;  %v6158_v2 = vsub.f32 %v18007_v12, %v15494_v51  ;;  %v6242_v30 = vmul.f32 %v15628_v26, %v6110_v38  ;;  %v6243_v47 = vmul.f32 %v15670_v55, %v6111_v63 }
 0x3cd   :  { %7628 = vst.msk [vmem:[%s17004_s5 + $0xa4] sm:$0xf] %vm7607_vm14, %v7596_v23  ;;  %7630 = vst.msk [vmem:[%s17004_s5 + $0xb4] sm:$0xf] %vm7607_vm14, %v7596_v23  ;;  %v6246_v59 = vmul.f32 %v15628_v26, %v6114_v27  ;;  %v6247_v54 = vmul.f32 %v15670_v55, %v6115_v15  ;;  %v6250_v6 = vmul.f32 %v15628_v26, %v6118_v61 }
 0x3ce   :  { %7125 = vst.msk [vmem:[%s17004_s5 + $0xf0] sm:$0xff] %vm15776_vm15, %v8776_v31  ;;  %v18008_v31 = vld [vmem:[#allocation61_spill] sm:$0xff]  ;;  %v6251_v7 = vmul.f32 %v15670_v55, %v6119_v9  ;;  %v6254_v48 = vmul.f32 %v15628_v26, %v6122_v36  ;;  %v6255_v1 = vmul.f32 %v15670_v55, %v6123_v25  ;;  %v6258_v22 = vmul.f32 %v15628_v26, %v6126_v46 }
 0x3cf   :  { %7632 = vst.msk [vmem:[%s17004_s5 + $0xc4] sm:$0xf] %vm7607_vm14, %v7596_v23  ;;  %7634 = vst.msk [vmem:[%s17004_s5 + $0xd4] sm:$0xf] %vm7607_vm14, %v7596_v23  ;;  %v6159_v49 = vsub.f32 %v18008_v31, %v15510_v34  ;;  %v6259_v35 = vmul.f32 %v15670_v55, %v6127_v58  ;;  %v6262_v38 = vmul.f32 %v15628_v26, %v6130_v3 }
 0x3d0   :  { %7636 = vst.msk [vmem:[%s17004_s5 + $0xe4] sm:$0xf] %vm7607_vm14, %v7596_v23  ;;  %7638 = vst.msk [vmem:[%s17004_s5 + $0xf4] sm:$0xf] %vm7607_vm14, %v7596_v23  ;;  %v6150_v23 = vsub.f32 %v18003_v56, %v15494_v51  ;;  %v6263_v63 = vmul.f32 %v15670_v55, %v6131_v40  ;;  %v6266_v27 = vmul.f32 %v15628_v26, %v6134_v45 }
 0x3d1   :  { %v6267_v15 = vmul.f32 %v15670_v55, %v6135_v33  ;;  %v6270_v61 = vmul.f32 %v15628_v26, %v6138_v62  ;;  %v6271_v9 = vmul.f32 %v15670_v55, %v6139_v50  ;;  %v6274_v36 = vmul.f32 %v15628_v26, %v6142_v14 }
 0x3d2   :  { %v6275_v25 = vmul.f32 %v15670_v55, %v6143_v53  ;;  %v6278_v46 = vmul.f32 %v15628_v26, %v6146_v28  ;;  %v6279_v58 = vmul.f32 %v15670_v55, %v6147_v10  ;;  %v6282_v3 = vmul.f32 %v15628_v26, %v6150_v23 }
 0x3d3   :  { %v6283_v40 = vmul.f32 %v15670_v55, %v6151_v18  ;;  %v6286_v45 = vmul.f32 %v15628_v26, %v6154_v43  ;;  %v6287_v0 = vmul.f32 %v15670_v55, %v6155_v37  ;;  %v6290_v33 = vmul.f32 %v15628_v26, %v6158_v2 }
 0x3d4   :  { %v6291_v16 = vmul.f32 %v15670_v55, %v6159_v49  ;;  %v6294_v62 = vmul.f32 %v15628_v26, %v6162_v52  ;;  %v6295_v13 = vmul.f32 %v15670_v55, %v6163_v60  ;;  %v6378_v50 = vmul.f32 %v17977_v17, %v6238_v57 }
 0x3d5   :  { %v6379_v21 = vmul.f32 %v17978_v32, %v6239_v19  ;;  %v6382_v14 = vmul.f32 %v17977_v17, %v6242_v30  ;;  %v6383_v20 = vmul.f32 %v17978_v32, %v6243_v47  ;;  %v6386_v53 = vmul.f32 %v17977_v17, %v6246_v59 }
 0x3d6   :  { %v6387_v8 = vmul.f32 %v17978_v32, %v6247_v54  ;;  %v6390_v28 = vmul.f32 %v17977_v17, %v6250_v6  ;;  %v6391_v42 = vmul.f32 %v17978_v32, %v6251_v7  ;;  %v6394_v10 = vmul.f32 %v17977_v17, %v6254_v48 }
 0x3d7   :  { %v6395_v56 = vmul.f32 %v17978_v32, %v6255_v1  ;;  %v6398_v23 = vmul.f32 %v17977_v17, %v6258_v22  ;;  %v6399_v29 = vmul.f32 %v17978_v32, %v6259_v35  ;;  %v6402_v18 = vmul.f32 %v17977_v17, %v6262_v38 }
 0x3d8   :  { %v6403_v4 = vmul.f32 %v17978_v32, %v6263_v63  ;;  %v6406_v43 = vmul.f32 %v17977_v17, %v6266_v27  ;;  %v6407_v39 = vmul.f32 %v17978_v32, %v6267_v15  ;;  %v6410_v37 = vmul.f32 %v17977_v17, %v6270_v61 }
 0x3d9   :  { %v6411_v12 = vmul.f32 %v17978_v32, %v6271_v9  ;;  %v6414_v2 = vmul.f32 %v17977_v17, %v6274_v36  ;;  %v6415_v31 = vmul.f32 %v17978_v32, %v6275_v25  ;;  %v6418_v49 = vmul.f32 %v17977_v17, %v6278_v46 }
 0x3da   :  { %v6419_v41 = vmul.f32 %v17978_v32, %v6279_v58  ;;  %v6422_v52 = vmul.f32 %v17977_v17, %v6282_v3  ;;  %v6423_v44 = vmul.f32 %v17978_v32, %v6283_v40  ;;  %v6426_v60 = vmul.f32 %v17977_v17, %v6286_v45 }
 0x3db   :  { %v6427_v57 = vmul.f32 %v17978_v32, %v6287_v0  ;;  %v6430_v19 = vmul.f32 %v17977_v17, %v6290_v33  ;;  %v6431_v30 = vmul.f32 %v17978_v32, %v6291_v16  ;;  %v6434_v47 = vmul.f32 %v17977_v17, %v6294_v62 }
 0x3dc   :  { %v6435_v59 = vmul.f32 %v17978_v32, %v6295_v13  ;;  %v6518_v54 = vadd.f32 %v17979_v11, %v6378_v50  ;;  %v6519_v6 = vadd.f32 %v17980_v24, %v6379_v21  ;;  %v6522_v7 = vadd.f32 %v17979_v11, %v6382_v14 }
 0x3dd   :  { %v6523_v48 = vadd.f32 %v17980_v24, %v6383_v20  ;;  %v6526_v1 = vadd.f32 %v17979_v11, %v6386_v53  ;;  %v6527_v22 = vadd.f32 %v17980_v24, %v6387_v8  ;;  %v6530_v35 = vadd.f32 %v17979_v11, %v6390_v28 }
 0x3de   :  { %v6531_v38 = vadd.f32 %v17980_v24, %v6391_v42  ;;  %v6534_v63 = vadd.f32 %v17979_v11, %v6394_v10  ;;  %v6535_v27 = vadd.f32 %v17980_v24, %v6395_v56  ;;  %v6538_v15 = vadd.f32 %v17979_v11, %v6398_v23 }
 0x3df   :  { %v6539_v61 = vadd.f32 %v17980_v24, %v6399_v29  ;;  %v6542_v9 = vadd.f32 %v17979_v11, %v6402_v18  ;;  %v6543_v36 = vadd.f32 %v17980_v24, %v6403_v4  ;;  %v6546_v25 = vadd.f32 %v17979_v11, %v6406_v43 }
 0x3e0   :  { %v6547_v46 = vadd.f32 %v17980_v24, %v6407_v39  ;;  %v6550_v58 = vadd.f32 %v17979_v11, %v6410_v37  ;;  %v6551_v3 = vadd.f32 %v17980_v24, %v6411_v12  ;;  %v6554_v40 = vadd.f32 %v17979_v11, %v6414_v2 }
 0x3e1   :  { %v6555_v45 = vadd.f32 %v17980_v24, %v6415_v31  ;;  %v6558_v0 = vadd.f32 %v17979_v11, %v6418_v49  ;;  %v6559_v33 = vadd.f32 %v17980_v24, %v6419_v41  ;;  %v6562_v16 = vadd.f32 %v17979_v11, %v6422_v52 }
 0x3e2   :  { %v6563_v62 = vadd.f32 %v17980_v24, %v6423_v44  ;;  %v6566_v13 = vadd.f32 %v17979_v11, %v6426_v60  ;;  %v6567_v50 = vadd.f32 %v17980_v24, %v6427_v57  ;;  %v6570_v21 = vadd.f32 %v17979_v11, %v6430_v19 }
 0x3e3   :  { %v6571_v14 = vadd.f32 %v17980_v24, %v6431_v30  ;;  %v6574_v20 = vadd.f32 %v17979_v11, %v6434_v47  ;;  %v6575_v53 = vadd.f32 %v17980_v24, %v6435_v59  ;;  %v6646_v8 = vmax.f32 %v6518_v54, 0.0 }
 0x3e4   :  { %v6647_v28 = vmax.f32 %v6519_v6, 0.0  ;;  %v6650_v42 = vmax.f32 %v6522_v7, 0.0  ;;  %v6651_v10 = vmax.f32 %v6523_v48, 0.0  ;;  %v6654_v56 = vmax.f32 %v6526_v1, 0.0 }
 0x3e5   :  { %v6655_v23 = vmax.f32 %v6527_v22, 0.0  ;;  %v6658_v29 = vmax.f32 %v6530_v35, 0.0  ;;  %v6659_v18 = vmax.f32 %v6531_v38, 0.0  ;;  %v6662_v4 = vmax.f32 %v6534_v63, 0.0 }
 0x3e6   :  { %v6663_v43 = vmax.f32 %v6535_v27, 0.0  ;;  %v6666_v39 = vmax.f32 %v6538_v15, 0.0  ;;  %v6667_v37 = vmax.f32 %v6539_v61, 0.0  ;;  %v6670_v12 = vmax.f32 %v6542_v9, 0.0 }
 0x3e7   :  { %v6671_v2 = vmax.f32 %v6543_v36, 0.0  ;;  %v6674_v31 = vmax.f32 %v6546_v25, 0.0  ;;  %v6675_v49 = vmax.f32 %v6547_v46, 0.0  ;;  %v6678_v41 = vmax.f32 %v6550_v58, 0.0 }
 0x3e8   :  { %v6679_v52 = vmax.f32 %v6551_v3, 0.0  ;;  %v6682_v44 = vmax.f32 %v6554_v40, 0.0  ;;  %v6683_v60 = vmax.f32 %v6555_v45, 0.0  ;;  %v6686_v57 = vmax.f32 %v6558_v0, 0.0  ;;  %v18011_v40 = vld [vmem:[#allocation5_spill] sm:$0xff] }
 0x3e9   :  { %v6687_v19 = vmax.f32 %v6559_v33, 0.0  ;;  %v6690_v30 = vmax.f32 %v6562_v16, 0.0  ;;  %v6691_v47 = vmax.f32 %v6563_v62, 0.0  ;;  %v6694_v59 = vmax.f32 %v6566_v13, 0.0  ;;  %v18012_v33 = vld [vmem:[#allocation115_spill] sm:$0xff]  ;;  %v18013_v62 = vld [vmem:[#allocation114_spill] sm:$0xff] }
 0x3ea   :  { %v6695_v54 = vmax.f32 %v6567_v50, 0.0  ;;  %v6698_v6 = vmax.f32 %v6570_v21, 0.0  ;;  %v6699_v7 = vmax.f32 %v6571_v14, 0.0  ;;  %v6702_v48 = vmax.f32 %v6574_v20, 0.0  ;;  %v18014_v50 = vld [vmem:[#allocation15_spill] sm:$0xff]  ;;  %v18015_v14 = vld [vmem:[#allocation57_spill] sm:$0xff] }
 0x3eb   :  { %v6703_v1 = vmax.f32 %v6575_v53, 0.0  ;;  %v8779_v22 = vpack.c.bf16 %v6647_v28, %v6646_v8  ;;  %v8781_v35 = vpack.c.bf16 %v6651_v10, %v6650_v42  ;;  %v8783_v38 = vpack.c.bf16 %v6655_v23, %v6654_v56  ;;  %v18016_v53 = vld [vmem:[#allocation42_spill] sm:$0xff]  ;;  %v18019_v23 = vld [vmem:[#allocation75_spill] sm:$0xff] }
 0x3ec   :  { %v8785_v63 = vpack.c.bf16 %v6659_v18, %v6658_v29  ;;  %v8787_v27 = vpack.c.bf16 %v6663_v43, %v6662_v4  ;;  %v8789_v15 = vpack.c.bf16 %v6667_v37, %v6666_v39  ;;  %v8791_v61 = vpack.c.bf16 %v6671_v2, %v6670_v12  ;;  %v18017_v28 = vld [vmem:[#allocation22_spill] sm:$0xff]  ;;  %v18020_v18 = vld [vmem:[#allocation33_spill] sm:$0xff]  ;;  %v18021_v43 = vld [vmem:[#allocation87_spill] sm:$0xff] }
 0x3ed   :  { %v8793_v9 = vpack.c.bf16 %v6675_v49, %v6674_v31  ;;  %v8795_v36 = vpack.c.bf16 %v6679_v52, %v6678_v41  ;;  %7128 = vst.msk [vmem:[%s17004_s5 + $0x108] sm:$0xff] %vm15776_vm15, %v8779_v22  ;;  %v8797_v25 = vpack.c.bf16 %v6683_v60, %v6682_v44  ;;  %v8799_v46 = vpack.c.bf16 %v6687_v19, %v6686_v57  ;;  %v18018_v10 = vld [vmem:[#allocation66_spill] sm:$0xff]  ;;  %v18023_v2 = vld [vmem:[#allocation39_spill] sm:$0xff]  ;;  %v18025_v52 = vld [vmem:[#allocation101_spill] sm:$0xff] }
 0x3ee   :  { %v8801_v58 = vpack.c.bf16 %v6691_v47, %v6690_v30  ;;  %v8803_v3 = vpack.c.bf16 %v6695_v54, %v6694_v59  ;;  %7130 = vst.msk [vmem:[%s17004_s5 + $0x118] sm:$0xff] %vm15776_vm15, %v8781_v35  ;;  %7132 = vst.msk [vmem:[%s17004_s5 + $0x128] sm:$0xff] %vm15776_vm15, %v8783_v38  ;;  %v8805_v45 = vpack.c.bf16 %v6699_v7, %v6698_v6  ;;  %v18022_v37 = vld [vmem:[#allocation38_spill] sm:$0xff]  ;;  %v18026_v60 = vld [vmem:[#allocation3_spill] sm:$0xff] }
 0x3ef   :  { %7134 = vst.msk [vmem:[%s17004_s5 + $0x138] sm:$0xff] %vm15776_vm15, %v8785_v63  ;;  %7136 = vst.msk [vmem:[%s17004_s5 + $0x148] sm:$0xff] %vm15776_vm15, %v8787_v27  ;;  %v8807_v0 = vpack.c.bf16 %v6703_v1, %v6702_v48  ;;  %v6104_v16 = vsub.f32 %v18012_v33, %v15494_v51  ;;  %v6105_v13 = vsub.f32 %v18013_v62, %v15510_v34  ;;  %v18024_v49 = vld [vmem:[#allocation50_spill] sm:$0xff]  ;;  %v18027_v19 = vld [vmem:[#allocation63_spill] sm:$0xff] }
 0x3f0   :  { %7641 = vst.msk [vmem:[%s17004_s5 + $0x10c] sm:$0xf] %vm7607_vm14, %v18011_v40  ;;  %7643 = vst.msk [vmem:[%s17004_s5 + $0x11c] sm:$0xf] %vm7607_vm14, %v18011_v40  ;;  %v6108_v21 = vsub.f32 %v18014_v50, %v15494_v51  ;;  %v6109_v20 = vsub.f32 %v18015_v14, %v15510_v34  ;;  %v6112_v8 = vsub.f32 %v18016_v53, %v15494_v51  ;;  %v18028_v47 = vld [vmem:[#allocation74_spill] sm:$0xff]  ;;  %v18029_v54 = vld [vmem:[#allocation96_spill] sm:$0xff] }
 0x3f1   :  { %7138 = vst.msk [vmem:[%s17004_s5 + $0x158] sm:$0xff] %vm15776_vm15, %v8789_v15  ;;  %7140 = vst.msk [vmem:[%s17004_s5 + $0x168] sm:$0xff] %vm15776_vm15, %v8791_v61  ;;  %v6113_v42 = vsub.f32 %v18017_v28, %v15510_v34  ;;  %v6116_v56 = vsub.f32 %v18018_v10, %v15494_v51  ;;  %v6117_v29 = vsub.f32 %v18019_v23, %v15510_v34  ;;  %v18030_v7 = vld [vmem:[#allocation88_spill] sm:$0xff]  ;;  %v18031_v1 = vld [vmem:[#allocation89_spill] sm:$0xff] }
 0x3f2   :  { %7142 = vst.msk [vmem:[%s17004_s5 + $0x178] sm:$0xff] %vm15776_vm15, %v8793_v9  ;;  %7144 = vst.msk [vmem:[%s17004_s5 + $0x188] sm:$0xff] %vm15776_vm15, %v8795_v36  ;;  %v6120_v4 = vsub.f32 %v18020_v18, %v15494_v51  ;;  %v6121_v39 = vsub.f32 %v18021_v43, %v15510_v34  ;;  %v6124_v12 = vsub.f32 %v18022_v37, %v15494_v51  ;;  %v18032_v35 = vld [vmem:[#allocation92_spill] sm:$0xff]  ;;  %v18033_v63 = vld [vmem:[#allocation98_spill] sm:$0xff] }
 0x3f3   :  { %7645 = vst.msk [vmem:[%s17004_s5 + $0x12c] sm:$0xf] %vm7607_vm14, %v18011_v40  ;;  %7647 = vst.msk [vmem:[%s17004_s5 + $0x13c] sm:$0xf] %vm7607_vm14, %v18011_v40  ;;  %v6125_v31 = vsub.f32 %v18023_v2, %v15510_v34  ;;  %v6128_v41 = vsub.f32 %v18024_v49, %v15494_v51  ;;  %v6129_v44 = vsub.f32 %v18025_v52, %v15510_v34  ;;  %v18034_v15 = vld [vmem:[#allocation109_spill] sm:$0xff]  ;;  %v18035_v9 = vld [vmem:[#allocation31_spill] sm:$0xff] }
 0x3f4   :  { %7649 = vst.msk [vmem:[%s17004_s5 + $0x14c] sm:$0xf] %vm7607_vm14, %v18011_v40  ;;  %7651 = vst.msk [vmem:[%s17004_s5 + $0x15c] sm:$0xf] %vm7607_vm14, %v18011_v40  ;;  %v6132_v57 = vsub.f32 %v18026_v60, %v15494_v51  ;;  %v6133_v30 = vsub.f32 %v18027_v19, %v15510_v34  ;;  %v6136_v59 = vsub.f32 %v18028_v47, %v15494_v51  ;;  %v18040_v62 = vld [vmem:[#allocation117_spill] sm:$0xff]  ;;  %v18041_v14 = vld [vmem:[#allocation118_spill] sm:$0xff] }
 0x3f5   :  { %7146 = vst.msk [vmem:[%s17004_s5 + $0x198] sm:$0xff] %vm15776_vm15, %v8797_v25  ;;  %7148 = vst.msk [vmem:[%s17004_s5 + $0x1a8] sm:$0xff] %vm15776_vm15, %v8799_v46  ;;  %v6137_v6 = vsub.f32 %v18029_v54, %v15510_v34  ;;  %v6140_v48 = vsub.f32 %v18030_v7, %v15494_v51  ;;  %v6141_v22 = vsub.f32 %v18031_v1, %v15510_v34  ;;  %v18036_v25 = vld [vmem:[#allocation10_spill] sm:$0xff]  ;;  %v18042_v28 = vld [vmem:[#allocation121_spill] sm:$0xff] }
 0x3f6   :  { %7150 = vst.msk [vmem:[%s17004_s5 + $0x1b8] sm:$0xff] %vm15776_vm15, %v8801_v58  ;;  %7152 = vst.msk [vmem:[%s17004_s5 + $0x1c8] sm:$0xff] %vm15776_vm15, %v8803_v3  ;;  %v6144_v38 = vsub.f32 %v18032_v35, %v15494_v51  ;;  %v6145_v27 = vsub.f32 %v18033_v63, %v15510_v34  ;;  %v6148_v61 = vsub.f32 %v18034_v15, %v15494_v51  ;;  %v18037_v58 = vld [vmem:[#allocation110_spill] sm:$0xff] }
 0x3f7   :  { %7653 = vst.msk [vmem:[%s17004_s5 + $0x16c] sm:$0xf] %vm7607_vm14, %v18011_v40  ;;  %7655 = vst.msk [vmem:[%s17004_s5 + $0x17c] sm:$0xf] %vm7607_vm14, %v18011_v40  ;;  %v6149_v36 = vsub.f32 %v18035_v9, %v15510_v34  ;;  %v6152_v46 = vsub.f32 %v18036_v25, %v15494_v51  ;;  %v6153_v3 = vsub.f32 %v18037_v58, %v15510_v34  ;;  %v18043_v23 = vld [vmem:[#allocation122_spill] sm:$0xff] }
 0x3f8   :  { %7657 = vst.msk [vmem:[%s17004_s5 + $0x18c] sm:$0xf] %vm7607_vm14, %v18011_v40  ;;  %7659 = vst.msk [vmem:[%s17004_s5 + $0x19c] sm:$0xf] %vm7607_vm14, %v18011_v40  ;;  %v6160_v50 = vsub.f32 %v18040_v62, %v15494_v51  ;;  %v6161_v53 = vsub.f32 %v18041_v14, %v15510_v34  ;;  %v6164_v10 = vsub.f32 %v18042_v28, %v15494_v51 }
 0x3f9   :  { %7154 = vst.msk [vmem:[%s17004_s5 + $0x1d8] sm:$0xff] %vm15776_vm15, %v8805_v45  ;;  %7156 = vst.msk [vmem:[%s17004_s5 + $0x1e8] sm:$0xff] %vm15776_vm15, %v8807_v0  ;;  %v18039_v0 = vld [vmem:[#allocation116_spill] sm:$0xff]  ;;  %v6165_v18 = vsub.f32 %v18043_v23, %v15510_v34  ;;  %v6236_v43 = vmul.f32 %v15628_v26, %v6104_v16  ;;  %v6237_v37 = vmul.f32 %v15670_v55, %v6105_v13 }
 0x3fa   :  { %7661 = vst.msk [vmem:[%s17004_s5 + $0x1ac] sm:$0xf] %vm7607_vm14, %v18011_v40  ;;  %7663 = vst.msk [vmem:[%s17004_s5 + $0x1bc] sm:$0xf] %vm7607_vm14, %v18011_v40  ;;  %v6157_v33 = vsub.f32 %v18039_v0, %v15510_v34  ;;  %v6240_v2 = vmul.f32 %v15628_v26, %v6108_v21  ;;  %v6241_v49 = vmul.f32 %v15670_v55, %v6109_v20 }
 0x3fb   :  { %7665 = vst.msk [vmem:[%s17004_s5 + $0x1cc] sm:$0xf] %vm7607_vm14, %v18011_v40  ;;  %7667 = vst.msk [vmem:[%s17004_s5 + $0x1dc] sm:$0xf] %vm7607_vm14, %v18011_v40  ;;  %v6244_v52 = vmul.f32 %v15628_v26, %v6112_v8  ;;  %v6245_v60 = vmul.f32 %v15670_v55, %v6113_v42  ;;  %v6248_v19 = vmul.f32 %v15628_v26, %v6116_v56 }
 0x3fc   :  { %7669 = vst.msk [vmem:[%s17004_s5 + $0x1ec] sm:$0xf] %vm7607_vm14, %v18011_v40  ;;  %v18038_v40 = vld [vmem:[#allocation12_spill] sm:$0xff]  ;;  %v6249_v47 = vmul.f32 %v15670_v55, %v6117_v29  ;;  %v6253_v34 = vmul.f32 %v15670_v55, %v6121_v39  ;;  %v6256_v16 = vmul.f32 %v15628_v26, %v6124_v12  ;;  %v6257_v13 = vmul.f32 %v15670_v55, %v6125_v31 }
 0x3fd   :  { %v6156_v45 = vsub.f32 %v18038_v40, %v15494_v51  ;;  %v6252_v51 = vmul.f32 %v15628_v26, %v6120_v4  ;;  %v6260_v21 = vmul.f32 %v15628_v26, %v6128_v41  ;;  %v6261_v20 = vmul.f32 %v15670_v55, %v6129_v44 }
 0x3fe   :  { %v6264_v8 = vmul.f32 %v15628_v26, %v6132_v57  ;;  %v6265_v42 = vmul.f32 %v15670_v55, %v6133_v30  ;;  %v6268_v56 = vmul.f32 %v15628_v26, %v6136_v59  ;;  %v6269_v29 = vmul.f32 %v15670_v55, %v6137_v6 }
 0x3ff   :  { %v6272_v4 = vmul.f32 %v15628_v26, %v6140_v48  ;;  %v6273_v39 = vmul.f32 %v15670_v55, %v6141_v22  ;;  %v6276_v12 = vmul.f32 %v15628_v26, %v6144_v38  ;;  %v6277_v31 = vmul.f32 %v15670_v55, %v6145_v27 }
 0x400   :  { %v6280_v41 = vmul.f32 %v15628_v26, %v6148_v61  ;;  %v6281_v44 = vmul.f32 %v15670_v55, %v6149_v36  ;;  %v6284_v57 = vmul.f32 %v15628_v26, %v6152_v46  ;;  %v6285_v30 = vmul.f32 %v15670_v55, %v6153_v3 }
 0x401   :  { %v6288_v59 = vmul.f32 %v15628_v26, %v6156_v45  ;;  %v6289_v54 = vmul.f32 %v15670_v55, %v6157_v33  ;;  %v6292_v6 = vmul.f32 %v15628_v26, %v6160_v50  ;;  %v6293_v7 = vmul.f32 %v15670_v55, %v6161_v53 }
 0x402   :  { %v6296_v48 = vmul.f32 %v15628_v26, %v6164_v10  ;;  %v6297_v1 = vmul.f32 %v15670_v55, %v6165_v18  ;;  %v6376_v22 = vmul.f32 %v17977_v17, %v6236_v43  ;;  %v6377_v35 = vmul.f32 %v17978_v32, %v6237_v37 }
 0x403   :  { %v6380_v38 = vmul.f32 %v17977_v17, %v6240_v2  ;;  %v6381_v63 = vmul.f32 %v17978_v32, %v6241_v49  ;;  %v6384_v27 = vmul.f32 %v17977_v17, %v6244_v52  ;;  %v6385_v15 = vmul.f32 %v17978_v32, %v6245_v60 }
 0x404   :  { %v6388_v61 = vmul.f32 %v17977_v17, %v6248_v19  ;;  %v6389_v9 = vmul.f32 %v17978_v32, %v6249_v47  ;;  %v6392_v26 = vmul.f32 %v17977_v17, %v6252_v51  ;;  %v6393_v55 = vmul.f32 %v17978_v32, %v6253_v34 }
 0x405   :  { %v6396_v36 = vmul.f32 %v17977_v17, %v6256_v16  ;;  %v6397_v25 = vmul.f32 %v17978_v32, %v6257_v13  ;;  %v6400_v46 = vmul.f32 %v17977_v17, %v6260_v21  ;;  %v6401_v58 = vmul.f32 %v17978_v32, %v6261_v20 }
 0x406   :  { %v6404_v3 = vmul.f32 %v17977_v17, %v6264_v8  ;;  %v6405_v40 = vmul.f32 %v17978_v32, %v6265_v42  ;;  %v6408_v45 = vmul.f32 %v17977_v17, %v6268_v56  ;;  %v6409_v0 = vmul.f32 %v17978_v32, %v6269_v29 }
 0x407   :  { %v6412_v33 = vmul.f32 %v17977_v17, %v6272_v4  ;;  %v6413_v62 = vmul.f32 %v17978_v32, %v6273_v39  ;;  %v6416_v50 = vmul.f32 %v17977_v17, %v6276_v12  ;;  %v6417_v14 = vmul.f32 %v17978_v32, %v6277_v31 }
 0x408   :  { %v6420_v53 = vmul.f32 %v17977_v17, %v6280_v41  ;;  %v6421_v28 = vmul.f32 %v17978_v32, %v6281_v44  ;;  %v6424_v10 = vmul.f32 %v17977_v17, %v6284_v57  ;;  %v6425_v23 = vmul.f32 %v17978_v32, %v6285_v30 }
 0x409   :  { %v6428_v18 = vmul.f32 %v17977_v17, %v6288_v59  ;;  %v6429_v43 = vmul.f32 %v17978_v32, %v6289_v54  ;;  %v6432_v37 = vmul.f32 %v17977_v17, %v6292_v6  ;;  %v6433_v2 = vmul.f32 %v17978_v32, %v6293_v7 }
 0x40a   :  { %v6436_v49 = vmul.f32 %v17977_v17, %v6296_v48  ;;  %v6437_v52 = vmul.f32 %v17978_v32, %v6297_v1  ;;  %v16809_v60 = vadd.f32 %v17979_v11, %v6376_v22  ;;  %v16812_v19 = vadd.f32 %v17980_v24, %v6377_v35 }
 0x40b   :  { %v16815_v47 = vadd.f32 %v17979_v11, %v6380_v38  ;;  %v16818_v51 = vadd.f32 %v17980_v24, %v6381_v63  ;;  %v16821_v34 = vadd.f32 %v17979_v11, %v6384_v27  ;;  %v6525_v16 = vadd.f32 %v17980_v24, %v6385_v15 }
 0x40c   :  { %v6528_v17 = vadd.f32 %v17979_v11, %v6388_v61  ;;  %v6529_v32 = vadd.f32 %v17980_v24, %v6389_v9  ;;  %v6532_v13 = vadd.f32 %v17979_v11, %v6392_v26  ;;  %v6533_v21 = vadd.f32 %v17980_v24, %v6393_v55 }
 0x40d   :  { %v6536_v20 = vadd.f32 %v17979_v11, %v6396_v36  ;;  %v6537_v8 = vadd.f32 %v17980_v24, %v6397_v25  ;;  %v6540_v42 = vadd.f32 %v17979_v11, %v6400_v46  ;;  %v6541_v56 = vadd.f32 %v17980_v24, %v6401_v58 }
 0x40e   :  { %v6544_v29 = vadd.f32 %v17979_v11, %v6404_v3  ;;  %v6545_v4 = vadd.f32 %v17980_v24, %v6405_v40  ;;  %v6548_v39 = vadd.f32 %v17979_v11, %v6408_v45  ;;  %v6549_v12 = vadd.f32 %v17980_v24, %v6409_v0 }
 0x40f   :  { %v6552_v31 = vadd.f32 %v17979_v11, %v6412_v33  ;;  %v6553_v41 = vadd.f32 %v17980_v24, %v6413_v62  ;;  %v6556_v44 = vadd.f32 %v17979_v11, %v6416_v50  ;;  %v6557_v57 = vadd.f32 %v17980_v24, %v6417_v14 }
 0x410   :  { %v6560_v30 = vadd.f32 %v17979_v11, %v6420_v53  ;;  %v6561_v59 = vadd.f32 %v17980_v24, %v6421_v28  ;;  %v6564_v54 = vadd.f32 %v17979_v11, %v6424_v10  ;;  %v6565_v6 = vadd.f32 %v17980_v24, %v6425_v23 }
 0x411   :  { %v6568_v7 = vadd.f32 %v17979_v11, %v6428_v18  ;;  %v6569_v48 = vadd.f32 %v17980_v24, %v6429_v43  ;;  %v6572_v1 = vadd.f32 %v17979_v11, %v6432_v37  ;;  %v6573_v22 = vadd.f32 %v17980_v24, %v6433_v2 }
 0x412   :  { %v6576_v35 = vadd.f32 %v17979_v11, %v6436_v49  ;;  %v6577_v38 = vadd.f32 %v17980_v24, %v6437_v52  ;;  %v6644_v63 = vmax.f32 %v16809_v60, 0.0  ;;  %v6645_v27 = vmax.f32 %v16812_v19, 0.0 }
 0x413   :  { %v6648_v15 = vmax.f32 %v16815_v47, 0.0  ;;  %v6649_v61 = vmax.f32 %v16818_v51, 0.0  ;;  %v6652_v9 = vmax.f32 %v16821_v34, 0.0  ;;  %v6653_v26 = vmax.f32 %v6525_v16, 0.0 }
 0x414   :  { %v6656_v55 = vmax.f32 %v6528_v17, 0.0  ;;  %v6657_v36 = vmax.f32 %v6529_v32, 0.0  ;;  %v6660_v25 = vmax.f32 %v6532_v13, 0.0  ;;  %v6661_v46 = vmax.f32 %v6533_v21, 0.0  ;;  %v7600_v32 = vpop.permute.xlu0 %7599 }
 0x415   :  { %v6664_v58 = vmax.f32 %v6536_v20, 0.0  ;;  %v6665_v3 = vmax.f32 %v6537_v8, 0.0  ;;  %v6668_v11 = vmax.f32 %v6540_v42, 0.0  ;;  %v6669_v40 = vmax.f32 %v6541_v56, 0.0 }
 0x416   :  { %v6672_v24 = vmax.f32 %v6544_v29, 0.0  ;;  %v6673_v45 = vmax.f32 %v6545_v4, 0.0  ;;  %v6676_v0 = vmax.f32 %v6548_v39, 0.0  ;;  %v6677_v33 = vmax.f32 %v6549_v12, 0.0 }
 0x417   :  { %v6680_v62 = vmax.f32 %v6552_v31, 0.0  ;;  %v6681_v50 = vmax.f32 %v6553_v41, 0.0  ;;  %v6684_v14 = vmax.f32 %v6556_v44, 0.0  ;;  %v6685_v53 = vmax.f32 %v6557_v57, 0.0 }
 0x418   :  { %v6688_v28 = vmax.f32 %v6560_v30, 0.0  ;;  %v6689_v10 = vmax.f32 %v6561_v59, 0.0  ;;  %v6692_v23 = vmax.f32 %v6564_v54, 0.0  ;;  %v6693_v18 = vmax.f32 %v6565_v6, 0.0 }
 0x419   :  { %v6696_v43 = vmax.f32 %v6568_v7, 0.0  ;;  %v6697_v37 = vmax.f32 %v6569_v48, 0.0  ;;  %v6700_v2 = vmax.f32 %v6572_v1, 0.0  ;;  %v6701_v49 = vmax.f32 %v6573_v22, 0.0 }
 0x41a   :  { %v6704_v52 = vmax.f32 %v6576_v35, 0.0  ;;  %v6705_v60 = vmax.f32 %v6577_v38, 0.0  ;;  %v8778_v19 = vpack.c.bf16 %v6645_v27, %v6644_v63  ;;  %v8780_v47 = vpack.c.bf16 %v6649_v61, %v6648_v15 }
 0x41b   :  { %v8782_v51 = vpack.c.bf16 %v6653_v26, %v6652_v9  ;;  %v8784_v34 = vpack.c.bf16 %v6657_v36, %v6656_v55  ;;  %v8786_v16 = vpack.c.bf16 %v6661_v46, %v6660_v25  ;;  %v8788_v17 = vpack.c.bf16 %v6665_v3, %v6664_v58 }
 0x41c   :  { %v8790_v13 = vpack.c.bf16 %v6669_v40, %v6668_v11  ;;  %v8792_v21 = vpack.c.bf16 %v6673_v45, %v6672_v24  ;;  %v8794_v20 = vpack.c.bf16 %v6677_v33, %v6676_v0  ;;  %v8796_v8 = vpack.c.bf16 %v6681_v50, %v6680_v62  ;;  %7127 = vst.msk [vmem:[%s17004_s5 + $0x100] sm:$0xff] %vm15776_vm15, %v8778_v19 }
 0x41d   :  { %7129 = vst.msk [vmem:[%s17004_s5 + $0x110] sm:$0xff] %vm15776_vm15, %v8780_v47  ;;  %v8798_v42 = vpack.c.bf16 %v6685_v53, %v6684_v14  ;;  %v8800_v56 = vpack.c.bf16 %v6689_v10, %v6688_v28  ;;  %v8802_v29 = vpack.c.bf16 %v6693_v18, %v6692_v23  ;;  %v8804_v4 = vpack.c.bf16 %v6697_v37, %v6696_v43 }
 0x41e   :  { %7131 = vst.msk [vmem:[%s17004_s5 + $0x120] sm:$0xff] %vm15776_vm15, %v8782_v51  ;;  %7133 = vst.msk [vmem:[%s17004_s5 + $0x130] sm:$0xff] %vm15776_vm15, %v8784_v34  ;;  %v8806_v39 = vpack.c.bf16 %v6701_v49, %v6700_v2  ;;  %v8808_v12 = vpack.c.bf16 %v6705_v60, %v6704_v52 }
 0x41f   :  { %7135 = vst.msk [vmem:[%s17004_s5 + $0x140] sm:$0xff] %vm15776_vm15, %v8786_v16  ;;  %7137 = vst.msk [vmem:[%s17004_s5 + $0x150] sm:$0xff] %vm15776_vm15, %v8788_v17 }
 0x420   :  { %7640 = vst.msk [vmem:[%s17004_s5 + $0x104] sm:$0xf] %vm7607_vm14, %v7600_v32  ;;  %7642 = vst.msk [vmem:[%s17004_s5 + $0x114] sm:$0xf] %vm7607_vm14, %v7600_v32 }
 0x421   :  { %7139 = vst.msk [vmem:[%s17004_s5 + $0x160] sm:$0xff] %vm15776_vm15, %v8790_v13  ;;  %7141 = vst.msk [vmem:[%s17004_s5 + $0x170] sm:$0xff] %vm15776_vm15, %v8792_v21 }
 0x422   :  { %7143 = vst.msk [vmem:[%s17004_s5 + $0x180] sm:$0xff] %vm15776_vm15, %v8794_v20  ;;  %7145 = vst.msk [vmem:[%s17004_s5 + $0x190] sm:$0xff] %vm15776_vm15, %v8796_v8 }
 0x423   :  { %7644 = vst.msk [vmem:[%s17004_s5 + $0x124] sm:$0xf] %vm7607_vm14, %v7600_v32  ;;  %7646 = vst.msk [vmem:[%s17004_s5 + $0x134] sm:$0xf] %vm7607_vm14, %v7600_v32 }
 0x424   :  { %7648 = vst.msk [vmem:[%s17004_s5 + $0x144] sm:$0xf] %vm7607_vm14, %v7600_v32  ;;  %7650 = vst.msk [vmem:[%s17004_s5 + $0x154] sm:$0xf] %vm7607_vm14, %v7600_v32 }
 0x425   :  { %7147 = vst.msk [vmem:[%s17004_s5 + $0x1a0] sm:$0xff] %vm15776_vm15, %v8798_v42  ;;  %7149 = vst.msk [vmem:[%s17004_s5 + $0x1b0] sm:$0xff] %vm15776_vm15, %v8800_v56 }
 0x426   :  { %7151 = vst.msk [vmem:[%s17004_s5 + $0x1c0] sm:$0xff] %vm15776_vm15, %v8802_v29  ;;  %7153 = vst.msk [vmem:[%s17004_s5 + $0x1d0] sm:$0xff] %vm15776_vm15, %v8804_v4 }
 0x427   :  { %7652 = vst.msk [vmem:[%s17004_s5 + $0x164] sm:$0xf] %vm7607_vm14, %v7600_v32  ;;  %7654 = vst.msk [vmem:[%s17004_s5 + $0x174] sm:$0xf] %vm7607_vm14, %v7600_v32 }
 0x428   :  { %7656 = vst.msk [vmem:[%s17004_s5 + $0x184] sm:$0xf] %vm7607_vm14, %v7600_v32  ;;  %7658 = vst.msk [vmem:[%s17004_s5 + $0x194] sm:$0xf] %vm7607_vm14, %v7600_v32 }
 0x429   :  { %7155 = vst.msk [vmem:[%s17004_s5 + $0x1e0] sm:$0xff] %vm15776_vm15, %v8806_v39  ;;  %7157 = vst.msk [vmem:[%s17004_s5 + $0x1f0] sm:$0xff] %vm15776_vm15, %v8808_v12 }
 0x42a   :  { %7660 = vst.msk [vmem:[%s17004_s5 + $0x1a4] sm:$0xf] %vm7607_vm14, %v7600_v32  ;;  %7662 = vst.msk [vmem:[%s17004_s5 + $0x1b4] sm:$0xf] %vm7607_vm14, %v7600_v32 }
 0x42b   :  { %7664 = vst.msk [vmem:[%s17004_s5 + $0x1c4] sm:$0xf] %vm7607_vm14, %v7600_v32  ;;  %7666 = vst.msk [vmem:[%s17004_s5 + $0x1d4] sm:$0xf] %vm7607_vm14, %v7600_v32 }
 0x42c   :  { %7668 = vst.msk [vmem:[%s17004_s5 + $0x1e4] sm:$0xf] %vm7607_vm14, %v7600_v32  ;;  %7670 = vst.msk [vmem:[%s17004_s5 + $0x1f4] sm:$0xf] %vm7607_vm14, %v7600_v32 }

</bundles_post_ra>
